<compile_context>
chip_gen: v6e
topology: v6e:2x2x1
jax: 0.10.0
libtpu: 0.0.40
codegen_flags: <defaults>
</compile_context>

<pallas_src>
import functools

import jax
import jax.numpy as jnp
from jax import lax
from jax.experimental import pallas as pl
from jax.experimental.pallas import tpu as pltpu


def _round_up(x, m):
    return ((x + m - 1) // m) * m


# ---------------------------------------------------------------------------
# FC head: tiled matmul + bias + optional ReLU
# ---------------------------------------------------------------------------
def _matmul_kernel(x_ref, w_ref, b_ref, o_ref, acc_ref, *, relu):
    k = pl.program_id(2)

    @pl.when(k == 0)
    def _():
        acc_ref[...] = jnp.zeros_like(acc_ref)

    acc_ref[...] += jnp.dot(x_ref[...], w_ref[...],
                            preferred_element_type=jnp.float32)

    @pl.when(k == pl.num_programs(2) - 1)
    def _():
        r = acc_ref[...] + b_ref[...]
        if relu:
            r = jnp.maximum(r, 0.0)
        o_ref[...] = r.astype(o_ref.dtype)


def matmul_bias_act(x, w, b, *, relu, out_dtype=jnp.float32):
    """(M,K)@(K,N) + b, optional ReLU.  bf16 operands, f32 accumulation."""
    M, K = x.shape
    N = w.shape[1]

    tm = min(256, _round_up(M, 16))                 # native bf16 (16,128) sublane tile
    Np = _round_up(N, 128)
    # >=2 N tiles whenever possible so both v7x TensorCores get work (no-op on 1-TC chips).
    tn = 256 if (Np >= 512 and Np % 256 == 0) else 128
    # Weight-streaming bound at small batch: few, fat K steps.
    tk = K if K <= 2048 else 2048
    Mp, Kp = _round_up(M, tm), _round_up(K, tk)

    x = x.astype(jnp.bfloat16)
    w = w.astype(jnp.bfloat16)
    if (Mp, Kp) != (M, K):
        x = jnp.pad(x, ((0, Mp - M), (0, Kp - K)))
    if (Kp, Np) != (K, N):
        w = jnp.pad(w, ((0, Kp - K), (0, Np - N)))
    b2 = b.reshape(1, N).astype(jnp.float32)
    if Np != N:
        b2 = jnp.pad(b2, ((0, 0), (0, Np - N)))

    grid = (Mp // tm, Np // tn, Kp // tk)
    out = pl.pallas_call(
        functools.partial(_matmul_kernel, relu=relu),
        out_shape=jax.ShapeDtypeStruct((Mp, Np), out_dtype),
        grid_spec=pltpu.PrefetchScalarGridSpec(
            num_scalar_prefetch=0,
            grid=grid,
            in_specs=[
                pl.BlockSpec((tm, tk), lambda i, j, k: (i, k)),
                pl.BlockSpec((tk, tn), lambda i, j, k: (k, j)),
                pl.BlockSpec((1, tn), lambda i, j, k: (0, j)),
            ],
            out_specs=pl.BlockSpec((tm, tn), lambda i, j, k: (i, j)),
            scratch_shapes=[pltpu.VMEM((tm, tn), jnp.float32)],
        ),
        compiler_params=pltpu.CompilerParams(
            dimension_semantics=("parallel", "parallel", "arbitrary"),
            vmem_limit_bytes=32 << 20),
        cost_estimate=pl.CostEstimate(
            flops=2 * Mp * Np * Kp,
            transcendentals=0,
            bytes_accessed=(Mp * Kp + Kp * Np) * 2 + Mp * Np * 4),
    )(x, w, b2)

    if (Mp, Np) != (M, N):
        out = out[:M, :N]
    return out


# ---------------------------------------------------------------------------
# Fused conv block: Conv2d(3x3, pad=1) + ReLU + MaxPool2d(2) + BatchNorm2d(eval)
# (bias/ReLU applied after the pool -- mathematically identical, 4x cheaper)
# ---------------------------------------------------------------------------
def _pick_rows(H, W, kdim, budget_bytes=2 << 20):
    """Largest even divisor of H whose bf16 im2col chunk (rows*W, kdim) fits the budget."""
    best = 2
    for r in range(2, H + 1, 2):
        if H % r == 0 and r * W * kdim * 2 <= budget_bytes:
            best = r
    return best


def _conv_block_kernel(x_ref, w_ref, b_ref, s_ref, t_ref, o_ref, *, H, W, rows, k3):
    # x_ref : (H+2, W+2, Cin)  zero-padded image            (k3=True)
    #         (H,   W,   K  )  taps pre-folded into K       (k3=False)
    # w_ref : (9*Cin or K, Cout)   b/s/t : (1, Cout)   o_ref : (H//2, W//2, Cout)
    Cin = x_ref.shape[-1]
    Cout = w_ref.shape[-1]
    Wo = W // 2

    def chunk(i, carry):
        r0 = i * rows
        if k3:
            xw = x_ref[pl.ds(r0, rows + 2), :, :]                # (rows+2, W+2, Cin)
            # im2col patch: all 9 taps folded into the contraction dim (one MXU pass).
            pieces = [xw[ky:ky + rows, kx:kx + W, :].reshape(rows * W, Cin)
                      for ky in range(3) for kx in range(3)]
            patch = jnp.concatenate(pieces, axis=-1)             # (rows*W, 9*Cin)
        else:
            patch = x_ref[pl.ds(r0, rows), :, :].reshape(rows * W, Cin)
        acc = jnp.dot(patch, w_ref[...], preferred_element_type=jnp.float32)

        # 2x2 max-pool FIRST (per-channel bias commutes with max, ReLU monotone),
        # then bias + ReLU + BatchNorm affine on the 4x smaller pooled tensor.
        cpool = jnp.max(acc.reshape(rows * Wo, 2, Cout), axis=1)        # pool along W
        pooled = jnp.max(cpool.reshape(rows // 2, 2, Wo, Cout), axis=1)  # pool along H
        pooled = jnp.maximum(pooled + b_ref[...], 0.0)                   # bias + ReLU
        pooled = pooled * s_ref[...] + t_ref[...]                        # BN (inference)
        o_ref[pl.ds(i * (rows // 2), rows // 2), :, :] = pooled.astype(o_ref.dtype)
        return carry

    n_chunks = H // rows
    if n_chunks == 1:
        chunk(0, 0)
    else:
        lax.fori_loop(0, n_chunks, chunk, 0)


def conv_block(x_nhwc, wk, bias, bn_scale, bn_shift, *, k3=True):
    """k3=True : x (N,H,W,Cin),  wk (9*Cin,Cout)  -> 3x3 conv, pad=1
       k3=False: x (N,H,W,K) with taps pre-folded, wk (K,Cout)
       Returns (N, H//2, W//2, Cout) bf16 (conv + ReLU + maxpool2 + BN fused)."""
    N, H, W, Cin = x_nhwc.shape
    Kdim, Cout = wk.shape
    assert H % 2 == 0 and W % 2 == 0

    x_in = x_nhwc.astype(jnp.bfloat16)
    if k3:
        x_in = jnp.pad(x_in, ((0, 0), (1, 1), (1, 1), (0, 0)))
    b2 = bias.reshape(1, Cout).astype(jnp.float32)
    s2 = bn_scale.reshape(1, Cout).astype(jnp.float32)
    t2 = bn_shift.reshape(1, Cout).astype(jnp.float32)

    Ho, Wo = H // 2, W // 2
    rows = _pick_rows(H, W, Kdim)
    Hx, Wx = x_in.shape[1], x_in.shape[2]

    out = pl.pallas_call(
        functools.partial(_conv_block_kernel, H=H, W=W, rows=rows, k3=k3),
        out_shape=jax.ShapeDtypeStruct((N, Ho, Wo, Cout), jnp.bfloat16),
        grid_spec=pltpu.PrefetchScalarGridSpec(
            num_scalar_prefetch=0,
            grid=(N,),                         # whole image per step: minimal grid overhead
            in_specs=[
                pl.BlockSpec((None, Hx, Wx, Cin), lambda n: (n, 0, 0, 0)),
                pl.BlockSpec((Kdim, Cout), lambda n: (0, 0)),
                pl.BlockSpec((1, Cout), lambda n: (0, 0)),
                pl.BlockSpec((1, Cout), lambda n: (0, 0)),
                pl.BlockSpec((1, Cout), lambda n: (0, 0)),
            ],
            out_specs=pl.BlockSpec((None, Ho, Wo, Cout), lambda n: (n, 0, 0, 0)),
        ),
        compiler_params=pltpu.CompilerParams(
            dimension_semantics=("parallel",),
            vmem_limit_bytes=32 << 20),
        cost_estimate=pl.CostEstimate(
            flops=2 * N * H * W * Kdim * Cout,
            transcendentals=0,
            bytes_accessed=(N * Hx * Wx * Cin * 2 + Kdim * Cout * 2
                            + N * Ho * Wo * Cout * 2)),
    )(x_in, wk, b2, s2, t2)
    return out


# ---------------------------------------------------------------------------
# Parameter construction (deterministic, synthetic)
# ---------------------------------------------------------------------------
def init_params(key, input_size):
    assert input_size % 16 == 0
    conv_dims = [(3, 64), (64, 128), (128, 256), (256, 512)]
    params = {"conv": [], "fc": []}
    eps = 1e-5
    for cin, cout in conv_dims:
        key, kw, kb, kg, kbe, km, kv = jax.random.split(key, 7)
        w = jax.random.normal(kw, (3, 3, cin, cout), jnp.float32) / jnp.sqrt(9.0 * cin)
        b = 0.01 * jax.random.normal(kb, (cout,), jnp.float32)
        gamma = 1.0 + 0.1 * jax.random.normal(kg, (cout,), jnp.float32)
        beta = 0.05 * jax.random.normal(kbe, (cout,), jnp.float32)
        r_mean = 0.05 * jax.random.normal(km, (cout,), jnp.float32)
        r_var = 1.0 + 0.1 * jnp.abs(jax.random.normal(kv, (cout,), jnp.float32))
        bn_scale = gamma / jnp.sqrt(r_var + eps)
        bn_shift = beta - r_mean * bn_scale
        # K layout = ((ky*3 + kx)*Cin + ci): matches the in-kernel im2col concat order.
        params["conv"].append((
            w.reshape(9 * cin, cout).astype(jnp.bfloat16),
            b, bn_scale, bn_shift))

    spatial = input_size // 16          # 4 MaxPool2d(2) layers
    flat = 512 * spatial * spatial
    fc_dims = [(flat, 512), (512, 256), (256, 2)]
    fcs = []
    for din, dout in fc_dims:
        key, kw, kb = jax.random.split(key, 3)
        w = jax.random.normal(kw, (din, dout), jnp.float32) / jnp.sqrt(float(din))
        b = 0.01 * jax.random.normal(kb, (dout,), jnp.float32)
        fcs.append((w, b))

    # FC1 is defined against the PyTorch NCHW-flatten order; permute its rows once
    # so the forward pass can consume NHWC-flattened activations directly.
    w1, b1 = fcs[0]
    w1 = (w1.reshape(512, spatial, spatial, 512)
            .transpose(1, 2, 0, 3)
            .reshape(flat, 512))
    fcs[0] = (w1, b1)

    params["fc"] = [(w.astype(jnp.bfloat16), b) for (w, b) in fcs]
    return params


# ---------------------------------------------------------------------------
# Forward
# ---------------------------------------------------------------------------
def deepfake_detector_forward(params, x_nchw):
    # PyTorch-style NCHW input -> NHWC bf16 for the kernels.
    x = jnp.transpose(x_nchw, (0, 2, 3, 1)).astype(jnp.bfloat16)
    N, H, W, _ = x.shape

    # Layer 1: Cin=3 would use 3/128 lanes; fold all 27 taps (3x3x3) into the
    # channel/contraction dim outside the kernel (input prep is tiny: ~9x of a
    # 3-channel image), so the kernel runs a dense K=27 matmul per output row.
    xp = jnp.pad(x, ((0, 0), (1, 1), (1, 1), (0, 0)))
    x27 = jnp.concatenate(
        [xp[:, ky:ky + H, kx:kx + W, :] for ky in range(3) for kx in range(3)],
        axis=-1)
    wk, b, s, t = params["conv"][0]
    x = conv_block(x27, wk, b, s, t, k3=False)

    # Layers 2-4: fused 3x3 conv blocks (in-kernel im2col, K = 9*Cin).
    for (wk, b, s, t) in params["conv"][1:]:
        x = conv_block(x, wk, b, s, t, k3=True)

    # NHWC flatten; FC1 rows were pre-permuted at init to match torch.flatten(NCHW).
    n = x.shape[0]
    x = x.reshape(n, -1)

    # FC head (Dropout = identity in eval mode).
    (w1, b1), (w2, b2), (w3, b3) = params["fc"]
    x = matmul_bias_act(x, w1, b1, relu=True, out_dtype=jnp.bfloat16)
    x = matmul_bias_act(x, w2, b2, relu=True, out_dtype=jnp.bfloat16)
    x = matmul_bias_act(x, w3, b3, relu=False, out_dtype=jnp.float32)
    return x


if __name__ == "__main__":
    input_size = 16            # small, consistent with the module (divisible by 16)
    batch = 2

    key = jax.random.PRNGKey(0)
    key, kx = jax.random.split(key)
    x = jax.random.normal(kx, (batch, 3, input_size, input_size), jnp.float32)

    params = init_params(key, input_size)

    fwd = jax.jit(deepfake_detector_forward)
    logits = fwd(params, x)
    logits = jax.block_until_ready(logits)

    assert logits.shape == (batch, 2), logits.shape
    assert logits.dtype == jnp.float32
    print("KERNEL_OK")
</pallas_src>

<mosaic_0001>
module attributes {stable_mosaic.version = 11 : i64} {
  func.func @_conv_block_kernel(%arg0: i32, %arg1: memref<1x16x16x27xbf16, #tpu.memory_space<vmem>>, %arg2: memref<27x64xbf16, #tpu.memory_space<vmem>>, %arg3: memref<1x64xf32, #tpu.memory_space<vmem>>, %arg4: memref<1x64xf32, #tpu.memory_space<vmem>>, %arg5: memref<1x64xf32, #tpu.memory_space<vmem>>, %arg6: memref<1x8x8x64xbf16, #tpu.memory_space<vmem>>) attributes {dimension_semantics = [#tpu.dimension_semantics<parallel>], iteration_bounds = array<i64: 2>, scalar_prefetch = 0 : i64, scratch_operands = 0 : i64, tpu.core_type = #tpu.core_type<tc>, window_params = [{transform_indices = @transform_0, window_bounds = array<i64: 1, 16, 16, 27>}, {pipeline_mode = #tpu.pipeline_mode<synchronous>, transform_indices = @transform_1, window_bounds = array<i64: 27, 64>}, {pipeline_mode = #tpu.pipeline_mode<synchronous>, transform_indices = @transform_2, window_bounds = array<i64: 1, 64>}, {pipeline_mode = #tpu.pipeline_mode<synchronous>, transform_indices = @transform_3, window_bounds = array<i64: 1, 64>}, {pipeline_mode = #tpu.pipeline_mode<synchronous>, transform_indices = @transform_4, window_bounds = array<i64: 1, 64>}, {transform_indices = @transform_5, window_bounds = array<i64: 1, 8, 8, 64>}]} {
    %c0 = arith.constant 0 : index
    %c0_0 = arith.constant 0 : index
    %c0_1 = arith.constant 0 : index
    %c0_2 = arith.constant 0 : index
    %0 = vector.load %arg1[%c0, %c0_0, %c0_1, %c0_2] : memref<1x16x16x27xbf16, #tpu.memory_space<vmem>>, vector<1x16x16x27xbf16>
    %1 = vector.shape_cast %0 : vector<1x16x16x27xbf16> to vector<16x16x27xbf16>
    %2 = vector.shape_cast %1 : vector<16x16x27xbf16> to vector<256x27xbf16>
    %c0_3 = arith.constant 0 : index
    %c0_4 = arith.constant 0 : index
    %3 = vector.load %arg2[%c0_3, %c0_4] : memref<27x64xbf16, #tpu.memory_space<vmem>>, vector<27x64xbf16>
    %cst = arith.constant dense<0.000000e+00> : vector<256x64xf32>
    %4 = tpu.matmul %2, %3, %cst {dimension_numbers = #tpu.dot_dimension_numbers<[1], [0], [0], [1], [0, 0, 1, 1], [], []>} : vector<256x27xbf16>, vector<27x64xbf16>, vector<256x64xf32> -> vector<256x64xf32>
    %5 = vector.shape_cast %4 : vector<256x64xf32> to vector<128x2x64xf32>
    %cst_5 = arith.constant dense<0xFF800000> : vector<128x64xf32>
    %6 = vector.multi_reduction <maximumf>, %5, %cst_5 [1] : vector<128x2x64xf32> to vector<128x64xf32>
    %7 = vector.shape_cast %6 : vector<128x64xf32> to vector<8x2x8x64xf32>
    %cst_6 = arith.constant dense<0xFF800000> : vector<8x8x64xf32>
    %8 = vector.multi_reduction <maximumf>, %7, %cst_6 [1] : vector<8x2x8x64xf32> to vector<8x8x64xf32>
    %c0_7 = arith.constant 0 : index
    %c0_8 = arith.constant 0 : index
    %9 = vector.load %arg3[%c0_7, %c0_8] : memref<1x64xf32, #tpu.memory_space<vmem>>, vector<1x64xf32>
    %10 = vector.shape_cast %9 : vector<1x64xf32> to vector<1x1x64xf32>
    %11 = vector.broadcast %10 : vector<1x1x64xf32> to vector<8x8x64xf32>
    %12 = arith.addf %8, %11 : vector<8x8x64xf32>
    %cst_9 = arith.constant 0.000000e+00 : f32
    %13 = vector.broadcast %cst_9 : f32 to vector<8x8x64xf32>
    %14 = arith.maximumf %12, %13 : vector<8x8x64xf32>
    %c0_10 = arith.constant 0 : index
    %c0_11 = arith.constant 0 : index
    %15 = vector.load %arg4[%c0_10, %c0_11] : memref<1x64xf32, #tpu.memory_space<vmem>>, vector<1x64xf32>
    %16 = vector.shape_cast %15 : vector<1x64xf32> to vector<1x1x64xf32>
    %17 = vector.broadcast %16 : vector<1x1x64xf32> to vector<8x8x64xf32>
    %18 = arith.mulf %14, %17 : vector<8x8x64xf32>
    %c0_12 = arith.constant 0 : index
    %c0_13 = arith.constant 0 : index
    %19 = vector.load %arg5[%c0_12, %c0_13] : memref<1x64xf32, #tpu.memory_space<vmem>>, vector<1x64xf32>
    %20 = vector.shape_cast %19 : vector<1x64xf32> to vector<1x1x64xf32>
    %21 = vector.broadcast %20 : vector<1x1x64xf32> to vector<8x8x64xf32>
    %22 = arith.addf %18, %21 : vector<8x8x64xf32>
    %23 = arith.truncf %22 : vector<8x8x64xf32> to vector<8x8x64xbf16>
    %c0_14 = arith.constant 0 : index
    %c0_15 = arith.constant 0 : index
    %c0_16 = arith.constant 0 : index
    %c0_17 = arith.constant 0 : index
    %24 = vector.load %arg6[%c0_14, %c0_15, %c0_16, %c0_17] : memref<1x8x8x64xbf16, #tpu.memory_space<vmem>>, vector<1x8x8x64xbf16>
    %25 = vector.shape_cast %24 : vector<1x8x8x64xbf16> to vector<8x8x64xbf16>
    %26 = vector.shape_cast %23 : vector<8x8x64xbf16> to vector<1x8x8x64xbf16>
    tpu.vector_store %arg6[%c0_14, %c0_15, %c0_16, %c0_17], %26 {strides = array<i32>} : memref<1x8x8x64xbf16, #tpu.memory_space<vmem>>, vector<1x8x8x64xbf16>,
    return
  }
  func.func @transform_0(%arg0: i32) -> (i32, i32, i32, i32) {
    %c0_i32 = arith.constant 0 : i32
    %c0_i32_0 = arith.constant 0 : i32
    %c0_i32_1 = arith.constant 0 : i32
    %c0_i32_2 = arith.constant 0 : i32
    return %arg0, %c0_i32, %c0_i32_0, %c0_i32_1 : i32, i32, i32, i32
  }
  func.func @transform_1(%arg0: i32) -> (i32, i32) {
    %c0_i32 = arith.constant 0 : i32
    %c0_i32_0 = arith.constant 0 : i32
    %c0_i32_1 = arith.constant 0 : i32
    return %c0_i32, %c0_i32_0 : i32, i32
  }
  func.func @transform_2(%arg0: i32) -> (i32, i32) {
    %c0_i32 = arith.constant 0 : i32
    %c0_i32_0 = arith.constant 0 : i32
    %c0_i32_1 = arith.constant 0 : i32
    return %c0_i32, %c0_i32_0 : i32, i32
  }
  func.func @transform_3(%arg0: i32) -> (i32, i32) {
    %c0_i32 = arith.constant 0 : i32
    %c0_i32_0 = arith.constant 0 : i32
    %c0_i32_1 = arith.constant 0 : i32
    return %c0_i32, %c0_i32_0 : i32, i32
  }
  func.func @transform_4(%arg0: i32) -> (i32, i32) {
    %c0_i32 = arith.constant 0 : i32
    %c0_i32_0 = arith.constant 0 : i32
    %c0_i32_1 = arith.constant 0 : i32
    return %c0_i32, %c0_i32_0 : i32, i32
  }
  func.func @transform_5(%arg0: i32) -> (i32, i32, i32, i32) {
    %c0_i32 = arith.constant 0 : i32
    %c0_i32_0 = arith.constant 0 : i32
    %c0_i32_1 = arith.constant 0 : i32
    %c0_i32_2 = arith.constant 0 : i32
    return %arg0, %c0_i32, %c0_i32_0, %c0_i32_1 : i32, i32, i32, i32
  }
}

module attributes {stable_mosaic.version = 11 : i64} {
  func.func @_conv_block_kernel(%arg0: i32, %arg1: memref<1x10x10x64xbf16, #tpu.memory_space<vmem>>, %arg2: memref<576x128xbf16, #tpu.memory_space<vmem>>, %arg3: memref<1x128xf32, #tpu.memory_space<vmem>>, %arg4: memref<1x128xf32, #tpu.memory_space<vmem>>, %arg5: memref<1x128xf32, #tpu.memory_space<vmem>>, %arg6: memref<1x4x4x128xbf16, #tpu.memory_space<vmem>>) attributes {dimension_semantics = [#tpu.dimension_semantics<parallel>], iteration_bounds = array<i64: 2>, scalar_prefetch = 0 : i64, scratch_operands = 0 : i64, tpu.core_type = #tpu.core_type<tc>, window_params = [{transform_indices = @transform_0, window_bounds = array<i64: 1, 10, 10, 64>}, {pipeline_mode = #tpu.pipeline_mode<synchronous>, transform_indices = @transform_1, window_bounds = array<i64: 576, 128>}, {pipeline_mode = #tpu.pipeline_mode<synchronous>, transform_indices = @transform_2, window_bounds = array<i64: 1, 128>}, {pipeline_mode = #tpu.pipeline_mode<synchronous>, transform_indices = @transform_3, window_bounds = array<i64: 1, 128>}, {pipeline_mode = #tpu.pipeline_mode<synchronous>, transform_indices = @transform_4, window_bounds = array<i64: 1, 128>}, {transform_indices = @transform_5, window_bounds = array<i64: 1, 4, 4, 128>}]} {
    %c0 = arith.constant 0 : index
    %c0_0 = arith.constant 0 : index
    %c0_1 = arith.constant 0 : index
    %c0_2 = arith.constant 0 : index
    %0 = vector.load %arg1[%c0, %c0_0, %c0_1, %c0_2] : memref<1x10x10x64xbf16, #tpu.memory_space<vmem>>, vector<1x10x10x64xbf16>
    %1 = vector.shape_cast %0 : vector<1x10x10x64xbf16> to vector<10x10x64xbf16>
    %2 = vector.extract_strided_slice %1 {offsets = [0, 0, 0], sizes = [8, 8, 64], strides = [1, 1, 1]} : vector<10x10x64xbf16> to vector<8x8x64xbf16>
    %3 = vector.shape_cast %2 : vector<8x8x64xbf16> to vector<64x64xbf16>
    %4 = vector.extract_strided_slice %1 {offsets = [0, 1, 0], sizes = [8, 8, 64], strides = [1, 1, 1]} : vector<10x10x64xbf16> to vector<8x8x64xbf16>
    %5 = vector.shape_cast %4 : vector<8x8x64xbf16> to vector<64x64xbf16>
    %6 = vector.extract_strided_slice %1 {offsets = [0, 2, 0], sizes = [8, 8, 64], strides = [1, 1, 1]} : vector<10x10x64xbf16> to vector<8x8x64xbf16>
    %7 = vector.shape_cast %6 : vector<8x8x64xbf16> to vector<64x64xbf16>
    %8 = vector.extract_strided_slice %1 {offsets = [1, 0, 0], sizes = [8, 8, 64], strides = [1, 1, 1]} : vector<10x10x64xbf16> to vector<8x8x64xbf16>
    %9 = vector.shape_cast %8 : vector<8x8x64xbf16> to vector<64x64xbf16>
    %10 = vector.extract_strided_slice %1 {offsets = [1, 1, 0], sizes = [8, 8, 64], strides = [1, 1, 1]} : vector<10x10x64xbf16> to vector<8x8x64xbf16>
    %11 = vector.shape_cast %10 : vector<8x8x64xbf16> to vector<64x64xbf16>
    %12 = vector.extract_strided_slice %1 {offsets = [1, 2, 0], sizes = [8, 8, 64], strides = [1, 1, 1]} : vector<10x10x64xbf16> to vector<8x8x64xbf16>
    %13 = vector.shape_cast %12 : vector<8x8x64xbf16> to vector<64x64xbf16>
    %14 = vector.extract_strided_slice %1 {offsets = [2, 0, 0], sizes = [8, 8, 64], strides = [1, 1, 1]} : vector<10x10x64xbf16> to vector<8x8x64xbf16>
    %15 = vector.shape_cast %14 : vector<8x8x64xbf16> to vector<64x64xbf16>
    %16 = vector.extract_strided_slice %1 {offsets = [2, 1, 0], sizes = [8, 8, 64], strides = [1, 1, 1]} : vector<10x10x64xbf16> to vector<8x8x64xbf16>
    %17 = vector.shape_cast %16 : vector<8x8x64xbf16> to vector<64x64xbf16>
    %18 = vector.extract_strided_slice %1 {offsets = [2, 2, 0], sizes = [8, 8, 64], strides = [1, 1, 1]} : vector<10x10x64xbf16> to vector<8x8x64xbf16>
    %19 = vector.shape_cast %18 : vector<8x8x64xbf16> to vector<64x64xbf16>
    %20 = tpu.concatenate %3, %5, %7, %9, %11, %13, %15, %17, %19 in 1 : vector<64x64xbf16>, vector<64x64xbf16>, vector<64x64xbf16>, vector<64x64xbf16>, vector<64x64xbf16>, vector<64x64xbf16>, vector<64x64xbf16>, vector<64x64xbf16>, vector<64x64xbf16> -> vector<64x576xbf16>
    %c0_3 = arith.constant 0 : index
    %c0_4 = arith.constant 0 : index
    %21 = vector.load %arg2[%c0_3, %c0_4] : memref<576x128xbf16, #tpu.memory_space<vmem>>, vector<576x128xbf16>
    %cst = arith.constant dense<0.000000e+00> : vector<64x128xf32>
    %22 = tpu.matmul %20, %21, %cst {dimension_numbers = #tpu.dot_dimension_numbers<[1], [0], [0], [1], [0, 0, 1, 1], [], []>} : vector<64x576xbf16>, vector<576x128xbf16>, vector<64x128xf32> -> vector<64x128xf32>
    %23 = vector.shape_cast %22 : vector<64x128xf32> to vector<32x2x128xf32>
    %cst_5 = arith.constant dense<0xFF800000> : vector<32x128xf32>
    %24 = vector.multi_reduction <maximumf>, %23, %cst_5 [1] : vector<32x2x128xf32> to vector<32x128xf32>
    %25 = vector.shape_cast %24 : vector<32x128xf32> to vector<4x2x4x128xf32>
    %cst_6 = arith.constant dense<0xFF800000> : vector<4x4x128xf32>
    %26 = vector.multi_reduction <maximumf>, %25, %cst_6 [1] : vector<4x2x4x128xf32> to vector<4x4x128xf32>
    %c0_7 = arith.constant 0 : index
    %c0_8 = arith.constant 0 : index
    %27 = vector.load %arg3[%c0_7, %c0_8] : memref<1x128xf32, #tpu.memory_space<vmem>>, vector<1x128xf32>
    %28 = vector.shape_cast %27 : vector<1x128xf32> to vector<1x1x128xf32>
    %29 = vector.broadcast %28 : vector<1x1x128xf32> to vector<4x4x128xf32>
    %30 = arith.addf %26, %29 : vector<4x4x128xf32>
    %cst_9 = arith.constant 0.000000e+00 : f32
    %31 = vector.broadcast %cst_9 : f32 to vector<4x4x128xf32>
    %32 = arith.maximumf %30, %31 : vector<4x4x128xf32>
    %c0_10 = arith.constant 0 : index
    %c0_11 = arith.constant 0 : index
    %33 = vector.load %arg4[%c0_10, %c0_11] : memref<1x128xf32, #tpu.memory_space<vmem>>, vector<1x128xf32>
    %34 = vector.shape_cast %33 : vector<1x128xf32> to vector<1x1x128xf32>
    %35 = vector.broadcast %34 : vector<1x1x128xf32> to vector<4x4x128xf32>
    %36 = arith.mulf %32, %35 : vector<4x4x128xf32>
    %c0_12 = arith.constant 0 : index
    %c0_13 = arith.constant 0 : index
    %37 = vector.load %arg5[%c0_12, %c0_13] : memref<1x128xf32, #tpu.memory_space<vmem>>, vector<1x128xf32>
    %38 = vector.shape_cast %37 : vector<1x128xf32> to vector<1x1x128xf32>
    %39 = vector.broadcast %38 : vector<1x1x128xf32> to vector<4x4x128xf32>
    %40 = arith.addf %36, %39 : vector<4x4x128xf32>
    %41 = arith.truncf %40 : vector<4x4x128xf32> to vector<4x4x128xbf16>
    %c0_14 = arith.constant 0 : index
    %c0_15 = arith.constant 0 : index
    %c0_16 = arith.constant 0 : index
    %c0_17 = arith.constant 0 : index
    %42 = vector.load %arg6[%c0_14, %c0_15, %c0_16, %c0_17] : memref<1x4x4x128xbf16, #tpu.memory_space<vmem>>, vector<1x4x4x128xbf16>
    %43 = vector.shape_cast %42 : vector<1x4x4x128xbf16> to vector<4x4x128xbf16>
    %44 = vector.shape_cast %41 : vector<4x4x128xbf16> to vector<1x4x4x128xbf16>
    tpu.vector_store %arg6[%c0_14, %c0_15, %c0_16, %c0_17], %44 {strides = array<i32>} : memref<1x4x4x128xbf16, #tpu.memory_space<vmem>>, vector<1x4x4x128xbf16>,
    return
  }
  func.func @transform_0(%arg0: i32) -> (i32, i32, i32, i32) {
    %c0_i32 = arith.constant 0 : i32
    %c0_i32_0 = arith.constant 0 : i32
    %c0_i32_1 = arith.constant 0 : i32
    %c0_i32_2 = arith.constant 0 : i32
    return %arg0, %c0_i32, %c0_i32_0, %c0_i32_1 : i32, i32, i32, i32
  }
  func.func @transform_1(%arg0: i32) -> (i32, i32) {
    %c0_i32 = arith.constant 0 : i32
    %c0_i32_0 = arith.constant 0 : i32
    %c0_i32_1 = arith.constant 0 : i32
    return %c0_i32, %c0_i32_0 : i32, i32
  }
  func.func @transform_2(%arg0: i32) -> (i32, i32) {
    %c0_i32 = arith.constant 0 : i32
    %c0_i32_0 = arith.constant 0 : i32
    %c0_i32_1 = arith.constant 0 : i32
    return %c0_i32, %c0_i32_0 : i32, i32
  }
  func.func @transform_3(%arg0: i32) -> (i32, i32) {
    %c0_i32 = arith.constant 0 : i32
    %c0_i32_0 = arith.constant 0 : i32
    %c0_i32_1 = arith.constant 0 : i32
    return %c0_i32, %c0_i32_0 : i32, i32
  }
  func.func @transform_4(%arg0: i32) -> (i32, i32) {
    %c0_i32 = arith.constant 0 : i32
    %c0_i32_0 = arith.constant 0 : i32
    %c0_i32_1 = arith.constant 0 : i32
    return %c0_i32, %c0_i32_0 : i32, i32
  }
  func.func @transform_5(%arg0: i32) -> (i32, i32, i32, i32) {
    %c0_i32 = arith.constant 0 : i32
    %c0_i32_0 = arith.constant 0 : i32
    %c0_i32_1 = arith.constant 0 : i32
    %c0_i32_2 = arith.constant 0 : i32
    return %arg0, %c0_i32, %c0_i32_0, %c0_i32_1 : i32, i32, i32, i32
  }
}

module attributes {stable_mosaic.version = 11 : i64} {
  func.func @_conv_block_kernel(%arg0: i32, %arg1: memref<1x6x6x128xbf16, #tpu.memory_space<vmem>>, %arg2: memref<1152x256xbf16, #tpu.memory_space<vmem>>, %arg3: memref<1x256xf32, #tpu.memory_space<vmem>>, %arg4: memref<1x256xf32, #tpu.memory_space<vmem>>, %arg5: memref<1x256xf32, #tpu.memory_space<vmem>>, %arg6: memref<1x2x2x256xbf16, #tpu.memory_space<vmem>>) attributes {dimension_semantics = [#tpu.dimension_semantics<parallel>], iteration_bounds = array<i64: 2>, scalar_prefetch = 0 : i64, scratch_operands = 0 : i64, tpu.core_type = #tpu.core_type<tc>, window_params = [{transform_indices = @transform_0, window_bounds = array<i64: 1, 6, 6, 128>}, {pipeline_mode = #tpu.pipeline_mode<synchronous>, transform_indices = @transform_1, window_bounds = array<i64: 1152, 256>}, {pipeline_mode = #tpu.pipeline_mode<synchronous>, transform_indices = @transform_2, window_bounds = array<i64: 1, 256>}, {pipeline_mode = #tpu.pipeline_mode<synchronous>, transform_indices = @transform_3, window_bounds = array<i64: 1, 256>}, {pipeline_mode = #tpu.pipeline_mode<synchronous>, transform_indices = @transform_4, window_bounds = array<i64: 1, 256>}, {transform_indices = @transform_5, window_bounds = array<i64: 1, 2, 2, 256>}]} {
    %c0 = arith.constant 0 : index
    %c0_0 = arith.constant 0 : index
    %c0_1 = arith.constant 0 : index
    %c0_2 = arith.constant 0 : index
    %0 = vector.load %arg1[%c0, %c0_0, %c0_1, %c0_2] : memref<1x6x6x128xbf16, #tpu.memory_space<vmem>>, vector<1x6x6x128xbf16>
    %1 = vector.shape_cast %0 : vector<1x6x6x128xbf16> to vector<6x6x128xbf16>
    %2 = vector.extract_strided_slice %1 {offsets = [0, 0, 0], sizes = [4, 4, 128], strides = [1, 1, 1]} : vector<6x6x128xbf16> to vector<4x4x128xbf16>
    %3 = vector.shape_cast %2 : vector<4x4x128xbf16> to vector<16x128xbf16>
    %4 = vector.extract_strided_slice %1 {offsets = [0, 1, 0], sizes = [4, 4, 128], strides = [1, 1, 1]} : vector<6x6x128xbf16> to vector<4x4x128xbf16>
    %5 = vector.shape_cast %4 : vector<4x4x128xbf16> to vector<16x128xbf16>
    %6 = vector.extract_strided_slice %1 {offsets = [0, 2, 0], sizes = [4, 4, 128], strides = [1, 1, 1]} : vector<6x6x128xbf16> to vector<4x4x128xbf16>
    %7 = vector.shape_cast %6 : vector<4x4x128xbf16> to vector<16x128xbf16>
    %8 = vector.extract_strided_slice %1 {offsets = [1, 0, 0], sizes = [4, 4, 128], strides = [1, 1, 1]} : vector<6x6x128xbf16> to vector<4x4x128xbf16>
    %9 = vector.shape_cast %8 : vector<4x4x128xbf16> to vector<16x128xbf16>
    %10 = vector.extract_strided_slice %1 {offsets = [1, 1, 0], sizes = [4, 4, 128], strides = [1, 1, 1]} : vector<6x6x128xbf16> to vector<4x4x128xbf16>
    %11 = vector.shape_cast %10 : vector<4x4x128xbf16> to vector<16x128xbf16>
    %12 = vector.extract_strided_slice %1 {offsets = [1, 2, 0], sizes = [4, 4, 128], strides = [1, 1, 1]} : vector<6x6x128xbf16> to vector<4x4x128xbf16>
    %13 = vector.shape_cast %12 : vector<4x4x128xbf16> to vector<16x128xbf16>
    %14 = vector.extract_strided_slice %1 {offsets = [2, 0, 0], sizes = [4, 4, 128], strides = [1, 1, 1]} : vector<6x6x128xbf16> to vector<4x4x128xbf16>
    %15 = vector.shape_cast %14 : vector<4x4x128xbf16> to vector<16x128xbf16>
    %16 = vector.extract_strided_slice %1 {offsets = [2, 1, 0], sizes = [4, 4, 128], strides = [1, 1, 1]} : vector<6x6x128xbf16> to vector<4x4x128xbf16>
    %17 = vector.shape_cast %16 : vector<4x4x128xbf16> to vector<16x128xbf16>
    %18 = vector.extract_strided_slice %1 {offsets = [2, 2, 0], sizes = [4, 4, 128], strides = [1, 1, 1]} : vector<6x6x128xbf16> to vector<4x4x128xbf16>
    %19 = vector.shape_cast %18 : vector<4x4x128xbf16> to vector<16x128xbf16>
    %20 = tpu.concatenate %3, %5, %7, %9, %11, %13, %15, %17, %19 in 1 : vector<16x128xbf16>, vector<16x128xbf16>, vector<16x128xbf16>, vector<16x128xbf16>, vector<16x128xbf16>, vector<16x128xbf16>, vector<16x128xbf16>, vector<16x128xbf16>, vector<16x128xbf16> -> vector<16x1152xbf16>
    %c0_3 = arith.constant 0 : index
    %c0_4 = arith.constant 0 : index
    %21 = vector.load %arg2[%c0_3, %c0_4] : memref<1152x256xbf16, #tpu.memory_space<vmem>>, vector<1152x256xbf16>
    %cst = arith.constant dense<0.000000e+00> : vector<16x256xf32>
    %22 = tpu.matmul %20, %21, %cst {dimension_numbers = #tpu.dot_dimension_numbers<[1], [0], [0], [1], [0, 0, 1, 1], [], []>} : vector<16x1152xbf16>, vector<1152x256xbf16>, vector<16x256xf32> -> vector<16x256xf32>
    %23 = vector.shape_cast %22 : vector<16x256xf32> to vector<8x2x256xf32>
    %cst_5 = arith.constant dense<0xFF800000> : vector<8x256xf32>
    %24 = vector.multi_reduction <maximumf>, %23, %cst_5 [1] : vector<8x2x256xf32> to vector<8x256xf32>
    %25 = vector.shape_cast %24 : vector<8x256xf32> to vector<2x2x2x256xf32>
    %cst_6 = arith.constant dense<0xFF800000> : vector<2x2x256xf32>
    %26 = vector.multi_reduction <maximumf>, %25, %cst_6 [1] : vector<2x2x2x256xf32> to vector<2x2x256xf32>
    %c0_7 = arith.constant 0 : index
    %c0_8 = arith.constant 0 : index
    %27 = vector.load %arg3[%c0_7, %c0_8] : memref<1x256xf32, #tpu.memory_space<vmem>>, vector<1x256xf32>
    %28 = vector.shape_cast %27 : vector<1x256xf32> to vector<1x1x256xf32>
    %29 = vector.broadcast %28 : vector<1x1x256xf32> to vector<2x2x256xf32>
    %30 = arith.addf %26, %29 : vector<2x2x256xf32>
    %cst_9 = arith.constant 0.000000e+00 : f32
    %31 = vector.broadcast %cst_9 : f32 to vector<2x2x256xf32>
    %32 = arith.maximumf %30, %31 : vector<2x2x256xf32>
    %c0_10 = arith.constant 0 : index
    %c0_11 = arith.constant 0 : index
    %33 = vector.load %arg4[%c0_10, %c0_11] : memref<1x256xf32, #tpu.memory_space<vmem>>, vector<1x256xf32>
    %34 = vector.shape_cast %33 : vector<1x256xf32> to vector<1x1x256xf32>
    %35 = vector.broadcast %34 : vector<1x1x256xf32> to vector<2x2x256xf32>
    %36 = arith.mulf %32, %35 : vector<2x2x256xf32>
    %c0_12 = arith.constant 0 : index
    %c0_13 = arith.constant 0 : index
    %37 = vector.load %arg5[%c0_12, %c0_13] : memref<1x256xf32, #tpu.memory_space<vmem>>, vector<1x256xf32>
    %38 = vector.shape_cast %37 : vector<1x256xf32> to vector<1x1x256xf32>
    %39 = vector.broadcast %38 : vector<1x1x256xf32> to vector<2x2x256xf32>
    %40 = arith.addf %36, %39 : vector<2x2x256xf32>
    %41 = arith.truncf %40 : vector<2x2x256xf32> to vector<2x2x256xbf16>
    %c0_14 = arith.constant 0 : index
    %c0_15 = arith.constant 0 : index
    %c0_16 = arith.constant 0 : index
    %c0_17 = arith.constant 0 : index
    %42 = vector.load %arg6[%c0_14, %c0_15, %c0_16, %c0_17] : memref<1x2x2x256xbf16, #tpu.memory_space<vmem>>, vector<1x2x2x256xbf16>
    %43 = vector.shape_cast %42 : vector<1x2x2x256xbf16> to vector<2x2x256xbf16>
    %44 = vector.shape_cast %41 : vector<2x2x256xbf16> to vector<1x2x2x256xbf16>
    tpu.vector_store %arg6[%c0_14, %c0_15, %c0_16, %c0_17], %44 {strides = array<i32>} : memref<1x2x2x256xbf16, #tpu.memory_space<vmem>>, vector<1x2x2x256xbf16>,
    return
  }
  func.func @transform_0(%arg0: i32) -> (i32, i32, i32, i32) {
    %c0_i32 = arith.constant 0 : i32
    %c0_i32_0 = arith.constant 0 : i32
    %c0_i32_1 = arith.constant 0 : i32
    %c0_i32_2 = arith.constant 0 : i32
    return %arg0, %c0_i32, %c0_i32_0, %c0_i32_1 : i32, i32, i32, i32
  }
  func.func @transform_1(%arg0: i32) -> (i32, i32) {
    %c0_i32 = arith.constant 0 : i32
    %c0_i32_0 = arith.constant 0 : i32
    %c0_i32_1 = arith.constant 0 : i32
    return %c0_i32, %c0_i32_0 : i32, i32
  }
  func.func @transform_2(%arg0: i32) -> (i32, i32) {
    %c0_i32 = arith.constant 0 : i32
    %c0_i32_0 = arith.constant 0 : i32
    %c0_i32_1 = arith.constant 0 : i32
    return %c0_i32, %c0_i32_0 : i32, i32
  }
  func.func @transform_3(%arg0: i32) -> (i32, i32) {
    %c0_i32 = arith.constant 0 : i32
    %c0_i32_0 = arith.constant 0 : i32
    %c0_i32_1 = arith.constant 0 : i32
    return %c0_i32, %c0_i32_0 : i32, i32
  }
  func.func @transform_4(%arg0: i32) -> (i32, i32) {
    %c0_i32 = arith.constant 0 : i32
    %c0_i32_0 = arith.constant 0 : i32
    %c0_i32_1 = arith.constant 0 : i32
    return %c0_i32, %c0_i32_0 : i32, i32
  }
  func.func @transform_5(%arg0: i32) -> (i32, i32, i32, i32) {
    %c0_i32 = arith.constant 0 : i32
    %c0_i32_0 = arith.constant 0 : i32
    %c0_i32_1 = arith.constant 0 : i32
    %c0_i32_2 = arith.constant 0 : i32
    return %arg0, %c0_i32, %c0_i32_0, %c0_i32_1 : i32, i32, i32, i32
  }
}

module attributes {stable_mosaic.version = 11 : i64} {
  func.func @_conv_block_kernel(%arg0: i32, %arg1: memref<1x4x4x256xbf16, #tpu.memory_space<vmem>>, %arg2: memref<2304x512xbf16, #tpu.memory_space<vmem>>, %arg3: memref<1x512xf32, #tpu.memory_space<vmem>>, %arg4: memref<1x512xf32, #tpu.memory_space<vmem>>, %arg5: memref<1x512xf32, #tpu.memory_space<vmem>>, %arg6: memref<1x1x1x512xbf16, #tpu.memory_space<vmem>>) attributes {dimension_semantics = [#tpu.dimension_semantics<parallel>], iteration_bounds = array<i64: 2>, scalar_prefetch = 0 : i64, scratch_operands = 0 : i64, tpu.core_type = #tpu.core_type<tc>, window_params = [{transform_indices = @transform_0, window_bounds = array<i64: 1, 4, 4, 256>}, {pipeline_mode = #tpu.pipeline_mode<synchronous>, transform_indices = @transform_1, window_bounds = array<i64: 2304, 512>}, {pipeline_mode = #tpu.pipeline_mode<synchronous>, transform_indices = @transform_2, window_bounds = array<i64: 1, 512>}, {pipeline_mode = #tpu.pipeline_mode<synchronous>, transform_indices = @transform_3, window_bounds = array<i64: 1, 512>}, {pipeline_mode = #tpu.pipeline_mode<synchronous>, transform_indices = @transform_4, window_bounds = array<i64: 1, 512>}, {transform_indices = @transform_5, window_bounds = array<i64: 1, 1, 1, 512>}]} {
    %c0 = arith.constant 0 : index
    %c0_0 = arith.constant 0 : index
    %c0_1 = arith.constant 0 : index
    %c0_2 = arith.constant 0 : index
    %0 = vector.load %arg1[%c0, %c0_0, %c0_1, %c0_2] : memref<1x4x4x256xbf16, #tpu.memory_space<vmem>>, vector<1x4x4x256xbf16>
    %1 = vector.shape_cast %0 : vector<1x4x4x256xbf16> to vector<4x4x256xbf16>
    %2 = vector.extract_strided_slice %1 {offsets = [0, 0, 0], sizes = [2, 2, 256], strides = [1, 1, 1]} : vector<4x4x256xbf16> to vector<2x2x256xbf16>
    %3 = vector.shape_cast %2 : vector<2x2x256xbf16> to vector<4x256xbf16>
    %4 = vector.extract_strided_slice %1 {offsets = [0, 1, 0], sizes = [2, 2, 256], strides = [1, 1, 1]} : vector<4x4x256xbf16> to vector<2x2x256xbf16>
    %5 = vector.shape_cast %4 : vector<2x2x256xbf16> to vector<4x256xbf16>
    %6 = vector.extract_strided_slice %1 {offsets = [0, 2, 0], sizes = [2, 2, 256], strides = [1, 1, 1]} : vector<4x4x256xbf16> to vector<2x2x256xbf16>
    %7 = vector.shape_cast %6 : vector<2x2x256xbf16> to vector<4x256xbf16>
    %8 = vector.extract_strided_slice %1 {offsets = [1, 0, 0], sizes = [2, 2, 256], strides = [1, 1, 1]} : vector<4x4x256xbf16> to vector<2x2x256xbf16>
    %9 = vector.shape_cast %8 : vector<2x2x256xbf16> to vector<4x256xbf16>
    %10 = vector.extract_strided_slice %1 {offsets = [1, 1, 0], sizes = [2, 2, 256], strides = [1, 1, 1]} : vector<4x4x256xbf16> to vector<2x2x256xbf16>
    %11 = vector.shape_cast %10 : vector<2x2x256xbf16> to vector<4x256xbf16>
    %12 = vector.extract_strided_slice %1 {offsets = [1, 2, 0], sizes = [2, 2, 256], strides = [1, 1, 1]} : vector<4x4x256xbf16> to vector<2x2x256xbf16>
    %13 = vector.shape_cast %12 : vector<2x2x256xbf16> to vector<4x256xbf16>
    %14 = vector.extract_strided_slice %1 {offsets = [2, 0, 0], sizes = [2, 2, 256], strides = [1, 1, 1]} : vector<4x4x256xbf16> to vector<2x2x256xbf16>
    %15 = vector.shape_cast %14 : vector<2x2x256xbf16> to vector<4x256xbf16>
    %16 = vector.extract_strided_slice %1 {offsets = [2, 1, 0], sizes = [2, 2, 256], strides = [1, 1, 1]} : vector<4x4x256xbf16> to vector<2x2x256xbf16>
    %17 = vector.shape_cast %16 : vector<2x2x256xbf16> to vector<4x256xbf16>
    %18 = vector.extract_strided_slice %1 {offsets = [2, 2, 0], sizes = [2, 2, 256], strides = [1, 1, 1]} : vector<4x4x256xbf16> to vector<2x2x256xbf16>
    %19 = vector.shape_cast %18 : vector<2x2x256xbf16> to vector<4x256xbf16>
    %20 = tpu.concatenate %3, %5, %7, %9, %11, %13, %15, %17, %19 in 1 : vector<4x256xbf16>, vector<4x256xbf16>, vector<4x256xbf16>, vector<4x256xbf16>, vector<4x256xbf16>, vector<4x256xbf16>, vector<4x256xbf16>, vector<4x256xbf16>, vector<4x256xbf16> -> vector<4x2304xbf16>
    %c0_3 = arith.constant 0 : index
    %c0_4 = arith.constant 0 : index
    %21 = vector.load %arg2[%c0_3, %c0_4] : memref<2304x512xbf16, #tpu.memory_space<vmem>>, vector<2304x512xbf16>
    %cst = arith.constant dense<0.000000e+00> : vector<4x512xf32>
    %22 = tpu.matmul %20, %21, %cst {dimension_numbers = #tpu.dot_dimension_numbers<[1], [0], [0], [1], [0, 0, 1, 1], [], []>} : vector<4x2304xbf16>, vector<2304x512xbf16>, vector<4x512xf32> -> vector<4x512xf32>
    %23 = vector.shape_cast %22 : vector<4x512xf32> to vector<2x2x512xf32>
    %cst_5 = arith.constant dense<0xFF800000> : vector<2x512xf32>
    %24 = vector.multi_reduction <maximumf>, %23, %cst_5 [1] : vector<2x2x512xf32> to vector<2x512xf32>
    %25 = vector.shape_cast %24 : vector<2x512xf32> to vector<1x2x1x512xf32>
    %cst_6 = arith.constant dense<0xFF800000> : vector<1x1x512xf32>
    %26 = vector.multi_reduction <maximumf>, %25, %cst_6 [1] : vector<1x2x1x512xf32> to vector<1x1x512xf32>
    %c0_7 = arith.constant 0 : index
    %c0_8 = arith.constant 0 : index
    %27 = vector.load %arg3[%c0_7, %c0_8] : memref<1x512xf32, #tpu.memory_space<vmem>>, vector<1x512xf32>
    %28 = vector.shape_cast %27 : vector<1x512xf32> to vector<1x1x512xf32>
    %29 = arith.addf %26, %28 : vector<1x1x512xf32>
    %cst_9 = arith.constant 0.000000e+00 : f32
    %30 = vector.broadcast %cst_9 : f32 to vector<1x1x512xf32>
    %31 = arith.maximumf %29, %30 : vector<1x1x512xf32>
    %c0_10 = arith.constant 0 : index
    %c0_11 = arith.constant 0 : index
    %32 = vector.load %arg4[%c0_10, %c0_11] : memref<1x512xf32, #tpu.memory_space<vmem>>, vector<1x512xf32>
    %33 = vector.shape_cast %32 : vector<1x512xf32> to vector<1x1x512xf32>
    %34 = arith.mulf %31, %33 : vector<1x1x512xf32>
    %c0_12 = arith.constant 0 : index
    %c0_13 = arith.constant 0 : index
    %35 = vector.load %arg5[%c0_12, %c0_13] : memref<1x512xf32, #tpu.memory_space<vmem>>, vector<1x512xf32>
    %36 = vector.shape_cast %35 : vector<1x512xf32> to vector<1x1x512xf32>
    %37 = arith.addf %34, %36 : vector<1x1x512xf32>
    %38 = arith.truncf %37 : vector<1x1x512xf32> to vector<1x1x512xbf16>
    %c0_14 = arith.constant 0 : index
    %c0_15 = arith.constant 0 : index
    %c0_16 = arith.constant 0 : index
    %c0_17 = arith.constant 0 : index
    %39 = vector.load %arg6[%c0_14, %c0_15, %c0_16, %c0_17] : memref<1x1x1x512xbf16, #tpu.memory_space<vmem>>, vector<1x1x1x512xbf16>
    %40 = vector.shape_cast %39 : vector<1x1x1x512xbf16> to vector<1x1x512xbf16>
    %41 = vector.shape_cast %38 : vector<1x1x512xbf16> to vector<1x1x1x512xbf16>
    tpu.vector_store %arg6[%c0_14, %c0_15, %c0_16, %c0_17], %41 {strides = array<i32>} : memref<1x1x1x512xbf16, #tpu.memory_space<vmem>>, vector<1x1x1x512xbf16>,
    return
  }
  func.func @transform_0(%arg0: i32) -> (i32, i32, i32, i32) {
    %c0_i32 = arith.constant 0 : i32
    %c0_i32_0 = arith.constant 0 : i32
    %c0_i32_1 = arith.constant 0 : i32
    %c0_i32_2 = arith.constant 0 : i32
    return %arg0, %c0_i32, %c0_i32_0, %c0_i32_1 : i32, i32, i32, i32
  }
  func.func @transform_1(%arg0: i32) -> (i32, i32) {
    %c0_i32 = arith.constant 0 : i32
    %c0_i32_0 = arith.constant 0 : i32
    %c0_i32_1 = arith.constant 0 : i32
    return %c0_i32, %c0_i32_0 : i32, i32
  }
  func.func @transform_2(%arg0: i32) -> (i32, i32) {
    %c0_i32 = arith.constant 0 : i32
    %c0_i32_0 = arith.constant 0 : i32
    %c0_i32_1 = arith.constant 0 : i32
    return %c0_i32, %c0_i32_0 : i32, i32
  }
  func.func @transform_3(%arg0: i32) -> (i32, i32) {
    %c0_i32 = arith.constant 0 : i32
    %c0_i32_0 = arith.constant 0 : i32
    %c0_i32_1 = arith.constant 0 : i32
    return %c0_i32, %c0_i32_0 : i32, i32
  }
  func.func @transform_4(%arg0: i32) -> (i32, i32) {
    %c0_i32 = arith.constant 0 : i32
    %c0_i32_0 = arith.constant 0 : i32
    %c0_i32_1 = arith.constant 0 : i32
    return %c0_i32, %c0_i32_0 : i32, i32
  }
  func.func @transform_5(%arg0: i32) -> (i32, i32, i32, i32) {
    %c0_i32 = arith.constant 0 : i32
    %c0_i32_0 = arith.constant 0 : i32
    %c0_i32_1 = arith.constant 0 : i32
    %c0_i32_2 = arith.constant 0 : i32
    return %arg0, %c0_i32, %c0_i32_0, %c0_i32_1 : i32, i32, i32, i32
  }
}

module attributes {stable_mosaic.version = 11 : i64} {
  func.func @_matmul_kernel(%arg0: i32, %arg1: i32, %arg2: i32, %arg3: memref<16x512xbf16, #tpu.memory_space<vmem>>, %arg4: memref<512x256xbf16, #tpu.memory_space<vmem>>, %arg5: memref<1x256xf32, #tpu.memory_space<vmem>>, %arg6: memref<16x256xbf16, #tpu.memory_space<vmem>>, %arg7: memref<16x256xf32, #tpu.memory_space<vmem>>) attributes {dimension_semantics = [#tpu.dimension_semantics<parallel>, #tpu.dimension_semantics<parallel>, #tpu.dimension_semantics<arbitrary>], iteration_bounds = array<i64: 1, 2, 1>, scalar_prefetch = 0 : i64, scratch_operands = 1 : i64, tpu.core_type = #tpu.core_type<tc>, window_params = [{transform_indices = @transform_0, window_bounds = array<i64: 16, 512>}, {transform_indices = @transform_1, window_bounds = array<i64: 512, 256>}, {transform_indices = @transform_2, window_bounds = array<i64: 1, 256>}, {transform_indices = @transform_3, window_bounds = array<i64: 16, 256>}]} {
    %c0_i32 = arith.constant 0 : i32
    %0 = arith.cmpi eq, %arg2, %c0_i32 : i32
    %1 = arith.extui %0 : i1 to i32
    %c0_i32_0 = arith.constant 0 : i32
    %2 = arith.cmpi ne, %1, %c0_i32_0 : i32
    scf.if %2 {
      %cst_10 = arith.constant 0.000000e+00 : f32
      %12 = vector.broadcast %cst_10 : f32 to vector<16x256xf32>
      %c0_11 = arith.constant 0 : index
      %c0_12 = arith.constant 0 : index
      %13 = vector.load %arg7[%c0_11, %c0_12] : memref<16x256xf32, #tpu.memory_space<vmem>>, vector<16x256xf32>
      tpu.vector_store %arg7[%c0_11, %c0_12], %12 {strides = array<i32>} : memref<16x256xf32, #tpu.memory_space<vmem>>, vector<16x256xf32>,
    } else {
    }
    %c0 = arith.constant 0 : index
    %c0_1 = arith.constant 0 : index
    %3 = vector.load %arg7[%c0, %c0_1] : memref<16x256xf32, #tpu.memory_space<vmem>>, vector<16x256xf32>
    %c0_2 = arith.constant 0 : index
    %c0_3 = arith.constant 0 : index
    %4 = vector.load %arg3[%c0_2, %c0_3] : memref<16x512xbf16, #tpu.memory_space<vmem>>, vector<16x512xbf16>
    %c0_4 = arith.constant 0 : index
    %c0_5 = arith.constant 0 : index
    %5 = vector.load %arg4[%c0_4, %c0_5] : memref<512x256xbf16, #tpu.memory_space<vmem>>, vector<512x256xbf16>
    %cst = arith.constant dense<0.000000e+00> : vector<16x256xf32>
    %6 = tpu.matmul %4, %5, %cst {dimension_numbers = #tpu.dot_dimension_numbers<[1], [0], [0], [1], [0, 0, 1, 1], [], []>} : vector<16x512xbf16>, vector<512x256xbf16>, vector<16x256xf32> -> vector<16x256xf32>
    %7 = arith.addf %3, %6 : vector<16x256xf32>
    %c0_6 = arith.constant 0 : index
    %c0_7 = arith.constant 0 : index
    %8 = vector.load %arg7[%c0_6, %c0_7] : memref<16x256xf32, #tpu.memory_space<vmem>>, vector<16x256xf32>
    tpu.vector_store %arg7[%c0_6, %c0_7], %7 {strides = array<i32>} : memref<16x256xf32, #tpu.memory_space<vmem>>, vector<16x256xf32>,
    %c0_i32_8 = arith.constant 0 : i32
    %9 = arith.cmpi eq, %arg2, %c0_i32_8 : i32
    %10 = arith.extui %9 : i1 to i32
    %c0_i32_9 = arith.constant 0 : i32
    %11 = arith.cmpi ne, %10, %c0_i32_9 : i32
    scf.if %11 {
      %c0_10 = arith.constant 0 : index
      %c0_11 = arith.constant 0 : index
      %12 = vector.load %arg7[%c0_10, %c0_11] : memref<16x256xf32, #tpu.memory_space<vmem>>, vector<16x256xf32>
      %c0_12 = arith.constant 0 : index
      %c0_13 = arith.constant 0 : index
      %13 = vector.load %arg5[%c0_12, %c0_13] : memref<1x256xf32, #tpu.memory_space<vmem>>, vector<1x256xf32>
      %14 = vector.broadcast %13 : vector<1x256xf32> to vector<16x256xf32>
      %15 = arith.addf %12, %14 : vector<16x256xf32>
      %cst_14 = arith.constant 0.000000e+00 : f32
      %16 = vector.broadcast %cst_14 : f32 to vector<16x256xf32>
      %17 = arith.maximumf %15, %16 : vector<16x256xf32>
      %18 = arith.truncf %17 : vector<16x256xf32> to vector<16x256xbf16>
      %c0_15 = arith.constant 0 : index
      %c0_16 = arith.constant 0 : index
      %19 = vector.load %arg6[%c0_15, %c0_16] : memref<16x256xbf16, #tpu.memory_space<vmem>>, vector<16x256xbf16>
      tpu.vector_store %arg6[%c0_15, %c0_16], %18 {strides = array<i32>} : memref<16x256xbf16, #tpu.memory_space<vmem>>, vector<16x256xbf16>,
    } else {
    }
    return
  }
  func.func @transform_0(%arg0: i32, %arg1: i32, %arg2: i32) -> (i32, i32) {
    %c0_i32 = arith.constant 0 : i32
    return %arg0, %arg2 : i32, i32
  }
  func.func @transform_1(%arg0: i32, %arg1: i32, %arg2: i32) -> (i32, i32) {
    %c0_i32 = arith.constant 0 : i32
    return %arg2, %arg1 : i32, i32
  }
  func.func @transform_2(%arg0: i32, %arg1: i32, %arg2: i32) -> (i32, i32) {
    %c0_i32 = arith.constant 0 : i32
    %c0_i32_0 = arith.constant 0 : i32
    return %c0_i32, %arg1 : i32, i32
  }
  func.func @transform_3(%arg0: i32, %arg1: i32, %arg2: i32) -> (i32, i32) {
    %c0_i32 = arith.constant 0 : i32
    return %arg0, %arg1 : i32, i32
  }
}

module attributes {stable_mosaic.version = 11 : i64} {
  func.func @_matmul_kernel(%arg0: i32, %arg1: i32, %arg2: i32, %arg3: memref<16x512xbf16, #tpu.memory_space<vmem>>, %arg4: memref<512x128xbf16, #tpu.memory_space<vmem>>, %arg5: memref<1x128xf32, #tpu.memory_space<vmem>>, %arg6: memref<16x128xbf16, #tpu.memory_space<vmem>>, %arg7: memref<16x128xf32, #tpu.memory_space<vmem>>) attributes {dimension_semantics = [#tpu.dimension_semantics<parallel>, #tpu.dimension_semantics<parallel>, #tpu.dimension_semantics<arbitrary>], iteration_bounds = array<i64: 1, 2, 1>, scalar_prefetch = 0 : i64, scratch_operands = 1 : i64, tpu.core_type = #tpu.core_type<tc>, window_params = [{transform_indices = @transform_0, window_bounds = array<i64: 16, 512>}, {transform_indices = @transform_1, window_bounds = array<i64: 512, 128>}, {transform_indices = @transform_2, window_bounds = array<i64: 1, 128>}, {transform_indices = @transform_3, window_bounds = array<i64: 16, 128>}]} {
    %c0_i32 = arith.constant 0 : i32
    %0 = arith.cmpi eq, %arg2, %c0_i32 : i32
    %1 = arith.extui %0 : i1 to i32
    %c0_i32_0 = arith.constant 0 : i32
    %2 = arith.cmpi ne, %1, %c0_i32_0 : i32
    scf.if %2 {
      %cst_10 = arith.constant 0.000000e+00 : f32
      %12 = vector.broadcast %cst_10 : f32 to vector<16x128xf32>
      %c0_11 = arith.constant 0 : index
      %c0_12 = arith.constant 0 : index
      %13 = vector.load %arg7[%c0_11, %c0_12] : memref<16x128xf32, #tpu.memory_space<vmem>>, vector<16x128xf32>
      tpu.vector_store %arg7[%c0_11, %c0_12], %12 {strides = array<i32>} : memref<16x128xf32, #tpu.memory_space<vmem>>, vector<16x128xf32>,
    } else {
    }
    %c0 = arith.constant 0 : index
    %c0_1 = arith.constant 0 : index
    %3 = vector.load %arg7[%c0, %c0_1] : memref<16x128xf32, #tpu.memory_space<vmem>>, vector<16x128xf32>
    %c0_2 = arith.constant 0 : index
    %c0_3 = arith.constant 0 : index
    %4 = vector.load %arg3[%c0_2, %c0_3] : memref<16x512xbf16, #tpu.memory_space<vmem>>, vector<16x512xbf16>
    %c0_4 = arith.constant 0 : index
    %c0_5 = arith.constant 0 : index
    %5 = vector.load %arg4[%c0_4, %c0_5] : memref<512x128xbf16, #tpu.memory_space<vmem>>, vector<512x128xbf16>
    %cst = arith.constant dense<0.000000e+00> : vector<16x128xf32>
    %6 = tpu.matmul %4, %5, %cst {dimension_numbers = #tpu.dot_dimension_numbers<[1], [0], [0], [1], [0, 0, 1, 1], [], []>} : vector<16x512xbf16>, vector<512x128xbf16>, vector<16x128xf32> -> vector<16x128xf32>
    %7 = arith.addf %3, %6 : vector<16x128xf32>
    %c0_6 = arith.constant 0 : index
    %c0_7 = arith.constant 0 : index
    %8 = vector.load %arg7[%c0_6, %c0_7] : memref<16x128xf32, #tpu.memory_space<vmem>>, vector<16x128xf32>
    tpu.vector_store %arg7[%c0_6, %c0_7], %7 {strides = array<i32>} : memref<16x128xf32, #tpu.memory_space<vmem>>, vector<16x128xf32>,
    %c0_i32_8 = arith.constant 0 : i32
    %9 = arith.cmpi eq, %arg2, %c0_i32_8 : i32
    %10 = arith.extui %9 : i1 to i32
    %c0_i32_9 = arith.constant 0 : i32
    %11 = arith.cmpi ne, %10, %c0_i32_9 : i32
    scf.if %11 {
      %c0_10 = arith.constant 0 : index
      %c0_11 = arith.constant 0 : index
      %12 = vector.load %arg7[%c0_10, %c0_11] : memref<16x128xf32, #tpu.memory_space<vmem>>, vector<16x128xf32>
      %c0_12 = arith.constant 0 : index
      %c0_13 = arith.constant 0 : index
      %13 = vector.load %arg5[%c0_12, %c0_13] : memref<1x128xf32, #tpu.memory_space<vmem>>, vector<1x128xf32>
      %14 = vector.broadcast %13 : vector<1x128xf32> to vector<16x128xf32>
      %15 = arith.addf %12, %14 : vector<16x128xf32>
      %cst_14 = arith.constant 0.000000e+00 : f32
      %16 = vector.broadcast %cst_14 : f32 to vector<16x128xf32>
      %17 = arith.maximumf %15, %16 : vector<16x128xf32>
      %18 = arith.truncf %17 : vector<16x128xf32> to vector<16x128xbf16>
      %c0_15 = arith.constant 0 : index
      %c0_16 = arith.constant 0 : index
      %19 = vector.load %arg6[%c0_15, %c0_16] : memref<16x128xbf16, #tpu.memory_space<vmem>>, vector<16x128xbf16>
      tpu.vector_store %arg6[%c0_15, %c0_16], %18 {strides = array<i32>} : memref<16x128xbf16, #tpu.memory_space<vmem>>, vector<16x128xbf16>,
    } else {
    }
    return
  }
  func.func @transform_0(%arg0: i32, %arg1: i32, %arg2: i32) -> (i32, i32) {
    %c0_i32 = arith.constant 0 : i32
    return %arg0, %arg2 : i32, i32
  }
  func.func @transform_1(%arg0: i32, %arg1: i32, %arg2: i32) -> (i32, i32) {
    %c0_i32 = arith.constant 0 : i32
    return %arg2, %arg1 : i32, i32
  }
  func.func @transform_2(%arg0: i32, %arg1: i32, %arg2: i32) -> (i32, i32) {
    %c0_i32 = arith.constant 0 : i32
    %c0_i32_0 = arith.constant 0 : i32
    return %c0_i32, %arg1 : i32, i32
  }
  func.func @transform_3(%arg0: i32, %arg1: i32, %arg2: i32) -> (i32, i32) {
    %c0_i32 = arith.constant 0 : i32
    return %arg0, %arg1 : i32, i32
  }
}

module attributes {stable_mosaic.version = 11 : i64} {
  func.func @_matmul_kernel(%arg0: i32, %arg1: i32, %arg2: i32, %arg3: memref<16x256xbf16, #tpu.memory_space<vmem>>, %arg4: memref<256x128xbf16, #tpu.memory_space<vmem>>, %arg5: memref<1x128xf32, #tpu.memory_space<vmem>>, %arg6: memref<16x128xf32, #tpu.memory_space<vmem>>, %arg7: memref<16x128xf32, #tpu.memory_space<vmem>>) attributes {dimension_semantics = [#tpu.dimension_semantics<parallel>, #tpu.dimension_semantics<parallel>, #tpu.dimension_semantics<arbitrary>], iteration_bounds = array<i64: 1, 1, 1>, scalar_prefetch = 0 : i64, scratch_operands = 1 : i64, tpu.core_type = #tpu.core_type<tc>, window_params = [{transform_indices = @transform_0, window_bounds = array<i64: 16, 256>}, {transform_indices = @transform_1, window_bounds = array<i64: 256, 128>}, {transform_indices = @transform_2, window_bounds = array<i64: 1, 128>}, {transform_indices = @transform_3, window_bounds = array<i64: 16, 128>}]} {
    %c0_i32 = arith.constant 0 : i32
    %0 = arith.cmpi eq, %arg2, %c0_i32 : i32
    %1 = arith.extui %0 : i1 to i32
    %c0_i32_0 = arith.constant 0 : i32
    %2 = arith.cmpi ne, %1, %c0_i32_0 : i32
    scf.if %2 {
      %cst_10 = arith.constant 0.000000e+00 : f32
      %12 = vector.broadcast %cst_10 : f32 to vector<16x128xf32>
      %c0_11 = arith.constant 0 : index
      %c0_12 = arith.constant 0 : index
      %13 = vector.load %arg7[%c0_11, %c0_12] : memref<16x128xf32, #tpu.memory_space<vmem>>, vector<16x128xf32>
      tpu.vector_store %arg7[%c0_11, %c0_12], %12 {strides = array<i32>} : memref<16x128xf32, #tpu.memory_space<vmem>>, vector<16x128xf32>,
    } else {
    }
    %c0 = arith.constant 0 : index
    %c0_1 = arith.constant 0 : index
    %3 = vector.load %arg7[%c0, %c0_1] : memref<16x128xf32, #tpu.memory_space<vmem>>, vector<16x128xf32>
    %c0_2 = arith.constant 0 : index
    %c0_3 = arith.constant 0 : index
    %4 = vector.load %arg3[%c0_2, %c0_3] : memref<16x256xbf16, #tpu.memory_space<vmem>>, vector<16x256xbf16>
    %c0_4 = arith.constant 0 : index
    %c0_5 = arith.constant 0 : index
    %5 = vector.load %arg4[%c0_4, %c0_5] : memref<256x128xbf16, #tpu.memory_space<vmem>>, vector<256x128xbf16>
    %cst = arith.constant dense<0.000000e+00> : vector<16x128xf32>
    %6 = tpu.matmul %4, %5, %cst {dimension_numbers = #tpu.dot_dimension_numbers<[1], [0], [0], [1], [0, 0, 1, 1], [], []>} : vector<16x256xbf16>, vector<256x128xbf16>, vector<16x128xf32> -> vector<16x128xf32>
    %7 = arith.addf %3, %6 : vector<16x128xf32>
    %c0_6 = arith.constant 0 : index
    %c0_7 = arith.constant 0 : index
    %8 = vector.load %arg7[%c0_6, %c0_7] : memref<16x128xf32, #tpu.memory_space<vmem>>, vector<16x128xf32>
    tpu.vector_store %arg7[%c0_6, %c0_7], %7 {strides = array<i32>} : memref<16x128xf32, #tpu.memory_space<vmem>>, vector<16x128xf32>,
    %c0_i32_8 = arith.constant 0 : i32
    %9 = arith.cmpi eq, %arg2, %c0_i32_8 : i32
    %10 = arith.extui %9 : i1 to i32
    %c0_i32_9 = arith.constant 0 : i32
    %11 = arith.cmpi ne, %10, %c0_i32_9 : i32
    scf.if %11 {
      %c0_10 = arith.constant 0 : index
      %c0_11 = arith.constant 0 : index
      %12 = vector.load %arg7[%c0_10, %c0_11] : memref<16x128xf32, #tpu.memory_space<vmem>>, vector<16x128xf32>
      %c0_12 = arith.constant 0 : index
      %c0_13 = arith.constant 0 : index
      %13 = vector.load %arg5[%c0_12, %c0_13] : memref<1x128xf32, #tpu.memory_space<vmem>>, vector<1x128xf32>
      %14 = vector.broadcast %13 : vector<1x128xf32> to vector<16x128xf32>
      %15 = arith.addf %12, %14 : vector<16x128xf32>
      %c0_14 = arith.constant 0 : index
      %c0_15 = arith.constant 0 : index
      %16 = vector.load %arg6[%c0_14, %c0_15] : memref<16x128xf32, #tpu.memory_space<vmem>>, vector<16x128xf32>
      tpu.vector_store %arg6[%c0_14, %c0_15], %15 {strides = array<i32>} : memref<16x128xf32, #tpu.memory_space<vmem>>, vector<16x128xf32>,
    } else {
    }
    return
  }
  func.func @transform_0(%arg0: i32, %arg1: i32, %arg2: i32) -> (i32, i32) {
    %c0_i32 = arith.constant 0 : i32
    return %arg0, %arg2 : i32, i32
  }
  func.func @transform_1(%arg0: i32, %arg1: i32, %arg2: i32) -> (i32, i32) {
    %c0_i32 = arith.constant 0 : i32
    return %arg2, %arg1 : i32, i32
  }
  func.func @transform_2(%arg0: i32, %arg1: i32, %arg2: i32) -> (i32, i32) {
    %c0_i32 = arith.constant 0 : i32
    %c0_i32_0 = arith.constant 0 : i32
    return %c0_i32, %arg1 : i32, i32
  }
  func.func @transform_3(%arg0: i32, %arg1: i32, %arg2: i32) -> (i32, i32) {
    %c0_i32 = arith.constant 0 : i32
    return %arg0, %arg1 : i32, i32
  }
}

</mosaic_0001>

<bundles_post_ra>
// kernel: deepfake_detector_forward.7
= control target key start
LH: loop header
LB: loop body
LE: loop exit
PB: predicated region body
PF: predicated region fallthrough
CT: control target
= control target key end

     0   :  { %s3470_s18 = smov 0   ;;  %s4490_s0 = inlined_call_operand.vmem [shape: bf16[2,16,16,27], index: 0, kind: input, shape index: {}]   ;;  %s4491_s1 = inlined_call_operand.vmem [shape: bf16[27,64], index: 1, kind: input, shape index: {}]   ;;  %s4492_s2 = inlined_call_operand.vmem [shape: f32[1,64], index: 2, kind: input, shape index: {}]   ;;  %s4493_s3 = inlined_call_operand.vmem [shape: f32[1,64], index: 3, kind: input, shape index: {}]   ;;  %s4494_s4 = inlined_call_operand.vmem [shape: f32[1,64], index: 4, kind: input, shape index: {}]   ;;  %s4495_s5 = inlined_call_operand.vmem [shape: bf16[2,8,8,64], index: 5, kind: output, shape index: {}]  }
   0x1 LB: > { %s3160_s19 = sadd.s32 4294967295, %s3436_s18   ;;  %p3164_p0 = scmp.ge.s32.totalorder %s3436_s18, 1  ;;  %s3436_s18 = sphi %s3470_s18, %s15_s18  }
   0x2   : > { %p187_p1 = scmp.lt.s32.totalorder %s3436_s18, 3 }
   0x4   : > { %p188_p2 = pnand %p3164_p0, %p187_p1 }
   0x5   : > { %p215_p3 = scmp.lt.s32.totalorder (!%p188_p2), %s3160_s19, 1 }
   0x6   : > { %191 = sbr.rel (%p188_p2) target bundleno = 665 (0x299), region = 40 }
   0xb   : > { %v3406_v0 = vld [vmem:[%s4491_s1 + $0x8] sm:$0x3f]   ;;  %vm402_vm0 = vcmask 1044480   ;;  %vm403_vm1 = vcmask 1045504   ;;  %v3438_v1 = vmov 65535   ;;  %v3407_v5 = vld [vmem:[%s4491_s1] sm:$0xff]   ;;  %v606_v24 = vlaneseq }
   0xc   : > { %v404_v2 = vsel %vm402_vm0, 4294967295, %v3438_v1  ;;  %s4497_s19 = smov (!%p215_p3, %s3160_s19), 1  ;;  %vm353_vm2 = vcmask 220160   ;;  %v3439_v22 = vmov 1983009808   ;;  %vm1274_vm3 = vcmask 517120  }
   0xd   : > { %v405_v3 = vsel %vm403_vm1, %v404_v2, 0  ;;  %s3272_s24 = sshll.u32 %s4497_s19, 7  ;;  %v604_v23 = vunpack.c.l.s4 %v3439_v22  ;;  %v607_v26 = vshrl.u32 %v606_v24, 7  ;;  %vm2171_vm4 = vcmask 523264   ;;  %s3273_s9 = sshll.u32 %s4497_s19, 5 }
   0xe   : > { %v407_v4 = vand.u32 %v3406_v0, %v405_v3  ;;  %s3490_s27 = scalar_lea.vmem %s4490_s0, %s3272_s24  ;;  %vm2962_vm5 = vcmask 1041409   ;;  %vm2965_vm6 = vcmask 1042434   ;;  %vm2968_vm7 = vcmask 1043459   ;;  %s3771_s12 = scalar_lea.vmem %s4495_s5, %s3273_s9 }
   0xf   : > { %v3408_v6 = vld [vmem:[%s3490_s27] sm:$0xff]   ;;  %v3410_v8 = vld [vmem:[%s3490_s27 + $0x8] sm:$0xff]   ;;  %v3412_v10 = vld [vmem:[%s3490_s27 + $0x10] sm:$0xff]   ;;  %v605_v25 = vunpack.c.0.s8 %v604_v23  ;;  %vm2971_vm8 = vcmask 1044484   ;;  %vm2974_vm9 = vcmask 1045509   ;;  %vm2977_vm10 = vcmask 1046534  }
  0x10   : > { %3356 = vmatprep.subr.bf16.mxu0 %v407_v4  ;;  %3392 = vmatprep.subr.bf16.mxu1 %v407_v4  ;;  %v3409_v7 = vld [vmem:[%s3490_s27 + $0x40] sm:$0xff]   ;;  %v3411_v9 = vld [vmem:[%s3490_s27 + $0x48] sm:$0xff]   ;;  %v3413_v11 = vld [vmem:[%s3490_s27 + $0x50] sm:$0xff]   ;;  %vm2980_vm11 = vcmask 1047559   ;;  %vm3096_vm12 = vcmask 519168  }
  0x11   : > { %3357 = vmatpush3.bf16.msra.mxu0 %v407_v4  ;;  %3394 = vmatpush3.bf16.msra.mxu1 %v407_v4  ;;  %v3414_v12 = vld [vmem:[%s3490_s27 + $0x18] sm:$0xff]   ;;  %v3416_v14 = vld [vmem:[%s3490_s27 + $0x20] sm:$0xff]   ;;  %v3418_v16 = vld [vmem:[%s3490_s27 + $0x28] sm:$0xff]   ;;  %v3524_v27 = vsub.s32 %v605_v25, %v607_v26 }
  0x12   : > { %3358 = vmatprep.subr.bf16.mxu0 %v3407_v5  ;;  %3393 = vmatprep.subr.bf16.mxu1 %v3407_v5  ;;  %v3415_v13 = vld [vmem:[%s3490_s27 + $0x58] sm:$0xff]   ;;  %v3417_v15 = vld [vmem:[%s3490_s27 + $0x60] sm:$0xff]   ;;  %v3419_v17 = vld [vmem:[%s3490_s27 + $0x68] sm:$0xff]  }
  0x13   : > { %3360 = vmatprep.mubr.msk.bf16.mxu0 %vm353_vm2, %v3408_v6  ;;  %3376 = vmatprep.mubr.msk.bf16.mxu1 %vm353_vm2, %v3409_v7  ;;  %v3420_v18 = vld [vmem:[%s3490_s27 + $0x30] sm:$0xff]   ;;  %v3422_v20 = vld [vmem:[%s3490_s27 + $0x38] sm:$0xff]  }
  0x14   : > { %v3421_v19 = vld [vmem:[%s3490_s27 + $0x70] sm:$0xff]   ;;  %v3423_v21 = vld [vmem:[%s3490_s27 + $0x78] sm:$0xff]  }
  0x15   : > { %3359 = vmatpush3.bf16.msra.mxu0 %v3407_v5  ;;  %3395 = vmatpush3.bf16.msra.mxu1 %v3407_v5 }
  0x18   : > { %3361 = vmatmul.mubr.msk.bf16.vlgmr.msra.gmra.mxu0 %vm353_vm2, %v3410_v8  ;;  %3377 = vmatmul.mubr.msk.bf16.vlgmr.msra.gmra.mxu1 %vm353_vm2, %v3411_v9 }
  0x19   : > { %3364 = vmatprep.mubr.msk.bf16.mxu0 %vm353_vm2, %v3412_v10  ;;  %3380 = vmatprep.mubr.msk.bf16.mxu1 %vm353_vm2, %v3413_v11 }
  0x20   : > { %3365 = vmatmul.mubr.msk.bf16.gmra.mxu0 %vm353_vm2, %v3414_v12  ;;  %3381 = vmatmul.mubr.msk.bf16.gmra.mxu1 %vm353_vm2, %v3415_v13 }
  0x21   : > { %3368 = vmatprep.mubr.msk.bf16.mxu0 %vm353_vm2, %v3416_v14  ;;  %3384 = vmatprep.mubr.msk.bf16.mxu1 %vm353_vm2, %v3417_v15 }
  0x28   : > { %3369 = vmatmul.mubr.msk.bf16.gmra.mxu0 %vm353_vm2, %v3418_v16  ;;  %3385 = vmatmul.mubr.msk.bf16.gmra.mxu1 %vm353_vm2, %v3419_v17 }
  0x29   : > { %3372 = vmatprep.mubr.msk.bf16.mxu0 %vm353_vm2, %v3420_v18  ;;  %3388 = vmatprep.mubr.msk.bf16.mxu1 %vm353_vm2, %v3421_v19 }
  0x30   : > { %3373 = vmatmul.mubr.msk.bf16.gmra.mxu0 %vm353_vm2, %v3422_v20  ;;  %3389 = vmatmul.mubr.msk.bf16.gmra.mxu1 %vm353_vm2, %v3423_v21 }
  0xd8   : > { %v3362_v28 = vpop.f32.mrf.mxu0  ;;  %v3378_v29 = vpop.f32.mrf.mxu1 }
  0xd9   : > { %v636_v30 = vcombine.high %v3362_v28, %v3362_v28  ;;  %v643_v31 = vrot.slane %v3362_v28, %v3524_v27  ;;  %v908_v32 = vcombine.high %v3378_v29, %v3378_v29  ;;  %v915_v33 = vrot.slane %v3378_v29, %v3524_v27 }
  0xda   : > { %v3528_v34 = vpop.f32.mrf.mxu0 }
  0xdb   : > { %v650_v35 = vrot.slane %v636_v30, %v3524_v27  ;;  %v651_v36 = vcombine.high %v643_v31, %v643_v31  ;;  %v1331_v37 = vsel %vm1274_vm3, %v643_v31, -inf  ;;  %v922_v38 = vrot.slane %v908_v32, %v3524_v27 }
  0xdc   : > { %v1332_v39 = vrot.slane %v1331_v37, 4  ;;  %v923_v40 = vcombine.high %v915_v33, %v915_v33  ;;  %v1779_v41 = vsel %vm1274_vm3, %v915_v33, -inf  ;;  %v602_v42 = vcombine.high %v3528_v34, %v3528_v34 }
  0xdd   : > { %v652_v43 = vcombine.high %v650_v35, %v650_v35  ;;  %v1338_v44 = vsel %vm1274_vm3, %v651_v36, -inf  ;;  %v1345_v45 = vsel %vm1274_vm3, %v650_v35, -inf  ;;  %v924_v46 = vcombine.high %v922_v38, %v922_v38 }
  0xde   : > { %v1333_v47 = vmax.f32 %v1331_v37, %v1332_v39  ;;  %v1339_v48 = vrot.slane %v1338_v44, 4  ;;  %v1346_v49 = vrot.slane %v1345_v45, 4  ;;  %v1780_v50 = vrot.slane %v1779_v41, 4 }
  0xdf   : > { %v1352_v51 = vsel %vm1274_vm3, %v652_v43, -inf  ;;  %v1786_v52 = vsel %vm1274_vm3, %v923_v40, -inf  ;;  %v1793_v53 = vsel %vm1274_vm3, %v922_v38, -inf  ;;  %v1800_v54 = vsel %vm1274_vm3, %v924_v46, -inf }
  0xe0   : > { %v1334_v55 = vrot.slane %v1333_v47, 2  ;;  %v1340_v56 = vmax.f32 %v1338_v44, %v1339_v48  ;;  %v1347_v57 = vmax.f32 %v1345_v45, %v1346_v49  ;;  %v1353_v58 = vrot.slane %v1352_v51, 4 }
  0xe1   : > { %v1781_v59 = vmax.f32 %v1779_v41, %v1780_v50  ;;  %v1787_v60 = vrot.slane %v1786_v52, 4  ;;  %v1794_v61 = vrot.slane %v1793_v53, 4  ;;  %v1801_v62 = vrot.slane %v1800_v54, 4  ;;  %v507_v41 = vpop.f32.mrf.mxu1 }
  0xe2   : > { %v1335_v63 = vmax.f32 %v1333_v47, %v1334_v55  ;;  %v1341_v0 = vrot.slane %v1340_v56, 2  ;;  %v1348_v1 = vrot.slane %v1347_v57, 2  ;;  %v1354_v2 = vmax.f32 %v1352_v51, %v1353_v58  ;;  %v3573_v51 = vpop.f32.mrf.mxu0 }
  0xe3   : > { %v1782_v3 = vrot.slane %v1781_v59, 2  ;;  %v1788_v4 = vmax.f32 %v1786_v52, %v1787_v60  ;;  %v1795_v5 = vmax.f32 %v1793_v53, %v1794_v61  ;;  %v1802_v6 = vmax.f32 %v1800_v54, %v1801_v62 }
  0xe4   : > { %v1336_v7 = vrot.slane %v1335_v63, 1  ;;  %v1342_v8 = vmax.f32 %v1340_v56, %v1341_v0  ;;  %v1349_v9 = vmax.f32 %v1347_v57, %v1348_v1  ;;  %v1355_v10 = vrot.slane %v1354_v2, 2 }
  0xe5   : > { %v1783_v11 = vmax.f32 %v1781_v59, %v1782_v3  ;;  %v1789_v12 = vrot.slane %v1788_v4, 2  ;;  %v1796_v13 = vrot.slane %v1795_v5, 2  ;;  %v1803_v14 = vrot.slane %v1802_v6, 2 }
  0xe6   : > { %v1337_v15 = vmax.f32 %v1335_v63, %v1336_v7  ;;  %v1343_v16 = vrot.slane %v1342_v8, 1  ;;  %v1350_v17 = vrot.slane %v1349_v9, 1  ;;  %v1356_v18 = vmax.f32 %v1354_v2, %v1355_v10 }
  0xe7   : > { %v1784_v19 = vrot.slane %v1783_v11, 1  ;;  %v1790_v20 = vmax.f32 %v1788_v4, %v1789_v12  ;;  %v1797_v21 = vmax.f32 %v1795_v5, %v1796_v13  ;;  %v1804_v22 = vmax.f32 %v1802_v6, %v1803_v14 }
  0xe8   : > { %v1344_v23 = vmax.f32 %v1342_v8, %v1343_v16  ;;  %v1351_v24 = vmax.f32 %v1349_v9, %v1350_v17  ;;  %v1357_v25 = vrot.slane %v1356_v18, 1  ;;  %v3543_v26 = vsel %vm2171_vm4, %v1337_v15, -inf }
  0xe9   : > { %v1785_v28 = vmax.f32 %v1783_v11, %v1784_v19  ;;  %v1791_v29 = vrot.slane %v1790_v20, 1  ;;  %v1798_v30 = vrot.slane %v1797_v21, 1  ;;  %v1805_v31 = vrot.slane %v1804_v22, 1 }
  0xea   : > { %v1358_v32 = vmax.f32 %v1356_v18, %v1357_v25  ;;  %v3546_v33 = vsel %vm2171_vm4, %v1344_v23, -inf  ;;  %v3549_v35 = vsel %vm2171_vm4, %v1351_v24, -inf  ;;  %v609_v36 = vrot.slane %v3528_v34, %v3524_v27 }
  0xeb   : > { %v1792_v37 = vmax.f32 %v1790_v20, %v1791_v29  ;;  %v1799_v38 = vmax.f32 %v1797_v21, %v1798_v30  ;;  %v1806_v39 = vmax.f32 %v1804_v22, %v1805_v31  ;;  %v3554_v40 = vsel %vm2171_vm4, %v1785_v28, -inf }
  0xec   : > { %v3557_v43 = vsel %vm2171_vm4, %v1358_v32, -inf  ;;  %v616_v44 = vrot.slane %v602_v42, %v3524_v27  ;;  %v617_v45 = vcombine.high %v609_v36, %v609_v36  ;;  %v1275_v46 = vsel %vm1274_vm3, %v609_v36, -inf }
  0xed   : > { %v3565_v47 = vsel %vm2171_vm4, %v1792_v37, -inf  ;;  %v3568_v48 = vsel %vm2171_vm4, %v1799_v38, -inf  ;;  %v3571_v49 = vsel %vm2171_vm4, %v1806_v39, -inf  ;;  %v1276_v50 = vrot.slane %v1275_v46, 4  ;;  %v3594_v39 = vld [vmem:[%s4492_s2] ss:$0 sm:$0xff] }
  0xee   : > { %v618_v52 = vcombine.high %v616_v44, %v616_v44  ;;  %v1282_v53 = vsel %vm1274_vm3, %v617_v45, -inf  ;;  %v1289_v34 = vsel %vm1274_vm3, %v616_v44, -inf  ;;  %v874_v42 = vcombine.high %v507_v41, %v507_v41 }
  0xef   : > { %v1277_v54 = vmax.f32 %v1275_v46, %v1276_v50  ;;  %v1283_v55 = vrot.slane %v1282_v53, 4  ;;  %v1290_v56 = vrot.slane %v1289_v34, 4  ;;  %v881_v57 = vrot.slane %v507_v41, %v3524_v27 }
  0xf0   : > { %v1296_v58 = vsel %vm1274_vm3, %v618_v52, -inf  ;;  %v888_v59 = vrot.slane %v874_v42, %v3524_v27  ;;  %v653_v60 = vcombine.high %v3573_v51, %v3573_v51  ;;  %v3584_v61 = vrot.slane %v3573_v51, %v3524_v27 }
  0xf1   : > { %v1278_v62 = vrot.slane %v1277_v54, 2  ;;  %v1284_v63 = vmax.f32 %v1282_v53, %v1283_v55  ;;  %v1291_v0 = vmax.f32 %v1289_v34, %v1290_v56  ;;  %v1297_v1 = vrot.slane %v1296_v58, 4 }
  0xf2   : > { %v889_v2 = vcombine.high %v881_v57, %v881_v57  ;;  %v890_v3 = vcombine.high %v888_v59, %v888_v59  ;;  %v1723_v4 = vsel %vm1274_vm3, %v881_v57, -inf  ;;  %v1737_v5 = vsel %vm1274_vm3, %v888_v59, -inf }
  0xf3   : > { %v1279_v6 = vmax.f32 %v1277_v54, %v1278_v62  ;;  %v1285_v7 = vrot.slane %v1284_v63, 2  ;;  %v1292_v8 = vrot.slane %v1291_v0, 2  ;;  %v1298_v9 = vmax.f32 %v1296_v58, %v1297_v1  ;;  %v3614_v1 = vld [vmem:[%s4494_s4] ss:$0 sm:$0xff] }
  0xf4   : > { %v1724_v10 = vrot.slane %v1723_v4, 4  ;;  %v1730_v11 = vsel %vm1274_vm3, %v889_v2, -inf  ;;  %v1738_v12 = vrot.slane %v1737_v5, 4  ;;  %v1744_v13 = vsel %vm1274_vm3, %v890_v3, -inf }
  0xf5   : > { %v1280_v14 = vrot.slane %v1279_v6, 1  ;;  %v1286_v15 = vmax.f32 %v1284_v63, %v1285_v7  ;;  %v1293_v16 = vmax.f32 %v1291_v0, %v1292_v8  ;;  %v1299_v17 = vrot.slane %v1298_v9, 2 }
  0xf6   : > { %v1725_v18 = vmax.f32 %v1723_v4, %v1724_v10  ;;  %v1731_v19 = vrot.slane %v1730_v11, 4  ;;  %v1739_v20 = vmax.f32 %v1737_v5, %v1738_v12  ;;  %v1745_v21 = vrot.slane %v1744_v13, 4 }
  0xf7   : > { %v1281_v22 = vmax.f32 %v1279_v6, %v1280_v14  ;;  %v1287_v23 = vrot.slane %v1286_v15, 1  ;;  %v1294_v24 = vrot.slane %v1293_v16, 1  ;;  %v1300_v25 = vmax.f32 %v1298_v9, %v1299_v17 }
  0xf8   : > { %v1726_v28 = vrot.slane %v1725_v18, 2  ;;  %v1732_v29 = vmax.f32 %v1730_v11, %v1731_v19  ;;  %v1740_v30 = vrot.slane %v1739_v20, 2  ;;  %v1746_v31 = vmax.f32 %v1744_v13, %v1745_v21 }
  0xf9   : > { %v1288_v32 = vmax.f32 %v1286_v15, %v1287_v23  ;;  %v1295_v36 = vmax.f32 %v1293_v16, %v1294_v24  ;;  %v1301_v37 = vrot.slane %v1300_v25, 1  ;;  %v2172_v38 = vsel %vm2171_vm4, %v1281_v22, -inf }
  0xfa   : > { %v2174_v41 = vmax.f32 %v2172_v38, %v3543_v26  ;;  %v1727_v44 = vmax.f32 %v1725_v18, %v1726_v28  ;;  %v1733_v45 = vrot.slane %v1732_v29, 2  ;;  %v1741_v46 = vmax.f32 %v1739_v20, %v1740_v30  ;;  %v3606_v26 = vld [vmem:[%s4493_s3] ss:$0 sm:$0xff] }
  0xfb   : > { %v1302_v50 = vmax.f32 %v1300_v25, %v1301_v37  ;;  %v2175_v52 = vsel %vm2171_vm4, %v1288_v32, -inf  ;;  %v2178_v53 = vsel %vm2171_vm4, %v1295_v36, -inf  ;;  %v1747_v34 = vrot.slane %v1746_v31, 2 }
  0xfc   : > { %v2177_v42 = vmax.f32 %v2175_v52, %v3546_v33  ;;  %v2180_v54 = vmax.f32 %v2178_v53, %v3549_v35  ;;  %v2371_v55 = vadd.f32 %v3594_v39, %v2174_v41  ;;  %v1728_v56 = vrot.slane %v1727_v44, 1 }
  0xfd   : > { %v2181_v57 = vsel %vm2171_vm4, %v1302_v50, -inf  ;;  %v1734_v58 = vmax.f32 %v1732_v29, %v1733_v45  ;;  %v1742_v59 = vrot.slane %v1741_v46, 1  ;;  %v1748_v62 = vmax.f32 %v1746_v31, %v1747_v34 }
  0xfe   : > { %v2183_v63 = vmax.f32 %v2181_v57, %v3557_v43  ;;  %v2372_v0 = vadd.f32 %v3594_v39, %v2177_v42  ;;  %v2373_v33 = vadd.f32 %v3594_v39, %v2180_v54  ;;  %v2435_v35 = vmax.f32 %v2371_v55, 0.0 }
  0xff   : > { %v1729_v2 = vmax.f32 %v1727_v44, %v1728_v56  ;;  %v1735_v3 = vrot.slane %v1734_v58, 1  ;;  %v1743_v4 = vmax.f32 %v1741_v46, %v1742_v59  ;;  %v1749_v5 = vrot.slane %v1748_v62, 1 }
 0x100   : > { %v2374_v6 = vadd.f32 %v3594_v39, %v2183_v63  ;;  %v2436_v7 = vmax.f32 %v2372_v0, 0.0  ;;  %v2437_v8 = vmax.f32 %v2373_v33, 0.0  ;;  %v2506_v43 = vmul.f32 %v3606_v26, %v2435_v35 }
 0x101   : > { %v1736_v9 = vmax.f32 %v1734_v58, %v1735_v3  ;;  %v1750_v10 = vmax.f32 %v1748_v62, %v1749_v5  ;;  %v2268_v11 = vsel %vm2171_vm4, %v1729_v2, -inf  ;;  %v2274_v12 = vsel %vm2171_vm4, %v1743_v4, -inf }
 0x102   : > { %v2438_v13 = vmax.f32 %v2374_v6, 0.0  ;;  %v2507_v14 = vmul.f32 %v3606_v26, %v2436_v7  ;;  %v2508_v15 = vmul.f32 %v3606_v26, %v2437_v8  ;;  %v2577_v16 = vadd.f32 %v3614_v1, %v2506_v43 }
 0x103   : > { %v2270_v17 = vmax.f32 %v2268_v11, %v3554_v40  ;;  %v2271_v18 = vsel %vm2171_vm4, %v1736_v9, -inf  ;;  %v2276_v19 = vmax.f32 %v2274_v12, %v3568_v48  ;;  %v2277_v20 = vsel %vm2171_vm4, %v1750_v10, -inf  ;;  %v3379_v10 = vpop.f32.mrf.mxu1 }
 0x104   : > { %v2509_v21 = vmul.f32 %v3606_v26, %v2438_v13  ;;  %v2578_v22 = vadd.f32 %v3614_v1, %v2507_v14  ;;  %v2579_v23 = vadd.f32 %v3614_v1, %v2508_v15  ;;  %v3274_v24 = vpack.c.bf16 %v2577_v16, %v2577_v16 }
 0x105   : > { %v2273_v25 = vmax.f32 %v2271_v18, %v3565_v47  ;;  %v2279_v28 = vmax.f32 %v2277_v20, %v3571_v49  ;;  %v2403_v29 = vadd.f32 %v3594_v39, %v2270_v17  ;;  %v2405_v40 = vadd.f32 %v3594_v39, %v2276_v19 }
 0x106   : > { %v2580_v30 = vadd.f32 %v3614_v1, %v2509_v21  ;;  %v3275_v48 = vpack.c.bf16 %v2578_v22, %v2578_v22  ;;  %v3276_v31 = vpack.c.bf16 %v2579_v23, %v2579_v23  ;;  %v2897_v32 = vunpack.c.l.b16 %v3274_v24  ;;  %v446_v22 = vpop.f32.mrf.mxu0 }
 0x107   : > { %v2404_v36 = vadd.f32 %v3594_v39, %v2273_v25  ;;  %v2406_v37 = vadd.f32 %v3594_v39, %v2279_v28  ;;  %v2467_v38 = vmax.f32 %v2403_v29, 0.0  ;;  %v2469_v41 = vmax.f32 %v2405_v40, 0.0 }
 0x108   : > { %v3277_v44 = vpack.c.bf16 %v2580_v30, %v2580_v30  ;;  %v2898_v45 = vunpack.c.l.b16 %v3275_v48  ;;  %v2899_v47 = vunpack.c.l.b16 %v3276_v31  ;;  %v667_v49 = vrot.slane %v653_v60, %v3524_v27 }
 0x109   : > { %v2468_v46 = vmax.f32 %v2404_v36, 0.0  ;;  %v2470_v50 = vmax.f32 %v2406_v37, 0.0  ;;  %v2538_v52 = vmul.f32 %v3606_v26, %v2467_v38  ;;  %v2540_v53 = vmul.f32 %v3606_v26, %v2469_v41 }
 0x10a   : > { %v3643_v34 = vunpack.c.l.b16 %v3277_v44  ;;  %v2961_v42 = vrot.slane %v2898_v45, 7  ;;  %v2964_v54 = vrot.slane %v2899_v47, 6  ;;  %v668_v55 = vcombine.high %v3584_v61, %v3584_v61 }
 0x10b   : > { %v2539_v56 = vmul.f32 %v3606_v26, %v2468_v46  ;;  %v2541_v57 = vmul.f32 %v3606_v26, %v2470_v50  ;;  %v2609_v51 = vadd.f32 %v3614_v1, %v2538_v52  ;;  %v2611_v60 = vadd.f32 %v3614_v1, %v2540_v53 }
 0x10c   : > { %v2963_v58 = vsel %vm2962_vm5, %v2961_v42, %v2897_v32  ;;  %v2967_v59 = vrot.slane %v3643_v34, 5  ;;  %v669_v62 = vcombine.high %v667_v49, %v667_v49  ;;  %v1359_v63 = vsel %vm1274_vm3, %v3584_v61, -inf }
 0x10d   : > { %v3656_v0 = vsel %vm2965_vm6, %v2964_v54, %v2963_v58  ;;  %v2610_v33 = vadd.f32 %v3614_v1, %v2539_v56  ;;  %v2612_v35 = vadd.f32 %v3614_v1, %v2541_v57  ;;  %v3306_v2 = vpack.c.bf16 %v2609_v51, %v2609_v51 }
 0x10e   : > { %v3308_v3 = vpack.c.bf16 %v2611_v60, %v2611_v60  ;;  %v1360_v4 = vrot.slane %v1359_v63, 4  ;;  %v1366_v5 = vsel %vm1274_vm3, %v668_v55, -inf  ;;  %v1373_v6 = vsel %vm1274_vm3, %v667_v49, -inf }
 0x10f   : > { %v3307_v7 = vpack.c.bf16 %v2610_v33, %v2610_v33  ;;  %v3309_v8 = vpack.c.bf16 %v2612_v35, %v2612_v35  ;;  %v2929_v43 = vunpack.c.l.b16 %v3306_v2  ;;  %v1367_v9 = vrot.slane %v1366_v5, 4 }
 0x110   : > { %v2931_v61 = vunpack.c.l.b16 %v3308_v3  ;;  %v1361_v11 = vmax.f32 %v1359_v63, %v1360_v4  ;;  %v1374_v12 = vrot.slane %v1373_v6, 4  ;;  %v1380_v13 = vsel %vm1274_vm3, %v669_v62, -inf }
 0x111   : > { %v2930_v14 = vunpack.c.l.b16 %v3307_v7  ;;  %v3663_v15 = vunpack.c.l.b16 %v3309_v8  ;;  %v1368_v16 = vmax.f32 %v1366_v5, %v1367_v9  ;;  %v1381_v17 = vrot.slane %v1380_v13, 4 }
 0x112   : > { %v3026_v18 = vrot.slane %v2931_v61, 6  ;;  %v1362_v19 = vrot.slane %v1361_v11, 2  ;;  %v1375_v20 = vmax.f32 %v1373_v6, %v1374_v12  ;;  %v925_v21 = vcombine.high %v3379_v10, %v3379_v10 }
 0x113   : > { %v3024_v23 = vrot.slane %v2930_v14, 7  ;;  %v3028_v24 = vrot.slane %v3663_v15, 5  ;;  %v1369_v25 = vrot.slane %v1368_v16, 2  ;;  %v1382_v28 = vmax.f32 %v1380_v13, %v1381_v17 }
 0x114   : > { %v1363_v29 = vmax.f32 %v1361_v11, %v1362_v19  ;;  %v1376_v40 = vrot.slane %v1375_v20, 2  ;;  %v932_v30 = vrot.slane %v3379_v10, %v3524_v27  ;;  %v939_v48 = vrot.slane %v925_v21, %v3524_v27 }
 0x115   : > { %v3025_v31 = vsel %vm2962_vm5, %v3024_v23, %v2929_v43  ;;  %v1370_v32 = vmax.f32 %v1368_v16, %v1369_v25  ;;  %v1383_v36 = vrot.slane %v1382_v28, 2  ;;  %v619_v37 = vcombine.high %v446_v22, %v446_v22 }
 0x116   : > { %v3670_v38 = vsel %vm2965_vm6, %v3026_v18, %v3025_v31  ;;  %v1364_v41 = vrot.slane %v1363_v29, 1  ;;  %v1377_v44 = vmax.f32 %v1375_v20, %v1376_v40  ;;  %v940_v45 = vcombine.high %v932_v30, %v932_v30 }
 0x117   : > { %v1371_v47 = vrot.slane %v1370_v32, 1  ;;  %v1384_v49 = vmax.f32 %v1382_v28, %v1383_v36  ;;  %v941_v46 = vcombine.high %v939_v48, %v939_v48  ;;  %v1807_v50 = vsel %vm1274_vm3, %v932_v30, -inf  ;;  %v510_v36 = vpop.f32.mrf.mxu1 }
 0x118   : > { %v1365_v52 = vmax.f32 %v1363_v29, %v1364_v41  ;;  %v1378_v53 = vrot.slane %v1377_v44, 1  ;;  %v1808_v42 = vrot.slane %v1807_v50, 4  ;;  %v1814_v54 = vsel %vm1274_vm3, %v940_v45, -inf }
 0x119   : > { %v1372_v55 = vmax.f32 %v1370_v32, %v1371_v47  ;;  %v1385_v56 = vrot.slane %v1384_v49, 1  ;;  %v1815_v57 = vrot.slane %v1814_v54, 4  ;;  %v1821_v51 = vsel %vm1274_vm3, %v939_v48, -inf }
 0x11a   : > { %v1379_v60 = vmax.f32 %v1377_v44, %v1378_v53  ;;  %v3676_v58 = vsel %vm2171_vm4, %v1365_v52, -inf  ;;  %v1809_v62 = vmax.f32 %v1807_v50, %v1808_v42  ;;  %v1822_v63 = vrot.slane %v1821_v51, 4 }
 0x11b   : > { %v1386_v33 = vmax.f32 %v1384_v49, %v1385_v56  ;;  %v3679_v35 = vsel %vm2171_vm4, %v1372_v55, -inf  ;;  %v1816_v2 = vmax.f32 %v1814_v54, %v1815_v57  ;;  %v1828_v3 = vsel %vm1274_vm3, %v941_v46, -inf }
 0x11c   : > { %v3683_v4 = vsel %vm2171_vm4, %v1379_v60, -inf  ;;  %v1810_v5 = vrot.slane %v1809_v62, 2  ;;  %v1823_v6 = vmax.f32 %v1821_v51, %v1822_v63  ;;  %v1829_v7 = vrot.slane %v1828_v3, 4 }
 0x11d   : > { %v3686_v8 = vsel %vm2171_vm4, %v1386_v33, -inf  ;;  %v1817_v43 = vrot.slane %v1816_v2, 2  ;;  %v626_v9 = vrot.slane %v446_v22, %v3524_v27  ;;  %v633_v10 = vrot.slane %v619_v37, %v3524_v27 }
 0x11e   : > { %v1811_v61 = vmax.f32 %v1809_v62, %v1810_v5  ;;  %v1824_v11 = vrot.slane %v1823_v6, 2  ;;  %v1830_v12 = vmax.f32 %v1828_v3, %v1829_v7  ;;  %v3694_v13 = vsel %vm2968_vm7, %v2967_v59, %v3656_v0 }
 0x11f   : > { %v1818_v14 = vmax.f32 %v1816_v2, %v1817_v43  ;;  %v634_v16 = vcombine.high %v626_v9, %v626_v9  ;;  %v635_v17 = vcombine.high %v633_v10, %v633_v10  ;;  %v1303_v18 = vsel %vm1274_vm3, %v626_v9, -inf }
 0x120   : > { %v1812_v19 = vrot.slane %v1811_v61, 1  ;;  %v1825_v20 = vmax.f32 %v1823_v6, %v1824_v11  ;;  %v1831_v21 = vrot.slane %v1830_v12, 2  ;;  %v1304_v22 = vrot.slane %v1303_v18, 4 }
 0x121   : > { %v1819_v23 = vrot.slane %v1818_v14, 1  ;;  %v1310_v25 = vsel %vm1274_vm3, %v634_v16, -inf  ;;  %v1317_v28 = vsel %vm1274_vm3, %v633_v10, -inf  ;;  %v1324_v29 = vsel %vm1274_vm3, %v635_v17, -inf }
 0x122   : > { %v1813_v34 = vmax.f32 %v1811_v61, %v1812_v19  ;;  %v1826_v40 = vrot.slane %v1825_v20, 1  ;;  %v1832_v59 = vmax.f32 %v1830_v12, %v1831_v21  ;;  %v1305_v0 = vmax.f32 %v1303_v18, %v1304_v22 }
 0x123   : > { %v1820_v30 = vmax.f32 %v1818_v14, %v1819_v23  ;;  %v1311_v48 = vrot.slane %v1310_v25, 4  ;;  %v1318_v31 = vrot.slane %v1317_v28, 4  ;;  %v1325_v32 = vrot.slane %v1324_v29, 4 }
 0x124   : > { %v1827_v37 = vmax.f32 %v1825_v20, %v1826_v40  ;;  %v1833_v41 = vrot.slane %v1832_v59, 1  ;;  %v3701_v44 = vsel %vm2171_vm4, %v1813_v34, -inf  ;;  %v1306_v45 = vrot.slane %v1305_v0, 2 }
 0x125   : > { %v3704_v47 = vsel %vm2171_vm4, %v1820_v30, -inf  ;;  %v1312_v49 = vmax.f32 %v1310_v25, %v1311_v48  ;;  %v1319_v46 = vmax.f32 %v1317_v28, %v1318_v31  ;;  %v1326_v50 = vmax.f32 %v1324_v29, %v1325_v32 }
 0x126   : > { %v1834_v52 = vmax.f32 %v1832_v59, %v1833_v41  ;;  %v3707_v53 = vsel %vm2171_vm4, %v1827_v37, -inf  ;;  %v1307_v42 = vmax.f32 %v1305_v0, %v1306_v45  ;;  %v891_v54 = vcombine.high %v510_v36, %v510_v36 }
 0x127   : > { %v1313_v55 = vrot.slane %v1312_v49, 2  ;;  %v1320_v56 = vrot.slane %v1319_v46, 2  ;;  %v1327_v57 = vrot.slane %v1326_v50, 2  ;;  %v898_v51 = vrot.slane %v510_v36, %v3524_v27 }
 0x128   : > { %v3711_v60 = vsel %vm2171_vm4, %v1834_v52, -inf  ;;  %v1308_v62 = vrot.slane %v1307_v42, 1  ;;  %v905_v63 = vrot.slane %v891_v54, %v3524_v27  ;;  %v3718_v33 = vsel %vm2968_vm7, %v3028_v24, %v3670_v38 }
 0x129   : > { %v1314_v2 = vmax.f32 %v1312_v49, %v1313_v55  ;;  %v1321_v3 = vmax.f32 %v1319_v46, %v1320_v56  ;;  %v1328_v5 = vmax.f32 %v1326_v50, %v1327_v57  ;;  %v906_v6 = vcombine.high %v898_v51, %v898_v51 }
 0x12a   : > { %v1309_v7 = vmax.f32 %v1307_v42, %v1308_v62  ;;  %v907_v43 = vcombine.high %v905_v63, %v905_v63  ;;  %v1751_v9 = vsel %vm1274_vm3, %v898_v51, -inf  ;;  %v1765_v10 = vsel %vm1274_vm3, %v905_v63, -inf }
 0x12b   : > { %v1315_v61 = vrot.slane %v1314_v2, 1  ;;  %v1322_v11 = vrot.slane %v1321_v3, 1  ;;  %v1329_v12 = vrot.slane %v1328_v5, 1  ;;  %v1752_v14 = vrot.slane %v1751_v9, 4 }
 0x12c   : > { %v2184_v16 = vsel %vm2171_vm4, %v1309_v7, -inf  ;;  %v1758_v15 = vsel %vm1274_vm3, %v906_v6, -inf  ;;  %v1766_v24 = vrot.slane %v1765_v10, 4  ;;  %v1772_v38 = vsel %vm1274_vm3, %v907_v43, -inf }
 0x12d   : > { %v1316_v17 = vmax.f32 %v1314_v2, %v1315_v61  ;;  %v1323_v18 = vmax.f32 %v1321_v3, %v1322_v11  ;;  %v1330_v19 = vmax.f32 %v1328_v5, %v1329_v12  ;;  %v2186_v20 = vmax.f32 %v2184_v16, %v3676_v58 }
 0x12e   : > { %v1753_v21 = vmax.f32 %v1751_v9, %v1752_v14  ;;  %v1759_v22 = vrot.slane %v1758_v15, 4  ;;  %v1767_v23 = vmax.f32 %v1765_v10, %v1766_v24  ;;  %v1773_v25 = vrot.slane %v1772_v38, 4 }
 0x12f   : > { %v2187_v28 = vsel %vm2171_vm4, %v1316_v17, -inf  ;;  %v2190_v29 = vsel %vm2171_vm4, %v1323_v18, -inf  ;;  %v2193_v34 = vsel %vm2171_vm4, %v1330_v19, -inf  ;;  %v2375_v40 = vadd.f32 %v3594_v39, %v2186_v20 }
 0x130   : > { %v2189_v59 = vmax.f32 %v2187_v28, %v3679_v35  ;;  %v2192_v0 = vmax.f32 %v2190_v29, %v3683_v4  ;;  %v2195_v30 = vmax.f32 %v2193_v34, %v3686_v8  ;;  %v1754_v48 = vrot.slane %v1753_v21, 2 }
 0x131   : > { %v2439_v58 = vmax.f32 %v2375_v40, 0.0  ;;  %v1760_v31 = vmax.f32 %v1758_v15, %v1759_v22  ;;  %v1768_v32 = vrot.slane %v1767_v23, 2  ;;  %v1774_v36 = vmax.f32 %v1772_v38, %v1773_v25 }
 0x132   : > { %v2376_v37 = vadd.f32 %v3594_v39, %v2189_v59  ;;  %v2377_v41 = vadd.f32 %v3594_v39, %v2192_v0  ;;  %v2378_v45 = vadd.f32 %v3594_v39, %v2195_v30  ;;  %v1755_v49 = vmax.f32 %v1753_v21, %v1754_v48  ;;  %v3756_v30 = vpop.f32.mrf.mxu1 }
 0x133   : > { %v2510_v46 = vmul.f32 %v3606_v26, %v2439_v58  ;;  %v1761_v35 = vrot.slane %v1760_v31, 2  ;;  %v1769_v50 = vmax.f32 %v1767_v23, %v1768_v32  ;;  %v1775_v4 = vrot.slane %v1774_v36, 2 }
 0x134   : > { %v2440_v52 = vmax.f32 %v2376_v37, 0.0  ;;  %v2441_v8 = vmax.f32 %v2377_v41, 0.0  ;;  %v2442_v42 = vmax.f32 %v2378_v45, 0.0  ;;  %v1756_v54 = vrot.slane %v1755_v49, 1 }
 0x135   : > { %v2581_v55 = vadd.f32 %v3614_v1, %v2510_v46  ;;  %v1762_v56 = vmax.f32 %v1760_v31, %v1761_v35  ;;  %v1770_v57 = vrot.slane %v1769_v50, 1  ;;  %v1776_v51 = vmax.f32 %v1774_v36, %v1775_v4 }
 0x136   : > { %v2511_v62 = vmul.f32 %v3606_v26, %v2440_v52  ;;  %v2512_v63 = vmul.f32 %v3606_v26, %v2441_v8  ;;  %v2513_v2 = vmul.f32 %v3606_v26, %v2442_v42  ;;  %v1757_v3 = vmax.f32 %v1755_v49, %v1756_v54 }
 0x137   : > { %v3278_v5 = vpack.c.bf16 %v2581_v55, %v2581_v55  ;;  %v1763_v6 = vrot.slane %v1762_v56, 1  ;;  %v1771_v7 = vmax.f32 %v1769_v50, %v1770_v57  ;;  %v1777_v43 = vrot.slane %v1776_v51, 1 }
 0x138   : > { %v2582_v9 = vadd.f32 %v3614_v1, %v2511_v62  ;;  %v2583_v10 = vadd.f32 %v3614_v1, %v2512_v63  ;;  %v2584_v61 = vadd.f32 %v3614_v1, %v2513_v2  ;;  %v2280_v11 = vsel %vm2171_vm4, %v1757_v3, -inf }
 0x139   : > { %v2901_v12 = vunpack.c.l.b16 %v3278_v5  ;;  %v1764_v14 = vmax.f32 %v1762_v56, %v1763_v6  ;;  %v1778_v16 = vmax.f32 %v1776_v51, %v1777_v43  ;;  %v2282_v15 = vmax.f32 %v2280_v11, %v3701_v44  ;;  %v3366_v44 = vpop.f32.mrf.mxu0 }
 0x13a   : > { %v3279_v24 = vpack.c.bf16 %v2582_v9, %v2582_v9  ;;  %v3280_v38 = vpack.c.bf16 %v2583_v10, %v2583_v10  ;;  %v3281_v17 = vpack.c.bf16 %v2584_v61, %v2584_v61  ;;  %v2286_v18 = vsel %vm2171_vm4, %v1771_v7, -inf }
 0x13b   : > { %v2970_v19 = vrot.slane %v2901_v12, 4  ;;  %v2283_v20 = vsel %vm2171_vm4, %v1764_v14, -inf  ;;  %v2288_v21 = vmax.f32 %v2286_v18, %v3707_v53  ;;  %v2289_v22 = vsel %vm2171_vm4, %v1778_v16, -inf }
 0x13c   : > { %v2902_v23 = vunpack.c.l.b16 %v3279_v24  ;;  %v2903_v25 = vunpack.c.l.b16 %v3280_v38  ;;  %v2904_v28 = vunpack.c.l.b16 %v3281_v17  ;;  %v2285_v29 = vmax.f32 %v2283_v20, %v3704_v47 }
 0x13d   : > { %v2972_v34 = vsel %vm2971_vm8, %v2970_v19, %v3694_v13  ;;  %v2291_v40 = vmax.f32 %v2289_v22, %v3711_v60  ;;  %v2407_v59 = vadd.f32 %v3594_v39, %v2282_v15  ;;  %v2409_v0 = vadd.f32 %v3594_v39, %v2288_v21 }
 0x13e   : > { %v2973_v53 = vrot.slane %v2902_v23, 3  ;;  %v2976_v48 = vrot.slane %v2903_v25, 2  ;;  %v2979_v58 = vrot.slane %v2904_v28, 1  ;;  %v2408_v31 = vadd.f32 %v3594_v39, %v2285_v29 }
 0x13f   : > { %v2410_v47 = vadd.f32 %v3594_v39, %v2291_v40  ;;  %v2471_v32 = vmax.f32 %v2407_v59, 0.0  ;;  %v2473_v36 = vmax.f32 %v2409_v0, 0.0  ;;  %v704_v37 = vcombine.high %v3366_v44, %v3366_v44 }
 0x140   : > { %v2975_v13 = vsel %vm2974_vm9, %v2973_v53, %v2972_v34  ;;  %v2472_v60 = vmax.f32 %v2408_v31, 0.0  ;;  %v711_v41 = vrot.slane %v3366_v44, %v3524_v27  ;;  %v976_v45 = vcombine.high %v3756_v30, %v3756_v30 }
 0x141   : > { %v2978_v49 = vsel %vm2977_vm10, %v2976_v48, %v2975_v13  ;;  %v2474_v46 = vmax.f32 %v2410_v47, 0.0  ;;  %v2542_v35 = vmul.f32 %v3606_v26, %v2471_v32  ;;  %v2544_v50 = vmul.f32 %v3606_v26, %v2473_v36 }
 0x142   : > { %v2981_v4 = vsel %vm2980_vm11, %v2979_v58, %v2978_v49  ;;  %v2543_v52 = vmul.f32 %v3606_v26, %v2472_v60  ;;  %v718_v8 = vrot.slane %v704_v37, %v3524_v27  ;;  %v719_v42 = vcombine.high %v711_v41, %v711_v41 }
 0x143   : > { %v3080_v54 = vpack.c.b16 %v2981_v4, %v2981_v4  ;;  %v2545_v55 = vmul.f32 %v3606_v26, %v2474_v46  ;;  %v2613_v56 = vadd.f32 %v3614_v1, %v2542_v35  ;;  %v2615_v57 = vadd.f32 %v3614_v1, %v2544_v50 }
 0x144   : > { %v2614_v51 = vadd.f32 %v3614_v1, %v2543_v52  ;;  %v720_v62 = vcombine.high %v718_v8, %v718_v8  ;;  %v1443_v63 = vsel %vm1274_vm3, %v711_v41, -inf  ;;  %v1450_v2 = vsel %vm1274_vm3, %v719_v42, -inf  ;;  %v459_v52 = vpop.f32.mrf.mxu0 }
 0x145   : > { %3097 = vst.msk [vmem:[%s3771_s12] sm:$0xf] %vm3096_vm12, %v3080_v54  ;;  %v2616_v3 = vadd.f32 %v3614_v1, %v2545_v55  ;;  %v3310_v5 = vpack.c.bf16 %v2613_v56, %v2613_v56  ;;  %v3312_v6 = vpack.c.bf16 %v2615_v57, %v2615_v57  ;;  %v1444_v7 = vrot.slane %v1443_v63, 4 }
 0x146   : > { %v3311_v43 = vpack.c.bf16 %v2614_v51, %v2614_v51  ;;  %v1451_v9 = vrot.slane %v1450_v2, 4  ;;  %v1457_v10 = vsel %vm1274_vm3, %v718_v8, -inf  ;;  %v1464_v61 = vsel %vm1274_vm3, %v720_v62, -inf }
 0x147   : > { %v3313_v11 = vpack.c.bf16 %v2616_v3, %v2616_v3  ;;  %v2933_v12 = vunpack.c.l.b16 %v3310_v5  ;;  %v2935_v14 = vunpack.c.l.b16 %v3312_v6  ;;  %v1445_v16 = vmax.f32 %v1443_v63, %v1444_v7  ;;  %v523_v5 = vpop.f32.mrf.mxu1 }
 0x148   : > { %v2934_v15 = vunpack.c.l.b16 %v3311_v43  ;;  %v1452_v24 = vmax.f32 %v1450_v2, %v1451_v9  ;;  %v1458_v38 = vrot.slane %v1457_v10, 4  ;;  %v1465_v17 = vrot.slane %v1464_v61, 4 }
 0x149   : > { %v2936_v18 = vunpack.c.l.b16 %v3313_v11  ;;  %v3030_v19 = vrot.slane %v2933_v12, 4  ;;  %v3034_v20 = vrot.slane %v2935_v14, 2  ;;  %v1446_v21 = vrot.slane %v1445_v16, 2 }
 0x14a   : > { %v3032_v22 = vrot.slane %v2934_v15, 3  ;;  %v1453_v23 = vrot.slane %v1452_v24, 2  ;;  %v1459_v25 = vmax.f32 %v1457_v10, %v1458_v38  ;;  %v1466_v28 = vmax.f32 %v1464_v61, %v1465_v17 }
 0x14b   : > { %v3031_v29 = vsel %vm2971_vm8, %v3030_v19, %v3718_v33  ;;  %v3036_v44 = vrot.slane %v2936_v18, 1  ;;  %v1447_v34 = vmax.f32 %v1445_v16, %v1446_v21  ;;  %v983_v40 = vrot.slane %v3756_v30, %v3524_v27 }
 0x14c   : > { %v3033_v59 = vsel %vm2974_vm9, %v3032_v22, %v3031_v29  ;;  %v1454_v0 = vmax.f32 %v1452_v24, %v1453_v23  ;;  %v1460_v53 = vrot.slane %v1459_v25, 2  ;;  %v1467_v48 = vrot.slane %v1466_v28, 2 }
 0x14d   : > { %v3035_v58 = vsel %vm2977_vm10, %v3034_v20, %v3033_v59  ;;  %v1448_v31 = vrot.slane %v1447_v34, 1  ;;  %v990_v47 = vrot.slane %v976_v45, %v3524_v27  ;;  %v991_v32 = vcombine.high %v983_v40, %v983_v40 }
 0x14e   : > { %v3037_v36 = vsel %vm2980_vm11, %v3036_v44, %v3035_v58  ;;  %v1455_v33 = vrot.slane %v1454_v0, 1  ;;  %v1461_v37 = vmax.f32 %v1459_v25, %v1460_v53  ;;  %v1468_v13 = vmax.f32 %v1466_v28, %v1467_v48 }
 0x14f   : > { %v3084_v60 = vpack.c.b16 %v3037_v36, %v3037_v36  ;;  %v1449_v41 = vmax.f32 %v1447_v34, %v1448_v31  ;;  %v992_v30 = vcombine.high %v990_v47, %v990_v47  ;;  %v1891_v49 = vsel %vm1274_vm3, %v983_v40, -inf }
 0x150   : > { %v1456_v46 = vmax.f32 %v1454_v0, %v1455_v33  ;;  %v1462_v35 = vrot.slane %v1461_v37, 1  ;;  %v1469_v50 = vrot.slane %v1468_v13, 1  ;;  %v1892_v4 = vrot.slane %v1891_v49, 4 }
 0x151   : > { %3101 = vst.msk [vmem:[%s3771_s12 + $0x10] sm:$0xf] %vm3096_vm12, %v3084_v60  ;;  %v3799_v45 = vsel %vm2171_vm4, %v1449_v41, -inf  ;;  %v1898_v8 = vsel %vm1274_vm3, %v991_v32, -inf  ;;  %v1905_v42 = vsel %vm1274_vm3, %v990_v47, -inf  ;;  %v1912_v54 = vsel %vm1274_vm3, %v992_v30, -inf }
 0x152   : > { %v1463_v55 = vmax.f32 %v1461_v37, %v1462_v35  ;;  %v1470_v56 = vmax.f32 %v1468_v13, %v1469_v50  ;;  %v3805_v57 = vsel %vm2171_vm4, %v1456_v46, -inf  ;;  %v1893_v51 = vmax.f32 %v1891_v49, %v1892_v4  ;;  %v3823_v50 = vpop.f32.mrf.mxu0 }
 0x153   : > { %v1899_v62 = vrot.slane %v1898_v8, 4  ;;  %v1906_v63 = vrot.slane %v1905_v42, 4  ;;  %v1913_v2 = vrot.slane %v1912_v54, 4  ;;  %v670_v3 = vcombine.high %v459_v52, %v459_v52 }
 0x154   : > { %v3808_v6 = vsel %vm2171_vm4, %v1463_v55, -inf  ;;  %v3811_v7 = vsel %vm2171_vm4, %v1470_v56, -inf  ;;  %v1894_v43 = vrot.slane %v1893_v51, 2  ;;  %v677_v9 = vrot.slane %v459_v52, %v3524_v27 }
 0x155   : > { %v1900_v10 = vmax.f32 %v1898_v8, %v1899_v62  ;;  %v1907_v61 = vmax.f32 %v1905_v42, %v1906_v63  ;;  %v1914_v11 = vmax.f32 %v1912_v54, %v1913_v2  ;;  %v684_v12 = vrot.slane %v670_v3, %v3524_v27 }
 0x156   : > { %v1895_v14 = vmax.f32 %v1893_v51, %v1894_v43  ;;  %v685_v16 = vcombine.high %v677_v9, %v677_v9  ;;  %v1387_v15 = vsel %vm1274_vm3, %v677_v9, -inf  ;;  %v942_v24 = vcombine.high %v523_v5, %v523_v5 }
 0x157   : > { %v1901_v38 = vrot.slane %v1900_v10, 2  ;;  %v1908_v17 = vrot.slane %v1907_v61, 2  ;;  %v1915_v18 = vrot.slane %v1914_v11, 2  ;;  %v686_v19 = vcombine.high %v684_v12, %v684_v12 }
 0x158   : > { %v1896_v20 = vrot.slane %v1895_v14, 1  ;;  %v1388_v21 = vrot.slane %v1387_v15, 4  ;;  %v1394_v22 = vsel %vm1274_vm3, %v685_v16, -inf  ;;  %v1401_v23 = vsel %vm1274_vm3, %v684_v12, -inf }
 0x159   : > { %v1902_v25 = vmax.f32 %v1900_v10, %v1901_v38  ;;  %v1909_v28 = vmax.f32 %v1907_v61, %v1908_v17  ;;  %v1916_v29 = vmax.f32 %v1914_v11, %v1915_v18  ;;  %v1395_v44 = vrot.slane %v1394_v22, 4 }
 0x15a   : > { %v1897_v34 = vmax.f32 %v1895_v14, %v1896_v20  ;;  %v1389_v40 = vmax.f32 %v1387_v15, %v1388_v21  ;;  %v1402_v59 = vrot.slane %v1401_v23, 4  ;;  %v1408_v0 = vsel %vm1274_vm3, %v686_v19, -inf }
 0x15b   : > { %v1903_v53 = vrot.slane %v1902_v25, 1  ;;  %v1910_v48 = vrot.slane %v1909_v28, 1  ;;  %v1917_v58 = vrot.slane %v1916_v29, 1  ;;  %v1396_v31 = vmax.f32 %v1394_v22, %v1395_v44 }
 0x15c   : > { %v3820_v47 = vsel %vm2171_vm4, %v1897_v34, -inf  ;;  %v1390_v32 = vrot.slane %v1389_v40, 2  ;;  %v1403_v36 = vmax.f32 %v1401_v23, %v1402_v59  ;;  %v1409_v33 = vrot.slane %v1408_v0, 4 }
 0x15d   : > { %v1904_v37 = vmax.f32 %v1902_v25, %v1903_v53  ;;  %v1911_v13 = vmax.f32 %v1909_v28, %v1910_v48  ;;  %v1918_v60 = vmax.f32 %v1916_v29, %v1917_v58  ;;  %v1397_v41 = vrot.slane %v1396_v31, 2 }
 0x15e   : > { %v1391_v30 = vmax.f32 %v1389_v40, %v1390_v32  ;;  %v1404_v49 = vrot.slane %v1403_v36, 2  ;;  %v1410_v46 = vmax.f32 %v1408_v0, %v1409_v33  ;;  %v949_v35 = vrot.slane %v523_v5, %v3524_v27 }
 0x15f   : > { %v3826_v4 = vsel %vm2171_vm4, %v1904_v37, -inf  ;;  %v3829_v52 = vsel %vm2171_vm4, %v1911_v13, -inf  ;;  %v3832_v8 = vsel %vm2171_vm4, %v1918_v60, -inf  ;;  %v1398_v42 = vmax.f32 %v1396_v31, %v1397_v41 }
 0x160   : > { %v1392_v54 = vrot.slane %v1391_v30, 1  ;;  %v1405_v55 = vmax.f32 %v1403_v36, %v1404_v49  ;;  %v1411_v56 = vrot.slane %v1410_v46, 2  ;;  %v956_v51 = vrot.slane %v942_v24, %v3524_v27 }
 0x161   : > { %v1399_v62 = vrot.slane %v1398_v42, 1  ;;  %v957_v63 = vcombine.high %v949_v35, %v949_v35  ;;  %v1835_v2 = vsel %vm1274_vm3, %v949_v35, -inf  ;;  %v721_v3 = vcombine.high %v3823_v50, %v3823_v50 }
 0x162   : > { %v1393_v5 = vmax.f32 %v1391_v30, %v1392_v54  ;;  %v1406_v43 = vrot.slane %v1405_v55, 1  ;;  %v1412_v9 = vmax.f32 %v1410_v46, %v1411_v56  ;;  %v958_v10 = vcombine.high %v956_v51, %v956_v51 }
 0x163   : > { %v1400_v61 = vmax.f32 %v1398_v42, %v1399_v62  ;;  %v1836_v11 = vrot.slane %v1835_v2, 4  ;;  %v1842_v12 = vsel %vm1274_vm3, %v957_v63, -inf  ;;  %v1849_v14 = vsel %vm1274_vm3, %v956_v51, -inf }
 0x164   : > { %v1407_v16 = vmax.f32 %v1405_v55, %v1406_v43  ;;  %v1413_v15 = vrot.slane %v1412_v9, 1  ;;  %v2196_v24 = vsel %vm2171_vm4, %v1393_v5, -inf  ;;  %v1843_v38 = vrot.slane %v1842_v12, 4 }
 0x165   : > { %v2198_v17 = vmax.f32 %v2196_v24, %v3799_v45  ;;  %v2199_v18 = vsel %vm2171_vm4, %v1400_v61, -inf  ;;  %v1837_v19 = vmax.f32 %v1835_v2, %v1836_v11  ;;  %v1850_v20 = vrot.slane %v1849_v14, 4 }
 0x166   : > { %v1414_v21 = vmax.f32 %v1412_v9, %v1413_v15  ;;  %v2201_v22 = vmax.f32 %v2199_v18, %v3805_v57  ;;  %v2202_v23 = vsel %vm2171_vm4, %v1407_v16, -inf  ;;  %v1844_v25 = vmax.f32 %v1842_v12, %v1843_v38 }
 0x167   : > { %v2204_v28 = vmax.f32 %v2202_v23, %v3808_v6  ;;  %v2379_v29 = vadd.f32 %v3594_v39, %v2198_v17  ;;  %v1838_v44 = vrot.slane %v1837_v19, 2  ;;  %v1851_v34 = vmax.f32 %v1849_v14, %v1850_v20 }
 0x168   : > { %v2205_v40 = vsel %vm2171_vm4, %v1414_v21, -inf  ;;  %v2380_v45 = vadd.f32 %v3594_v39, %v2201_v22  ;;  %v1845_v59 = vrot.slane %v1844_v25, 2  ;;  %v1856_v0 = vsel %vm1274_vm3, %v958_v10, -inf }
 0x169   : > { %v2207_v53 = vmax.f32 %v2205_v40, %v3811_v7  ;;  %v2381_v57 = vadd.f32 %v3594_v39, %v2204_v28  ;;  %v2443_v48 = vmax.f32 %v2379_v29, 0.0  ;;  %v1839_v58 = vmax.f32 %v1837_v19, %v1838_v44 }
 0x16a   : > { %v2444_v31 = vmax.f32 %v2380_v45, 0.0  ;;  %v1846_v32 = vmax.f32 %v1844_v25, %v1845_v59  ;;  %v1852_v6 = vrot.slane %v1851_v34, 2  ;;  %v1857_v36 = vrot.slane %v1856_v0, 4 }
 0x16b   : > { %v2382_v33 = vadd.f32 %v3594_v39, %v2207_v53  ;;  %v2445_v37 = vmax.f32 %v2381_v57, 0.0  ;;  %v2514_v13 = vmul.f32 %v3606_v26, %v2443_v48  ;;  %v1840_v60 = vrot.slane %v1839_v58, 1  ;;  %v3893_v57 = vld [vmem:[%s4493_s3] ss:$0 sm:$0xff] }
 0x16c   : > { %v2515_v41 = vmul.f32 %v3606_v26, %v2444_v31  ;;  %v1847_v30 = vrot.slane %v1846_v32, 1  ;;  %v1853_v49 = vmax.f32 %v1851_v34, %v1852_v6  ;;  %v1858_v46 = vmax.f32 %v1856_v0, %v1857_v36  ;;  %v3904_v36 = vld [vmem:[%s4494_s4] ss:$0 sm:$0xff] }
 0x16d   : > { %v2446_v7 = vmax.f32 %v2382_v33, 0.0  ;;  %v2516_v35 = vmul.f32 %v3606_v26, %v2445_v37  ;;  %v2585_v42 = vadd.f32 %v3614_v1, %v2514_v13  ;;  %v1841_v54 = vmax.f32 %v1839_v58, %v1840_v60 }
 0x16e   : > { %v2586_v55 = vadd.f32 %v3614_v1, %v2515_v41  ;;  %v1848_v56 = vmax.f32 %v1846_v32, %v1847_v30  ;;  %v1854_v51 = vrot.slane %v1853_v49, 1  ;;  %v1859_v62 = vrot.slane %v1858_v46, 2 }
 0x16f   : > { %v2517_v63 = vmul.f32 %v3606_v26, %v2446_v7  ;;  %v2587_v2 = vadd.f32 %v3614_v1, %v2516_v35  ;;  %v3282_v5 = vpack.c.bf16 %v2585_v42, %v2585_v42  ;;  %v2292_v43 = vsel %vm2171_vm4, %v1841_v54, -inf }
 0x170   : > { %v3283_v9 = vpack.c.bf16 %v2586_v55, %v2586_v55  ;;  %v1855_v10 = vmax.f32 %v1853_v49, %v1854_v51  ;;  %v1860_v61 = vmax.f32 %v1858_v46, %v1859_v62  ;;  %v2294_v11 = vmax.f32 %v2292_v43, %v3820_v47 }
 0x171   : > { %v2588_v12 = vadd.f32 %v3614_v1, %v2517_v63  ;;  %v3284_v14 = vpack.c.bf16 %v2587_v2, %v2587_v2  ;;  %v2905_v16 = vunpack.c.l.b16 %v3282_v5  ;;  %v2295_v15 = vsel %vm2171_vm4, %v1848_v56, -inf  ;;  %v3871_v1 = vld [vmem:[%s4492_s2] ss:$0 sm:$0xff]  ;;  %v3383_v63 = vpop.f32.mrf.mxu1 }
 0x172   : > { %v2906_v24 = vunpack.c.l.b16 %v3283_v9  ;;  %v1861_v38 = vrot.slane %v1860_v61, 1  ;;  %v2297_v26 = vmax.f32 %v2295_v15, %v3826_v4  ;;  %v2298_v17 = vsel %vm2171_vm4, %v1855_v10, -inf }
 0x173   : > { %v3285_v18 = vpack.c.bf16 %v2588_v12, %v2588_v12  ;;  %v2907_v19 = vunpack.c.l.b16 %v3284_v14  ;;  %v2300_v20 = vmax.f32 %v2298_v17, %v3829_v52  ;;  %v2411_v21 = vadd.f32 %v3594_v39, %v2294_v11 }
 0x174   : > { %v2982_v22 = vrot.slane %v2906_v24, 7  ;;  %v1862_v47 = vmax.f32 %v1860_v61, %v1861_v38  ;;  %v2412_v23 = vadd.f32 %v3871_v1, %v2297_v26  ;;  %v728_v4 = vrot.slane %v3823_v50, %v3524_v27 }
 0x175   : > { %v3876_v25 = vunpack.c.l.b16 %v3285_v18  ;;  %v2984_v28 = vrot.slane %v2907_v19, 6  ;;  %v2413_v29 = vadd.f32 %v3871_v1, %v2300_v20  ;;  %v2475_v52 = vmax.f32 %v2411_v21, 0.0 }
 0x176   : > { %v2983_v39 = vsel %vm2962_vm5, %v2982_v22, %v2905_v16  ;;  %v2301_v44 = vsel %vm2171_vm4, %v1862_v47, -inf  ;;  %v2476_v34 = vmax.f32 %v2412_v23, 0.0  ;;  %v735_v40 = vrot.slane %v721_v3, %v3524_v27 }
 0x177   : > { %v3886_v45 = vsel %vm2965_vm6, %v2984_v28, %v2983_v39  ;;  %v2986_v59 = vrot.slane %v3876_v25, 5  ;;  %v2303_v0 = vmax.f32 %v2301_v44, %v3832_v8  ;;  %v2477_v53 = vmax.f32 %v2413_v29, 0.0 }
 0x178   : > { %v2546_v48 = vmul.f32 %v3893_v57, %v2475_v52  ;;  %v2547_v58 = vmul.f32 %v3893_v57, %v2476_v34  ;;  %v736_v31 = vcombine.high %v728_v4, %v728_v4  ;;  %v737_v50 = vcombine.high %v735_v40, %v735_v40 }
 0x179   : > { %v2414_v3 = vadd.f32 %v3871_v1, %v2303_v0  ;;  %v2548_v32 = vmul.f32 %v3893_v57, %v2477_v53  ;;  %v1471_v6 = vsel %vm1274_vm3, %v728_v4, -inf  ;;  %v1485_v8 = vsel %vm1274_vm3, %v735_v40, -inf }
 0x17a   : > { %v2617_v33 = vadd.f32 %v3904_v36, %v2546_v48  ;;  %v2618_v37 = vadd.f32 %v3904_v36, %v2547_v58  ;;  %v1472_v13 = vrot.slane %v1471_v6, 4  ;;  %v1478_v60 = vsel %vm1274_vm3, %v736_v31, -inf }
 0x17b   : > { %v2478_v41 = vmax.f32 %v2414_v3, 0.0  ;;  %v2619_v30 = vadd.f32 %v3904_v36, %v2548_v32  ;;  %v1479_v49 = vrot.slane %v1478_v60, 4  ;;  %v1486_v46 = vrot.slane %v1485_v8, 4  ;;  %v462_v3 = vpop.f32.mrf.mxu0 }
 0x17c   : > { %v3314_v7 = vpack.c.bf16 %v2617_v33, %v2617_v33  ;;  %v3315_v35 = vpack.c.bf16 %v2618_v37, %v2618_v37  ;;  %v1473_v42 = vmax.f32 %v1471_v6, %v1472_v13  ;;  %v1492_v54 = vsel %vm1274_vm3, %v737_v50, -inf }
 0x17d   : > { %v2549_v55 = vmul.f32 %v3893_v57, %v2478_v41  ;;  %v3316_v56 = vpack.c.bf16 %v2619_v30, %v2619_v30  ;;  %v1480_v51 = vmax.f32 %v1478_v60, %v1479_v49  ;;  %v1487_v62 = vmax.f32 %v1485_v8, %v1486_v46 }
 0x17e   : > { %v2937_v2 = vunpack.c.l.b16 %v3314_v7  ;;  %v2938_v5 = vunpack.c.l.b16 %v3315_v35  ;;  %v1474_v43 = vrot.slane %v1473_v42, 2  ;;  %v1493_v9 = vrot.slane %v1492_v54, 4 }
 0x17f   : > { %v2620_v10 = vadd.f32 %v3904_v36, %v2549_v55  ;;  %v2939_v61 = vunpack.c.l.b16 %v3316_v56  ;;  %v1481_v11 = vrot.slane %v1480_v51, 2  ;;  %v1488_v12 = vrot.slane %v1487_v62, 2 }
 0x180   : > { %v3038_v14 = vrot.slane %v2938_v5, 7  ;;  %v1475_v16 = vmax.f32 %v1473_v42, %v1474_v43  ;;  %v1494_v15 = vmax.f32 %v1492_v54, %v1493_v9  ;;  %v993_v24 = vcombine.high %v3383_v63, %v3383_v63 }
 0x181   : > { %v3317_v38 = vpack.c.bf16 %v2620_v10, %v2620_v10  ;;  %v3040_v26 = vrot.slane %v2939_v61, 6  ;;  %v1482_v17 = vmax.f32 %v1480_v51, %v1481_v11  ;;  %v1489_v18 = vmax.f32 %v1487_v62, %v1488_v12 }
 0x182   : > { %v3039_v19 = vsel %vm2962_vm5, %v3038_v14, %v2937_v2  ;;  %v1476_v20 = vrot.slane %v1475_v16, 1  ;;  %v1495_v21 = vrot.slane %v1494_v15, 2  ;;  %v1000_v22 = vrot.slane %v3383_v63, %v3524_v27 }
 0x183   : > { %v3915_v47 = vunpack.c.l.b16 %v3317_v38  ;;  %v3918_v23 = vsel %vm2965_vm6, %v3040_v26, %v3039_v19  ;;  %v1483_v4 = vrot.slane %v1482_v17, 1  ;;  %v1490_v28 = vrot.slane %v1489_v18, 1 }
 0x184   : > { %v1477_v29 = vmax.f32 %v1475_v16, %v1476_v20  ;;  %v1496_v52 = vmax.f32 %v1494_v15, %v1495_v21  ;;  %v1007_v39 = vrot.slane %v993_v24, %v3524_v27  ;;  %v1008_v44 = vcombine.high %v1000_v22, %v1000_v22 }
 0x185   : > { %v3042_v34 = vrot.slane %v3915_v47, 5  ;;  %v1484_v40 = vmax.f32 %v1482_v17, %v1483_v4  ;;  %v1491_v0 = vmax.f32 %v1489_v18, %v1490_v28  ;;  %v1919_v53 = vsel %vm1274_vm3, %v1000_v22, -inf  ;;  %v526_v28 = vpop.f32.mrf.mxu1 }
 0x186   : > { %v1497_v48 = vrot.slane %v1496_v52, 1  ;;  %v3924_v58 = vsel %vm2171_vm4, %v1477_v29, -inf  ;;  %v1009_v31 = vcombine.high %v1007_v39, %v1007_v39  ;;  %v1920_v50 = vrot.slane %v1919_v53, 4 }
 0x187   : > { %v3927_v32 = vsel %vm2171_vm4, %v1484_v40, -inf  ;;  %v3930_v6 = vsel %vm2171_vm4, %v1491_v0, -inf  ;;  %v1926_v8 = vsel %vm1274_vm3, %v1008_v44, -inf  ;;  %v1933_v33 = vsel %vm1274_vm3, %v1007_v39, -inf }
 0x188   : > { %v1498_v37 = vmax.f32 %v1496_v52, %v1497_v48  ;;  %v1921_v13 = vmax.f32 %v1919_v53, %v1920_v50  ;;  %v1927_v60 = vrot.slane %v1926_v8, 4  ;;  %v1934_v41 = vrot.slane %v1933_v33, 4 }
 0x189   : > { %v1940_v30 = vsel %vm1274_vm3, %v1009_v31, -inf  ;;  %v687_v49 = vcombine.high %v462_v3, %v462_v3  ;;  %v694_v46 = vrot.slane %v462_v3, %v3524_v27  ;;  %v3940_v7 = vsel %vm2968_vm7, %v2986_v59, %v3886_v45 }
 0x18a   : > { %v3943_v35 = vsel %vm2171_vm4, %v1498_v37, -inf  ;;  %v1922_v42 = vrot.slane %v1921_v13, 2  ;;  %v1928_v54 = vmax.f32 %v1926_v8, %v1927_v60  ;;  %v1935_v55 = vmax.f32 %v1933_v33, %v1934_v41 }
 0x18b   : > { %v1941_v56 = vrot.slane %v1940_v30, 4  ;;  %v701_v51 = vrot.slane %v687_v49, %v3524_v27  ;;  %v702_v62 = vcombine.high %v694_v46, %v694_v46  ;;  %v1415_v63 = vsel %vm1274_vm3, %v694_v46, -inf }
 0x18c   : > { %v1923_v2 = vmax.f32 %v1921_v13, %v1922_v42  ;;  %v1929_v5 = vrot.slane %v1928_v54, 2  ;;  %v1936_v43 = vrot.slane %v1935_v55, 2  ;;  %v1416_v9 = vrot.slane %v1415_v63, 4 }
 0x18d   : > { %v1942_v25 = vmax.f32 %v1940_v30, %v1941_v56  ;;  %v703_v10 = vcombine.high %v701_v51, %v701_v51  ;;  %v1422_v45 = vsel %vm1274_vm3, %v702_v62, -inf  ;;  %v1429_v59 = vsel %vm1274_vm3, %v701_v51, -inf }
 0x18e   : > { %v1924_v61 = vrot.slane %v1923_v2, 1  ;;  %v1930_v11 = vmax.f32 %v1928_v54, %v1929_v5  ;;  %v1937_v12 = vmax.f32 %v1935_v55, %v1936_v43  ;;  %v1417_v14 = vmax.f32 %v1415_v63, %v1416_v9 }
 0x18f   : > { %v1943_v16 = vrot.slane %v1942_v25, 2  ;;  %v1423_v15 = vrot.slane %v1422_v45, 4  ;;  %v1430_v24 = vrot.slane %v1429_v59, 4  ;;  %v1436_v38 = vsel %vm1274_vm3, %v703_v10, -inf }
 0x190   : > { %v1925_v26 = vmax.f32 %v1923_v2, %v1924_v61  ;;  %v1931_v17 = vrot.slane %v1930_v11, 1  ;;  %v1938_v18 = vrot.slane %v1937_v12, 1  ;;  %v1418_v19 = vrot.slane %v1417_v14, 2 }
 0x191   : > { %v1944_v20 = vmax.f32 %v1942_v25, %v1943_v16  ;;  %v1424_v21 = vmax.f32 %v1422_v45, %v1423_v15  ;;  %v1431_v22 = vmax.f32 %v1429_v59, %v1430_v24  ;;  %v1437_v4 = vrot.slane %v1436_v38, 4 }
 0x192   : > { %v1932_v29 = vmax.f32 %v1930_v11, %v1931_v17  ;;  %v1939_v52 = vmax.f32 %v1937_v12, %v1938_v18  ;;  %v3951_v39 = vsel %vm2171_vm4, %v1925_v26, -inf  ;;  %v1419_v44 = vmax.f32 %v1417_v14, %v1418_v19 }
 0x193   : > { %v1945_v40 = vrot.slane %v1944_v20, 1  ;;  %v1425_v0 = vrot.slane %v1424_v21, 2  ;;  %v1432_v53 = vrot.slane %v1431_v22, 2  ;;  %v1438_v48 = vmax.f32 %v1436_v38, %v1437_v4 }
 0x194   : > { %v3954_v31 = vsel %vm2171_vm4, %v1932_v29, -inf  ;;  %v3957_v50 = vsel %vm2171_vm4, %v1939_v52, -inf  ;;  %v1420_v3 = vrot.slane %v1419_v44, 1  ;;  %v959_v8 = vcombine.high %v526_v28, %v526_v28 }
 0x195   : > { %v1946_v33 = vmax.f32 %v1944_v20, %v1945_v40  ;;  %v1426_v37 = vmax.f32 %v1424_v21, %v1425_v0  ;;  %v1433_v13 = vmax.f32 %v1431_v22, %v1432_v53  ;;  %v1439_v60 = vrot.slane %v1438_v48, 2 }
 0x196   : > { %v1421_v41 = vmax.f32 %v1419_v44, %v1420_v3  ;;  %v966_v30 = vrot.slane %v526_v28, %v3524_v27  ;;  %v973_v49 = vrot.slane %v959_v8, %v3524_v27  ;;  %v3965_v46 = vsel %vm2968_vm7, %v3042_v34, %v3918_v23 }
 0x197   : > { %v3968_v42 = vsel %vm2171_vm4, %v1946_v33, -inf  ;;  %v1427_v54 = vrot.slane %v1426_v37, 1  ;;  %v1434_v55 = vrot.slane %v1433_v13, 1  ;;  %v1440_v56 = vmax.f32 %v1438_v48, %v1439_v60 }
 0x198   : > { %v2208_v51 = vsel %vm2171_vm4, %v1421_v41, -inf  ;;  %v974_v62 = vcombine.high %v966_v30, %v966_v30  ;;  %v975_v63 = vcombine.high %v973_v49, %v973_v49  ;;  %v1863_v2 = vsel %vm1274_vm3, %v966_v30, -inf }
 0x199   : > { %v1428_v5 = vmax.f32 %v1426_v37, %v1427_v54  ;;  %v1435_v43 = vmax.f32 %v1433_v13, %v1434_v55  ;;  %v1441_v9 = vrot.slane %v1440_v56, 1  ;;  %v2210_v47 = vmax.f32 %v2208_v51, %v3924_v58 }
 0x19a   : > { %v1864_v25 = vrot.slane %v1863_v2, 4  ;;  %v1870_v23 = vsel %vm1274_vm3, %v974_v62, -inf  ;;  %v1877_v34 = vsel %vm1274_vm3, %v973_v49, -inf  ;;  %v1884_v10 = vsel %vm1274_vm3, %v975_v63, -inf }
 0x19b   : > { %v1442_v45 = vmax.f32 %v1440_v56, %v1441_v9  ;;  %v2211_v59 = vsel %vm2171_vm4, %v1428_v5, -inf  ;;  %v2214_v61 = vsel %vm2171_vm4, %v1435_v43, -inf  ;;  %v2383_v11 = vadd.f32 %v3871_v1, %v2210_v47 }
 0x19c   : > { %v2213_v12 = vmax.f32 %v2211_v59, %v3927_v32  ;;  %v2216_v14 = vmax.f32 %v2214_v61, %v3930_v6  ;;  %v1865_v16 = vmax.f32 %v1863_v2, %v1864_v25  ;;  %v1871_v58 = vrot.slane %v1870_v23, 4  ;;  %v3370_v61 = vpop.f32.mrf.mxu0 }
 0x19d   : > { %v2217_v15 = vsel %vm2171_vm4, %v1442_v45, -inf  ;;  %v2447_v24 = vmax.f32 %v2383_v11, 0.0  ;;  %v1878_v38 = vrot.slane %v1877_v34, 4  ;;  %v1885_v26 = vrot.slane %v1884_v10, 4 }
 0x19e   : > { %v2219_v17 = vmax.f32 %v2217_v15, %v3943_v35  ;;  %v2384_v18 = vadd.f32 %v3871_v1, %v2213_v12  ;;  %v2385_v19 = vadd.f32 %v3871_v1, %v2216_v14  ;;  %v1866_v20 = vrot.slane %v1865_v16, 2 }
 0x19f   : > { %v2518_v21 = vmul.f32 %v3893_v57, %v2447_v24  ;;  %v1872_v22 = vmax.f32 %v1870_v23, %v1871_v58  ;;  %v1879_v32 = vmax.f32 %v1877_v34, %v1878_v38  ;;  %v1886_v4 = vmax.f32 %v1884_v10, %v1885_v26 }
 0x1a0   : > { %v2386_v6 = vadd.f32 %v3871_v1, %v2219_v17  ;;  %v2448_v28 = vmax.f32 %v2384_v18, 0.0  ;;  %v2449_v29 = vmax.f32 %v2385_v19, 0.0  ;;  %v1867_v52 = vmax.f32 %v1865_v16, %v1866_v20 }
 0x1a1   : > { %v2589_v44 = vadd.f32 %v3904_v36, %v2518_v21  ;;  %v1873_v40 = vrot.slane %v1872_v22, 2  ;;  %v1880_v0 = vrot.slane %v1879_v32, 2  ;;  %v1887_v35 = vrot.slane %v1886_v4, 2 }
 0x1a2   : > { %v2450_v53 = vmax.f32 %v2386_v6, 0.0  ;;  %v2519_v48 = vmul.f32 %v3893_v57, %v2448_v28  ;;  %v2520_v3 = vmul.f32 %v3893_v57, %v2449_v29  ;;  %v1868_v8 = vrot.slane %v1867_v52, 1 }
 0x1a3   : > { %v3286_v33 = vpack.c.bf16 %v2589_v44, %v2589_v44  ;;  %v1874_v37 = vmax.f32 %v1872_v22, %v1873_v40  ;;  %v1881_v13 = vmax.f32 %v1879_v32, %v1880_v0  ;;  %v1888_v60 = vmax.f32 %v1886_v4, %v1887_v35 }
 0x1a4   : > { %v2521_v41 = vmul.f32 %v3893_v57, %v2450_v53  ;;  %v2590_v30 = vadd.f32 %v3904_v36, %v2519_v48  ;;  %v2591_v49 = vadd.f32 %v3904_v36, %v2520_v3  ;;  %v1869_v54 = vmax.f32 %v1867_v52, %v1868_v8 }
 0x1a5   : > { %v2909_v55 = vunpack.c.l.b16 %v3286_v33  ;;  %v1875_v56 = vrot.slane %v1874_v37, 1  ;;  %v1882_v51 = vrot.slane %v1881_v13, 1  ;;  %v1889_v62 = vrot.slane %v1888_v60, 1 }
 0x1a6   : > { %v2592_v63 = vadd.f32 %v3904_v36, %v2521_v41  ;;  %v3287_v2 = vpack.c.bf16 %v2590_v30, %v2590_v30  ;;  %v3288_v5 = vpack.c.bf16 %v2591_v49, %v2591_v49  ;;  %v2304_v43 = vsel %vm2171_vm4, %v1869_v54, -inf }
 0x1a7   : > { %v2988_v9 = vrot.slane %v2909_v55, 4  ;;  %v1876_v47 = vmax.f32 %v1874_v37, %v1875_v56  ;;  %v1883_v25 = vmax.f32 %v1881_v13, %v1882_v51  ;;  %v1890_v23 = vmax.f32 %v1888_v60, %v1889_v62 }
 0x1a8   : > { %v3289_v34 = vpack.c.bf16 %v2592_v63, %v2592_v63  ;;  %v2910_v10 = vunpack.c.l.b16 %v3287_v2  ;;  %v2911_v45 = vunpack.c.l.b16 %v3288_v5  ;;  %v2306_v59 = vmax.f32 %v2304_v43, %v3951_v39 }
 0x1a9   : > { %v2989_v11 = vsel %vm2971_vm8, %v2988_v9, %v3940_v7  ;;  %v2307_v12 = vsel %vm2171_vm4, %v1876_v47, -inf  ;;  %v2310_v14 = vsel %vm2171_vm4, %v1883_v25, -inf  ;;  %v2313_v16 = vsel %vm2171_vm4, %v1890_v23, -inf }
 0x1aa   : > { %v2912_v58 = vunpack.c.l.b16 %v3289_v34  ;;  %v2990_v15 = vrot.slane %v2910_v10, 3  ;;  %v2992_v24 = vrot.slane %v2911_v45, 2  ;;  %v2309_v38 = vmax.f32 %v2307_v12, %v3954_v31 }
 0x1ab   : > { %v2312_v26 = vmax.f32 %v2310_v14, %v3957_v50  ;;  %v2315_v17 = vmax.f32 %v2313_v16, %v3968_v42  ;;  %v2415_v39 = vadd.f32 %v3871_v1, %v2306_v59  ;;  %v772_v18 = vcombine.high %v3370_v61, %v3370_v61 }
 0x1ac   : > { %v2991_v7 = vsel %vm2974_vm9, %v2990_v15, %v2989_v11  ;;  %v2994_v19 = vrot.slane %v2912_v58, 1  ;;  %v2416_v20 = vadd.f32 %v3871_v1, %v2309_v38  ;;  %v779_v21 = vrot.slane %v3370_v61, %v3524_v27  ;;  %v3386_v15 = vpop.f32.mrf.mxu1 }
 0x1ad   : > { %v2993_v22 = vsel %vm2977_vm10, %v2992_v24, %v2991_v7  ;;  %v2417_v32 = vadd.f32 %v3871_v1, %v2312_v26  ;;  %v2418_v31 = vadd.f32 %v3871_v1, %v2315_v17  ;;  %v2479_v50 = vmax.f32 %v2415_v39, 0.0 }
 0x1ae   : > { %v2995_v42 = vsel %vm2980_vm11, %v2994_v19, %v2993_v22  ;;  %v2480_v4 = vmax.f32 %v2416_v20, 0.0  ;;  %v786_v6 = vrot.slane %v772_v18, %v3524_v27  ;;  %v787_v28 = vcombine.high %v779_v21, %v779_v21 }
 0x1af   : > { %v3081_v29 = vpack.c.b16 %v2995_v42, %v2995_v42  ;;  %v2481_v52 = vmax.f32 %v2417_v32, 0.0  ;;  %v2482_v44 = vmax.f32 %v2418_v31, 0.0  ;;  %v2550_v40 = vmul.f32 %v3893_v57, %v2479_v50 }
 0x1b0   : > { %v2551_v0 = vmul.f32 %v3893_v57, %v2480_v4  ;;  %v788_v35 = vcombine.high %v786_v6, %v786_v6  ;;  %v1555_v53 = vsel %vm1274_vm3, %v779_v21, -inf  ;;  %v1562_v48 = vsel %vm1274_vm3, %v787_v28, -inf }
 0x1b1   : > { %3098 = vst.msk [vmem:[%s3771_s12 + $0x4] sm:$0xf] %vm3096_vm12, %v3081_v29  ;;  %v2552_v3 = vmul.f32 %v3893_v57, %v2481_v52  ;;  %v2553_v8 = vmul.f32 %v3893_v57, %v2482_v44  ;;  %v2621_v33 = vadd.f32 %v3904_v36, %v2550_v40  ;;  %v1556_v37 = vrot.slane %v1555_v53, 4 }
 0x1b2   : > { %v2622_v13 = vadd.f32 %v3904_v36, %v2551_v0  ;;  %v1563_v60 = vrot.slane %v1562_v48, 4  ;;  %v1569_v41 = vsel %vm1274_vm3, %v786_v6, -inf  ;;  %v1576_v30 = vsel %vm1274_vm3, %v788_v35, -inf  ;;  %v475_v35 = vpop.f32.mrf.mxu0 }
 0x1b3   : > { %v2623_v49 = vadd.f32 %v3904_v36, %v2552_v3  ;;  %v2624_v54 = vadd.f32 %v3904_v36, %v2553_v8  ;;  %v3318_v55 = vpack.c.bf16 %v2621_v33, %v2621_v33  ;;  %v1557_v56 = vmax.f32 %v1555_v53, %v1556_v37  ;;  %v539_v33 = vpop.f32.mrf.mxu1 }
 0x1b4   : > { %v3319_v51 = vpack.c.bf16 %v2622_v13, %v2622_v13  ;;  %v1564_v62 = vmax.f32 %v1562_v48, %v1563_v60  ;;  %v1570_v63 = vrot.slane %v1569_v41, 4  ;;  %v1577_v2 = vrot.slane %v1576_v30, 4 }
 0x1b5   : > { %v3320_v5 = vpack.c.bf16 %v2623_v49, %v2623_v49  ;;  %v3321_v43 = vpack.c.bf16 %v2624_v54, %v2624_v54  ;;  %v2941_v9 = vunpack.c.l.b16 %v3318_v55  ;;  %v1558_v47 = vrot.slane %v1557_v56, 2 }
 0x1b6   : > { %v2942_v25 = vunpack.c.l.b16 %v3319_v51  ;;  %v1565_v23 = vrot.slane %v1564_v62, 2  ;;  %v1571_v34 = vmax.f32 %v1569_v41, %v1570_v63  ;;  %v1578_v10 = vmax.f32 %v1576_v30, %v1577_v2 }
 0x1b7   : > { %v2943_v45 = vunpack.c.l.b16 %v3320_v5  ;;  %v2944_v59 = vunpack.c.l.b16 %v3321_v43  ;;  %v3044_v61 = vrot.slane %v2941_v9, 4  ;;  %v1559_v11 = vmax.f32 %v1557_v56, %v1558_v47 }
 0x1b8   : > { %v3046_v12 = vrot.slane %v2942_v25, 3  ;;  %v1566_v14 = vmax.f32 %v1564_v62, %v1565_v23  ;;  %v1572_v16 = vrot.slane %v1571_v34, 2  ;;  %v1579_v58 = vrot.slane %v1578_v10, 2 }
 0x1b9   : > { %v3045_v24 = vsel %vm2971_vm8, %v3044_v61, %v3965_v46  ;;  %v3048_v38 = vrot.slane %v2943_v45, 2  ;;  %v3050_v26 = vrot.slane %v2944_v59, 1  ;;  %v1560_v17 = vrot.slane %v1559_v11, 1 }
 0x1ba   : > { %v3047_v39 = vsel %vm2974_vm9, %v3046_v12, %v3045_v24  ;;  %v1567_v18 = vrot.slane %v1566_v14, 1  ;;  %v1573_v7 = vmax.f32 %v1571_v34, %v1572_v16  ;;  %v1580_v19 = vmax.f32 %v1578_v10, %v1579_v58 }
 0x1bb   : > { %v3049_v20 = vsel %vm2977_vm10, %v3048_v38, %v3047_v39  ;;  %v1561_v21 = vmax.f32 %v1559_v11, %v1560_v17  ;;  %v1044_v22 = vcombine.high %v3386_v15, %v3386_v15  ;;  %v1051_v32 = vrot.slane %v3386_v15, %v3524_v27 }
 0x1bc   : > { %v3051_v31 = vsel %vm2980_vm11, %v3050_v26, %v3049_v20  ;;  %v1568_v50 = vmax.f32 %v1566_v14, %v1567_v18  ;;  %v1574_v42 = vrot.slane %v1573_v7, 1  ;;  %v1581_v46 = vrot.slane %v1580_v19, 1 }
 0x1bd   : > { %v3085_v4 = vpack.c.b16 %v3051_v31, %v3051_v31  ;;  %v4034_v6 = vsel %vm2171_vm4, %v1561_v21, -inf  ;;  %v1058_v28 = vrot.slane %v1044_v22, %v3524_v27  ;;  %v1059_v29 = vcombine.high %v1051_v32, %v1051_v32 }
 0x1be   : > { %v1575_v52 = vmax.f32 %v1573_v7, %v1574_v42  ;;  %v1582_v44 = vmax.f32 %v1580_v19, %v1581_v46  ;;  %v4038_v40 = vsel %vm2171_vm4, %v1568_v50, -inf  ;;  %v2003_v0 = vsel %vm1274_vm3, %v1051_v32, -inf }
 0x1bf   : > { %3102 = vst.msk [vmem:[%s3771_s12 + $0x14] sm:$0xf] %vm3096_vm12, %v3085_v4  ;;  %v1060_v53 = vcombine.high %v1058_v28, %v1058_v28  ;;  %v2004_v48 = vrot.slane %v2003_v0, 4  ;;  %v2010_v3 = vsel %vm1274_vm3, %v1059_v29, -inf  ;;  %v2017_v8 = vsel %vm1274_vm3, %v1058_v28, -inf  ;;  %v4061_v29 = vpop.f32.mrf.mxu0 }
 0x1c0   : > { %v4046_v37 = vsel %vm2171_vm4, %v1575_v52, -inf  ;;  %v4049_v13 = vsel %vm2171_vm4, %v1582_v44, -inf  ;;  %v2011_v60 = vrot.slane %v2010_v3, 4  ;;  %v2018_v41 = vrot.slane %v2017_v8, 4 }
 0x1c1   : > { %v2005_v30 = vmax.f32 %v2003_v0, %v2004_v48  ;;  %v2024_v49 = vsel %vm1274_vm3, %v1060_v53, -inf  ;;  %v738_v54 = vcombine.high %v475_v35, %v475_v35  ;;  %v745_v55 = vrot.slane %v475_v35, %v3524_v27 }
 0x1c2   : > { %v2012_v56 = vmax.f32 %v2010_v3, %v2011_v60  ;;  %v2019_v51 = vmax.f32 %v2017_v8, %v2018_v41  ;;  %v2025_v62 = vrot.slane %v2024_v49, 4  ;;  %v1010_v63 = vcombine.high %v539_v33, %v539_v33 }
 0x1c3   : > { %v2006_v2 = vrot.slane %v2005_v30, 2  ;;  %v752_v5 = vrot.slane %v738_v54, %v3524_v27  ;;  %v753_v43 = vcombine.high %v745_v55, %v745_v55  ;;  %v1499_v9 = vsel %vm1274_vm3, %v745_v55, -inf }
 0x1c4   : > { %v2013_v47 = vrot.slane %v2012_v56, 2  ;;  %v2020_v25 = vrot.slane %v2019_v51, 2  ;;  %v2026_v23 = vmax.f32 %v2024_v49, %v2025_v62  ;;  %v1500_v34 = vrot.slane %v1499_v9, 4 }
 0x1c5   : > { %v2007_v10 = vmax.f32 %v2005_v30, %v2006_v2  ;;  %v754_v45 = vcombine.high %v752_v5, %v752_v5  ;;  %v1506_v59 = vsel %vm1274_vm3, %v753_v43, -inf  ;;  %v1513_v61 = vsel %vm1274_vm3, %v752_v5, -inf }
 0x1c6   : > { %v2014_v11 = vmax.f32 %v2012_v56, %v2013_v47  ;;  %v2021_v12 = vmax.f32 %v2019_v51, %v2020_v25  ;;  %v2027_v14 = vrot.slane %v2026_v23, 2  ;;  %v1501_v16 = vmax.f32 %v1499_v9, %v1500_v34 }
 0x1c7   : > { %v2008_v58 = vrot.slane %v2007_v10, 1  ;;  %v1507_v15 = vrot.slane %v1506_v59, 4  ;;  %v1514_v24 = vrot.slane %v1513_v61, 4  ;;  %v1520_v38 = vsel %vm1274_vm3, %v754_v45, -inf }
 0x1c8   : > { %v2015_v26 = vrot.slane %v2014_v11, 1  ;;  %v2022_v17 = vrot.slane %v2021_v12, 1  ;;  %v2028_v39 = vmax.f32 %v2026_v23, %v2027_v14  ;;  %v1502_v18 = vrot.slane %v1501_v16, 2 }
 0x1c9   : > { %v2009_v7 = vmax.f32 %v2007_v10, %v2008_v58  ;;  %v1508_v19 = vmax.f32 %v1506_v59, %v1507_v15  ;;  %v1515_v20 = vmax.f32 %v1513_v61, %v1514_v24  ;;  %v1521_v21 = vrot.slane %v1520_v38, 4 }
 0x1ca   : > { %v2016_v22 = vmax.f32 %v2014_v11, %v2015_v26  ;;  %v2023_v32 = vmax.f32 %v2021_v12, %v2022_v17  ;;  %v2029_v31 = vrot.slane %v2028_v39, 1  ;;  %v1503_v50 = vmax.f32 %v1501_v16, %v1502_v18 }
 0x1cb   : > { %v4059_v42 = vsel %vm2171_vm4, %v2009_v7, -inf  ;;  %v1509_v46 = vrot.slane %v1508_v19, 2  ;;  %v1516_v4 = vrot.slane %v1515_v20, 2  ;;  %v1522_v28 = vmax.f32 %v1520_v38, %v1521_v21 }
 0x1cc   : > { %v2030_v52 = vmax.f32 %v2028_v39, %v2029_v31  ;;  %v4064_v44 = vsel %vm2171_vm4, %v2016_v22, -inf  ;;  %v4067_v0 = vsel %vm2171_vm4, %v2023_v32, -inf  ;;  %v1504_v35 = vrot.slane %v1503_v50, 1 }
 0x1cd   : > { %v1510_v53 = vmax.f32 %v1508_v19, %v1509_v46  ;;  %v1517_v48 = vmax.f32 %v1515_v20, %v1516_v4  ;;  %v1523_v3 = vrot.slane %v1522_v28, 2  ;;  %v1017_v8 = vrot.slane %v539_v33, %v3524_v27 }
 0x1ce   : > { %v4071_v60 = vsel %vm2171_vm4, %v2030_v52, -inf  ;;  %v1505_v41 = vmax.f32 %v1503_v50, %v1504_v35  ;;  %v1024_v30 = vrot.slane %v1010_v63, %v3524_v27  ;;  %v789_v49 = vcombine.high %v4061_v29, %v4061_v29 }
 0x1cf   : > { %v1511_v54 = vrot.slane %v1510_v53, 1  ;;  %v1518_v55 = vrot.slane %v1517_v48, 1  ;;  %v1524_v56 = vmax.f32 %v1522_v28, %v1523_v3  ;;  %v1025_v51 = vcombine.high %v1017_v8, %v1017_v8 }
 0x1d0   : > { %v2220_v62 = vsel %vm2171_vm4, %v1505_v41, -inf  ;;  %v1026_v2 = vcombine.high %v1024_v30, %v1024_v30  ;;  %v1947_v5 = vsel %vm1274_vm3, %v1017_v8, -inf  ;;  %v1961_v33 = vsel %vm1274_vm3, %v1024_v30, -inf }
 0x1d1   : > { %v1512_v43 = vmax.f32 %v1510_v53, %v1511_v54  ;;  %v1519_v9 = vmax.f32 %v1517_v48, %v1518_v55  ;;  %v1525_v47 = vrot.slane %v1524_v56, 1  ;;  %v2222_v25 = vmax.f32 %v2220_v62, %v4034_v6 }
 0x1d2   : > { %v1948_v63 = vrot.slane %v1947_v5, 4  ;;  %v1954_v23 = vsel %vm1274_vm3, %v1025_v51, -inf  ;;  %v1962_v34 = vrot.slane %v1961_v33, 4  ;;  %v1968_v10 = vsel %vm1274_vm3, %v1026_v2, -inf }
 0x1d3   : > { %v1526_v45 = vmax.f32 %v1524_v56, %v1525_v47  ;;  %v2223_v59 = vsel %vm2171_vm4, %v1512_v43, -inf  ;;  %v2226_v61 = vsel %vm2171_vm4, %v1519_v9, -inf  ;;  %v2387_v11 = vadd.f32 %v3871_v1, %v2222_v25 }
 0x1d4   : > { %v2225_v12 = vmax.f32 %v2223_v59, %v4038_v40  ;;  %v2228_v14 = vmax.f32 %v2226_v61, %v4046_v37  ;;  %v1949_v16 = vmax.f32 %v1947_v5, %v1948_v63  ;;  %v1955_v58 = vrot.slane %v1954_v23, 4 }
 0x1d5   : > { %v2229_v6 = vsel %vm2171_vm4, %v1526_v45, -inf  ;;  %v2451_v15 = vmax.f32 %v2387_v11, 0.0  ;;  %v1963_v24 = vmax.f32 %v1961_v33, %v1962_v34  ;;  %v1969_v38 = vrot.slane %v1968_v10, 4 }
 0x1d6   : > { %v2231_v26 = vmax.f32 %v2229_v6, %v4049_v13  ;;  %v2388_v17 = vadd.f32 %v3871_v1, %v2225_v12  ;;  %v2389_v39 = vadd.f32 %v3871_v1, %v2228_v14  ;;  %v1950_v18 = vrot.slane %v1949_v16, 2 }
 0x1d7   : > { %v2522_v7 = vmul.f32 %v3893_v57, %v2451_v15  ;;  %v1956_v19 = vmax.f32 %v1954_v23, %v1955_v58  ;;  %v1964_v40 = vrot.slane %v1963_v24, 2  ;;  %v1970_v20 = vmax.f32 %v1968_v10, %v1969_v38 }
 0x1d8   : > { %v2390_v37 = vadd.f32 %v3871_v1, %v2231_v26  ;;  %v2452_v21 = vmax.f32 %v2388_v17, 0.0  ;;  %v2453_v22 = vmax.f32 %v2389_v39, 0.0  ;;  %v1951_v32 = vmax.f32 %v1949_v16, %v1950_v18 }
 0x1d9   : > { %v2593_v31 = vadd.f32 %v3904_v36, %v2522_v7  ;;  %v1957_v50 = vrot.slane %v1956_v19, 2  ;;  %v1965_v46 = vmax.f32 %v1963_v24, %v1964_v40  ;;  %v1971_v13 = vrot.slane %v1970_v20, 2 }
 0x1da   : > { %v2454_v4 = vmax.f32 %v2390_v37, 0.0  ;;  %v2523_v28 = vmul.f32 %v3893_v57, %v2452_v21  ;;  %v2524_v52 = vmul.f32 %v3893_v57, %v2453_v22  ;;  %v1952_v35 = vrot.slane %v1951_v32, 1 }
 0x1db   : > { %v3290_v53 = vpack.c.bf16 %v2593_v31, %v2593_v31  ;;  %v1958_v48 = vmax.f32 %v1956_v19, %v1957_v50  ;;  %v1966_v3 = vrot.slane %v1965_v46, 1  ;;  %v1972_v8 = vmax.f32 %v1970_v20, %v1971_v13 }
 0x1dc   : > { %v2525_v41 = vmul.f32 %v3893_v57, %v2454_v4  ;;  %v2594_v30 = vadd.f32 %v3904_v36, %v2523_v28  ;;  %v2595_v54 = vadd.f32 %v3904_v36, %v2524_v52  ;;  %v1953_v55 = vmax.f32 %v1951_v32, %v1952_v35 }
 0x1dd   : > { %v2913_v56 = vunpack.c.l.b16 %v3290_v53  ;;  %v1959_v51 = vrot.slane %v1958_v48, 1  ;;  %v1967_v62 = vmax.f32 %v1965_v46, %v1966_v3  ;;  %v1973_v2 = vrot.slane %v1972_v8, 1 }
 0x1de   : > { %v2596_v5 = vadd.f32 %v3904_v36, %v2525_v41  ;;  %v3291_v33 = vpack.c.bf16 %v2594_v30, %v2594_v30  ;;  %v3292_v43 = vpack.c.bf16 %v2595_v54, %v2595_v54  ;;  %v2316_v9 = vsel %vm2171_vm4, %v1953_v55, -inf }
 0x1df   : > { %v1960_v47 = vmax.f32 %v1958_v48, %v1959_v51  ;;  %v1974_v25 = vmax.f32 %v1972_v8, %v1973_v2  ;;  %v2318_v63 = vmax.f32 %v2316_v9, %v4059_v42  ;;  %v2322_v23 = vsel %vm2171_vm4, %v1967_v62, -inf  ;;  %v3387_v8 = vpop.f32.mrf.mxu1 }
 0x1e0   : > { %v3293_v34 = vpack.c.bf16 %v2596_v5, %v2596_v5  ;;  %v2914_v10 = vunpack.c.l.b16 %v3291_v33  ;;  %v2915_v45 = vunpack.c.l.b16 %v3292_v43  ;;  %v2324_v59 = vmax.f32 %v2322_v23, %v4067_v0 }
 0x1e1   : > { %v2319_v61 = vsel %vm2171_vm4, %v1960_v47, -inf  ;;  %v2325_v11 = vsel %vm2171_vm4, %v1974_v25, -inf  ;;  %v2419_v12 = vadd.f32 %v3871_v1, %v2318_v63  ;;  %v796_v14 = vrot.slane %v4061_v29, %v3524_v27 }
 0x1e2   : > { %v4109_v16 = vunpack.c.l.b16 %v3293_v34  ;;  %v2996_v58 = vrot.slane %v2914_v10, 7  ;;  %v2998_v42 = vrot.slane %v2915_v45, 6  ;;  %v2321_v6 = vmax.f32 %v2319_v61, %v4064_v44 }
 0x1e3   : > { %v2327_v15 = vmax.f32 %v2325_v11, %v4071_v60  ;;  %v2421_v24 = vadd.f32 %v3871_v1, %v2324_v59  ;;  %v2483_v0 = vmax.f32 %v2419_v12, 0.0  ;;  %v803_v38 = vrot.slane %v789_v49, %v3524_v27 }
 0x1e4   : > { %v2997_v26 = vsel %vm2962_vm5, %v2996_v58, %v2913_v56  ;;  %v3000_v17 = vrot.slane %v4109_v16, 5  ;;  %v2420_v39 = vadd.f32 %v3871_v1, %v2321_v6  ;;  %v804_v18 = vcombine.high %v796_v14, %v796_v14 }
 0x1e5   : > { %v4122_v7 = vsel %vm2965_vm6, %v2998_v42, %v2997_v26  ;;  %v2422_v44 = vadd.f32 %v3871_v1, %v2327_v15  ;;  %v2485_v60 = vmax.f32 %v2421_v24, 0.0  ;;  %v2554_v19 = vmul.f32 %v3893_v57, %v2483_v0 }
 0x1e6   : > { %v2484_v40 = vmax.f32 %v2420_v39, 0.0  ;;  %v805_v20 = vcombine.high %v803_v38, %v803_v38  ;;  %v1583_v29 = vsel %vm1274_vm3, %v796_v14, -inf  ;;  %v1590_v49 = vsel %vm1274_vm3, %v804_v18, -inf }
 0x1e7   : > { %v2486_v37 = vmax.f32 %v2422_v44, 0.0  ;;  %v2556_v21 = vmul.f32 %v3893_v57, %v2485_v60  ;;  %v2625_v22 = vadd.f32 %v3904_v36, %v2554_v19  ;;  %v1584_v32 = vrot.slane %v1583_v29, 4 }
 0x1e8   : > { %v2555_v31 = vmul.f32 %v3893_v57, %v2484_v40  ;;  %v1591_v50 = vrot.slane %v1590_v49, 4  ;;  %v1597_v1 = vsel %vm1274_vm3, %v803_v38, -inf  ;;  %v1604_v46 = vsel %vm1274_vm3, %v805_v20, -inf  ;;  %v478_v38 = vpop.f32.mrf.mxu0 }
 0x1e9   : > { %v2557_v13 = vmul.f32 %v3893_v57, %v2486_v37  ;;  %v2627_v4 = vadd.f32 %v3904_v36, %v2556_v21  ;;  %v3322_v28 = vpack.c.bf16 %v2625_v22, %v2625_v22  ;;  %v1585_v52 = vmax.f32 %v1583_v29, %v1584_v32  ;;  %v542_v22 = vpop.f32.mrf.mxu1 }
 0x1ea   : > { %v2626_v35 = vadd.f32 %v3904_v36, %v2555_v31  ;;  %v1592_v53 = vmax.f32 %v1590_v49, %v1591_v50  ;;  %v1598_v48 = vrot.slane %v1597_v1, 4  ;;  %v1605_v3 = vrot.slane %v1604_v46, 4 }
 0x1eb   : > { %v2628_v41 = vadd.f32 %v3904_v36, %v2557_v13  ;;  %v3324_v30 = vpack.c.bf16 %v2627_v4, %v2627_v4  ;;  %v2945_v54 = vunpack.c.l.b16 %v3322_v28  ;;  %v1586_v55 = vrot.slane %v1585_v52, 2 }
 0x1ec   : > { %v3323_v56 = vpack.c.bf16 %v2626_v35, %v2626_v35  ;;  %v1593_v51 = vrot.slane %v1592_v53, 2  ;;  %v1599_v62 = vmax.f32 %v1597_v1, %v1598_v48  ;;  %v1606_v2 = vmax.f32 %v1604_v46, %v1605_v3 }
 0x1ed   : > { %v3325_v57 = vpack.c.bf16 %v2628_v41, %v2628_v41  ;;  %v2947_v5 = vunpack.c.l.b16 %v3324_v30  ;;  %v1587_v33 = vmax.f32 %v1585_v52, %v1586_v55  ;;  %v1061_v43 = vcombine.high %v3387_v8, %v3387_v8 }
 0x1ee   : > { %v2946_v9 = vunpack.c.l.b16 %v3323_v56  ;;  %v1594_v47 = vmax.f32 %v1592_v53, %v1593_v51  ;;  %v1600_v25 = vrot.slane %v1599_v62, 2  ;;  %v1607_v63 = vrot.slane %v1606_v2, 2 }
 0x1ef   : > { %v4137_v23 = vunpack.c.l.b16 %v3325_v57  ;;  %v3054_v34 = vrot.slane %v2947_v5, 6  ;;  %v1588_v10 = vrot.slane %v1587_v33, 1  ;;  %v1068_v36 = vrot.slane %v3387_v8, %v3524_v27 }
 0x1f0   : > { %v3052_v45 = vrot.slane %v2946_v9, 7  ;;  %v1595_v59 = vrot.slane %v1594_v47, 1  ;;  %v1601_v61 = vmax.f32 %v1599_v62, %v1600_v25  ;;  %v1608_v11 = vmax.f32 %v1606_v2, %v1607_v63 }
 0x1f1   : > { %v3056_v12 = vrot.slane %v4137_v23, 5  ;;  %v1589_v14 = vmax.f32 %v1587_v33, %v1588_v10  ;;  %v1075_v58 = vrot.slane %v1061_v43, %v3524_v27  ;;  %v1076_v42 = vcombine.high %v1068_v36, %v1068_v36 }
 0x1f2   : > { %v3053_v6 = vsel %vm2962_vm5, %v3052_v45, %v2945_v54  ;;  %v1596_v15 = vmax.f32 %v1594_v47, %v1595_v59  ;;  %v1602_v24 = vrot.slane %v1601_v61, 1  ;;  %v1609_v0 = vrot.slane %v1608_v11, 1 }
 0x1f3   : > { %v4144_v26 = vsel %vm2965_vm6, %v3054_v34, %v3053_v6  ;;  %v4147_v39 = vsel %vm2171_vm4, %v1589_v14, -inf  ;;  %v1077_v18 = vcombine.high %v1075_v58, %v1075_v58  ;;  %v2031_v44 = vsel %vm1274_vm3, %v1068_v36, -inf }
 0x1f4   : > { %v1603_v60 = vmax.f32 %v1601_v61, %v1602_v24  ;;  %v1610_v19 = vmax.f32 %v1608_v11, %v1609_v0  ;;  %v4151_v40 = vsel %vm2171_vm4, %v1596_v15, -inf  ;;  %v2032_v20 = vrot.slane %v2031_v44, 4 }
 0x1f5   : > { %v2038_v29 = vsel %vm1274_vm3, %v1076_v42, -inf  ;;  %v2045_v49 = vsel %vm1274_vm3, %v1075_v58, -inf  ;;  %v2052_v37 = vsel %vm1274_vm3, %v1077_v18, -inf  ;;  %v755_v21 = vcombine.high %v478_v38, %v478_v38 }
 0x1f6   : > { %v4157_v32 = vsel %vm2171_vm4, %v1603_v60, -inf  ;;  %v4160_v31 = vsel %vm2171_vm4, %v1610_v19, -inf  ;;  %v2033_v50 = vmax.f32 %v2031_v44, %v2032_v20  ;;  %v2039_v1 = vrot.slane %v2038_v29, 4 }
 0x1f7   : > { %v2046_v46 = vrot.slane %v2045_v49, 4  ;;  %v2053_v13 = vrot.slane %v2052_v37, 4  ;;  %v762_v4 = vrot.slane %v478_v38, %v3524_v27  ;;  %v769_v28 = vrot.slane %v755_v21, %v3524_v27 }
 0x1f8   : > { %v2034_v52 = vrot.slane %v2033_v50, 2  ;;  %v2040_v35 = vmax.f32 %v2038_v29, %v2039_v1  ;;  %v4168_v53 = vsel %vm2968_vm7, %v3000_v17, %v4122_v7  ;;  %v1027_v48 = vcombine.high %v542_v22, %v542_v22 }
 0x1f9   : > { %v2047_v3 = vmax.f32 %v2045_v49, %v2046_v46  ;;  %v2054_v8 = vmax.f32 %v2052_v37, %v2053_v13  ;;  %v770_v41 = vcombine.high %v762_v4, %v762_v4  ;;  %v771_v30 = vcombine.high %v769_v28, %v769_v28 }
 0x1fa   : > { %v2035_v54 = vmax.f32 %v2033_v50, %v2034_v52  ;;  %v2041_v55 = vrot.slane %v2040_v35, 2  ;;  %v1527_v56 = vsel %vm1274_vm3, %v762_v4, -inf  ;;  %v1541_v51 = vsel %vm1274_vm3, %v769_v28, -inf }
 0x1fb   : > { %v2048_v62 = vrot.slane %v2047_v3, 2  ;;  %v2055_v2 = vrot.slane %v2054_v8, 2  ;;  %v1528_v57 = vrot.slane %v1527_v56, 4  ;;  %v1534_v5 = vsel %vm1274_vm3, %v770_v41, -inf }
 0x1fc   : > { %v2036_v16 = vrot.slane %v2035_v54, 1  ;;  %v2042_v33 = vmax.f32 %v2040_v35, %v2041_v55  ;;  %v1535_v17 = vrot.slane %v1534_v5, 4  ;;  %v1542_v7 = vrot.slane %v1541_v51, 4 }
 0x1fd   : > { %v2049_v43 = vmax.f32 %v2047_v3, %v2048_v62  ;;  %v2056_v9 = vmax.f32 %v2054_v8, %v2055_v2  ;;  %v1529_v47 = vmax.f32 %v1527_v56, %v1528_v57  ;;  %v1548_v25 = vsel %vm1274_vm3, %v771_v30, -inf  ;;  %v4206_v57 = vld [vmem:[%s4492_s2] ss:$0 sm:$0xff] }
 0x1fe   : > { %v2037_v63 = vmax.f32 %v2035_v54, %v2036_v16  ;;  %v2043_v34 = vrot.slane %v2042_v33, 1  ;;  %v1536_v10 = vmax.f32 %v1534_v5, %v1535_v17  ;;  %v1543_v36 = vmax.f32 %v1541_v51, %v1542_v7 }
 0x1ff   : > { %v2050_v45 = vrot.slane %v2049_v43, 1  ;;  %v2057_v59 = vrot.slane %v2056_v9, 1  ;;  %v1530_v61 = vrot.slane %v1529_v47, 2  ;;  %v1549_v11 = vrot.slane %v1548_v25, 4 }
 0x200   : > { %v2044_v14 = vmax.f32 %v2042_v33, %v2043_v34  ;;  %v4175_v58 = vsel %vm2171_vm4, %v2037_v63, -inf  ;;  %v1537_v42 = vrot.slane %v1536_v10, 2  ;;  %v1544_v6 = vrot.slane %v1543_v36, 2 }
 0x201   : > { %v2051_v15 = vmax.f32 %v2049_v43, %v2050_v45  ;;  %v2058_v24 = vmax.f32 %v2056_v9, %v2057_v59  ;;  %v1531_v0 = vmax.f32 %v1529_v47, %v1530_v61  ;;  %v1550_v38 = vmax.f32 %v1548_v25, %v1549_v11  ;;  %v4218_v59 = vld [vmem:[%s4493_s3] ss:$0 sm:$0xff] }
 0x202   : > { %v4178_v18 = vsel %vm2171_vm4, %v2044_v14, -inf  ;;  %v1538_v44 = vmax.f32 %v1536_v10, %v1537_v42  ;;  %v1545_v60 = vmax.f32 %v1543_v36, %v1544_v6  ;;  %v1034_v19 = vrot.slane %v542_v22, %v3524_v27 }
 0x203   : > { %v4182_v20 = vsel %vm2171_vm4, %v2051_v15, -inf  ;;  %v4185_v29 = vsel %vm2171_vm4, %v2058_v24, -inf  ;;  %v1532_v49 = vrot.slane %v1531_v0, 1  ;;  %v1551_v37 = vrot.slane %v1550_v38, 2 }
 0x204   : > { %v1539_v21 = vrot.slane %v1538_v44, 1  ;;  %v1546_v50 = vrot.slane %v1545_v60, 1  ;;  %v1041_v1 = vrot.slane %v1027_v48, %v3524_v27  ;;  %v1042_v46 = vcombine.high %v1034_v19, %v1034_v19 }
 0x205   : > { %v1533_v13 = vmax.f32 %v1531_v0, %v1532_v49  ;;  %v1552_v4 = vmax.f32 %v1550_v38, %v1551_v37  ;;  %v1975_v28 = vsel %vm1274_vm3, %v1034_v19, -inf  ;;  %v4193_v22 = vsel %vm2968_vm7, %v3056_v12, %v4144_v26  ;;  %v4226_v0 = vld [vmem:[%s4494_s4] ss:$0 sm:$0xff] }
 0x206   : > { %v1540_v52 = vmax.f32 %v1538_v44, %v1539_v21  ;;  %v1547_v35 = vmax.f32 %v1545_v60, %v1546_v50  ;;  %v1043_v3 = vcombine.high %v1041_v1, %v1041_v1  ;;  %v1976_v8 = vrot.slane %v1975_v28, 4 }
 0x207   : > { %v1553_v41 = vrot.slane %v1552_v4, 1  ;;  %v2232_v30 = vsel %vm2171_vm4, %v1533_v13, -inf  ;;  %v1982_v48 = vsel %vm1274_vm3, %v1042_v46, -inf  ;;  %v1989_v54 = vsel %vm1274_vm3, %v1041_v1, -inf }
 0x208   : > { %v2234_v55 = vmax.f32 %v2232_v30, %v4147_v39  ;;  %v2235_v56 = vsel %vm2171_vm4, %v1540_v52, -inf  ;;  %v2238_v23 = vsel %vm2171_vm4, %v1547_v35, -inf  ;;  %v1977_v51 = vmax.f32 %v1975_v28, %v1976_v8 }
 0x209   : > { %v1554_v12 = vmax.f32 %v1552_v4, %v1553_v41  ;;  %v2237_v26 = vmax.f32 %v2235_v56, %v4151_v40  ;;  %v2240_v62 = vmax.f32 %v2238_v23, %v4157_v32  ;;  %v1983_v2 = vrot.slane %v1982_v48, 4 }
 0x20a   : > { %v2391_v5 = vadd.f32 %v4206_v57, %v2234_v55  ;;  %v1978_v16 = vrot.slane %v1977_v51, 2  ;;  %v1990_v39 = vrot.slane %v1989_v54, 4  ;;  %v1996_v33 = vsel %vm1274_vm3, %v1043_v3, -inf }
 0x20b   : > { %v2241_v17 = vsel %vm2171_vm4, %v1554_v12, -inf  ;;  %v2392_v7 = vadd.f32 %v4206_v57, %v2237_v26  ;;  %v2393_v40 = vadd.f32 %v4206_v57, %v2240_v62  ;;  %v1984_v43 = vmax.f32 %v1982_v48, %v1983_v2  ;;  %v3374_v62 = vpop.f32.mrf.mxu0 }
 0x20c   : > { %v2243_v32 = vmax.f32 %v2241_v17, %v4160_v31  ;;  %v2455_v9 = vmax.f32 %v2391_v5, 0.0  ;;  %v1979_v47 = vmax.f32 %v1977_v51, %v1978_v16  ;;  %v1991_v25 = vmax.f32 %v1989_v54, %v1990_v39 }
 0x20d   : > { %v2456_v63 = vmax.f32 %v2392_v7, 0.0  ;;  %v2457_v34 = vmax.f32 %v2393_v40, 0.0  ;;  %v1985_v10 = vrot.slane %v1984_v43, 2  ;;  %v1997_v36 = vrot.slane %v1996_v33, 4 }
 0x20e   : > { %v2394_v45 = vadd.f32 %v4206_v57, %v2243_v32  ;;  %v2526_v61 = vmul.f32 %v4218_v59, %v2455_v9  ;;  %v1980_v11 = vrot.slane %v1979_v47, 1  ;;  %v1992_v14 = vrot.slane %v1991_v25, 2  ;;  %v4246_v9 = vpop.f32.mrf.mxu1 }
 0x20f   : > { %v2527_v31 = vmul.f32 %v4218_v59, %v2456_v63  ;;  %v2528_v42 = vmul.f32 %v4218_v59, %v2457_v34  ;;  %v1986_v6 = vmax.f32 %v1984_v43, %v1985_v10  ;;  %v1998_v15 = vmax.f32 %v1996_v33, %v1997_v36 }
 0x210   : > { %v2458_v24 = vmax.f32 %v2394_v45, 0.0  ;;  %v2597_v38 = vadd.f32 %v4226_v0, %v2526_v61  ;;  %v1981_v44 = vmax.f32 %v1979_v47, %v1980_v11  ;;  %v1993_v60 = vmax.f32 %v1991_v25, %v1992_v14 }
 0x211   : > { %v2598_v19 = vadd.f32 %v4226_v0, %v2527_v31  ;;  %v2599_v49 = vadd.f32 %v4226_v0, %v2528_v42  ;;  %v1987_v37 = vrot.slane %v1986_v6, 1  ;;  %v1999_v21 = vrot.slane %v1998_v15, 2 }
 0x212   : > { %v2529_v50 = vmul.f32 %v4218_v59, %v2458_v24  ;;  %v3294_v1 = vpack.c.bf16 %v2597_v38, %v2597_v38  ;;  %v1994_v46 = vrot.slane %v1993_v60, 1  ;;  %v2328_v13 = vsel %vm2171_vm4, %v1981_v44, -inf }
 0x213   : > { %v3295_v4 = vpack.c.bf16 %v2598_v19, %v2598_v19  ;;  %v3296_v28 = vpack.c.bf16 %v2599_v49, %v2599_v49  ;;  %v1988_v52 = vmax.f32 %v1986_v6, %v1987_v37  ;;  %v2000_v35 = vmax.f32 %v1998_v15, %v1999_v21 }
 0x214   : > { %v2600_v3 = vadd.f32 %v4226_v0, %v2529_v50  ;;  %v2917_v8 = vunpack.c.l.b16 %v3294_v1  ;;  %v1995_v41 = vmax.f32 %v1993_v60, %v1994_v46  ;;  %v2330_v30 = vmax.f32 %v2328_v13, %v4175_v58 }
 0x215   : > { %v2918_v48 = vunpack.c.l.b16 %v3295_v4  ;;  %v2919_v54 = vunpack.c.l.b16 %v3296_v28  ;;  %v2001_v55 = vrot.slane %v2000_v35, 1  ;;  %v2331_v56 = vsel %vm2171_vm4, %v1988_v52, -inf }
 0x216   : > { %v3297_v23 = vpack.c.bf16 %v2600_v3, %v2600_v3  ;;  %v3002_v51 = vrot.slane %v2917_v8, 4  ;;  %v2333_v12 = vmax.f32 %v2331_v56, %v4178_v18  ;;  %v2334_v26 = vsel %vm2171_vm4, %v1995_v41, -inf }
 0x217   : > { %v3004_v2 = vrot.slane %v2918_v48, 3  ;;  %v3006_v5 = vrot.slane %v2919_v54, 2  ;;  %v2002_v16 = vmax.f32 %v2000_v35, %v2001_v55  ;;  %v2336_v39 = vmax.f32 %v2334_v26, %v4182_v20 }
 0x218   : > { %v2920_v33 = vunpack.c.l.b16 %v3297_v23  ;;  %v3003_v58 = vsel %vm2971_vm8, %v3002_v51, %v4168_v53  ;;  %v2423_v17 = vadd.f32 %v4206_v57, %v2330_v30  ;;  %v2424_v7 = vadd.f32 %v4206_v57, %v2333_v12 }
 0x219   : > { %v3005_v40 = vsel %vm2974_vm9, %v3004_v2, %v3003_v58  ;;  %v2337_v18 = vsel %vm2171_vm4, %v2002_v16, -inf  ;;  %v2425_v43 = vadd.f32 %v4206_v57, %v2336_v39  ;;  %v840_v32 = vcombine.high %v3374_v62, %v3374_v62 }
 0x21a   : > { %v3007_v47 = vsel %vm2977_vm10, %v3006_v5, %v3005_v40  ;;  %v3008_v20 = vrot.slane %v2920_v33, 1  ;;  %v2339_v25 = vmax.f32 %v2337_v18, %v4185_v29  ;;  %v2487_v63 = vmax.f32 %v2423_v17, 0.0 }
 0x21b   : > { %v2488_v53 = vmax.f32 %v2424_v7, 0.0  ;;  %v2489_v34 = vmax.f32 %v2425_v43, 0.0  ;;  %v847_v10 = vrot.slane %v3374_v62, %v3524_v27  ;;  %v854_v36 = vrot.slane %v840_v32, %v3524_v27 }
 0x21c   : > { %v3009_v45 = vsel %vm2980_vm11, %v3008_v20, %v3007_v47  ;;  %v2426_v61 = vadd.f32 %v4206_v57, %v2339_v25  ;;  %v2558_v11 = vmul.f32 %v4218_v59, %v2487_v63  ;;  %v1112_v14 = vcombine.high %v4246_v9, %v4246_v9 }
 0x21d   : > { %v3082_v31 = vpack.c.b16 %v3009_v45, %v3009_v45  ;;  %v2559_v29 = vmul.f32 %v4218_v59, %v2488_v53  ;;  %v2560_v42 = vmul.f32 %v4218_v59, %v2489_v34  ;;  %v855_v6 = vcombine.high %v847_v10, %v847_v10 }
 0x21e   : > { %v2490_v15 = vmax.f32 %v2426_v61, 0.0  ;;  %v2629_v24 = vadd.f32 %v4226_v0, %v2558_v11  ;;  %v856_v38 = vcombine.high %v854_v36, %v854_v36  ;;  %v1667_v44 = vsel %vm1274_vm3, %v847_v10, -inf }
 0x21f   : > { %3099 = vst.msk [vmem:[%s3771_s12 + $0x8] sm:$0xf] %vm3096_vm12, %v3082_v31  ;;  %v2630_v60 = vadd.f32 %v4226_v0, %v2559_v29  ;;  %v2631_v19 = vadd.f32 %v4226_v0, %v2560_v42  ;;  %v1668_v49 = vrot.slane %v1667_v44, 4  ;;  %v1674_v37 = vsel %vm1274_vm3, %v855_v6, -inf  ;;  %v491_v29 = vpop.f32.mrf.mxu0 }
 0x220   : > { %v2561_v21 = vmul.f32 %v4218_v59, %v2490_v15  ;;  %v3326_v50 = vpack.c.bf16 %v2629_v24, %v2629_v24  ;;  %v1675_v1 = vrot.slane %v1674_v37, 4  ;;  %v1681_v46 = vsel %vm1274_vm3, %v854_v36, -inf }
 0x221   : > { %v3327_v13 = vpack.c.bf16 %v2630_v60, %v2630_v60  ;;  %v3328_v4 = vpack.c.bf16 %v2631_v19, %v2631_v19  ;;  %v1669_v28 = vmax.f32 %v1667_v44, %v1668_v49  ;;  %v1682_v52 = vrot.slane %v1681_v46, 4 }
 0x222   : > { %v2632_v35 = vadd.f32 %v4226_v0, %v2561_v21  ;;  %v2949_v3 = vunpack.c.l.b16 %v3326_v50  ;;  %v1676_v8 = vmax.f32 %v1674_v37, %v1675_v1  ;;  %v1688_v41 = vsel %vm1274_vm3, %v856_v38, -inf }
 0x223   : > { %v2950_v30 = vunpack.c.l.b16 %v3327_v13  ;;  %v2951_v48 = vunpack.c.l.b16 %v3328_v4  ;;  %v1670_v54 = vrot.slane %v1669_v28, 2  ;;  %v1683_v55 = vmax.f32 %v1681_v46, %v1682_v52 }
 0x224   : > { %v3329_v56 = vpack.c.bf16 %v2632_v35, %v2632_v35  ;;  %v3058_v23 = vrot.slane %v2949_v3, 4  ;;  %v1677_v51 = vrot.slane %v1676_v8, 2  ;;  %v1689_v12 = vrot.slane %v1688_v41, 4 }
 0x225   : > { %v3060_v26 = vrot.slane %v2950_v30, 3  ;;  %v3062_v62 = vrot.slane %v2951_v48, 2  ;;  %v1671_v2 = vmax.f32 %v1669_v28, %v1670_v54  ;;  %v1684_v5 = vrot.slane %v1683_v55, 2 }
 0x226   : > { %v2952_v16 = vunpack.c.l.b16 %v3329_v56  ;;  %v3059_v39 = vsel %vm2971_vm8, %v3058_v23, %v4193_v22  ;;  %v1678_v33 = vmax.f32 %v1676_v8, %v1677_v51  ;;  %v1690_v58 = vmax.f32 %v1688_v41, %v1689_v12 }
 0x227   : > { %v3061_v17 = vsel %vm2974_vm9, %v3060_v26, %v3059_v39  ;;  %v1672_v7 = vrot.slane %v1671_v2, 1  ;;  %v1685_v40 = vmax.f32 %v1683_v55, %v1684_v5  ;;  %v1119_v18 = vrot.slane %v4246_v9, %v3524_v27 }
 0x228   : > { %v3063_v43 = vsel %vm2977_vm10, %v3062_v62, %v3061_v17  ;;  %v3064_v32 = vrot.slane %v2952_v16, 1  ;;  %v1691_v47 = vrot.slane %v1690_v58, 2  ;;  %v1679_v20 = vrot.slane %v1678_v33, 1  ;;  %v555_v62 = vpop.f32.mrf.mxu1 }
 0x229   : > { %v1126_v25 = vrot.slane %v1112_v14, %v3524_v27  ;;  %v1127_v63 = vcombine.high %v1119_v18, %v1119_v18  ;;  %v1686_v53 = vrot.slane %v1685_v40, 1  ;;  %v2115_v10 = vsel %vm1274_vm3, %v1119_v18, -inf }
 0x22a   : > { %v3065_v22 = vsel %vm2980_vm11, %v3064_v32, %v3063_v43  ;;  %v1692_v34 = vmax.f32 %v1690_v58, %v1691_v47  ;;  %v1673_v45 = vmax.f32 %v1671_v2, %v1672_v7  ;;  %v2116_v9 = vrot.slane %v2115_v10, 4 }
 0x22b   : > { %v3086_v36 = vpack.c.b16 %v3065_v22, %v3065_v22  ;;  %v1128_v61 = vcombine.high %v1126_v25, %v1126_v25  ;;  %v2122_v31 = vsel %vm1274_vm3, %v1127_v63, -inf  ;;  %v1680_v42 = vmax.f32 %v1678_v33, %v1679_v20 }
 0x22c   : > { %v1693_v11 = vrot.slane %v1692_v34, 1  ;;  %v2123_v6 = vrot.slane %v2122_v31, 4  ;;  %v2129_v14 = vsel %vm1274_vm3, %v1126_v25, -inf  ;;  %v1687_v24 = vmax.f32 %v1685_v40, %v1686_v53 }
 0x22d   : > { %3103 = vst.msk [vmem:[%s3771_s12 + $0x18] sm:$0xf] %vm3096_vm12, %v3086_v36  ;;  %v2136_v15 = vsel %vm1274_vm3, %v1128_v61, -inf  ;;  %v2117_v38 = vmax.f32 %v2115_v10, %v2116_v9  ;;  %v2130_v44 = vrot.slane %v2129_v14, 4  ;;  %v4285_v19 = vsel %vm2171_vm4, %v1673_v45, -inf }
 0x22e   : > { %v2137_v60 = vrot.slane %v2136_v15, 4  ;;  %v2124_v49 = vmax.f32 %v2122_v31, %v2123_v6  ;;  %v806_v37 = vcombine.high %v491_v29, %v491_v29  ;;  %v813_v21 = vrot.slane %v491_v29, %v3524_v27 }
 0x22f   : > { %v1694_v50 = vmax.f32 %v1692_v34, %v1693_v11  ;;  %v2118_v1 = vrot.slane %v2117_v38, 2  ;;  %v2131_v46 = vmax.f32 %v2129_v14, %v2130_v44  ;;  %v2248_v33 = vsel %vm2171_vm4, %v1680_v42, -inf }
 0x230   : > { %v2138_v13 = vmax.f32 %v2136_v15, %v2137_v60  ;;  %v2125_v4 = vrot.slane %v2124_v49, 2  ;;  %v820_v28 = vrot.slane %v806_v37, %v3524_v27  ;;  %v821_v52 = vcombine.high %v813_v21, %v813_v21 }
 0x231   : > { %v1611_v35 = vsel %vm1274_vm3, %v813_v21, -inf  ;;  %v2119_v3 = vmax.f32 %v2117_v38, %v2118_v1  ;;  %v2132_v8 = vrot.slane %v2131_v46, 2  ;;  %v1078_v32 = vcombine.high %v555_v62, %v555_v62 }
 0x232   : > { %v2139_v41 = vrot.slane %v2138_v13, 2  ;;  %v1612_v30 = vrot.slane %v1611_v35, 4  ;;  %v2126_v48 = vmax.f32 %v2124_v49, %v2125_v4  ;;  %v822_v54 = vcombine.high %v820_v28, %v820_v28 }
 0x233   : > { %v1618_v55 = vsel %vm1274_vm3, %v821_v52, -inf  ;;  %v1625_v56 = vsel %vm1274_vm3, %v820_v28, -inf  ;;  %v2120_v23 = vrot.slane %v2119_v3, 1  ;;  %v2133_v51 = vmax.f32 %v2131_v46, %v2132_v8 }
 0x234   : > { %v2140_v12 = vmax.f32 %v2138_v13, %v2139_v41  ;;  %v1613_v26 = vmax.f32 %v1611_v35, %v1612_v30  ;;  %v2127_v2 = vrot.slane %v2126_v48, 1  ;;  %v1619_v5 = vrot.slane %v1618_v55, 4 }
 0x235   : > { %v1626_v16 = vrot.slane %v1625_v56, 4  ;;  %v1632_v39 = vsel %vm1274_vm3, %v822_v54, -inf  ;;  %v2134_v58 = vrot.slane %v2133_v51, 1  ;;  %v2251_v47 = vsel %vm2171_vm4, %v1687_v24, -inf }
 0x236   : > { %v2141_v17 = vrot.slane %v2140_v12, 1  ;;  %v1614_v7 = vrot.slane %v1613_v26, 2  ;;  %v1620_v40 = vmax.f32 %v1618_v55, %v1619_v5  ;;  %v1633_v43 = vrot.slane %v1632_v39, 4 }
 0x237   : > { %v1627_v18 = vmax.f32 %v1625_v56, %v1626_v16  ;;  %v2254_v20 = vsel %vm2171_vm4, %v1694_v50, -inf  ;;  %v2121_v25 = vmax.f32 %v2119_v3, %v2120_v23  ;;  %v2128_v22 = vmax.f32 %v2126_v48, %v2127_v2 }
 0x238   : > { %v1615_v63 = vmax.f32 %v1613_v26, %v1614_v7  ;;  %v1621_v53 = vrot.slane %v1620_v40, 2  ;;  %v1634_v10 = vmax.f32 %v1632_v39, %v1633_v43  ;;  %v4296_v36 = vmax.f32 %v2133_v51, %v2134_v58 }
 0x239   : > { %v1628_v34 = vrot.slane %v1627_v18, 2  ;;  %v4298_v45 = vmax.f32 %v2140_v12, %v2141_v17  ;;  %v1085_v11 = vrot.slane %v555_v62, %v3524_v27  ;;  %v1092_v42 = vrot.slane %v1078_v32, %v3524_v27 }
 0x23a   : > { %v1616_v61 = vrot.slane %v1615_v63, 1  ;;  %v1622_v9 = vmax.f32 %v1620_v40, %v1621_v53  ;;  %v1635_v29 = vrot.slane %v1634_v10, 2  ;;  %v4303_v6 = vsel %vm2171_vm4, %v2121_v25, -inf }
 0x23b   : > { %v1629_v31 = vmax.f32 %v1627_v18, %v1628_v34  ;;  %v1093_v15 = vcombine.high %v1085_v11, %v1085_v11  ;;  %v2059_v24 = vsel %vm1274_vm3, %v1085_v11, -inf  ;;  %v1094_v49 = vcombine.high %v1092_v42, %v1092_v42  ;;  %v3375_v11 = vpop.f32.mrf.mxu0 }
 0x23c   : > { %v1617_v14 = vmax.f32 %v1615_v63, %v1616_v61  ;;  %v1623_v38 = vrot.slane %v1622_v9, 1  ;;  %v1636_v60 = vmax.f32 %v1634_v10, %v1635_v29  ;;  %v2060_v21 = vrot.slane %v2059_v24, 4 }
 0x23d   : > { %v1630_v44 = vrot.slane %v1629_v31, 1  ;;  %v2066_v50 = vsel %vm1274_vm3, %v1093_v15, -inf  ;;  %v2073_v1 = vsel %vm1274_vm3, %v1092_v42, -inf  ;;  %v2080_v8 = vsel %vm1274_vm3, %v1094_v49, -inf }
 0x23e   : > { %v2244_v37 = vsel %vm2171_vm4, %v1617_v14, -inf  ;;  %v1624_v46 = vmax.f32 %v1622_v9, %v1623_v38  ;;  %v1637_v4 = vrot.slane %v1636_v60, 1  ;;  %v2061_v52 = vmax.f32 %v2059_v24, %v2060_v21 }
 0x23f   : > { %v1631_v13 = vmax.f32 %v1629_v31, %v1630_v44  ;;  %v2246_v28 = vmax.f32 %v2244_v37, %v4285_v19  ;;  %v2067_v35 = vrot.slane %v2066_v50, 4  ;;  %v2074_v3 = vrot.slane %v2073_v1, 4 }
 0x240   : > { %v1638_v41 = vmax.f32 %v1636_v60, %v1637_v4  ;;  %v2247_v30 = vsel %vm2171_vm4, %v1624_v46, -inf  ;;  %v2062_v23 = vrot.slane %v2061_v52, 2  ;;  %v2081_v62 = vrot.slane %v2080_v8, 4 }
 0x241   : > { %v2250_v48 = vsel %vm2171_vm4, %v1631_v13, -inf  ;;  %v2395_v54 = vadd.f32 %v4206_v57, %v2246_v28  ;;  %v2249_v55 = vmax.f32 %v2247_v30, %v2248_v33  ;;  %v2068_v51 = vmax.f32 %v2066_v50, %v2067_v35 }
 0x242   : > { %v2252_v56 = vmax.f32 %v2250_v48, %v2251_v47  ;;  %v2253_v12 = vsel %vm2171_vm4, %v1638_v41, -inf  ;;  %v2075_v19 = vmax.f32 %v2073_v1, %v2074_v3  ;;  %v2063_v39 = vmax.f32 %v2061_v52, %v2062_v23 }
 0x243   : > { %v2459_v26 = vmax.f32 %v2395_v54, 0.0  ;;  %v2255_v2 = vmax.f32 %v2253_v12, %v2254_v20  ;;  %v2396_v5 = vadd.f32 %v4206_v57, %v2249_v55  ;;  %v2069_v17 = vrot.slane %v2068_v51, 2 }
 0x244   : > { %v2397_v16 = vadd.f32 %v4206_v57, %v2252_v56  ;;  %v2076_v7 = vrot.slane %v2075_v19, 2  ;;  %v2082_v40 = vmax.f32 %v2080_v8, %v2081_v62  ;;  %v2064_v32 = vrot.slane %v2063_v39, 1 }
 0x245   : > { %v2530_v58 = vmul.f32 %v4218_v59, %v2459_v26  ;;  %v2398_v33 = vadd.f32 %v4206_v57, %v2255_v2  ;;  %v2460_v18 = vmax.f32 %v2396_v5, 0.0  ;;  %v2344_v47 = vsel %vm2171_vm4, %v2128_v22, -inf }
 0x246   : > { %v2461_v43 = vmax.f32 %v2397_v16, 0.0  ;;  %v2070_v25 = vmax.f32 %v2068_v51, %v2069_v17  ;;  %v2077_v63 = vmax.f32 %v2075_v19, %v2076_v7  ;;  %v2083_v20 = vrot.slane %v2082_v40, 2 }
 0x247   : > { %v2462_v53 = vmax.f32 %v2398_v33, 0.0  ;;  %v2531_v34 = vmul.f32 %v4218_v59, %v2460_v18  ;;  %v2065_v61 = vmax.f32 %v2063_v39, %v2064_v32  ;;  %v2601_v9 = vadd.f32 %v4226_v0, %v2530_v58 }
 0x248   : > { %v2532_v10 = vmul.f32 %v4218_v59, %v2461_v43  ;;  %v2071_v31 = vrot.slane %v2070_v25, 1  ;;  %v2078_v29 = vrot.slane %v2077_v63, 1  ;;  %v2084_v42 = vmax.f32 %v2082_v40, %v2083_v20 }
 0x249   : > { %v2533_v14 = vmul.f32 %v4218_v59, %v2462_v53  ;;  %v2602_v15 = vadd.f32 %v4226_v0, %v2531_v34  ;;  %v2340_v24 = vsel %vm2171_vm4, %v2065_v61, -inf  ;;  %v857_v49 = vcombine.high %v3375_v11, %v3375_v11 }
 0x24a   : > { %v2603_v22 = vadd.f32 %v4226_v0, %v2532_v10  ;;  %v2072_v38 = vmax.f32 %v2070_v25, %v2071_v31  ;;  %v2079_v44 = vmax.f32 %v2077_v63, %v2078_v29  ;;  %v2085_v60 = vrot.slane %v2084_v42, 1  ;;  %v3391_v31 = vpop.f32.mrf.mxu1 }
 0x24b   : > { %v2347_v37 = vsel %vm2171_vm4, %v4296_v36, -inf  ;;  %v2350_v21 = vsel %vm2171_vm4, %v4298_v45, -inf  ;;  %v3299_v50 = vpack.c.bf16 %v2602_v15, %v2602_v15  ;;  %v2342_v1 = vmax.f32 %v2340_v24, %v4303_v6 }
 0x24c   : > { %v2086_v46 = vmax.f32 %v2084_v42, %v2085_v60  ;;  %v2343_v13 = vsel %vm2171_vm4, %v2072_v38, -inf  ;;  %v2346_v4 = vsel %vm2171_vm4, %v2079_v44, -inf  ;;  %v864_v28 = vrot.slane %v3375_v11, %v3524_v27 }
 0x24d   : > { %v2604_v52 = vadd.f32 %v4226_v0, %v2533_v14  ;;  %v3298_v35 = vpack.c.bf16 %v2601_v9, %v2601_v9  ;;  %v3300_v3 = vpack.c.bf16 %v2603_v22, %v2603_v22  ;;  %v2345_v8 = vmax.f32 %v2343_v13, %v2344_v47 }
 0x24e   : > { %v2348_v41 = vmax.f32 %v2346_v4, %v2347_v37  ;;  %v2349_v36 = vsel %vm2171_vm4, %v2086_v46, -inf  ;;  %v2427_v45 = vadd.f32 %v4206_v57, %v2342_v1  ;;  %v871_v30 = vrot.slane %v857_v49, %v3524_v27 }
 0x24f   : > { %v2351_v6 = vmax.f32 %v2349_v36, %v2350_v21  ;;  %v2922_v48 = vunpack.c.l.b16 %v3299_v50  ;;  %v2428_v54 = vadd.f32 %v4206_v57, %v2345_v8  ;;  %v872_v56 = vcombine.high %v864_v28, %v864_v28 }
 0x250   : > { %v2429_v55 = vadd.f32 %v4206_v57, %v2348_v41  ;;  %v2921_v23 = vunpack.c.l.b16 %v3298_v35  ;;  %v2491_v12 = vmax.f32 %v2427_v45, 0.0  ;;  %v873_v26 = vcombine.high %v871_v30, %v871_v30 }
 0x251   : > { %v2430_v51 = vadd.f32 %v4206_v57, %v2351_v6  ;;  %v3301_v19 = vpack.c.bf16 %v2604_v52, %v2604_v52  ;;  %v2923_v62 = vunpack.c.l.b16 %v3300_v3  ;;  %v2492_v2 = vmax.f32 %v2428_v54, 0.0 }
 0x252   : > { %v2493_v5 = vmax.f32 %v2429_v55, 0.0  ;;  %v1695_v39 = vsel %vm1274_vm3, %v864_v28, -inf  ;;  %v1702_v58 = vsel %vm1274_vm3, %v872_v56, -inf  ;;  %v1709_v17 = vsel %vm1274_vm3, %v871_v30, -inf }
 0x253   : > { %v2494_v16 = vmax.f32 %v2430_v51, 0.0  ;;  %v3010_v7 = vrot.slane %v2922_v48, 7  ;;  %v2563_v40 = vmul.f32 %v4218_v59, %v2492_v2  ;;  %v1696_v18 = vrot.slane %v1695_v39, 4  ;;  %v494_v51 = vpop.f32.mrf.mxu0 }
 0x254   : > { %v2564_v33 = vmul.f32 %v4218_v59, %v2493_v5  ;;  %v2562_v43 = vmul.f32 %v4218_v59, %v2491_v12  ;;  %v1703_v32 = vrot.slane %v1702_v58, 4  ;;  %v1710_v47 = vrot.slane %v1709_v17, 4 }
 0x255   : > { %v1716_v25 = vsel %vm1274_vm3, %v873_v26, -inf  ;;  %v4349_v63 = vunpack.c.l.b16 %v3301_v19  ;;  %v2565_v20 = vmul.f32 %v4218_v59, %v2494_v16  ;;  %v2634_v53 = vadd.f32 %v4226_v0, %v2563_v40 }
 0x256   : > { %v1697_v34 = vmax.f32 %v1695_v39, %v1696_v18  ;;  %v2635_v10 = vadd.f32 %v4226_v0, %v2564_v33  ;;  %v1704_v61 = vmax.f32 %v1702_v58, %v1703_v32  ;;  %v1711_v11 = vmax.f32 %v1709_v17, %v1710_v47  ;;  %v558_v33 = vpop.f32.mrf.mxu1 }
 0x257   : > { %v1717_v9 = vrot.slane %v1716_v25, 4  ;;  %v3011_v29 = vsel %vm2962_vm5, %v3010_v7, %v2921_v23  ;;  %v3012_v42 = vrot.slane %v2923_v62, 6  ;;  %v3331_v14 = vpack.c.bf16 %v2634_v53, %v2634_v53 }
 0x258   : > { %v1698_v15 = vrot.slane %v1697_v34, 2  ;;  %v4356_v22 = vadd.f32 %v4226_v0, %v2562_v43  ;;  %v1705_v24 = vrot.slane %v1704_v61, 2  ;;  %v1712_v38 = vrot.slane %v1711_v11, 2 }
 0x259   : > { %v1718_v44 = vmax.f32 %v1716_v25, %v1717_v9  ;;  %v3014_v60 = vrot.slane %v4349_v63, 5  ;;  %v4360_v49 = vadd.f32 %v4226_v0, %v2565_v20  ;;  %v1129_v21 = vcombine.high %v3391_v31, %v3391_v31 }
 0x25a   : > { %v1699_v37 = vmax.f32 %v1697_v34, %v1698_v15  ;;  %v3332_v50 = vpack.c.bf16 %v2635_v10, %v2635_v10  ;;  %v1706_v1 = vmax.f32 %v1704_v61, %v1705_v24  ;;  %v1713_v46 = vmax.f32 %v1711_v11, %v1712_v38 }
 0x25b   : > { %v1719_v13 = vrot.slane %v1718_v44, 2  ;;  %v4363_v4 = vsel %vm2965_vm6, %v3012_v42, %v3011_v29  ;;  %v4365_v28 = vunpack.c.l.b16 %v3331_v14  ;;  %v1136_v35 = vrot.slane %v3391_v31, %v3524_v27 }
 0x25c   : > { %v1700_v52 = vrot.slane %v1699_v37, 1  ;;  %v3330_v3 = vpack.c.bf16 %v4356_v22, %v4356_v22  ;;  %v1707_v8 = vrot.slane %v1706_v1, 1  ;;  %v1714_v41 = vrot.slane %v1713_v46, 1 }
 0x25d   : > { %v1720_v36 = vmax.f32 %v1718_v44, %v1719_v13  ;;  %v3333_v45 = vpack.c.bf16 %v4360_v49, %v4360_v49  ;;  %v1143_v6 = vrot.slane %v1129_v21, %v3524_v27  ;;  %v1144_v48 = vcombine.high %v1136_v35, %v1136_v35 }
 0x25e   : > { %v1701_v30 = vmax.f32 %v1699_v37, %v1700_v52  ;;  %v4373_v54 = vunpack.c.l.b16 %v3332_v50  ;;  %v1708_v55 = vmax.f32 %v1706_v1, %v1707_v8  ;;  %v1715_v56 = vmax.f32 %v1713_v46, %v1714_v41 }
 0x25f   : > { %v1721_v23 = vrot.slane %v1720_v36, 1  ;;  %v3066_v12 = vrot.slane %v4365_v28, 7  ;;  %v1145_v26 = vcombine.high %v1143_v6, %v1143_v6  ;;  %v2143_v19 = vsel %vm1274_vm3, %v1136_v35, -inf }
 0x260   : > { %v2150_v62 = vsel %vm1274_vm3, %v1144_v48, -inf  ;;  %v4379_v5 = vsel %vm2171_vm4, %v1701_v30, -inf  ;;  %v4382_v16 = vsel %vm2171_vm4, %v1708_v55, -inf  ;;  %v2144_v39 = vrot.slane %v2143_v19, 4 }
 0x261   : > { %v1722_v2 = vmax.f32 %v1720_v36, %v1721_v23  ;;  %v2151_v58 = vrot.slane %v2150_v62, 4  ;;  %v2157_v17 = vsel %vm1274_vm3, %v1143_v6, -inf  ;;  %v2164_v7 = vsel %vm1274_vm3, %v1145_v26, -inf }
 0x262   : > { %v823_v40 = vcombine.high %v494_v51, %v494_v51  ;;  %v4387_v18 = vsel %vm2171_vm4, %v1715_v56, -inf  ;;  %v2145_v43 = vmax.f32 %v2143_v19, %v2144_v39  ;;  %v2158_v32 = vrot.slane %v2157_v17, 4 }
 0x263   : > { %v2165_v47 = vrot.slane %v2164_v7, 4  ;;  %v4390_v25 = vsel %vm2171_vm4, %v1722_v2, -inf  ;;  %v2152_v20 = vmax.f32 %v2150_v62, %v2151_v58  ;;  %v830_v53 = vrot.slane %v494_v51, %v3524_v27 }
 0x264   : > { %v837_v34 = vrot.slane %v823_v40, %v3524_v27  ;;  %v2146_v10 = vrot.slane %v2145_v43, 2  ;;  %v2159_v61 = vmax.f32 %v2157_v17, %v2158_v32  ;;  %v1095_v9 = vcombine.high %v558_v33, %v558_v33 }
 0x265   : > { %v2166_v11 = vmax.f32 %v2164_v7, %v2165_v47  ;;  %v2153_v31 = vrot.slane %v2152_v20, 2  ;;  %v838_v29 = vcombine.high %v830_v53, %v830_v53  ;;  %v1639_v14 = vsel %vm1274_vm3, %v830_v53, -inf }
 0x266   : > { %v839_v42 = vcombine.high %v837_v34, %v837_v34  ;;  %v2147_v15 = vmax.f32 %v2145_v43, %v2146_v10  ;;  %v2160_v24 = vrot.slane %v2159_v61, 2  ;;  %v1640_v44 = vrot.slane %v1639_v14, 4 }
 0x267   : > { %v2167_v38 = vrot.slane %v2166_v11, 2  ;;  %v2154_v37 = vmax.f32 %v2152_v20, %v2153_v31  ;;  %v1646_v21 = vsel %vm1274_vm3, %v838_v29, -inf  ;;  %v1653_v50 = vsel %vm1274_vm3, %v837_v34, -inf }
 0x268   : > { %v1660_v1 = vsel %vm1274_vm3, %v839_v42, -inf  ;;  %v2148_v46 = vrot.slane %v2147_v15, 1  ;;  %v2161_v13 = vmax.f32 %v2159_v61, %v2160_v24  ;;  %v1641_v35 = vmax.f32 %v1639_v14, %v1640_v44 }
 0x269   : > { %v2168_v52 = vmax.f32 %v2166_v11, %v2167_v38  ;;  %v2155_v8 = vrot.slane %v2154_v37, 1  ;;  %v1647_v41 = vrot.slane %v1646_v21, 4  ;;  %v1654_v36 = vrot.slane %v1653_v50, 4 }
 0x26a   : > { %v1661_v30 = vrot.slane %v1660_v1, 4  ;;  %v2149_v6 = vmax.f32 %v2147_v15, %v2148_v46  ;;  %v2162_v48 = vrot.slane %v2161_v13, 1  ;;  %v1642_v56 = vrot.slane %v1641_v35, 2 }
 0x26b   : > { %v2169_v55 = vrot.slane %v2168_v52, 1  ;;  %v2156_v23 = vmax.f32 %v2154_v37, %v2155_v8  ;;  %v1648_v51 = vmax.f32 %v1646_v21, %v1647_v41  ;;  %v1655_v26 = vmax.f32 %v1653_v50, %v1654_v36 }
 0x26c   : > { %v1662_v19 = vmax.f32 %v1660_v1, %v1661_v30  ;;  %v2163_v62 = vmax.f32 %v2161_v13, %v2162_v48  ;;  %v1643_v39 = vmax.f32 %v1641_v35, %v1642_v56  ;;  %v4402_v58 = vsel %vm2968_vm7, %v3014_v60, %v4363_v4 }
 0x26d   : > { %v2170_v2 = vmax.f32 %v2168_v52, %v2169_v55  ;;  %v4405_v17 = vsel %vm2171_vm4, %v2149_v6, -inf  ;;  %v1649_v7 = vrot.slane %v1648_v51, 2  ;;  %v1656_v40 = vrot.slane %v1655_v26, 2 }
 0x26e   : > { %v1663_v43 = vrot.slane %v1662_v19, 2  ;;  %v4408_v32 = vsel %vm2171_vm4, %v2156_v23, -inf  ;;  %v4411_v47 = vsel %vm2171_vm4, %v2163_v62, -inf  ;;  %v1644_v20 = vrot.slane %v1643_v39, 1 }
 0x26f   : > { %v1102_v53 = vrot.slane %v558_v33, %v3524_v27  ;;  %v1650_v34 = vmax.f32 %v1648_v51, %v1649_v7  ;;  %v1657_v63 = vmax.f32 %v1655_v26, %v1656_v40  ;;  %v1109_v60 = vrot.slane %v1095_v9, %v3524_v27 }
 0x270   : > { %v1664_v10 = vmax.f32 %v1662_v19, %v1663_v43  ;;  %v4416_v4 = vsel %vm2171_vm4, %v2170_v2, -inf  ;;  %v1645_v61 = vmax.f32 %v1643_v39, %v1644_v20 }
 0x271   : > { %v1110_v11 = vcombine.high %v1102_v53, %v1102_v53  ;;  %v2087_v31 = vsel %vm1274_vm3, %v1102_v53, -inf  ;;  %v1651_v29 = vrot.slane %v1650_v34, 1  ;;  %v1658_v42 = vrot.slane %v1657_v63, 1 }
 0x272   : > { %v1665_v14 = vrot.slane %v1664_v10, 1  ;;  %v1111_v15 = vcombine.high %v1109_v60, %v1109_v60  ;;  %v2256_v24 = vsel %vm2171_vm4, %v1645_v61, -inf  ;;  %v2088_v38 = vrot.slane %v2087_v31, 4 }
 0x273   : > { %v2094_v33 = vsel %vm1274_vm3, %v1110_v11, -inf  ;;  %v2101_v44 = vsel %vm1274_vm3, %v1109_v60, -inf  ;;  %v1652_v37 = vmax.f32 %v1650_v34, %v1651_v29  ;;  %v1659_v27 = vmax.f32 %v1657_v63, %v1658_v42 }
 0x274   : > { %v1666_v9 = vmax.f32 %v1664_v10, %v1665_v14  ;;  %v2258_v21 = vmax.f32 %v2256_v24, %v4379_v5  ;;  %v2089_v50 = vmax.f32 %v2087_v31, %v2088_v38  ;;  %v2095_v1 = vrot.slane %v2094_v33, 4 }
 0x275   : > { %v2102_v46 = vrot.slane %v2101_v44, 4  ;;  %v2108_v13 = vsel %vm1274_vm3, %v1111_v15, -inf  ;;  %v2259_v52 = vsel %vm2171_vm4, %v1652_v37, -inf  ;;  %v2262_v35 = vsel %vm2171_vm4, %v1659_v27, -inf }
 0x276   : > { %v2265_v8 = vsel %vm2171_vm4, %v1666_v9, -inf  ;;  %v2399_v41 = vadd.f32 %v4206_v57, %v2258_v21  ;;  %v2261_v36 = vmax.f32 %v2259_v52, %v4382_v16  ;;  %v2264_v30 = vmax.f32 %v2262_v35, %v4387_v18 }
 0x277   : > { %v2267_v6 = vmax.f32 %v2265_v8, %v4390_v25  ;;  %v2090_v5 = vrot.slane %v2089_v50, 2  ;;  %v2096_v55 = vmax.f32 %v2094_v33, %v2095_v1  ;;  %v2103_v56 = vmax.f32 %v2101_v44, %v2102_v46 }
 0x278   : > { %v2463_v48 = vmax.f32 %v2399_v41, 0.0  ;;  %v2109_v23 = vrot.slane %v2108_v13, 4  ;;  %v2400_v51 = vadd.f32 %v4206_v57, %v2261_v36  ;;  %v2401_v26 = vadd.f32 %v4206_v57, %v2264_v30 }
 0x279   : > { %v2402_v19 = vadd.f32 %v4206_v57, %v2267_v6  ;;  %v2091_v62 = vmax.f32 %v2089_v50, %v2090_v5  ;;  %v2097_v39 = vrot.slane %v2096_v55, 2  ;;  %v2104_v16 = vrot.slane %v2103_v56, 2 }
 0x27a   : > { %v2534_v2 = vmul.f32 %v4218_v59, %v2463_v48  ;;  %v2110_v7 = vmax.f32 %v2108_v13, %v2109_v23  ;;  %v2464_v18 = vmax.f32 %v2400_v51, 0.0  ;;  %v2465_v40 = vmax.f32 %v2401_v26, 0.0 }
 0x27b   : > { %v2466_v25 = vmax.f32 %v2402_v19, 0.0  ;;  %v2092_v43 = vrot.slane %v2091_v62, 1  ;;  %v2098_v53 = vmax.f32 %v2096_v55, %v2097_v39  ;;  %v2105_v34 = vmax.f32 %v2103_v56, %v2104_v16 }
 0x27c   : > { %v2605_v20 = vadd.f32 %v4226_v0, %v2534_v2  ;;  %v2111_v63 = vrot.slane %v2110_v7, 2  ;;  %v2535_v10 = vmul.f32 %v4218_v59, %v2464_v18  ;;  %v2536_v60 = vmul.f32 %v4218_v59, %v2465_v40 }
 0x27d   : > { %v2537_v61 = vmul.f32 %v4218_v59, %v2466_v25  ;;  %v2093_v11 = vmax.f32 %v2091_v62, %v2092_v43  ;;  %v2099_v29 = vrot.slane %v2098_v53, 1  ;;  %v2106_v42 = vrot.slane %v2105_v34, 1 }
 0x27e   : > { %v3302_v31 = vpack.c.bf16 %v2605_v20, %v2605_v20  ;;  %v2112_v14 = vmax.f32 %v2110_v7, %v2111_v63  ;;  %v2606_v15 = vadd.f32 %v4226_v0, %v2535_v10  ;;  %v2607_v24 = vadd.f32 %v4226_v0, %v2536_v60 }
 0x27f   : > { %v2608_v38 = vadd.f32 %v4226_v0, %v2537_v61  ;;  %v2352_v33 = vsel %vm2171_vm4, %v2093_v11, -inf  ;;  %v2100_v37 = vmax.f32 %v2098_v53, %v2099_v29  ;;  %v2107_v27 = vmax.f32 %v2105_v34, %v2106_v42 }
 0x280   : > { %v2925_v44 = vunpack.c.l.b16 %v3302_v31  ;;  %v2113_v9 = vrot.slane %v2112_v14, 1  ;;  %v3303_v21 = vpack.c.bf16 %v2606_v15, %v2606_v15  ;;  %v3304_v50 = vpack.c.bf16 %v2607_v24, %v2607_v24 }
 0x281   : > { %v3305_v1 = vpack.c.bf16 %v2608_v38, %v2608_v38  ;;  %v2354_v46 = vmax.f32 %v2352_v33, %v4405_v17  ;;  %v2355_v35 = vsel %vm2171_vm4, %v2100_v37, -inf  ;;  %v2358_v8 = vsel %vm2171_vm4, %v2107_v27, -inf }
 0x282   : > { %v3016_v13 = vrot.slane %v2925_v44, 4  ;;  %v2114_v52 = vmax.f32 %v2112_v14, %v2113_v9  ;;  %v2926_v41 = vunpack.c.l.b16 %v3303_v21  ;;  %v2927_v36 = vunpack.c.l.b16 %v3304_v50 }
 0x283   : > { %v2928_v30 = vunpack.c.l.b16 %v3305_v1  ;;  %v2357_v6 = vmax.f32 %v2355_v35, %v4408_v32  ;;  %v2360_v48 = vmax.f32 %v2358_v8, %v4411_v47  ;;  %v2431_v17 = vadd.f32 %v4206_v57, %v2354_v46 }
 0x284   : > { %v3017_v5 = vsel %vm2971_vm8, %v3016_v13, %v4402_v58  ;;  %v2361_v55 = vsel %vm2171_vm4, %v2114_v52, -inf  ;;  %v3018_v56 = vrot.slane %v2926_v41, 3  ;;  %v3020_v23 = vrot.slane %v2927_v36, 2 }
 0x285   : > { %v3022_v51 = vrot.slane %v2928_v30, 1  ;;  %v2363_v26 = vmax.f32 %v2361_v55, %v4416_v4  ;;  %v2953_v19 = vunpack.c.l.b16 %v3330_v3  ;;  %v2432_v32 = vadd.f32 %v4206_v57, %v2357_v6 }
 0x286   : > { %v2433_v62 = vadd.f32 %v4206_v57, %v2360_v48  ;;  %v2495_v58 = vmax.f32 %v2431_v17, 0.0  ;;  %v2956_v47 = vunpack.c.l.b16 %v3333_v45  ;;  %v3068_v2 = vrot.slane %v4373_v54, 6 }
 0x287   : > { %v3019_v39 = vsel %vm2974_vm9, %v3018_v56, %v3017_v5  ;;  %v2434_v4 = vadd.f32 %v4206_v57, %v2363_v26  ;;  %v2496_v22 = vmax.f32 %v2432_v32, 0.0  ;;  %v3067_v18 = vsel %vm2962_vm5, %v3066_v12, %v2953_v19 }
 0x288   : > { %v3021_v16 = vsel %vm2977_vm10, %v3020_v23, %v3019_v39  ;;  %v2497_v3 = vmax.f32 %v2433_v62, 0.0  ;;  %v2566_v7 = vmul.f32 %v4218_v59, %v2495_v58  ;;  %v3070_v43 = vrot.slane %v2956_v47, 5 }
 0x289   : > { %v3023_v49 = vsel %vm2980_vm11, %v3022_v51, %v3021_v16  ;;  %v2498_v45 = vmax.f32 %v2434_v4, 0.0  ;;  %v2567_v54 = vmul.f32 %v4218_v59, %v2496_v22  ;;  %v3069_v53 = vsel %vm2965_vm6, %v3068_v2, %v3067_v18 }
 0x28a   : > { %v3083_v40 = vpack.c.b16 %v3023_v49, %v3023_v49  ;;  %v2568_v25 = vmul.f32 %v4218_v59, %v2497_v3  ;;  %v2637_v57 = vadd.f32 %v4226_v0, %v2566_v7  ;;  %v3071_v31 = vsel %vm2968_vm7, %v3070_v43, %v3069_v53 }
 0x28b   : > { %v2569_v20 = vmul.f32 %v4218_v59, %v2498_v45  ;;  %v2638_v28 = vadd.f32 %v4226_v0, %v2567_v54 }
 0x28c   : > { %3100 = vst.msk [vmem:[%s3771_s12 + $0xc] sm:$0xf] %vm3096_vm12, %v3083_v40  ;;  %v2639_v12 = vadd.f32 %v4226_v0, %v2568_v25  ;;  %v3334_v34 = vpack.c.bf16 %v2637_v57, %v2637_v57 }
 0x28d   : > { %v2640_v63 = vadd.f32 %v4226_v0, %v2569_v20  ;;  %v3335_v10 = vpack.c.bf16 %v2638_v28, %v2638_v28 }
 0x28e   : > { %v3336_v60 = vpack.c.bf16 %v2639_v12, %v2639_v12  ;;  %v2957_v61 = vunpack.c.l.b16 %v3334_v34 }
 0x28f   : > { %v3337_v11 = vpack.c.bf16 %v2640_v63, %v2640_v63  ;;  %v2958_v29 = vunpack.c.l.b16 %v3335_v10 }
 0x290   : > { %v2959_v59 = vunpack.c.l.b16 %v3336_v60  ;;  %v3072_v42 = vrot.slane %v2957_v61, 4 }
 0x291   : > { %v2960_v14 = vunpack.c.l.b16 %v3337_v11  ;;  %v3074_v24 = vrot.slane %v2958_v29, 3 }
 0x292   : > { %v3073_v15 = vsel %vm2971_vm8, %v3072_v42, %v3071_v31  ;;  %v3076_v38 = vrot.slane %v2959_v59, 2 }
 0x293   : > { %v3078_v33 = vrot.slane %v2960_v14, 1  ;;  %v3075_v44 = vsel %vm2974_vm9, %v3074_v24, %v3073_v15 }
 0x294   : > { %v3077_v0 = vsel %vm2977_vm10, %v3076_v38, %v3075_v44 }
 0x295   : > { %v3079_v37 = vsel %vm2980_vm11, %v3078_v33, %v3077_v0 }
 0x296   : > { %v3087_v27 = vpack.c.b16 %v3079_v37, %v3079_v37 }
 0x298   : > { %3104 = vst.msk [vmem:[%s3771_s12 + $0x1c] sm:$0xf] %vm3096_vm12, %v3087_v27 }
 0x299 PF: > { %s15_s18 = sadd.s32 1, %s3436_s18  }
 0x29a   : > { %p12_p4 = scmp.ge.s32.totalorder %s15_s18, 4  }
 0x29c   :  { %14 = sbr.rel (!%p12_p4) target bundleno = 1 (0x1), region = 70 }

// kernel: deepfake_detector_forward.8
= control target key start
LH: loop header
LB: loop body
LE: loop exit
PB: predicated region body
PF: predicated region fallthrough
CT: control target
= control target key end

     0   :  { %s2279_s18 = smov 0   ;;  %s2971_s0 = inlined_call_operand.vmem [shape: bf16[2,10,10,64], index: 0, kind: input, shape index: {}]   ;;  %s2972_s1 = inlined_call_operand.vmem [shape: bf16[576,128], index: 1, kind: input, shape index: {}]   ;;  %s2973_s2 = inlined_call_operand.vmem [shape: f32[1,128], index: 2, kind: input, shape index: {}]   ;;  %s2974_s3 = inlined_call_operand.vmem [shape: f32[1,128], index: 3, kind: input, shape index: {}]   ;;  %s2975_s4 = inlined_call_operand.vmem [shape: f32[1,128], index: 4, kind: input, shape index: {}]   ;;  %s2976_s5 = inlined_call_operand.vmem [shape: bf16[2,4,4,128], index: 5, kind: output, shape index: {}]  }
   0x1 LB: > { %s1976_s19 = sadd.s32 4294967295, %s2245_s18   ;;  %p1980_p0 = scmp.ge.s32.totalorder %s2245_s18, 1  ;;  %s2245_s18 = sphi %s2279_s18, %s15_s18  }
   0x2   : > { %p187_p1 = scmp.lt.s32.totalorder %s2245_s18, 3 }
   0x4   : > { %p188_p2 = pnand %p1980_p0, %p187_p1 }
   0x5   : > { %p215_p3 = scmp.lt.s32.totalorder (!%p188_p2), %s1976_s19, 1  ;;  %s2247_s13 = smov (!%p188_p2), 64  }
   0x6   : > { %191 = sbr.rel (%p188_p2) target bundleno = 503 (0x1f7), region = 40 }
   0xb   : > { %s2982_s19 = smov (!%p215_p3, %s1976_s19), 1  ;;  %v2198_v0 = vld [vmem:[%s2972_s1 + $0x78] sm:$0xff]   ;;  %vm246_vm0 = vsmask.f32 3328  ;;  %vm247_vm1 = vsmask.f32 7440 }
   0xc   : > { %v2199_v1 = vld [vmem:[%s2972_s1 + $0xf8] sm:$0xff]   ;;  %s2183_s24 = smul.u32 80, %s2982_s19  ;;  %2071 = vmatprep.subr.bf16.mxu0 %v2198_v0  ;;  %v2202_v4 = vld [vmem:[%s2972_s1 + $0x70] sm:$0xff]   ;;  %vm377_vm2 = vcmask 1042432   ;;  %vm378_vm3 = vcmask 1046532   ;;  %vm2353_vm4 = vmor %vm246_vm0, %vm247_vm1  ;;  %vm535_vm6 = vcmask 523264  }
   0xd   : > { %v2200_v2 = vld [vmem:[%s2972_s1 + $0x38] sm:$0xff]   ;;  %2111 = vmatprep.subr.bf16.mxu1 %v2199_v1  ;;  %v2203_v34 = vld [vmem:[%s2972_s1 + $0xf0] sm:$0xff]   ;;  %vm2387_vm5 = vmor %vm377_vm2, %vm378_vm3  ;;  %vm1256_vm7 = vcmask 1041408   ;;  %vm1855_vm8 = vcmask 1041409   ;;  %vm1858_vm9 = vcmask 1042434   ;;  %vm1861_vm10 = vcmask 1043459  }
   0xe   : > { %v2201_v3 = vld [vmem:[%s2972_s1 + $0xb8] sm:$0xff]   ;;  %s2305_s6 = scalar_lea.vmem %s2971_s0, %s2183_s24  ;;  %2072 = vmatpush3.bf16.msra.mxu0 %v2200_v2  ;;  %v2204_v57 = vld [vmem:[%s2972_s1 + $0x30] sm:$0xff]   ;;  %v2224_v35 = vld [vmem:[%s2972_s1 + $0x8] sm:$0xff]   ;;  %s2070_s11 = sshll.u32 %s2982_s19, 3 }
   0xf   : > { %v2311_v5 = vld [vmem:[%s2305_s6 + $0x10] sm:$0xf]  ;;  %v2314_v6 = vld [vmem:[%s2305_s6 + $0x14] sm:$0x1]  ;;  %v2317_v7 = vld [vmem:[%s2305_s6 + $0x18] sm:$0xf]  ;;  %2112 = vmatpush3.bf16.msra.mxu1 %v2201_v3  ;;  %2073 = vmatprep.subr.bf16.mxu0 %v2202_v4  ;;  %s2874_s19 = scalar_lea.vmem %s2976_s5, %s2070_s11 }
  0x10   : > { %v2320_v8 = vld [vmem:[%s2305_s6 + $0x1c] sm:$0x1]  ;;  %v2323_v9 = vld [vmem:[%s2305_s6 + $0x20] sm:$0xf]  ;;  %v2326_v10 = vld [vmem:[%s2305_s6 + $0x24] sm:$0x1]  ;;  %2113 = vmatprep.subr.bf16.mxu1 %v2203_v34 }
  0x11   : > { %v278_v11 = vshrl.u32 %v2311_v5, 16  ;;  %v281_v12 = vshll.u32 %v2311_v5, 16  ;;  %v287_v13 = vshll.u32 %v2314_v6, 16  ;;  %v292_v14 = vshrl.u32 %v2317_v7, 16  ;;  %v2333_v15 = vld [vmem:[%s2305_s6] sm:$0xf] }
  0x12   : > { %v295_v16 = vshll.u32 %v2317_v7, 16  ;;  %v301_v17 = vshll.u32 %v2320_v8, 16  ;;  %v306_v18 = vshrl.u32 %v2323_v9, 16  ;;  %v309_v19 = vshll.u32 %v2323_v9, 16  ;;  %v2340_v20 = vld [vmem:[%s2305_s6 + $0x4] sm:$0x1]  ;;  %2074 = vmatpush3.bf16.msra.mxu0 %v2204_v57 }
  0x13   : > { %v280_v21 = vrot.slane %v278_v11, 4  ;;  %v283_v22 = vrot.slane %v281_v12, 5  ;;  %v289_v23 = vrot.slane %v287_v13, 5  ;;  %v294_v24 = vrot.slane %v292_v14, 4  ;;  %v2343_v25 = vld [vmem:[%s2305_s6 + $0x8] sm:$0xf] }
  0x14   : > { %v297_v26 = vrot.slane %v295_v16, 5  ;;  %v303_v27 = vrot.slane %v301_v17, 5  ;;  %v308_v28 = vrot.slane %v306_v18, 4  ;;  %v311_v29 = vrot.slane %v309_v19, 5  ;;  %v229_v38 = vld [vmem:[%s2305_s6 + $0xc] sm:$0x1] }
  0x15   : > { %v284_v30 = vor.u32 %v283_v22, %v280_v21  ;;  %v315_v31 = vshll.u32 %v2326_v10, 16  ;;  %v250_v32 = vshrl.u32 %v2333_v15, 16  ;;  %v253_v33 = vshll.u32 %v2333_v15, 16  ;;  %v2376_v56 = vld [vmem:[%s2305_s6 + $0x28] sm:$0xf]  ;;  %v2226_v62 = vld [vmem:[%s2972_s1 + $0x40] sm:$0xff]  }
  0x16   : > { %v298_v36 = vor.u32 %v297_v26, %v294_v24  ;;  %v312_v37 = vor.u32 %v311_v29, %v308_v28  ;;  %v259_v39 = vshll.u32 %v2340_v20, 16  ;;  %v264_v40 = vshrl.u32 %v2343_v25, 16  ;;  %v2392_v63 = vld [vmem:[%s2305_s6 + $0x2c] sm:$0x1]  ;;  %v2409_v19 = vld [vmem:[%s2305_s6 + $0x30] sm:$0xf] }
  0x17   : > { %v285_v41 = vrot.slane %v284_v30, 4  ;;  %v317_v42 = vrot.slane %v315_v31, 5  ;;  %v252_v43 = vrot.slane %v250_v32, 4  ;;  %v255_v44 = vrot.slane %v253_v33, 5  ;;  %v2412_v21 = vld [vmem:[%s2305_s6 + $0x34] sm:$0x1] }
  0x18   : > { %v299_v45 = vrot.slane %v298_v36, 4  ;;  %v313_v46 = vrot.slane %v312_v37, 4  ;;  %v261_v47 = vrot.slane %v259_v39, 5  ;;  %v266_v48 = vrot.slane %v264_v40, 4  ;;  %v2206_v28 = vld [vmem:[%s2972_s1 + $0x68] sm:$0xff]  }
  0x19   : > { %v2362_v49 = vsel %vm2353_vm4, %v285_v41, %v289_v23  ;;  %v256_v50 = vor.u32 %v255_v44, %v252_v43  ;;  %v267_v51 = vshll.u32 %v2343_v25, 16  ;;  %v273_v52 = vshll.u32 %v229_v38, 16  ;;  %v2428_v32 = vld [vmem:[%s2305_s6 + $0x3c] sm:$0x1]  ;;  %v2207_v33 = vld [vmem:[%s2972_s1 + $0xe8] sm:$0xff]   ;;  %2075 = vmatprep.subr.bf16.mxu0 %v2206_v28 }
  0x1a   : > { %v2367_v53 = vsel %vm2353_vm4, %v299_v45, %v303_v27  ;;  %v2371_v54 = vsel %vm2353_vm4, %v313_v46, %v317_v42  ;;  %v2006_v55 = vcombine.low %v2343_v25, %v2311_v5  ;;  %v1985_v1 = vrot.slane %v2343_v25, 9  ;;  %v2421_v27 = vld [vmem:[%s2305_s6 + $0x38] sm:$0xf]  ;;  %v2209_v46 = vld [vmem:[%s2972_s1 + $0xa8] sm:$0xff]  }
  0x1b   : > { %v1999_v58 = vcombine.low %v2362_v49, %v2367_v53  ;;  %v2011_v59 = vcombine.low %v2367_v53, %v2371_v54  ;;  %v257_v60 = vrot.slane %v256_v50, 4  ;;  %v269_v61 = vrot.slane %v267_v51, 5  ;;  %v245_v28 = vld [vmem:[%s2305_s6 + $0x4c] sm:$0x1] }
  0x1c   : > { %v275_v0 = vrot.slane %v273_v52, 5  ;;  %v386_v2 = vrot.slane %v229_v38, 5  ;;  %v1986_v3 = vrot.slane %v2311_v5, 9  ;;  %v390_v12 = vrot.slane %v2314_v6, 5  ;;  %v2205_v6 = vld [vmem:[%s2972_s1 + $0xb0] sm:$0xff]   ;;  %v2208_v38 = vld [vmem:[%s2972_s1 + $0x28] sm:$0xff]  }
  0x1d   : > { %478 = vrot.lane.b32.xlu0 %v1999_v58, %s2247_s13  ;;  %v262_v4 = vsel %vm2353_vm4, %v257_v60, %v261_v47  ;;  %v270_v11 = vor.u32 %v269_v61, %v266_v48  ;;  %v320_v13 = vshrl.u32 %v2376_v56, 16  ;;  %v323_v16 = vshll.u32 %v2376_v56, 16  ;;  %2114 = vmatpush3.bf16.msra.mxu1 %v2205_v6  ;;  %v2467_v52 = vld [vmem:[%s2305_s6 + $0x40] sm:$0xf] }
  0x1e   : > { %v2403_v14 = vsel %vm2387_vm5, %v1985_v1, %v386_v2  ;;  %v329_v17 = vshll.u32 %v2392_v63, 16  ;;  %v1987_v18 = vrot.slane %v2317_v7, 9  ;;  %v391_v23 = vsel %vm2387_vm5, %v1986_v3, %v390_v12  ;;  %2115 = vmatprep.subr.bf16.mxu1 %v2207_v33  ;;  %2076 = vmatpush3.bf16.msra.mxu0 %v2208_v38 }
  0x1f   : > { %v271_v22 = vrot.slane %v270_v11, 4  ;;  %v322_v24 = vrot.slane %v320_v13, 4  ;;  %v394_v26 = vrot.slane %v2320_v8, 5  ;;  %v325_v29 = vrot.slane %v323_v16, 5 }
  0x20   : > { %v331_v30 = vrot.slane %v329_v17, 5  ;;  %v1988_v31 = vrot.slane %v2323_v9, 9  ;;  %v2014_v34 = vcombine.low %v2403_v14, %v391_v23  ;;  %v398_v37 = vrot.slane %v2326_v10, 5  ;;  %v2211_v17 = vld [vmem:[%s2972_s1 + $0xe0] sm:$0xff]  }
  0x21   : > { %v2435_v8 = vsel %vm2353_vm4, %v271_v22, %v275_v0  ;;  %501 = vrot.lane.b32.xlu0 %v2006_v55, %s2247_s13  ;;  %v2441_v36 = vsel %vm2387_vm5, %v1987_v18, %v394_v26  ;;  %v326_v41 = vor.u32 %v325_v29, %v322_v24  ;;  %v334_v10 = vshrl.u32 %v2409_v19, 16  ;;  %v2210_v55 = vld [vmem:[%s2972_s1 + $0x60] sm:$0xff]   ;;  %2116 = vmatpush3.bf16.msra.mxu1 %v2209_v46  ;;  %v2495_v26 = vld [vmem:[%s2305_s6 + $0x48] sm:$0xf] }
  0x22   : > { %v1998_v39 = vcombine.low %v262_v4, %v2435_v8  ;;  %v2010_v40 = vcombine.low %v2435_v8, %v2362_v49  ;;  %v2451_v42 = vcombine.low %v391_v23, %v2441_v36  ;;  %v399_v43 = vsel %vm2387_vm5, %v1988_v31, %v398_v37  ;;  %v2474_v0 = vld [vmem:[%s2305_s6 + $0x44] sm:$0x1]  ;;  %2077 = vmatprep.subr.bf16.mxu0 %v2210_v55 }
  0x23   : > { %v337_v44 = vshll.u32 %v2409_v19, 16  ;;  %v343_v45 = vshll.u32 %v2412_v21, 16  ;;  %v327_v47 = vrot.slane %v326_v41, 4  ;;  %v2007_v48 = vcombine.low %v2317_v7, %v2323_v9  ;;  %v2212_v18 = vld [vmem:[%s2972_s1 + $0x20] sm:$0xff]   ;;  %2117 = vmatprep.subr.bf16.mxu1 %v2211_v17 }
  0x24   : > { %476 = vrot.lane.b32.xlu1 %v1998_v39, %s2247_s13  ;;  %v348_v50 = vshrl.u32 %v2421_v27, 16  ;;  %v351_v51 = vshll.u32 %v2421_v27, 16  ;;  %v336_v57 = vrot.slane %v334_v10, 4  ;;  %v357_v61 = vshll.u32 %v2428_v32, 16  ;;  %v2213_v29 = vld [vmem:[%s2972_s1 + $0xa0] sm:$0xff]   ;;  %2078 = vmatpush3.bf16.msra.mxu0 %v2212_v18 }
  0x25   : > { %v339_v58 = vrot.slane %v337_v44, 5  ;;  %v345_v60 = vrot.slane %v343_v45, 5  ;;  %v2478_v1 = vsel %vm2353_vm4, %v327_v47, %v331_v30  ;;  %v2015_v2 = vcombine.low %v2441_v36, %v399_v43  ;;  %2118 = vmatpush3.bf16.msra.mxu1 %v2213_v29  ;;  %v2215_v45 = vld [vmem:[%s2972_s1 + $0xd8] sm:$0xff]   ;;  %v2238_v49 = vld [vmem:[%s2972_s1 + $0x100] sm:$0xff]  }
  0x26   : > { %v350_v3 = vrot.slane %v348_v50, 4  ;;  %v353_v4 = vrot.slane %v351_v51, 5  ;;  %v2000_v11 = vcombine.low %v2371_v54, %v2478_v1  ;;  %v359_v13 = vrot.slane %v357_v61, 5  ;;  %2119 = vmatprep.subr.bf16.mxu1 %v2215_v45 }
  0x27   : > { %v340_v12 = vor.u32 %v339_v58, %v336_v57  ;;  %v1989_v16 = vrot.slane %v2376_v56, 9  ;;  %v402_v22 = vrot.slane %v2392_v63, 5  ;;  %v1990_v23 = vrot.slane %v2409_v19, 9 }
  0x28   : > { %519 = vrot.lane.b32.xlu1 %v2014_v34, %s2247_s13  ;;  %v354_v6 = vor.u32 %v353_v4, %v350_v3  ;;  %v406_v24 = vrot.slane %v2412_v21, 5  ;;  %480 = vrot.lane.b32.xlu0 %v2000_v11, %s2247_s13  ;;  %v2008_v31 = vcombine.low %v2376_v56, %v2409_v19  ;;  %v413_v33 = vshrl.u32 %v2467_v52, 16  ;;  %v2214_v21 = vld [vmem:[%s2972_s1 + $0x58] sm:$0xff]  }
  0x29   : > { %v341_v30 = vrot.slane %v340_v12, 4  ;;  %v416_v63 = vshll.u32 %v2467_v52, 16  ;;  %v403_v36 = vsel %vm2387_vm5, %v1989_v16, %v402_v22  ;;  %v422_v38 = vshll.u32 %v2474_v0, 16  ;;  %2079 = vmatprep.subr.bf16.mxu0 %v2214_v21  ;;  %v2217_v4 = vld [vmem:[%s2972_s1 + $0x98] sm:$0xff]   ;;  %v2218_v22 = vld [vmem:[%s2972_s1 + $0x50] sm:$0xff]  }
  0x2a   : > { %v355_v34 = vrot.slane %v354_v6, 4  ;;  %v407_v37 = vsel %vm2387_vm5, %v1990_v23, %v406_v24  ;;  %v2518_v41 = vcombine.low %v399_v43, %v403_v36  ;;  %v415_v44 = vrot.slane %v413_v33, 4  ;;  %2120 = vmatpush3.bf16.msra.mxu1 %v2217_v4  ;;  %v2220_v21 = vld [vmem:[%s2972_s1 + $0x10] sm:$0xff]  }
  0x2b   : > { %v2516_v39 = vsel %vm2353_vm4, %v341_v30, %v345_v60  ;;  %v2016_v10 = vcombine.low %v403_v36, %v407_v37  ;;  %v418_v50 = vrot.slane %v416_v63, 5  ;;  %v424_v51 = vrot.slane %v422_v38, 5  ;;  %v2219_v63 = vld [vmem:[%s2972_s1 + $0xd0] sm:$0xff]  }
  0x2c   : > { %503 = vrot.lane.b32.xlu1 %v2007_v48, %s2247_s13  ;;  %v2526_v46 = vsel %vm2353_vm4, %v355_v34, %v359_v13  ;;  %v2012_v47 = vcombine.low %v2478_v1, %v2516_v39  ;;  %521 = vrot.lane.b32.xlu0 %v2015_v2, %s2247_s13  ;;  %v433_v55 = vshrl.u32 %v2495_v26, 16  ;;  %v436_v57 = vshll.u32 %v2495_v26, 16  ;;  %v2216_v48 = vld [vmem:[%s2972_s1 + $0x18] sm:$0xff]   ;;  %v2221_v36 = vld [vmem:[%s2972_s1 + $0x90] sm:$0xff]  }
  0x2d   : > { %v2001_v43 = vcombine.low %v2516_v39, %v2526_v46  ;;  %v442_v58 = vshll.u32 %v245_v28, 16  ;;  %v419_v60 = vor.u32 %v418_v50, %v415_v44  ;;  %v1991_v61 = vrot.slane %v2421_v27, 9  ;;  %2080 = vmatpush3.bf16.msra.mxu0 %v2216_v48  ;;  %2121 = vmatprep.subr.bf16.mxu1 %v2219_v63  ;;  %v2234_v4 = vld [vmem:[%s2972_s1 + $0x110] sm:$0xff]  }
  0x2e   : > { %v410_v3 = vrot.slane %v2428_v32, 5  ;;  %v1992_v2 = vrot.slane %v2467_v52, 9  ;;  %v435_v11 = vrot.slane %v433_v55, 4  ;;  %v438_v12 = vrot.slane %v436_v57, 5  ;;  %2081 = vmatprep.subr.bf16.mxu0 %v2218_v22  ;;  %2122 = vmatpush3.bf16.msra.mxu1 %v2221_v36  ;;  %v2227_v55 = vld [vmem:[%s2972_s1 + $0xc0] sm:$0xff]  }
  0x2f   : > { %v444_v13 = vrot.slane %v442_v58, 5  ;;  %v430_v16 = vrot.slane %v2474_v0, 5  ;;  %v420_v17 = vrot.slane %v419_v60, 4  ;;  %v1993_v32 = vrot.slane %v2495_v26, 9  ;;  %v2230_v57 = vld [vmem:[%s2972_s1 + $0x80] sm:$0xff]   ;;  %v2231_v58 = vld [vmem:[%s2972_s1 + $0x118] sm:$0xff]  }
  0x30   : > { %482 = vrot.lane.b32.xlu1 %v2001_v43, %s2247_s13  ;;  %v411_v18 = vsel %vm2387_vm5, %v1991_v61, %v410_v3  ;;  %v450_v6 = vrot.slane %v245_v28, 5  ;;  %505 = vrot.lane.b32.xlu0 %v2008_v31, %s2247_s13  ;;  %v2009_v0 = vcombine.low %v2421_v27, %v2467_v52  ;;  %v439_v23 = vor.u32 %v438_v12, %v435_v11  ;;  %v2225_v43 = vld [vmem:[%s2972_s1 + $0x88] sm:$0xff]  }
  0x31   : > { %v2555_v24 = vcombine.low %v407_v37, %v411_v18  ;;  %v1995_v29 = vcombine.low %v2311_v5, %v2317_v7  ;;  %v382_v30 = vrot.slane %v2340_v20, 5  ;;  %v2562_v28 = vsel %vm2353_vm4, %v420_v17, %v424_v51  ;;  %2082 = vmatpush3.bf16.msra.mxu0 %v2220_v21  ;;  %v2236_v17 = vld [vmem:[%s2972_s1 + $0x108] sm:$0xff]  }
  0x32   : > { %v2566_v33 = vsel %vm2387_vm5, %v1992_v2, %v430_v16  ;;  %v2570_v31 = vsel %vm2387_vm5, %v1993_v32, %v450_v6  ;;  %v440_v5 = vrot.slane %v439_v23, 4  ;;  %v2013_v7 = vcombine.low %v2526_v46, %v2562_v28 }
  0x33   : > { %v2020_v20 = vcombine.low %v2566_v33, %v2570_v31  ;;  %v1994_v34 = vcombine.low %v2333_v15, %v2343_v25  ;;  %v1984_v37 = vrot.slane %v2333_v15, 9  ;;  %v1996_v38 = vcombine.low %v2323_v9, %v2376_v56  ;;  %v2222_v15 = vld [vmem:[%s2972_s1 + $0x48] sm:$0xff]  }
  0x34   : > { %523 = vrot.lane.b32.xlu1 %v2016_v10, %s2247_s13  ;;  %v1997_v44 = vcombine.low %v2409_v19, %v2421_v27  ;;  %v2018_v45 = vcombine.low %v2467_v52, %v2495_v26  ;;  %507 = vrot.lane.b32.xlu0 %v2009_v0, %s2247_s13  ;;  %v445_v25 = vsel %vm2353_vm4, %v440_v5, %v444_v13  ;;  %v2223_v56 = vld [vmem:[%s2972_s1 + $0xc8] sm:$0xff]  }
  0x35   : > { %v2017_v10 = vcombine.low %v411_v18, %v2566_v33  ;;  %v2019_v9 = vcombine.low %v2562_v28, %v445_v25  ;;  %v383_v50 = vsel %vm2387_vm5, %v1984_v37, %v382_v30  ;;  %2083 = vmatprep.subr.bf16.mxu0 %v2222_v15  ;;  %2123 = vmatprep.subr.bf16.mxu1 %v2223_v56 }
  0x36   : > { %v2002_v51 = vcombine.low %v383_v50, %v2403_v14  ;;  %2084 = vmatpush3.bf16.msra.mxu0 %v2224_v35  ;;  %2124 = vmatpush3.bf16.msra.mxu1 %v2225_v43  ;;  %v2229_v14 = vld [vmem:[%s2972_s1] sm:$0xff]   ;;  %v2248_v43 = vmov 1983009808  }
  0x37   : > { %2085 = vmatprep.subr.bf16.mxu0 %v2226_v62  ;;  %2125 = vmatprep.subr.bf16.mxu1 %v2227_v55  ;;  %v1090_v62 = vunpack.c.l.s4 %v2248_v43  ;;  %v1092_v55 = vlaneseq }
  0x38   : > { %531 = vrot.lane.b32.xlu1 %v2019_v9, %s2247_s13  ;;  %525 = vrot.lane.b32.xlu0 %v2017_v10, %s2247_s13 }
  0x3a   : > { %2086 = vmatpush3.bf16.msra.mxu0 %v2229_v14  ;;  %2126 = vmatpush3.bf16.msra.mxu1 %v2230_v57 }
  0x3b   : > { %2159 = vmatprep.subr.bf16.mxu0 %v2231_v58  ;;  %2175 = vmatprep.subr.bf16.mxu1 %v2231_v58 }
  0x8f   : > { %v479_v48 = vpop.permute.xlu0 %478 }
  0x90   : > { %v542_v60 = vsel %vm535_vm6, %v1995_v29, %v479_v48 }
  0x91   : > { %982 = vmatprep.mubr.bf16.mxu1 %v542_v60 }
  0x93   : > { %v502_v61 = vpop.permute.xlu0 %501 }
  0x94   : > { %v554_v3 = vsel %vm535_vm6, %v2002_v51, %v502_v61 }
  0x95   : > { %917 = vmatprep.mubr.bf16.mxu0 %v554_v3  ;;  %v1091_v3 = vunpack.c.0.s8 %v1090_v62 }
  0x96   : > { %v477_v2 = vpop.permute.xlu1 %476 }
  0x97   : > { %v538_v11 = vsel %vm535_vm6, %v1994_v34, %v477_v2  ;;  %v1093_v2 = vshrl.u32 %v1092_v55, 7 }
  0x98   : > { %918 = vmatmul.mubr.bf16.vlgmr.msra.gmra.mxu0 %v538_v11 }
  0x99   : > { %2160 = vmatpush3.bf16.msra.mxu0 %v2231_v58 }
  0x9a   : > { %v520_v12 = vpop.permute.xlu1 %519  ;;  %2161 = vmatprep.subr.bf16.mxu0 %v2234_v4  ;;  %v481_v16 = vpop.permute.xlu0 %480 }
  0x9b   : > { %v570_v13 = vsel %vm535_vm6, %v2010_v40, %v520_v12  ;;  %v546_v18 = vsel %vm535_vm6, %v1996_v38, %v481_v16 }
  0x9c   : > { %983 = vmatmul.mubr.bf16.vlgmr.msra.gmra.mxu1 %v570_v13 }
  0x9d   : > { %2179 = vmatpush3.bf16.msra.mxu1 %v2231_v58  ;;  %990 = vmatprep.mubr.bf16.mxu1 %v546_v18 }
  0x9e   : > { %v504_v32 = vpop.permute.xlu1 %503  ;;  %2176 = vmatprep.subr.bf16.mxu1 %v2234_v4  ;;  %2162 = vmatpush3.bf16.msra.mxu0 %v2234_v4  ;;  %v522_v6 = vpop.permute.xlu0 %521 }
  0x9f   : > { %v558_v22 = vsel %vm535_vm6, %v2451_v42, %v504_v32  ;;  %2163 = vmatprep.subr.bf16.mxu0 %v2236_v17  ;;  %v574_v8 = vsel %vm535_vm6, %v2011_v59, %v522_v6  ;;  %v2687_v6 = vsub.s32 %v1091_v3, %v1093_v2 }
  0xa0   : > { %925 = vmatprep.mubr.bf16.mxu0 %v558_v22 }
  0xa1   : > { %926 = vmatmul.mubr.bf16.gmra.mxu0 %v542_v60  ;;  %2180 = vmatpush3.bf16.msra.mxu1 %v2234_v4 }
  0xa2   : > { %v483_v40 = vpop.permute.xlu1 %482  ;;  %2177 = vmatprep.subr.bf16.mxu1 %v2236_v17  ;;  %2164 = vmatpush3.bf16.msra.mxu0 %v2236_v17  ;;  %v506_v23 = vpop.permute.xlu0 %505 }
  0xa3   : > { %v550_v0 = vsel %vm535_vm6, %v1997_v44, %v483_v40  ;;  %2165 = vmatprep.subr.bf16.mxu0 %v2238_v49  ;;  %v562_v29 = vsel %vm535_vm6, %v2518_v41, %v506_v23 }
  0xa4   : > { %991 = vmatmul.mubr.bf16.gmra.mxu1 %v574_v8  ;;  %933 = vmatprep.mubr.bf16.mxu0 %v562_v29 }
  0xa5   : > { %998 = vmatprep.mubr.bf16.mxu1 %v550_v0  ;;  %2181 = vmatpush3.bf16.msra.mxu1 %v2236_v17 }
  0xa6   : > { %v524_v53 = vpop.permute.xlu1 %523  ;;  %2166 = vmatpush3.bf16.msra.mxu0 %v2238_v49  ;;  %v508_v54 = vpop.permute.xlu0 %507  ;;  %2178 = vmatprep.subr.bf16.mxu1 %v2238_v49 }
  0xa7   : > { %v566_v59 = vsel %vm535_vm6, %v2555_v24, %v508_v54  ;;  %v578_v19 = vsel %vm535_vm6, %v2012_v47, %v524_v53 }
  0xa9   : > { %934 = vmatmul.mubr.bf16.gmra.mxu0 %v546_v18  ;;  %2182 = vmatpush3.bf16.msra.mxu1 %v2238_v49 }
  0xaa   : > { %941 = vmatprep.mubr.bf16.mxu0 %v566_v59  ;;  %v532_v27 = vpop.permute.xlu1 %531  ;;  %v526_v63 = vpop.permute.xlu0 %525 }
  0xab   : > { %v586_v30 = vsel %vm535_vm6, %v2018_v45, %v532_v27  ;;  %v582_v5 = vsel %vm535_vm6, %v2013_v7, %v526_v63 }
  0xac   : > { %999 = vmatmul.mubr.bf16.gmra.mxu1 %v578_v19 }
  0xad   : > { %1006 = vmatprep.mubr.bf16.mxu1 %v586_v30 }
  0xb1   : > { %942 = vmatmul.mubr.bf16.gmra.mxu0 %v550_v0 }
  0xb2   : > { %2167 = vmatprep.mubr.msk.bf16.mxu0 %vm535_vm6, %v2451_v42 }
  0xb4   : > { %1007 = vmatmul.mubr.bf16.gmra.mxu1 %v582_v5 }
  0xb5   : > { %2171 = vmatprep.mubr.msk.bf16.mxu1 %vm535_vm6, %v2555_v24 }
  0xb9   : > { %2168 = vmatmul.mubr.msk.bf16.vlgmr.msra.gmra.mxu0 %vm535_vm6, %v2518_v41 }
  0xbc   : > { %2172 = vmatmul.mubr.msk.bf16.vlgmr.msra.gmra.mxu1 %vm535_vm6, %v2020_v20 }
 0x158   : > { %v2087_v52 = vpop.f32.mrf.mxu0 }
 0x15a   : > { %v2088_v1 = vpop.f32.mrf.mxu0 }
 0x15b   : > { %v2089_v26 = vadd.f32 %v2088_v1, %v2087_v52 }
 0x15c   : > { %v2127_v39 = vpop.f32.mrf.mxu1  ;;  %v2090_v46 = vpop.f32.mrf.mxu0 }
 0x15e   : > { %v2128_v47 = vpop.f32.mrf.mxu1  ;;  %v2091_v28 = vpop.f32.mrf.mxu0 }
 0x15f   : > { %v2129_v42 = vadd.f32 %v2128_v47, %v2127_v39  ;;  %v2092_v7 = vadd.f32 %v2091_v28, %v2090_v46 }
 0x160   : > { %v2130_v21 = vpop.f32.mrf.mxu1 }
 0x161   : > { %v2093_v34 = vpop.f32.mrf.mxu0  ;;  %v985_v24 = vadd.f32 %v2129_v42, %v2089_v26 }
 0x162   : > { %v2131_v36 = vpop.f32.mrf.mxu1 }
 0x163   : > { %v2132_v37 = vadd.f32 %v2131_v36, %v2130_v21  ;;  %v2094_v41 = vpop.f32.mrf.mxu0 }
 0x164   : > { %v2133_v38 = vpop.f32.mrf.mxu1  ;;  %v2095_v60 = vadd.f32 %v2094_v41, %v2093_v34 }
 0x165   : > { %v2096_v44 = vpop.f32.mrf.mxu0  ;;  %v2685_v33 = vadd.f32 %v2132_v37, %v2092_v7 }
 0x166   : > { %v2134_v31 = vpop.f32.mrf.mxu1 }
 0x167   : > { %v2097_v20 = vpop.f32.mrf.mxu0  ;;  %v2135_v48 = vadd.f32 %v2134_v31, %v2133_v38 }
 0x168   : > { %v2136_v45 = vpop.f32.mrf.mxu1  ;;  %v2098_v18 = vadd.f32 %v2097_v20, %v2096_v44 }
 0x169   : > { %v2099_v25 = vpop.f32.mrf.mxu0  ;;  %v993_v22 = vadd.f32 %v2135_v48, %v2095_v60 }
 0x16a   : > { %v2137_v10 = vpop.f32.mrf.mxu1 }
 0x16b   : > { %v2100_v15 = vpop.f32.mrf.mxu0  ;;  %v2138_v17 = vadd.f32 %v2137_v10, %v2136_v45 }
 0x16c   : > { %v2139_v9 = vpop.f32.mrf.mxu1  ;;  %v2101_v8 = vadd.f32 %v2100_v15, %v2099_v25 }
 0x16d   : > { %v2102_v56 = vpop.f32.mrf.mxu0  ;;  %v2692_v30 = vadd.f32 %v2138_v17, %v2098_v18 }
 0x16e   : > { %v2140_v50 = vpop.f32.mrf.mxu1 }
 0x16f   : > { %v2103_v35 = vpop.f32.mrf.mxu0  ;;  %v2141_v49 = vadd.f32 %v2140_v50, %v2139_v9 }
 0x170   : > { %v2142_v51 = vpop.f32.mrf.mxu1  ;;  %v2696_v5 = vadd.f32 %v2103_v35, %v2102_v56 }
 0x171   : > { %v2105_v14 = vpop.f32.mrf.mxu0  ;;  %v1001_v1 = vadd.f32 %v2141_v49, %v2101_v8 }
 0x172   : > { %v2143_v57 = vpop.f32.mrf.mxu1 }
 0x173   : > { %v2106_v58 = vpop.f32.mrf.mxu0  ;;  %v2694_v63 = vadd.f32 %v2143_v57, %v2142_v51 }
 0x174   : > { %v2145_v61 = vpop.f32.mrf.mxu1  ;;  %v2107_v4 = vadd.f32 %v2106_v58, %v2105_v14 }
 0x175   : > { %v2108_v11 = vpop.f32.mrf.mxu0 }
 0x176   : > { %v2146_v12 = vpop.f32.mrf.mxu1 }
 0x177   : > { %v2147_v13 = vadd.f32 %v2146_v12, %v2145_v61  ;;  %v2109_v16 = vpop.f32.mrf.mxu0 }
 0x178   : > { %v2148_v32 = vpop.f32.mrf.mxu1  ;;  %v2110_v26 = vadd.f32 %v2109_v16, %v2108_v11 }
 0x179   : > { %v1009_v40 = vadd.f32 %v2147_v13, %v2107_v4  ;;  %v2169_v0 = vpop.f32.mrf.mxu0 }
 0x17a   : > { %v2149_v23 = vpop.f32.mrf.mxu1  ;;  %v1058_v29 = vadd.f32 %v2169_v0, %v993_v22 }
 0x17b   : > { %v1049_v53 = vpop.f32.mrf.mxu0  ;;  %v2150_v28 = vadd.f32 %v2149_v23, %v2148_v32 }
 0x17c   : > { %v2173_v54 = vpop.f32.mrf.mxu1  ;;  %v1122_v59 = vcombine.high %v1058_v29, %v1058_v29  ;;  %v1129_v19 = vrot.slane %v1058_v29, %v2687_v6  ;;  %v2690_v27 = vadd.f32 %v1049_v53, %v985_v24 }
 0x17d   : > { %v1074_v52 = vadd.f32 %v2173_v54, %v1009_v40 }
 0x17e   : > { %v1136_v39 = vrot.slane %v1122_v59, %v2687_v6  ;;  %v1137_v46 = vcombine.high %v1129_v19, %v1129_v19  ;;  %v1313_v47 = vsel %vm1256_vm7, %v1129_v19, -inf  ;;  %v1088_v37 = vcombine.high %v2690_v27, %v2690_v27  ;;  %v1065_v55 = vpop.f32.mrf.mxu1 }
 0x17f   : > { %v1190_v42 = vcombine.high %v1074_v52, %v1074_v52  ;;  %v1197_v7 = vrot.slane %v1074_v52, %v2687_v6  ;;  %v1314_v21 = vrot.slane %v1313_v47, 4  ;;  %v1066_v13 = vadd.f32 %v1065_v55, %v1001_v1 }
 0x180   : > { %v1138_v34 = vcombine.high %v1136_v39, %v1136_v39  ;;  %v1320_v24 = vsel %vm1256_vm7, %v1137_v46, -inf  ;;  %v1327_v36 = vsel %vm1256_vm7, %v1136_v39, -inf  ;;  %v1095_v39 = vrot.slane %v2690_v27, %v2687_v6 }
 0x181   : > { %v1204_v41 = vrot.slane %v1190_v42, %v2687_v6  ;;  %v1205_v38 = vcombine.high %v1197_v7, %v1197_v7  ;;  %v1425_v44 = vsel %vm1256_vm7, %v1197_v7, -inf  ;;  %v1315_v31 = vmax.f32 %v1313_v47, %v1314_v21 }
 0x182   : > { %v1426_v20 = vrot.slane %v1425_v44, 4  ;;  %v1321_v45 = vrot.slane %v1320_v24, 4  ;;  %v1328_v25 = vrot.slane %v1327_v36, 4  ;;  %v1334_v10 = vsel %vm1256_vm7, %v1138_v34, -inf }
 0x183   : > { %v1206_v15 = vcombine.high %v1204_v41, %v1204_v41  ;;  %v1432_v9 = vsel %vm1256_vm7, %v1205_v38, -inf  ;;  %v1439_v56 = vsel %vm1256_vm7, %v1204_v41, -inf  ;;  %v1316_v50 = vrot.slane %v1315_v31, 2 }
 0x184   : > { %v1427_v35 = vmax.f32 %v1425_v44, %v1426_v20  ;;  %v1433_v51 = vrot.slane %v1432_v9, 4  ;;  %v1440_v43 = vrot.slane %v1439_v56, 4  ;;  %v1322_v62 = vmax.f32 %v1320_v24, %v1321_v45 }
 0x185   : > { %v1446_v14 = vsel %vm1256_vm7, %v1206_v15, -inf  ;;  %v1317_v57 = vmax.f32 %v1315_v31, %v1316_v50  ;;  %v1329_v58 = vmax.f32 %v1327_v36, %v1328_v25  ;;  %v1335_v48 = vrot.slane %v1334_v10, 4 }
 0x186   : > { %v1428_v60 = vrot.slane %v1427_v35, 2  ;;  %v1434_v61 = vmax.f32 %v1432_v9, %v1433_v51  ;;  %v1441_v3 = vmax.f32 %v1439_v56, %v1440_v43  ;;  %v1447_v2 = vrot.slane %v1446_v14, 4 }
 0x187   : > { %v1323_v4 = vrot.slane %v1322_v62, 2  ;;  %v1330_v11 = vrot.slane %v1329_v58, 2  ;;  %v1336_v12 = vmax.f32 %v1334_v10, %v1335_v48  ;;  %v1318_v22 = vrot.slane %v1317_v57, 1 }
 0x188   : > { %v1429_v16 = vmax.f32 %v1427_v35, %v1428_v60  ;;  %v1435_v17 = vrot.slane %v1434_v61, 2  ;;  %v1442_v18 = vrot.slane %v1441_v3, 2  ;;  %v1448_v32 = vmax.f32 %v1446_v14, %v1447_v2 }
 0x189   : > { %v1324_v49 = vmax.f32 %v1322_v62, %v1323_v4  ;;  %v1331_v8 = vmax.f32 %v1329_v58, %v1330_v11  ;;  %v1337_v40 = vrot.slane %v1336_v12, 2  ;;  %v1156_v52 = vcombine.high %v1066_v13, %v1066_v13 }
 0x18a   : > { %v1430_v0 = vrot.slane %v1429_v16, 1  ;;  %v2711_v23 = vmax.f32 %v1434_v61, %v1435_v17  ;;  %v2713_v29 = vmax.f32 %v1441_v3, %v1442_v18  ;;  %v1449_v53 = vrot.slane %v1448_v32, 2 }
 0x18b   : > { %v1325_v54 = vrot.slane %v1324_v49, 1  ;;  %v1332_v59 = vrot.slane %v1331_v8, 1  ;;  %v2715_v19 = vmax.f32 %v1336_v12, %v1337_v40  ;;  %v2721_v46 = vadd.f32 %v2150_v28, %v2110_v26 }
 0x18c   : > { %v2717_v1 = vmax.f32 %v1448_v32, %v1449_v53  ;;  %v2725_v47 = vadd.f32 %v2694_v63, %v2696_v5  ;;  %v2727_v42 = vmax.f32 %v1429_v16, %v1430_v0  ;;  %v1437_v7 = vrot.slane %v2711_v23, 1 }
 0x18d   : > { %v2730_v21 = vmax.f32 %v1317_v57, %v1318_v22  ;;  %v1163_v34 = vrot.slane %v1066_v13, %v2687_v6  ;;  %v1444_v24 = vrot.slane %v2713_v29, 1  ;;  %v2734_v36 = vmax.f32 %v1324_v49, %v1325_v54 }
 0x18e   : > { %v2736_v41 = vmax.f32 %v1331_v8, %v1332_v59  ;;  %v1170_v27 = vrot.slane %v1156_v52, %v2687_v6  ;;  %v1339_v26 = vrot.slane %v2715_v19, 1  ;;  %v1102_v28 = vrot.slane %v1088_v37, %v2687_v6  ;;  %v2174_v59 = vpop.f32.mrf.mxu1 }
 0x18f   : > { %v1171_v63 = vcombine.high %v1163_v34, %v1163_v34  ;;  %v1369_v5 = vsel %vm1256_vm7, %v1163_v34, -inf  ;;  %v1451_v38 = vrot.slane %v2717_v1, 1  ;;  %v1103_v10 = vcombine.high %v1095_v39, %v1095_v39 }
 0x190   : > { %v1172_v44 = vcombine.high %v1170_v27, %v1170_v27  ;;  %v1370_v31 = vrot.slane %v1369_v5, 4  ;;  %v1383_v20 = vsel %vm1256_vm7, %v1170_v27, -inf  ;;  %v1104_v15 = vcombine.high %v1102_v28, %v1102_v28 }
 0x191   : > { %v1376_v45 = vsel %vm1256_vm7, %v1171_v63, -inf  ;;  %v1384_v25 = vrot.slane %v1383_v20, 4  ;;  %v1257_v35 = vsel %vm1256_vm7, %v1095_v39, -inf  ;;  %v1264_v62 = vsel %vm1256_vm7, %v1103_v10, -inf  ;;  %v2170_v63 = vpop.f32.mrf.mxu0 }
 0x192   : > { %v1371_v9 = vmax.f32 %v1369_v5, %v1370_v31  ;;  %v1377_v56 = vrot.slane %v1376_v45, 4  ;;  %v1390_v50 = vsel %vm1256_vm7, %v1172_v44, -inf  ;;  %v1258_v37 = vrot.slane %v1257_v35, 4 }
 0x193   : > { %v1385_v51 = vmax.f32 %v1383_v20, %v1384_v25  ;;  %v1391_v43 = vrot.slane %v1390_v50, 4  ;;  %v1265_v57 = vrot.slane %v1264_v62, 4  ;;  %v1271_v58 = vsel %vm1256_vm7, %v1102_v28, -inf }
 0x194   : > { %v1372_v55 = vrot.slane %v1371_v9, 2  ;;  %v1378_v14 = vmax.f32 %v1376_v45, %v1377_v56  ;;  %v1259_v61 = vmax.f32 %v1257_v35, %v1258_v37  ;;  %v1272_v3 = vrot.slane %v1271_v58, 4 }
 0x195   : > { %v1386_v48 = vrot.slane %v1385_v51, 2  ;;  %v1392_v60 = vmax.f32 %v1390_v50, %v1391_v43  ;;  %v1266_v11 = vmax.f32 %v1264_v62, %v1265_v57  ;;  %v1278_v12 = vsel %vm1256_vm7, %v1104_v15, -inf }
 0x196   : > { %v1373_v2 = vmax.f32 %v1371_v9, %v1372_v55  ;;  %v1379_v4 = vrot.slane %v1378_v14, 2  ;;  %v1260_v17 = vrot.slane %v1259_v61, 2  ;;  %v1273_v18 = vmax.f32 %v1271_v58, %v1272_v3 }
 0x197   : > { %v1387_v13 = vmax.f32 %v1385_v51, %v1386_v48  ;;  %v1393_v16 = vrot.slane %v1392_v60, 2  ;;  %v1267_v49 = vrot.slane %v1266_v11, 2  ;;  %v1279_v8 = vrot.slane %v1278_v12, 4 }
 0x198   : > { %v1374_v32 = vrot.slane %v1373_v2, 1  ;;  %v1380_v22 = vmax.f32 %v1378_v14, %v1379_v4  ;;  %v2750_v53 = vmax.f32 %v1259_v61, %v1260_v17  ;;  %v1274_v54 = vrot.slane %v1273_v18, 2 }
 0x199   : > { %v1388_v40 = vrot.slane %v1387_v13, 1  ;;  %v1394_v0 = vmax.f32 %v1392_v60, %v1393_v16  ;;  %v2753_v52 = vmax.f32 %v2711_v23, %v1437_v7  ;;  %v2755_v34 = vmax.f32 %v1266_v11, %v1267_v49 }
 0x19a   : > { %v1381_v39 = vrot.slane %v1380_v22, 1  ;;  %v1280_v27 = vmax.f32 %v1278_v12, %v1279_v8  ;;  %v2758_v5 = vmax.f32 %v2713_v29, %v1444_v24  ;;  %v2761_v28 = vmax.f32 %v2715_v19, %v1339_v26  ;;  %v1068_v24 = vpop.f32.mrf.mxu1 }
 0x19b   : > { %v1395_v44 = vrot.slane %v1394_v0, 1  ;;  %v2763_v31 = vmax.f32 %v1273_v18, %v1274_v54  ;;  %v2766_v20 = vmax.f32 %v2717_v1, %v1451_v38  ;;  %v2768_v45 = vmax.f32 %v1373_v2, %v1374_v32 }
 0x19c   : > { %v1281_v23 = vrot.slane %v1280_v27, 2  ;;  %v1077_v7 = vadd.f32 %v2174_v59, %v2721_v46  ;;  %v2771_v25 = vmax.f32 %v1380_v22, %v1381_v39  ;;  %v2773_v10 = vmax.f32 %v1387_v13, %v1388_v40 }
 0x19d   : > { %v1262_v29 = vrot.slane %v2750_v53, 1  ;;  %v1061_v19 = vadd.f32 %v2170_v63, %v2692_v30  ;;  %v1269_v26 = vrot.slane %v2755_v34, 1  ;;  %v2781_v9 = vmax.f32 %v1394_v0, %v1395_v44 }
 0x19e   : > { %v2778_v15 = vmax.f32 %v1280_v27, %v1281_v23  ;;  %v1207_v1 = vcombine.high %v1077_v7, %v1077_v7  ;;  %v1214_v38 = vrot.slane %v1077_v7, %v2687_v6  ;;  %v1276_v46 = vrot.slane %v2763_v31, 1 }
 0x19f   : > { %v1139_v56 = vcombine.high %v1061_v19, %v1061_v19  ;;  %v1146_v50 = vrot.slane %v1061_v19, %v2687_v6  ;;  %v2788_v43 = vadd.f32 %v1068_v24, %v2725_v47 }
 0x1a0   : > { %v1221_v35 = vrot.slane %v1207_v1, %v2687_v6  ;;  %v1222_v51 = vcombine.high %v1214_v38, %v1214_v38  ;;  %v1453_v30 = vsel %vm1256_vm7, %v1214_v38, -inf  ;;  %v1283_v57 = vrot.slane %v2778_v15, 1 }
 0x1a1   : > { %v1454_v37 = vrot.slane %v1453_v30, 4  ;;  %v1153_v62 = vrot.slane %v1139_v56, %v2687_v6  ;;  %v1154_v55 = vcombine.high %v1146_v50, %v1146_v50  ;;  %v1341_v14 = vsel %vm1256_vm7, %v1146_v50, -inf }
 0x1a2   : > { %v1223_v58 = vcombine.high %v1221_v35, %v1221_v35  ;;  %v1460_v48 = vsel %vm1256_vm7, %v1222_v51, -inf  ;;  %v1467_v60 = vsel %vm1256_vm7, %v1221_v35, -inf  ;;  %v1342_v11 = vrot.slane %v1341_v14, 4 }
 0x1a3   : > { %v1455_v61 = vmax.f32 %v1453_v30, %v1454_v37  ;;  %v1461_v3 = vrot.slane %v1460_v48, 4  ;;  %v1468_v2 = vrot.slane %v1467_v60, 4  ;;  %v1155_v4 = vcombine.high %v1153_v62, %v1153_v62 }
 0x1a4   : > { %v1474_v47 = vsel %vm1256_vm7, %v1223_v58, -inf  ;;  %v1348_v12 = vsel %vm1256_vm7, %v1154_v55, -inf  ;;  %v1355_v13 = vsel %vm1256_vm7, %v1153_v62, -inf  ;;  %v1343_v22 = vmax.f32 %v1341_v14, %v1342_v11  ;;  %v2802_v55 = vld [vmem:[%s2973_s2] ss:$0 sm:$0xff] }
 0x1a5   : > { %v1456_v16 = vrot.slane %v1455_v61, 2  ;;  %v1462_v17 = vmax.f32 %v1460_v48, %v1461_v3  ;;  %v1469_v18 = vmax.f32 %v1467_v60, %v1468_v2  ;;  %v1475_v32 = vrot.slane %v1474_v47, 4 }
 0x1a6   : > { %v1349_v49 = vrot.slane %v1348_v12, 4  ;;  %v1356_v8 = vrot.slane %v1355_v13, 4  ;;  %v1362_v40 = vsel %vm1256_vm7, %v1155_v4, -inf  ;;  %v1344_v27 = vrot.slane %v1343_v22, 2 }
 0x1a7   : > { %v1457_v0 = vmax.f32 %v1455_v61, %v1456_v16  ;;  %v1463_v54 = vrot.slane %v1462_v17, 2  ;;  %v1470_v59 = vrot.slane %v1469_v18, 2  ;;  %v1476_v39 = vmax.f32 %v1474_v47, %v1475_v32 }
 0x1a8   : > { %v1350_v63 = vmax.f32 %v1348_v12, %v1349_v49  ;;  %v1357_v44 = vmax.f32 %v1355_v13, %v1356_v8  ;;  %v1363_v23 = vrot.slane %v1362_v40, 4  ;;  %v1345_v38 = vmax.f32 %v1343_v22, %v1344_v27  ;;  %v2811_v22 = vld [vmem:[%s2974_s3] ss:$0 sm:$0xff] }
 0x1a9   : > { %v1458_v7 = vrot.slane %v1457_v0, 1  ;;  %v1464_v19 = vmax.f32 %v1462_v17, %v1463_v54  ;;  %v1471_v24 = vmax.f32 %v1469_v18, %v1470_v59  ;;  %v1477_v1 = vrot.slane %v1476_v39, 2 }
 0x1aa   : > { %v1351_v56 = vrot.slane %v1350_v63, 2  ;;  %v1358_v50 = vrot.slane %v1357_v44, 2  ;;  %v1364_v35 = vmax.f32 %v1362_v40, %v1363_v23  ;;  %v1346_v14 = vrot.slane %v1345_v38, 1 }
 0x1ab   : > { %v1459_v51 = vmax.f32 %v1457_v0, %v1458_v7  ;;  %v1465_v30 = vrot.slane %v1464_v19, 1  ;;  %v1472_v37 = vrot.slane %v1471_v24, 1  ;;  %v1478_v62 = vmax.f32 %v1476_v39, %v1477_v1 }
 0x1ac   : > { %v1352_v58 = vmax.f32 %v1350_v63, %v1351_v56  ;;  %v1359_v48 = vmax.f32 %v1357_v44, %v1358_v50  ;;  %v1365_v60 = vrot.slane %v1364_v35, 2  ;;  %v1347_v47 = vmax.f32 %v1345_v38, %v1346_v14 }
 0x1ad   : > { %v1466_v61 = vmax.f32 %v1464_v19, %v1465_v30  ;;  %v1473_v3 = vmax.f32 %v1471_v24, %v1472_v37  ;;  %v1479_v2 = vrot.slane %v1478_v62, 1  ;;  %v1493_v4 = vmax.f32 %v2727_v42, %v1459_v51 }
 0x1ae   : > { %v1353_v11 = vrot.slane %v1352_v58, 1  ;;  %v1360_v12 = vrot.slane %v1359_v48, 1  ;;  %v1366_v13 = vmax.f32 %v1364_v35, %v1365_v60  ;;  %v1485_v42 = vmax.f32 %v2730_v21, %v1347_v47 }
 0x1af   : > { %v1480_v16 = vmax.f32 %v1478_v62, %v1479_v2  ;;  %v1494_v17 = vmax.f32 %v2753_v52, %v1466_v61  ;;  %v1495_v18 = vmax.f32 %v2758_v5, %v1473_v3  ;;  %v1516_v32 = vadd.f32 %v2802_v55, %v1493_v4  ;;  %v2820_v5 = vld [vmem:[%s2975_s4] ss:$0 sm:$0xff] }
 0x1b0   : > { %v1354_v49 = vmax.f32 %v1352_v58, %v1353_v11  ;;  %v1361_v8 = vmax.f32 %v1359_v48, %v1360_v12  ;;  %v1367_v40 = vrot.slane %v1366_v13, 1  ;;  %v1508_v44 = vadd.f32 %v2802_v55, %v1485_v42 }
 0x1b1   : > { %v1496_v0 = vmax.f32 %v2766_v20, %v1480_v16  ;;  %v1517_v54 = vadd.f32 %v2802_v55, %v1494_v17  ;;  %v1518_v52 = vadd.f32 %v2802_v55, %v1495_v18  ;;  %v1532_v59 = vmax.f32 %v1516_v32, 0.0 }
 0x1b2   : > { %v1368_v39 = vmax.f32 %v1366_v13, %v1367_v40  ;;  %v1486_v27 = vmax.f32 %v2734_v36, %v1354_v49  ;;  %v1487_v63 = vmax.f32 %v2736_v41, %v1361_v8  ;;  %v1524_v38 = vmax.f32 %v1508_v44, 0.0 }
 0x1b3   : > { %v1519_v21 = vadd.f32 %v2802_v55, %v1496_v0  ;;  %v1533_v20 = vmax.f32 %v1517_v54, 0.0  ;;  %v1534_v23 = vmax.f32 %v1518_v52, 0.0  ;;  %v1555_v7 = vmul.f32 %v2811_v22, %v1532_v59 }
 0x1b4   : > { %v1488_v19 = vmax.f32 %v2761_v28, %v1368_v39  ;;  %v1509_v24 = vadd.f32 %v2802_v55, %v1486_v27  ;;  %v1510_v1 = vadd.f32 %v2802_v55, %v1487_v63  ;;  %v1547_v37 = vmul.f32 %v2811_v22, %v1524_v38 }
 0x1b5   : > { %v1535_v56 = vmax.f32 %v1519_v21, 0.0  ;;  %v1556_v36 = vmul.f32 %v2811_v22, %v1533_v20  ;;  %v1557_v41 = vmul.f32 %v2811_v22, %v1534_v23  ;;  %v1578_v50 = vadd.f32 %v2820_v5, %v1555_v7 }
 0x1b6   : > { %v1511_v35 = vadd.f32 %v2802_v55, %v1488_v19  ;;  %v1525_v51 = vmax.f32 %v1509_v24, 0.0  ;;  %v1526_v30 = vmax.f32 %v1510_v1, 0.0  ;;  %v1570_v3 = vadd.f32 %v2820_v5, %v1547_v37 }
 0x1b7   : > { %v1558_v28 = vmul.f32 %v2811_v22, %v1535_v56  ;;  %v1579_v62 = vadd.f32 %v2820_v5, %v1556_v36  ;;  %v1580_v14 = vadd.f32 %v2820_v5, %v1557_v41  ;;  %v1594_v58 = vpack.c.bf16 %v1578_v50, %v1578_v50 }
 0x1b8   : > { %v1527_v48 = vmax.f32 %v1511_v35, 0.0  ;;  %v1548_v60 = vmul.f32 %v2811_v22, %v1525_v51  ;;  %v1549_v61 = vmul.f32 %v2811_v22, %v1526_v30  ;;  %v1586_v17 = vpack.c.bf16 %v1570_v3, %v1570_v3 }
 0x1b9   : > { %v1581_v2 = vadd.f32 %v2820_v5, %v1558_v28  ;;  %v1595_v4 = vpack.c.bf16 %v1579_v62, %v1579_v62  ;;  %v1596_v47 = vpack.c.bf16 %v1580_v14, %v1580_v14  ;;  %v1704_v11 = vrot.slane %v1594_v58, %v2687_v6 }
 0x1ba   : > { %v1550_v12 = vmul.f32 %v2811_v22, %v1527_v48  ;;  %v1571_v13 = vadd.f32 %v2820_v5, %v1548_v60  ;;  %v1572_v16 = vadd.f32 %v2820_v5, %v1549_v61  ;;  %v1648_v54 = vrot.slane %v1586_v17, %v2687_v6 }
 0x1bb   : > { %v1597_v18 = vpack.c.bf16 %v1581_v2, %v1581_v2  ;;  %v1711_v32 = vrot.slane %v1595_v4, %v2687_v6  ;;  %v1718_v49 = vrot.slane %v1596_v47, %v2687_v6  ;;  %v1816_v8 = vrot.slane %v1704_v11, %v2687_v6 }
 0x1bc   : > { %v1573_v40 = vadd.f32 %v2820_v5, %v1550_v12  ;;  %v1587_v42 = vpack.c.bf16 %v1571_v13, %v1571_v13  ;;  %v1588_v0 = vpack.c.bf16 %v1572_v16, %v1572_v16  ;;  %v1760_v20 = vrot.slane %v1648_v54, %v2687_v6 }
 0x1bd   : > { %v1725_v52 = vrot.slane %v1597_v18, %v2687_v6  ;;  %v1823_v59 = vrot.slane %v1711_v32, %v2687_v6  ;;  %v1830_v39 = vrot.slane %v1718_v49, %v2687_v6  ;;  %v1850_v27 = vunpack.c.l.b16 %v1816_v8  ;;  %v1052_v32 = vpop.f32.mrf.mxu0 }
 0x1be   : > { %v1589_v63 = vpack.c.bf16 %v1573_v40, %v1573_v40  ;;  %v1655_v44 = vrot.slane %v1587_v42, %v2687_v6  ;;  %v1662_v21 = vrot.slane %v1588_v0, %v2687_v6  ;;  %v1173_v24 = vcombine.high %v2788_v43, %v2788_v43 }
 0x1bf   : > { %v1837_v23 = vrot.slane %v1725_v52, %v2687_v6  ;;  %v1851_v7 = vunpack.c.l.b16 %v1823_v59  ;;  %v1852_v19 = vunpack.c.l.b16 %v1830_v39  ;;  %v1842_v36 = vunpack.c.l.b16 %v1760_v20 }
 0x1c0   : > { %v1669_v1 = vrot.slane %v1589_v63, %v2687_v6  ;;  %v1767_v38 = vrot.slane %v1655_v44, %v2687_v6  ;;  %v1774_v56 = vrot.slane %v1662_v21, %v2687_v6  ;;  %v1180_v51 = vrot.slane %v2788_v43, %v2687_v6 }
 0x1c1   : > { %v1853_v41 = vunpack.c.l.b16 %v1837_v23  ;;  %v1875_v50 = vrot.slane %v1851_v7, 7  ;;  %v1877_v35 = vrot.slane %v1852_v19, 6  ;;  %v1187_v62 = vrot.slane %v1173_v24, %v2687_v6 }
 0x1c2   : > { %v1781_v30 = vrot.slane %v1669_v1, %v2687_v6  ;;  %v1843_v37 = vunpack.c.l.b16 %v1767_v38  ;;  %v1844_v28 = vunpack.c.l.b16 %v1774_v56  ;;  %v1188_v48 = vcombine.high %v1180_v51, %v1180_v51 }
 0x1c3   : > { %v1876_v14 = vsel %vm1855_vm8, %v1875_v50, %v1850_v27  ;;  %v1879_v58 = vrot.slane %v1853_v41, 5  ;;  %v1397_v60 = vsel %vm1256_vm7, %v1180_v51, -inf  ;;  %v1189_v47 = vcombine.high %v1187_v62, %v1187_v62 }
 0x1c4   : > { %v1878_v61 = vsel %vm1858_vm9, %v1877_v35, %v1876_v14  ;;  %v1845_v3 = vunpack.c.l.b16 %v1781_v30  ;;  %v1863_v2 = vrot.slane %v1843_v37, 7  ;;  %v1865_v4 = vrot.slane %v1844_v28, 6 }
 0x1c5   : > { %v1880_v43 = vsel %vm1861_vm10, %v1879_v58, %v1878_v61  ;;  %v1398_v11 = vrot.slane %v1397_v60, 4  ;;  %v1404_v12 = vsel %vm1256_vm7, %v1188_v48, -inf  ;;  %v1411_v40 = vsel %vm1256_vm7, %v1187_v62, -inf }
 0x1c6   : > { %v1884_v13 = vpack.c.b16 %v1880_v43, %v1880_v43  ;;  %v1864_v16 = vsel %vm1855_vm8, %v1863_v2, %v1842_v36  ;;  %v1867_v17 = vrot.slane %v1845_v3, 5  ;;  %v1405_v18 = vrot.slane %v1404_v12, 4 }
 0x1c7   : > { %v1866_v49 = vsel %vm1858_vm9, %v1865_v4, %v1864_v16  ;;  %v1399_v8 = vmax.f32 %v1397_v60, %v1398_v11  ;;  %v1418_v42 = vsel %vm1256_vm7, %v1189_v47, -inf  ;;  %v1412_v52 = vrot.slane %v1411_v40, 4 }
 0x1c8   : > { %2067 = vst.sshfl [vmem:[%s2874_s19 + $0x6] sm:$0x3 pattern:$0x76325410] %v1884_v13  ;;  %v1868_v0 = vsel %vm1861_vm10, %v1867_v17, %v1866_v49  ;;  %v1406_v54 = vmax.f32 %v1404_v12, %v1405_v18  ;;  %v1419_v59 = vrot.slane %v1418_v42, 4  ;;  %v2887_v39 = vmax.f32 %v2750_v53, %v1262_v29 }
 0x1c9   : > { %v1882_v27 = vpack.c.b16 %v1868_v0, %v1868_v0  ;;  %v1400_v63 = vrot.slane %v1399_v8, 2  ;;  %v1053_v44 = vadd.f32 %v1052_v32, %v2685_v33  ;;  %v2893_v21 = vmax.f32 %v2755_v34, %v1269_v26 }
 0x1ca   : > { %v1407_v20 = vrot.slane %v1406_v54, 2  ;;  %v1413_v23 = vmax.f32 %v1411_v40, %v1412_v52  ;;  %v1420_v7 = vmax.f32 %v1418_v42, %v1419_v59  ;;  %v2898_v19 = vmax.f32 %v2763_v31, %v1276_v46 }
 0x1cb   : > { %2065 = vst.sshfl [vmem:[%s2874_s19 + $0x2] sm:$0x3 pattern:$0x76325410] %v1882_v27  ;;  %v1401_v53 = vmax.f32 %v1399_v8, %v1400_v63  ;;  %v1105_v29 = vcombine.high %v1053_v44, %v1053_v44  ;;  %v1112_v24 = vrot.slane %v1053_v44, %v2687_v6  ;;  %v2905_v33 = vmax.f32 %v2778_v15, %v1283_v57 }
 0x1cc   : > { %v1408_v34 = vmax.f32 %v1406_v54, %v1407_v20  ;;  %v1414_v26 = vrot.slane %v1413_v23, 2  ;;  %v1421_v1 = vrot.slane %v1420_v7, 2 }
 0x1cd   : > { %v1402_v38 = vrot.slane %v1401_v53, 1  ;;  %v1119_v56 = vrot.slane %v1105_v29, %v2687_v6  ;;  %v1120_v36 = vcombine.high %v1112_v24, %v1112_v24  ;;  %v1285_v31 = vsel %vm1256_vm7, %v1112_v24, -inf }
 0x1ce   : > { %v1409_v46 = vrot.slane %v1408_v34, 1  ;;  %v1415_v41 = vmax.f32 %v1413_v23, %v1414_v26  ;;  %v1422_v50 = vmax.f32 %v1420_v7, %v1421_v1  ;;  %v1286_v35 = vrot.slane %v1285_v31, 4 }
 0x1cf   : > { %v1403_v51 = vmax.f32 %v1401_v53, %v1402_v38  ;;  %v1121_v30 = vcombine.high %v1119_v56, %v1119_v56  ;;  %v1292_v37 = vsel %vm1256_vm7, %v1120_v36, -inf  ;;  %v1299_v15 = vsel %vm1256_vm7, %v1119_v56, -inf }
 0x1d0   : > { %v1410_v57 = vmax.f32 %v1408_v34, %v1409_v46  ;;  %v1416_v28 = vrot.slane %v1415_v41, 1  ;;  %v1423_v62 = vrot.slane %v1422_v50, 1  ;;  %v1287_v14 = vmax.f32 %v1285_v31, %v1286_v35 }
 0x1d1   : > { %v1489_v58 = vmax.f32 %v2768_v45, %v1403_v51  ;;  %v1293_v48 = vrot.slane %v1292_v37, 4  ;;  %v1300_v60 = vrot.slane %v1299_v15, 4  ;;  %v1306_v61 = vsel %vm1256_vm7, %v1121_v30, -inf }
 0x1d2   : > { %v1417_v3 = vmax.f32 %v1415_v41, %v1416_v28  ;;  %v1424_v2 = vmax.f32 %v1422_v50, %v1423_v62  ;;  %v1490_v4 = vmax.f32 %v2771_v25, %v1410_v57  ;;  %v1288_v43 = vrot.slane %v1287_v14, 2 }
 0x1d3   : > { %v1512_v47 = vadd.f32 %v2802_v55, %v1489_v58  ;;  %v1294_v11 = vmax.f32 %v1292_v37, %v1293_v48  ;;  %v1301_v12 = vmax.f32 %v1299_v15, %v1300_v60  ;;  %v1307_v13 = vrot.slane %v1306_v61, 4 }
 0x1d4   : > { %v1491_v16 = vmax.f32 %v2773_v10, %v1417_v3  ;;  %v1492_v17 = vmax.f32 %v2781_v9, %v1424_v2  ;;  %v1513_v45 = vadd.f32 %v2802_v55, %v1490_v4  ;;  %v1289_v18 = vmax.f32 %v1287_v14, %v1288_v43 }
 0x1d5   : > { %v1528_v32 = vmax.f32 %v1512_v47, 0.0  ;;  %v1295_v49 = vrot.slane %v1294_v11, 2  ;;  %v1302_v8 = vrot.slane %v1301_v12, 2  ;;  %v1308_v40 = vmax.f32 %v1306_v61, %v1307_v13 }
 0x1d6   : > { %v1514_v42 = vadd.f32 %v2802_v55, %v1491_v16  ;;  %v1515_v25 = vadd.f32 %v2802_v55, %v1492_v17  ;;  %v1529_v0 = vmax.f32 %v1513_v45, 0.0  ;;  %v1290_v54 = vrot.slane %v1289_v18, 1 }
 0x1d7   : > { %v1551_v52 = vmul.f32 %v2811_v22, %v1528_v32  ;;  %v1296_v59 = vmax.f32 %v1294_v11, %v1295_v49  ;;  %v1303_v27 = vmax.f32 %v1301_v12, %v1302_v8  ;;  %v1309_v10 = vrot.slane %v1308_v40, 2 }
 0x1d8   : > { %v1530_v63 = vmax.f32 %v1514_v42, 0.0  ;;  %v1531_v9 = vmax.f32 %v1515_v25, 0.0  ;;  %v1552_v44 = vmul.f32 %v2811_v22, %v1529_v0  ;;  %v1291_v20 = vmax.f32 %v1289_v18, %v1290_v54 }
 0x1d9   : > { %v1574_v23 = vadd.f32 %v2820_v5, %v1551_v52  ;;  %v1297_v7 = vrot.slane %v1296_v59, 1  ;;  %v1304_v53 = vrot.slane %v1303_v27, 1  ;;  %v1310_v29 = vmax.f32 %v1308_v40, %v1309_v10 }
 0x1da   : > { %v1553_v24 = vmul.f32 %v2811_v22, %v1530_v63  ;;  %v1554_v34 = vmul.f32 %v2811_v22, %v1531_v9  ;;  %v1575_v26 = vadd.f32 %v2820_v5, %v1552_v44  ;;  %v1481_v1 = vmax.f32 %v2887_v39, %v1291_v20 }
 0x1db   : > { %v1590_v38 = vpack.c.bf16 %v1574_v23, %v1574_v23  ;;  %v1298_v56 = vmax.f32 %v1296_v59, %v1297_v7  ;;  %v1305_v36 = vmax.f32 %v1303_v27, %v1304_v53  ;;  %v1311_v31 = vrot.slane %v1310_v29, 1 }
 0x1dc   : > { %v1576_v46 = vadd.f32 %v2820_v5, %v1553_v24  ;;  %v1577_v41 = vadd.f32 %v2820_v5, %v1554_v34  ;;  %v1591_v50 = vpack.c.bf16 %v1575_v26, %v1575_v26  ;;  %v1504_v35 = vadd.f32 %v2802_v55, %v1481_v1 }
 0x1dd   : > { %v1676_v51 = vrot.slane %v1590_v38, %v2687_v6  ;;  %v1312_v30 = vmax.f32 %v1310_v29, %v1311_v31  ;;  %v1482_v37 = vmax.f32 %v2893_v21, %v1298_v56  ;;  %v1483_v15 = vmax.f32 %v2898_v19, %v1305_v36 }
 0x1de   : > { %v1592_v57 = vpack.c.bf16 %v1576_v46, %v1576_v46  ;;  %v1593_v39 = vpack.c.bf16 %v1577_v41, %v1577_v41  ;;  %v1683_v28 = vrot.slane %v1591_v50, %v2687_v6  ;;  %v1520_v62 = vmax.f32 %v1504_v35, 0.0 }
 0x1df   : > { %v1788_v14 = vrot.slane %v1676_v51, %v2687_v6  ;;  %v1484_v58 = vmax.f32 %v2905_v33, %v1312_v30  ;;  %v1505_v48 = vadd.f32 %v2802_v55, %v1482_v37  ;;  %v1506_v60 = vadd.f32 %v2802_v55, %v1483_v15 }
 0x1e0   : > { %v1690_v61 = vrot.slane %v1592_v57, %v2687_v6  ;;  %v1697_v3 = vrot.slane %v1593_v39, %v2687_v6  ;;  %v1795_v21 = vrot.slane %v1683_v28, %v2687_v6  ;;  %v1543_v19 = vmul.f32 %v2811_v22, %v1520_v62 }
 0x1e1   : > { %v1507_v2 = vadd.f32 %v2802_v55, %v1484_v58  ;;  %v1521_v4 = vmax.f32 %v1505_v48, 0.0  ;;  %v1522_v43 = vmax.f32 %v1506_v60, 0.0  ;;  %v1846_v13 = vunpack.c.l.b16 %v1788_v14 }
 0x1e2   : > { %v1802_v47 = vrot.slane %v1690_v61, %v2687_v6  ;;  %v1809_v33 = vrot.slane %v1697_v3, %v2687_v6  ;;  %v1847_v11 = vunpack.c.l.b16 %v1795_v21  ;;  %v1566_v12 = vadd.f32 %v2820_v5, %v1543_v19 }
 0x1e3   : > { %v1523_v16 = vmax.f32 %v1507_v2, 0.0  ;;  %v1544_v17 = vmul.f32 %v2811_v22, %v1521_v4  ;;  %v1545_v45 = vmul.f32 %v2811_v22, %v1522_v43 }
 0x1e4   : > { %v1848_v18 = vunpack.c.l.b16 %v1802_v47  ;;  %v1849_v32 = vunpack.c.l.b16 %v1809_v33  ;;  %v1869_v49 = vrot.slane %v1847_v11, 7  ;;  %v1582_v8 = vpack.c.bf16 %v1566_v12, %v1566_v12 }
 0x1e5   : > { %v1546_v55 = vmul.f32 %v2811_v22, %v1523_v16  ;;  %v1567_v40 = vadd.f32 %v2820_v5, %v1544_v17  ;;  %v1568_v42 = vadd.f32 %v2820_v5, %v1545_v45 }
 0x1e6   : > { %v1870_v25 = vsel %vm1855_vm8, %v1869_v49, %v1846_v13  ;;  %v1871_v0 = vrot.slane %v1848_v18, 6  ;;  %v1873_v54 = vrot.slane %v1849_v32, 5  ;;  %v1620_v10 = vrot.slane %v1582_v8, %v2687_v6 }
 0x1e7   : > { %v1569_v52 = vadd.f32 %v2820_v5, %v1546_v55  ;;  %v1583_v59 = vpack.c.bf16 %v1567_v40, %v1567_v40  ;;  %v1584_v27 = vpack.c.bf16 %v1568_v42, %v1568_v42 }
 0x1e8   : > { %v1872_v63 = vsel %vm1858_vm9, %v1871_v0, %v1870_v25  ;;  %v1732_v53 = vrot.slane %v1620_v10, %v2687_v6 }
 0x1e9   : > { %v1874_v9 = vsel %vm1861_vm10, %v1873_v54, %v1872_v63  ;;  %v1585_v22 = vpack.c.bf16 %v1569_v52, %v1569_v52  ;;  %v1627_v44 = vrot.slane %v1583_v59, %v2687_v6  ;;  %v1634_v20 = vrot.slane %v1584_v27, %v2687_v6 }
 0x1ea   : > { %v1883_v23 = vpack.c.b16 %v1874_v9, %v1874_v9  ;;  %v1838_v1 = vunpack.c.l.b16 %v1732_v53 }
 0x1eb   : > { %v1641_v7 = vrot.slane %v1585_v22, %v2687_v6  ;;  %v1739_v5 = vrot.slane %v1627_v44, %v2687_v6  ;;  %v1746_v29 = vrot.slane %v1634_v20, %v2687_v6 }
 0x1ec   : > { %2066 = vst.sshfl [vmem:[%s2874_s19 + $0x4] sm:$0x3 pattern:$0x76325410] %v1883_v23 }
 0x1ed   : > { %v1753_v24 = vrot.slane %v1641_v7, %v2687_v6  ;;  %v1839_v34 = vunpack.c.l.b16 %v1739_v5  ;;  %v1840_v26 = vunpack.c.l.b16 %v1746_v29 }
 0x1ef   : > { %v1841_v38 = vunpack.c.l.b16 %v1753_v24  ;;  %v1854_v56 = vrot.slane %v1839_v34, 7  ;;  %v1857_v36 = vrot.slane %v1840_v26, 6 }
 0x1f1   : > { %v1856_v31 = vsel %vm1855_vm8, %v1854_v56, %v1838_v1  ;;  %v1860_v46 = vrot.slane %v1841_v38, 5 }
 0x1f2   : > { %v1859_v41 = vsel %vm1858_vm9, %v1857_v36, %v1856_v31 }
 0x1f3   : > { %v1862_v50 = vsel %vm1861_vm10, %v1860_v46, %v1859_v41 }
 0x1f4   : > { %v1881_v35 = vpack.c.b16 %v1862_v50, %v1862_v50 }
 0x1f6   : > { %2064 = vst.sshfl [vmem:[%s2874_s19] sm:$0x3 pattern:$0x76325410] %v1881_v35 }
 0x1f7 PF: > { %s15_s18 = sadd.s32 1, %s2245_s18  }
 0x1f8   : > { %p12_p4 = scmp.ge.s32.totalorder %s15_s18, 4  }
 0x1fa   :  { %14 = sbr.rel (!%p12_p4) target bundleno = 1 (0x1), region = 70 }

// kernel: deepfake_detector_forward.9
= control target key start
LH: loop header
LB: loop body
LE: loop exit
PB: predicated region body
PF: predicated region fallthrough
CT: control target
= control target key end

     0   :  { %s2609_s18 = smov 0   ;;  %s3404_s0 = inlined_call_operand.vmem [shape: bf16[2,6,6,128], index: 0, kind: input, shape index: {}]   ;;  %s3405_s1 = inlined_call_operand.vmem [shape: bf16[1152,256], index: 1, kind: input, shape index: {}]   ;;  %s3406_s2 = inlined_call_operand.vmem [shape: f32[1,256], index: 2, kind: input, shape index: {}]   ;;  %s3407_s3 = inlined_call_operand.vmem [shape: f32[1,256], index: 3, kind: input, shape index: {}]   ;;  %s3408_s4 = inlined_call_operand.vmem [shape: f32[1,256], index: 4, kind: input, shape index: {}]   ;;  %s3409_s5 = inlined_call_operand.vmem [shape: bf16[2,2,2,256], index: 5, kind: output, shape index: {}]  }
   0x1 LB: > { %s2168_s19 = sadd.s32 4294967295, %s2573_s18   ;;  %p2172_p0 = scmp.ge.s32.totalorder %s2573_s18, 1  ;;  %s2573_s18 = sphi %s2609_s18, %s15_s18  }
   0x2   : > { %p187_p1 = scmp.lt.s32.totalorder %s2573_s18, 3 }
   0x4   : > { %p188_p2 = pnand %p2172_p0, %p187_p1 }
   0x5   : > { %p214_p3 = scmp.lt.s32.totalorder (!%p188_p2), %s2168_s19, 1 }
   0x6   : > { %191 = sbr.rel (%p188_p2) target bundleno = 451 (0x1c3), region = 40 }
   0xb   : > { %v2346_v0 = vld [vmem:[%s3405_s1 + $0x74] ss:$8 sps:$4 sm:$0xff]   ;;  %v2350_v2 = vld [vmem:[%s3405_s1 + $0x70] ss:$8 sps:$4 sm:$0xff]   ;;  %v2352_v4 = vld [vmem:[%s3405_s1 + $0x64] ss:$8 sps:$4 sm:$0xff]   ;;  %v237_v38 = vlaneseq }
   0xc   : > { %v2348_v1 = vld [vmem:[%s3405_s1 + $0x174] ss:$8 sps:$4 sm:$0xff]   ;;  %1408 = vmatprep.subr.bf16.mxu0 %v2346_v0  ;;  %v2351_v3 = vld [vmem:[%s3405_s1 + $0x170] ss:$8 sps:$4 sm:$0xff]   ;;  %v2354_v5 = vld [vmem:[%s3405_s1 + $0x164] ss:$8 sps:$4 sm:$0xff]  }
   0xd   : > { %1451 = vmatprep.subr.bf16.mxu1 %v2348_v1  ;;  %1409 = vmatpush1.bf16.msra.mxu0 %v2350_v2  ;;  %v2356_v6 = vld [vmem:[%s3405_s1 + $0x60] ss:$8 sps:$4 sm:$0xff]   ;;  %v2358_v8 = vld [vmem:[%s3405_s1 + $0x54] ss:$8 sps:$4 sm:$0xff]   ;;  %v2362_v10 = vld [vmem:[%s3405_s1 + $0x50] ss:$8 sps:$4 sm:$0xff]  }
   0xe   : > { %1452 = vmatpush1.bf16.msra.mxu1 %v2351_v3  ;;  %1410 = vmatprep.subr.bf16.mxu0 %v2352_v4  ;;  %v2357_v7 = vld [vmem:[%s3405_s1 + $0x160] ss:$8 sps:$4 sm:$0xff]   ;;  %v2360_v9 = vld [vmem:[%s3405_s1 + $0x154] ss:$8 sps:$4 sm:$0xff]   ;;  %v2363_v11 = vld [vmem:[%s3405_s1 + $0x150] ss:$8 sps:$4 sm:$0xff]  }
   0xf   : > { %1453 = vmatprep.subr.bf16.mxu1 %v2354_v5  ;;  %v2364_v12 = vld [vmem:[%s3405_s1 + $0x44] ss:$8 sps:$4 sm:$0xff]   ;;  %v2368_v14 = vld [vmem:[%s3405_s1 + $0x40] ss:$8 sps:$4 sm:$0xff]   ;;  %v2370_v16 = vld [vmem:[%s3405_s1 + $0x34] ss:$8 sps:$4 sm:$0xff]  }
  0x10   : > { %v2366_v13 = vld [vmem:[%s3405_s1 + $0x144] ss:$8 sps:$4 sm:$0xff]   ;;  %v2369_v15 = vld [vmem:[%s3405_s1 + $0x140] ss:$8 sps:$4 sm:$0xff]   ;;  %v2372_v17 = vld [vmem:[%s3405_s1 + $0x134] ss:$8 sps:$4 sm:$0xff]  }
  0x11   : > { %1411 = vmatpush1.bf16.msra.mxu0 %v2356_v6  ;;  %v2374_v18 = vld [vmem:[%s3405_s1 + $0x30] ss:$8 sps:$4 sm:$0xff]   ;;  %v2376_v20 = vld [vmem:[%s3405_s1 + $0x24] ss:$8 sps:$4 sm:$0xff]   ;;  %v2380_v22 = vld [vmem:[%s3405_s1 + $0x20] ss:$8 sps:$4 sm:$0xff]  }
  0x12   : > { %1454 = vmatpush1.bf16.msra.mxu1 %v2357_v7  ;;  %1412 = vmatprep.subr.bf16.mxu0 %v2358_v8  ;;  %v2375_v19 = vld [vmem:[%s3405_s1 + $0x130] ss:$8 sps:$4 sm:$0xff]   ;;  %v2378_v21 = vld [vmem:[%s3405_s1 + $0x124] ss:$8 sps:$4 sm:$0xff]   ;;  %v2381_v23 = vld [vmem:[%s3405_s1 + $0x120] ss:$8 sps:$4 sm:$0xff]  }
  0x13   : > { %1455 = vmatprep.subr.bf16.mxu1 %v2360_v9  ;;  %v2382_v24 = vld [vmem:[%s3405_s1 + $0x14] ss:$8 sps:$4 sm:$0xff]   ;;  %v2386_v26 = vld [vmem:[%s3405_s1 + $0x10] ss:$8 sps:$4 sm:$0xff]   ;;  %v2388_v28 = vld [vmem:[%s3405_s1 + $0x4] ss:$8 sps:$4 sm:$0xff]  }
  0x14   : > { %v2384_v25 = vld [vmem:[%s3405_s1 + $0x114] ss:$8 sps:$4 sm:$0xff]   ;;  %v2387_v27 = vld [vmem:[%s3405_s1 + $0x110] ss:$8 sps:$4 sm:$0xff]   ;;  %v2390_v29 = vld [vmem:[%s3405_s1 + $0x104] ss:$8 sps:$4 sm:$0xff]  }
  0x15   : > { %1413 = vmatpush1.bf16.msra.mxu0 %v2362_v10  ;;  %v2392_v30 = vld [vmem:[%s3405_s1] ss:$8 sps:$4 sm:$0xff]   ;;  %v2394_v32 = vld [vmem:[%s3405_s1 + $0xf4] ss:$8 sps:$4 sm:$0xff]   ;;  %v2398_v34 = vld [vmem:[%s3405_s1 + $0xf0] ss:$8 sps:$4 sm:$0xff]  }
  0x16   : > { %1456 = vmatpush1.bf16.msra.mxu1 %v2363_v11  ;;  %1414 = vmatprep.subr.bf16.mxu0 %v2364_v12  ;;  %v2393_v31 = vld [vmem:[%s3405_s1 + $0x100] ss:$8 sps:$4 sm:$0xff]   ;;  %v2396_v33 = vld [vmem:[%s3405_s1 + $0x1f4] ss:$8 sps:$4 sm:$0xff]   ;;  %v2399_v35 = vld [vmem:[%s3405_s1 + $0x1f0] ss:$8 sps:$4 sm:$0xff]  }
  0x17   : > { %1457 = vmatprep.subr.bf16.mxu1 %v2366_v13  ;;  %s3423_s19 = smov (!%p214_p3, %s2168_s19), 1  ;;  %v2575_v36 = vmov 1983009808   ;;  %v2400_v39 = vld [vmem:[%s3405_s1 + $0xe4] ss:$8 sps:$4 sm:$0xff]   ;;  %v2741_v43 = vshrl.u32 %v237_v38, 7 }
  0x18   : > { %v235_v37 = vunpack.c.l.s4 %v2575_v36  ;;  %v2402_v40 = vld [vmem:[%s3405_s1 + $0x1e4] ss:$8 sps:$4 sm:$0xff]   ;;  %v2404_v41 = vld [vmem:[%s3405_s1 + $0xe0] ss:$8 sps:$4 sm:$0xff]   ;;  %s2333_s29 = smul.u32 24, %s3423_s19  ;;  %vm329_vm3 = vcmask 1040384  }
  0x19   : > { %1415 = vmatpush1.bf16.msra.mxu0 %v2368_v14  ;;  %v2405_v44 = vld [vmem:[%s3405_s1 + $0x1e0] ss:$8 sps:$4 sm:$0xff]   ;;  %v2406_v45 = vld [vmem:[%s3405_s1 + $0xd4] ss:$8 sps:$4 sm:$0xff]   ;;  %v2410_v47 = vld [vmem:[%s3405_s1 + $0xd0] ss:$8 sps:$4 sm:$0xff]  }
  0x1a   : > { %1458 = vmatpush1.bf16.msra.mxu1 %v2369_v15  ;;  %1416 = vmatprep.subr.bf16.mxu0 %v2370_v16  ;;  %v236_v42 = vunpack.c.0.s8 %v235_v37  ;;  %v2408_v46 = vld [vmem:[%s3405_s1 + $0x1d4] ss:$8 sps:$4 sm:$0xff]   ;;  %v2411_v48 = vld [vmem:[%s3405_s1 + $0x1d0] ss:$8 sps:$4 sm:$0xff]   ;;  %s2761_s17 = scalar_lea.vmem %s3404_s0, %s2333_s29  ;;  %vm266_vm0 = vsmask.f32 1280 }
  0x1b   : > { %1459 = vmatprep.subr.bf16.mxu1 %v2372_v17  ;;  %v2412_v50 = vld [vmem:[%s3405_s1 + $0xc4] ss:$8 sps:$4 sm:$0xff]   ;;  %vm267_vm1 = vsmask.f32 3336  ;;  %vm269_vm2 = vsmask.f32 5392 }
  0x1c   : > { %v2764_v49 = vsub.s32 %v236_v42, %v2741_v43  ;;  %v2414_v51 = vld [vmem:[%s3405_s1 + $0x1c4] ss:$8 sps:$4 sm:$0xff]   ;;  %v2416_v52 = vld [vmem:[%s3405_s1 + $0xc0] ss:$8 sps:$4 sm:$0xff]   ;;  %v2418_v55 = vld [vmem:[%s3405_s1 + $0xb4] ss:$8 sps:$4 sm:$0xff]  }
  0x1d   : > { %1417 = vmatpush1.bf16.msra.mxu0 %v2374_v18  ;;  %v2417_v53 = vld [vmem:[%s3405_s1 + $0x1c0] ss:$8 sps:$4 sm:$0xff]   ;;  %v2785_v56 = vld [vmem:[%s2761_s17 + $0x4] sm:$0x7]  ;;  %v2791_v58 = vld [vmem:[%s2761_s17 + $0xc] sm:$0x7] }
  0x1e   : > { %1460 = vmatpush1.bf16.msra.mxu1 %v2375_v19  ;;  %1418 = vmatprep.subr.bf16.mxu0 %v2376_v20  ;;  %v2779_v54 = vld [vmem:[%s2761_s17] sm:$0x7]  ;;  %v2788_v57 = vld [vmem:[%s2761_s17 + $0x8] sm:$0x7]  ;;  %vm330_vm4 = vcmask 1042434   ;;  %v2802_v61 = vrot.slane %v2785_v56, %v2764_v49  ;;  %v2810_v63 = vrot.slane %v2791_v58, %v2764_v49  ;;  %vm2814_vm5 = vmor %vm266_vm0, %vm267_vm1  ;;  %vm332_vm7 = vcmask 1044484  }
  0x1f   : > { %1461 = vmatprep.subr.bf16.mxu1 %v2378_v21  ;;  %v2795_v59 = vrot.slane %v2779_v54, %v2764_v49  ;;  %v2798_v60 = vld [vmem:[%s2761_s17 + $0x10] sm:$0x7]  ;;  %v2806_v62 = vrot.slane %v2788_v57, %v2764_v49  ;;  %vm271_vm6 = vsmask.f32 7448  ;;  %v2420_v1 = vld [vmem:[%s3405_s1 + $0x1b4] ss:$8 sps:$4 sm:$0xff]   ;;  %vm2853_vm8 = vmor %vm2814_vm5, %vm269_vm2 }
  0x20   : > { %v2829_v5 = vrot.slane %v2798_v60, %v2764_v49  ;;  %v2422_v6 = vld [vmem:[%s3405_s1 + $0xb0] ss:$8 sps:$4 sm:$0xff]   ;;  %v2839_v8 = vcombine.high %v2802_v61, %v2802_v61  ;;  %v2847_v10 = vcombine.high %v2810_v63, %v2810_v63  ;;  %v288_v11 = vshrl.u32 %v2802_v61, 16  ;;  %v2424_v17 = vld [vmem:[%s3405_s1 + $0xa4] ss:$8 sps:$4 sm:$0xff]   ;;  %vm2875_vm10 = vmor %vm2853_vm8, %vm271_vm6  ;;  %s2174_s23 = sshll.u32 %s3423_s19, 2 }
  0x21   : > { %1419 = vmatpush1.bf16.msra.mxu0 %v2380_v22  ;;  %v2823_v2 = vcombine.high %v2795_v59, %v2795_v59  ;;  %v274_v3 = vshrl.u32 %v2795_v59, 16  ;;  %v277_v4 = vshll.u32 %v2795_v59, 16  ;;  %v2423_v7 = vld [vmem:[%s3405_s1 + $0x1b0] ss:$8 sps:$4 sm:$0xff]   ;;  %v2843_v9 = vcombine.high %v2806_v62, %v2806_v62  ;;  %v2426_v22 = vld [vmem:[%s3405_s1 + $0x1a4] ss:$8 sps:$4 sm:$0xff]   ;;  %vm2905_vm11 = vmor %vm329_vm3, %vm330_vm4  ;;  %s3376_s26 = scalar_lea.vmem %s3409_s5, %s2174_s23 }
  0x22   : > { %1462 = vmatpush1.bf16.msra.mxu1 %v2381_v23  ;;  %1420 = vmatprep.subr.bf16.mxu0 %v2382_v24  ;;  %v291_v16 = vshll.u32 %v2802_v61, 16  ;;  %v290_v18 = vrot.slane %v288_v11, 6  ;;  %v297_v19 = vshll.u32 %v2839_v8, 16  ;;  %v302_v20 = vshrl.u32 %v2806_v62, 16  ;;  %v2430_v38 = vld [vmem:[%s3405_s1 + $0x94] ss:$8 sps:$4 sm:$0xff]   ;;  %vm2930_vm12 = vmor %vm2905_vm11, %vm332_vm7 }
  0x23   : > { %1463 = vmatprep.subr.bf16.mxu1 %v2384_v25  ;;  %v276_v13 = vrot.slane %v274_v3, 6  ;;  %v279_v14 = vrot.slane %v277_v4, 7  ;;  %v283_v15 = vshll.u32 %v2823_v2, 16  ;;  %v305_v21 = vshll.u32 %v2806_v62, 16  ;;  %v2436_v11 = vld [vmem:[%s3405_s1 + $0x84] ss:$8 sps:$4 sm:$0xff]  }
  0x24   : > { %v293_v25 = vrot.slane %v291_v16, 7  ;;  %vm334_vm9 = vcmask 1046534   ;;  %v319_v37 = vshll.u32 %v2810_v63, 16  ;;  %v2890_v42 = vcombine.high %v2829_v5, %v2829_v5  ;;  %v2438_v12 = vld [vmem:[%s3405_s1 + $0x184] ss:$8 sps:$4 sm:$0xff]  }
  0x25   : > { %1421 = vmatpush1.bf16.msra.mxu0 %v2386_v26  ;;  %v280_v23 = vor.u32 %v279_v14, %v276_v13  ;;  %v285_v24 = vrot.slane %v283_v15, 7  ;;  %v311_v26 = vshll.u32 %v2843_v9, 16  ;;  %vm2962_vm13 = vmor %vm2930_vm12, %vm334_vm9  ;;  %vm1743_vm14 = vcmask 1041408  }
  0x26   : > { %1464 = vmatpush1.bf16.msra.mxu1 %v2387_v27  ;;  %1422 = vmatprep.subr.bf16.mxu0 %v2388_v28  ;;  %v2428_v27 = vld [vmem:[%s3405_s1 + $0xa0] ss:$8 sps:$4 sm:$0xff]   ;;  %v2514_v28 = vld [vmem:[%s3405_s1 + $0x2c4] ss:$8 sps:$4 sm:$0xff]   ;;  %vm2073_vm15 = vcmask 1041409  }
  0x27   : > { %1465 = vmatprep.subr.bf16.mxu1 %v2390_v29  ;;  %v299_v29 = vrot.slane %v297_v19, 7  ;;  %v313_v36 = vrot.slane %v311_v26, 7  ;;  %v461_v19 = vcombine.low %v2791_v58, %v2798_v60  ;;  %v407_v26 = vcombine.low %v2788_v57, %v2791_v58 }
  0x29   : > { %1423 = vmatpush1.bf16.msra.mxu0 %v2392_v30  ;;  %v304_v30 = vrot.slane %v302_v20, 6 }
  0x2a   : > { %1466 = vmatpush1.bf16.msra.mxu1 %v2393_v31  ;;  %1424 = vmatprep.subr.bf16.mxu0 %v2394_v32  ;;  %v307_v31 = vrot.slane %v305_v21, 7  ;;  %v316_v32 = vshrl.u32 %v2810_v63, 16  ;;  %v2464_v21 = vld [vmem:[%s3405_s1 + $0x240] ss:$8 sps:$4 sm:$0xff]  }
  0x2b   : > { %1467 = vmatprep.subr.bf16.mxu1 %v2396_v33  ;;  %v2429_v33 = vld [vmem:[%s3405_s1 + $0x1a0] ss:$8 sps:$4 sm:$0xff]  }
  0x2d   : > { %1425 = vmatpush2.bf16.msra.mxu0 %v2398_v34  ;;  %v281_v34 = vrot.slane %v280_v23, 2 }
  0x2e   : > { %1468 = vmatpush2.bf16.msra.mxu1 %v2399_v35  ;;  %1426 = vmatprep.subr.bf16.mxu0 %v2400_v39  ;;  %v294_v35 = vor.u32 %v293_v25, %v290_v18  ;;  %v308_v39 = vor.u32 %v307_v31, %v304_v30  ;;  %v406_v25 = vcombine.low %v2779_v54, %v2785_v56  ;;  %v2448_v54 = vld [vmem:[%s3405_s1 + $0x274] ss:$8 sps:$4 sm:$0xff]  }
  0x2f   : > { %1469 = vmatprep.subr.bf16.mxu1 %v2402_v40  ;;  %v318_v40 = vrot.slane %v316_v32, 6  ;;  %v475_v31 = vrot.slane %v461_v19, %v2764_v49  ;;  %v2175_v32 = vrot.slane %v2795_v59, 9  ;;  %v2451_v59 = vld [vmem:[%s3405_s1 + $0x374] ss:$8 sps:$4 sm:$0xff]   ;;  %v2455_v19 = vld [vmem:[%s3405_s1 + $0x360] ss:$8 sps:$4 sm:$0xff]  }
  0x30   : > { %v414_v58 = vrot.slane %v406_v25, %v2764_v49  ;;  %v2470_v25 = vld [vmem:[%s3405_s1 + $0x230] ss:$8 sps:$4 sm:$0xff]  }
  0x31   : > { %1427 = vmatpush2.bf16.msra.mxu0 %v2404_v41  ;;  %v325_v41 = vshll.u32 %v2847_v10, 16 }
  0x32   : > { %1470 = vmatpush2.bf16.msra.mxu1 %v2405_v44  ;;  %1428 = vmatprep.subr.bf16.mxu0 %v2406_v45  ;;  %v2432_v44 = vld [vmem:[%s3405_s1 + $0x194] ss:$8 sps:$4 sm:$0xff]   ;;  %v286_v45 = vsel %vm2875_vm10, %v281_v34, %v285_v24 }
  0x33   : > { %1471 = vmatprep.subr.bf16.mxu1 %v2408_v46  ;;  %v295_v46 = vrot.slane %v294_v35, 2  ;;  %v2508_v34 = vld [vmem:[%s3405_s1 + $0x2d4] ss:$8 sps:$4 sm:$0xff]  }
  0x35   : > { %1429 = vmatpush2.bf16.msra.mxu0 %v2410_v47  ;;  %v321_v47 = vrot.slane %v319_v37, 7  ;;  %v300_v3 = vsel %vm2875_vm10, %v295_v46, %v299_v29  ;;  %v2176_v37 = vrot.slane %v2802_v61, 9 }
  0x36   : > { %1472 = vmatpush2.bf16.msra.mxu1 %v2411_v48  ;;  %1430 = vmatprep.subr.bf16.mxu0 %v2412_v50  ;;  %v362_v48 = vshrl.u32 %v2829_v5, 16  ;;  %v2434_v50 = vld [vmem:[%s3405_s1 + $0x90] ss:$8 sps:$4 sm:$0xff]   ;;  %v424_v16 = vcombine.low %v286_v45, %v300_v3 }
  0x37   : > { %1473 = vmatprep.subr.bf16.mxu1 %v2414_v51  ;;  %v309_v51 = vrot.slane %v308_v39, 2  ;;  %v322_v4 = vor.u32 %v321_v47, %v318_v40  ;;  %v2178_v47 = vrot.slane %v2810_v63, 9  ;;  %v2179_v63 = vrot.slane %v2829_v5, 9 }
  0x38   : > { %v432_v24 = vrot.slane %v424_v16, %v2764_v49  ;;  %v2458_v16 = vld [vmem:[%s3405_s1 + $0x250] ss:$8 sps:$4 sm:$0xff]  }
  0x39   : > { %1431 = vmatpush2.bf16.msra.mxu0 %v2416_v52  ;;  %v327_v52 = vrot.slane %v325_v41, 7  ;;  %v314_v13 = vsel %vm2875_vm10, %v309_v51, %v313_v36  ;;  %v338_v36 = vrot.slane %v2823_v2, 7 }
  0x3a   : > { %1474 = vmatpush2.bf16.msra.mxu1 %v2417_v53  ;;  %1432 = vmatprep.subr.bf16.mxu0 %v2418_v55  ;;  %v365_v53 = vshll.u32 %v2829_v5, 16  ;;  %v371_v55 = vshll.u32 %v2890_v42, 16  ;;  %v478_v18 = vcombine.low %v300_v3, %v314_v13 }
  0x3b   : > { %1475 = vmatprep.subr.bf16.mxu1 %v2420_v1  ;;  %v2435_v1 = vld [vmem:[%s3405_s1 + $0x190] ss:$8 sps:$4 sm:$0xff]   ;;  %v339_v2 = vsel %vm2962_vm13, %v2175_v32, %v338_v36  ;;  %v2484_v32 = vld [vmem:[%s3405_s1 + $0x214] ss:$8 sps:$4 sm:$0xff]  }
  0x3c   : > { %v367_v14 = vrot.slane %v365_v53, 7  ;;  %v373_v15 = vrot.slane %v371_v55, 7  ;;  %v2948_v30 = vrot.slane %v478_v18, %v2764_v49  ;;  %v377_v53 = vrot.slane %v2890_v42, 7  ;;  %v2460_v42 = vld [vmem:[%s3405_s1 + $0x254] ss:$8 sps:$4 sm:$0xff]  }
  0x3d   : > { %1433 = vmatpush2.bf16.msra.mxu0 %v2422_v6  ;;  %v364_v6 = vrot.slane %v362_v48, 6  ;;  %v350_v48 = vrot.slane %v2847_v10, 7  ;;  %v229_v36 = vld [vmem:[%s2761_s17 + $0x14] sm:$0x7] }
  0x3e   : > { %1476 = vmatpush2.bf16.msra.mxu1 %v2423_v7  ;;  %1434 = vmatprep.subr.bf16.mxu0 %v2424_v17  ;;  %v460_v7 = vcombine.low %v2785_v56, %v2788_v57  ;;  %v323_v17 = vrot.slane %v322_v4, 2  ;;  %v2452_v4 = vld [vmem:[%s3405_s1 + $0x260] ss:$8 sps:$4 sm:$0xff]   ;;  %v3013_v5 = vsel %vm2962_vm13, %v2179_v63, %v377_v53  ;;  %v2502_v63 = vld [vmem:[%s3405_s1 + $0x2e4] ss:$8 sps:$4 sm:$0xff]  }
  0x3f   : > { %1477 = vmatprep.subr.bf16.mxu1 %v2426_v22  ;;  %v2440_v22 = vld [vmem:[%s3405_s1 + $0x80] ss:$8 sps:$4 sm:$0xff]   ;;  %v368_v23 = vor.u32 %v367_v14, %v364_v6  ;;  %v351_v10 = vsel %vm2962_vm13, %v2178_v47, %v350_v48  ;;  %v2457_v14 = vld [vmem:[%s3405_s1 + $0x364] ss:$8 sps:$4 sm:$0xff]   ;;  %v2494_v48 = vld [vmem:[%s3405_s1 + $0x2f0] ss:$8 sps:$4 sm:$0xff]  }
  0x40   : > { %v468_v20 = vrot.slane %v460_v7, %v2764_v49  ;;  %v328_v29 = vsel %vm2875_vm10, %v323_v17, %v327_v52  ;;  %v497_v7 = vcombine.low %v351_v10, %v3013_v5  ;;  %v2466_v17 = vld [vmem:[%s3405_s1 + $0x244] ss:$8 sps:$4 sm:$0xff]   ;;  %v2491_v53 = vld [vmem:[%s3405_s1 + $0x300] ss:$8 sps:$4 sm:$0xff]  }
  0x41   : > { %1435 = vmatpush2.bf16.msra.mxu0 %v2428_v27  ;;  %v2441_v27 = vld [vmem:[%s3405_s1 + $0x180] ss:$8 sps:$4 sm:$0xff]   ;;  %v369_v56 = vrot.slane %v368_v23, 2  ;;  %v425_v57 = vcombine.low %v314_v13, %v328_v29  ;;  %v2461_v23 = vld [vmem:[%s3405_s1 + $0x350] ss:$8 sps:$4 sm:$0xff]  }
  0x42   : > { %1478 = vmatpush2.bf16.msra.mxu1 %v2429_v33  ;;  %1436 = vmatprep.subr.bf16.mxu0 %v2430_v38  ;;  %v2957_v33 = vrot.slane %v407_v26, %v2764_v49  ;;  %v476_v35 = vcombine.low %v468_v20, %v475_v31  ;;  %v342_v38 = vrot.slane %v2839_v8, 7  ;;  %v346_v8 = vrot.slane %v2843_v9, 7  ;;  %v2454_v9 = vld [vmem:[%s3405_s1 + $0x264] ss:$8 sps:$4 sm:$0xff]   ;;  %v2463_v20 = vld [vmem:[%s3405_s1 + $0x354] ss:$8 sps:$4 sm:$0xff]  }
  0x43   : > { %1479 = vmatprep.subr.bf16.mxu1 %v2432_v44  ;;  %v2974_v39 = vsel %vm2875_vm10, %v369_v56, %v373_v15  ;;  %v2977_v40 = vrot.slane %v425_v57, %v2764_v49  ;;  %v2177_v44 = vrot.slane %v2806_v62, 9  ;;  %v511_v15 = vrot.slane %v497_v7, %v2764_v49  ;;  %v2478_v26 = vld [vmem:[%s3405_s1 + $0x224] ss:$8 sps:$4 sm:$0xff]   ;;  %v2476_v31 = vld [vmem:[%s3405_s1 + $0x220] ss:$8 sps:$4 sm:$0xff]  }
  0x44   : > { %v422_v41 = vcombine.low %v414_v58, %v2957_v33  ;;  %v479_v45 = vcombine.low %v328_v29, %v2974_v39  ;;  %1483 = vmatprep.mubr.bf16.mxu1 %v476_v35  ;;  %v343_v61 = vsel %vm2962_vm13, %v2176_v37, %v342_v38  ;;  %v2475_v29 = vld [vmem:[%s3405_s1 + $0x334] ss:$8 sps:$4 sm:$0xff]   ;;  %v2481_v56 = vld [vmem:[%s3405_s1 + $0x324] ss:$8 sps:$4 sm:$0xff]   ;;  %v2482_v57 = vld [vmem:[%s3405_s1 + $0x210] ss:$8 sps:$4 sm:$0xff]   ;;  %v386_v38 = vrot.slane %v229_v36, %v2764_v49 }
  0x45   : > { %1437 = vmatpush2.bf16.msra.mxu0 %v2434_v50  ;;  %v440_v46 = vcombine.low %v432_v24, %v2977_v40  ;;  %v442_v62 = vcombine.low %v339_v2, %v343_v61  ;;  %v2446_v50 = vld [vmem:[%s3405_s1 + $0x270] ss:$8 sps:$4 sm:$0xff]   ;;  %v347_v52 = vsel %vm2962_vm13, %v2177_v44, %v346_v8  ;;  %v2469_v24 = vld [vmem:[%s3405_s1 + $0x344] ss:$8 sps:$4 sm:$0xff]   ;;  %v2487_v35 = vld [vmem:[%s3405_s1 + $0x314] ss:$8 sps:$4 sm:$0xff]  }
  0x46   : > { %1480 = vmatpush2.bf16.msra.mxu1 %v2435_v1  ;;  %1438 = vmatprep.subr.bf16.mxu0 %v2436_v11  ;;  %v2994_v51 = vrot.slane %v479_v45, %v2764_v49  ;;  %v496_v55 = vcombine.low %v343_v61, %v347_v52  ;;  %v443_v0 = vcombine.low %v347_v52, %v351_v10  ;;  %v2490_v58 = vld [vmem:[%s3405_s1 + $0x204] ss:$8 sps:$4 sm:$0xff]   ;;  %v2488_v37 = vld [vmem:[%s3405_s1 + $0x200] ss:$8 sps:$4 sm:$0xff]   ;;  %v2496_v44 = vld [vmem:[%s3405_s1 + $0x2f4] ss:$8 sps:$4 sm:$0xff]  }
  0x47   : > { %1481 = vmatprep.subr.bf16.mxu1 %v2438_v12  ;;  %1440 = vmatprep.mubr.bf16.mxu0 %v440_v46  ;;  %v450_v1 = vrot.slane %v442_v62, %v2764_v49  ;;  %v2449_v12 = vld [vmem:[%s3405_s1 + $0x370] ss:$8 sps:$4 sm:$0xff]   ;;  %v387_v2 = vcombine.high %v386_v38, %v386_v38  ;;  %v2180_v61 = vrot.slane %v386_v38, 9  ;;  %v389_v8 = vshrl.u32 %v386_v38, 16  ;;  %v2493_v47 = vld [vmem:[%s3405_s1 + $0x304] ss:$8 sps:$4 sm:$0xff]  }
  0x48   : > { %v494_v3 = vcombine.low %v2948_v30, %v2994_v51  ;;  %v3016_v6 = vrot.slane %v443_v0, %v2764_v49  ;;  %v504_v11 = vrot.slane %v496_v55, %v2764_v49  ;;  %v2485_v45 = vld [vmem:[%s3405_s1 + $0x310] ss:$8 sps:$4 sm:$0xff]   ;;  %v392_v46 = vshll.u32 %v386_v38, 16  ;;  %v2500_v7 = vld [vmem:[%s3405_s1 + $0x2e0] ss:$8 sps:$4 sm:$0xff]  }
  0x49   : > { %1439 = vmatpush2.bf16.msra.mxu0 %v2440_v22  ;;  %v2472_v22 = vld [vmem:[%s3405_s1 + $0x234] ss:$8 sps:$4 sm:$0xff]   ;;  %v404_v62 = vrot.slane %v387_v2, 7  ;;  %v2541_v38 = vld [vmem:[%s3405_s1 + $0x384] ss:$8 sps:$4 sm:$0xff]  }
  0x4a   : > { %1482 = vmatpush2.bf16.msra.mxu1 %v2441_v27  ;;  %1494 = vmatprep.subr.bf16.mxu0 %v2448_v54  ;;  %v458_v13 = vcombine.low %v450_v1, %v3016_v6  ;;  %v512_v18 = vcombine.low %v504_v11, %v511_v15  ;;  %v2467_v27 = vld [vmem:[%s3405_s1 + $0x340] ss:$8 sps:$4 sm:$0xff]   ;;  %v2473_v54 = vld [vmem:[%s3405_s1 + $0x330] ss:$8 sps:$4 sm:$0xff]   ;;  %v394_v52 = vrot.slane %v392_v46, 7 }
  0x4b   : > { %1537 = vmatprep.subr.bf16.mxu1 %v2451_v59  ;;  %v2479_v59 = vld [vmem:[%s3405_s1 + $0x320] ss:$8 sps:$4 sm:$0xff]   ;;  %v405_v55 = vsel %vm2962_vm13, %v2180_v61, %v404_v62  ;;  %v2576_v61 = vmov 0   ;;  %v2549_v46 = vld [vmem:[%s3405_s1 + $0x450] ss:$8 sps:$4 sm:$0xff]  }
  0x4c   : > { %1441 = vmatmul.mubr.bf16.vlgmr.msra.gmra.mxu0 %v422_v41  ;;  %v514_v41 = vcombine.low %v2798_v60, %v229_v36  ;;  %v2544_v36 = vld [vmem:[%s3405_s1 + $0x474] ss:$8 sps:$4 sm:$0xff]   ;;  %v2554_v30 = vld [vmem:[%s3405_s1 + $0x444] ss:$8 sps:$4 sm:$0xff]   ;;  %v2552_v51 = vld [vmem:[%s3405_s1 + $0x440] ss:$8 sps:$4 sm:$0xff]  }
  0x4d   : > { %1495 = vmatpush1.bf16.msra.mxu0 %v2446_v50  ;;  %1484 = vmatmul.mubr.bf16.vlgmr.msra.gmra.mxu1 %v458_v13  ;;  %v391_v50 = vrot.slane %v389_v8, 6  ;;  %v2497_v13 = vld [vmem:[%s3405_s1 + $0x3f0] ss:$8 sps:$4 sm:$0xff]   ;;  %v2551_v8 = vld [vmem:[%s3405_s1 + $0x454] ss:$8 sps:$4 sm:$0xff]  }
  0x4e   : > { %1496 = vmatprep.subr.bf16.mxu0 %v2454_v9  ;;  %1538 = vmatpush1.bf16.msra.mxu1 %v2449_v12  ;;  %v3107_v60 = vrot.slane %v514_v41, %v2764_v49  ;;  %v398_v9 = vshll.u32 %v387_v2, 16  ;;  %v2542_v41 = vld [vmem:[%s3405_s1 + $0x470] ss:$8 sps:$4 sm:$0xff]   ;;  %v2546_v2 = vld [vmem:[%s3405_s1 + $0x460] ss:$8 sps:$4 sm:$0xff]  }
  0x4f   : > { %1539 = vmatprep.subr.bf16.mxu1 %v2457_v14  ;;  %1526 = vmatprep.mubr.bf16.mxu0 %v512_v18  ;;  %v395_v0 = vor.u32 %v394_v52, %v391_v50  ;;  %v2505_v14 = vld [vmem:[%s3405_s1 + $0x3e4] ss:$8 sps:$4 sm:$0xff]   ;;  %v2561_v62 = vld [vmem:[%s3405_s1 + $0x410] ss:$8 sps:$4 sm:$0xff]   ;;  %v2564_v52 = vld [vmem:[%s3405_s1 + $0x400] ss:$8 sps:$4 sm:$0xff]  }
  0x50   : > { %v522_v10 = vcombine.low %v2957_v33, %v3107_v60  ;;  %v400_v1 = vrot.slane %v398_v9, 7  ;;  %v2555_v33 = vld [vmem:[%s3405_s1 + $0x430] ss:$8 sps:$4 sm:$0xff]   ;;  %v2558_v60 = vld [vmem:[%s3405_s1 + $0x420] ss:$8 sps:$4 sm:$0xff]  }
  0x51   : > { %1497 = vmatpush1.bf16.msra.mxu0 %v2452_v4  ;;  %v2499_v4 = vld [vmem:[%s3405_s1 + $0x3f4] ss:$8 sps:$4 sm:$0xff]   ;;  %v396_v11 = vrot.slane %v395_v0, 2  ;;  %v2566_v50 = vld [vmem:[%s3405_s1 + $0x404] ss:$8 sps:$4 sm:$0xff]  }
  0x52   : > { %1498 = vmatprep.subr.bf16.mxu0 %v2460_v42  ;;  %1540 = vmatpush1.bf16.msra.mxu1 %v2455_v19  ;;  %v534_v42 = vcombine.low %v3013_v5, %v405_v55  ;;  %v2511_v19 = vld [vmem:[%s3405_s1 + $0x3d4] ss:$8 sps:$4 sm:$0xff]  }
  0x53   : > { %1541 = vmatprep.subr.bf16.mxu1 %v2463_v20  ;;  %v401_v5 = vsel %vm2875_vm10, %v396_v11, %v400_v1 }
  0x54   : > { %v3133_v12 = vrot.slane %v534_v42, %v2764_v49  ;;  %v524_v15 = vcombine.low %v2974_v39, %v401_v5  ;;  %v2503_v39 = vld [vmem:[%s3405_s1 + $0x3e0] ss:$8 sps:$4 sm:$0xff]  }
  0x55   : > { %1499 = vmatpush1.bf16.msra.mxu0 %v2458_v16 }
  0x56   : > { %1500 = vmatprep.subr.bf16.mxu0 %v2466_v17  ;;  %1542 = vmatpush1.bf16.msra.mxu1 %v2461_v23  ;;  %v542_v16 = vcombine.low %v3016_v6, %v3133_v12  ;;  %v2506_v17 = vld [vmem:[%s3405_s1 + $0x2d0] ss:$8 sps:$4 sm:$0xff]   ;;  %v531_v18 = vrot.slane %v524_v15, %v2764_v49 }
  0x57   : > { %1543 = vmatprep.subr.bf16.mxu1 %v2469_v24  ;;  %v2509_v23 = vld [vmem:[%s3405_s1 + $0x3d0] ss:$8 sps:$4 sm:$0xff]  }
  0x58   : > { %v532_v20 = vcombine.low %v2977_v40, %v531_v18  ;;  %v2517_v40 = vld [vmem:[%s3405_s1 + $0x3c4] ss:$8 sps:$4 sm:$0xff]   ;;  %v2518_v24 = vld [vmem:[%s3405_s1 + $0x2b0] ss:$8 sps:$4 sm:$0xff]  }
  0x59   : > { %1501 = vmatpush1.bf16.msra.mxu0 %v2464_v21  ;;  %v2512_v21 = vld [vmem:[%s3405_s1 + $0x2c0] ss:$8 sps:$4 sm:$0xff]  }
  0x5a   : > { %1502 = vmatprep.subr.bf16.mxu0 %v2472_v22  ;;  %1544 = vmatpush1.bf16.msra.mxu1 %v2467_v27  ;;  %v2520_v22 = vld [vmem:[%s3405_s1 + $0x2b4] ss:$8 sps:$4 sm:$0xff]  }
  0x5b   : > { %1545 = vmatprep.subr.bf16.mxu1 %v2475_v29  ;;  %1569 = vmatprep.mubr.bf16.mxu1 %v532_v20  ;;  %v2523_v27 = vld [vmem:[%s3405_s1 + $0x3b4] ss:$8 sps:$4 sm:$0xff]   ;;  %v2524_v29 = vld [vmem:[%s3405_s1 + $0x2a0] ss:$8 sps:$4 sm:$0xff]  }
  0x5d   : > { %1503 = vmatpush1.bf16.msra.mxu0 %v2470_v25  ;;  %v2526_v25 = vld [vmem:[%s3405_s1 + $0x2a4] ss:$8 sps:$4 sm:$0xff]  }
  0x5e   : > { %1504 = vmatprep.subr.bf16.mxu0 %v2478_v26  ;;  %1546 = vmatpush1.bf16.msra.mxu1 %v2473_v54  ;;  %v2515_v26 = vld [vmem:[%s3405_s1 + $0x3c0] ss:$8 sps:$4 sm:$0xff]   ;;  %v2529_v54 = vld [vmem:[%s3405_s1 + $0x3a4] ss:$8 sps:$4 sm:$0xff]  }
  0x5f   : > { %1547 = vmatprep.subr.bf16.mxu1 %v2481_v56  ;;  %v2530_v56 = vld [vmem:[%s3405_s1 + $0x290] ss:$8 sps:$4 sm:$0xff]  }
  0x61   : > { %1505 = vmatpush1.bf16.msra.mxu0 %v2476_v31  ;;  %v2532_v31 = vld [vmem:[%s3405_s1 + $0x294] ss:$8 sps:$4 sm:$0xff]  }
  0x62   : > { %1506 = vmatprep.subr.bf16.mxu0 %v2484_v32  ;;  %1548 = vmatpush1.bf16.msra.mxu1 %v2479_v59  ;;  %v2521_v32 = vld [vmem:[%s3405_s1 + $0x3b0] ss:$8 sps:$4 sm:$0xff]   ;;  %v2535_v59 = vld [vmem:[%s3405_s1 + $0x394] ss:$8 sps:$4 sm:$0xff]  }
  0x63   : > { %1549 = vmatprep.subr.bf16.mxu1 %v2487_v35  ;;  %v2536_v35 = vld [vmem:[%s3405_s1 + $0x280] ss:$8 sps:$4 sm:$0xff]  }
  0x65   : > { %1507 = vmatpush1.bf16.msra.mxu0 %v2482_v57  ;;  %v2538_v57 = vld [vmem:[%s3405_s1 + $0x284] ss:$8 sps:$4 sm:$0xff]  }
  0x66   : > { %1508 = vmatprep.subr.bf16.mxu0 %v2490_v58  ;;  %1550 = vmatpush1.bf16.msra.mxu1 %v2485_v45  ;;  %v2527_v58 = vld [vmem:[%s3405_s1 + $0x3a0] ss:$8 sps:$4 sm:$0xff]  }
  0x67   : > { %1551 = vmatprep.subr.bf16.mxu1 %v2493_v47  ;;  %v2539_v45 = vld [vmem:[%s3405_s1 + $0x380] ss:$8 sps:$4 sm:$0xff]   ;;  %v2560_v47 = vld [vmem:[%s3405_s1 + $0x424] ss:$8 sps:$4 sm:$0xff]  }
  0x69   : > { %1509 = vmatpush1.bf16.msra.mxu0 %v2488_v37  ;;  %v2533_v37 = vld [vmem:[%s3405_s1 + $0x390] ss:$8 sps:$4 sm:$0xff]  }
  0x6a   : > { %1510 = vmatprep.subr.bf16.mxu0 %v2496_v44  ;;  %1552 = vmatpush1.bf16.msra.mxu1 %v2491_v53  ;;  %v2548_v44 = vld [vmem:[%s3405_s1 + $0x464] ss:$8 sps:$4 sm:$0xff]  }
  0x6b   : > { %1553 = vmatprep.subr.bf16.mxu1 %v2499_v4 }
  0x6d   : > { %1511 = vmatpush2.bf16.msra.mxu0 %v2494_v48  ;;  %v2563_v48 = vld [vmem:[%s3405_s1 + $0x414] ss:$8 sps:$4 sm:$0xff]  }
  0x6e   : > { %1512 = vmatprep.subr.bf16.mxu0 %v2502_v63  ;;  %1554 = vmatpush2.bf16.msra.mxu1 %v2497_v13 }
  0x6f   : > { %1555 = vmatprep.subr.bf16.mxu1 %v2505_v14 }
  0x71   : > { %1513 = vmatpush2.bf16.msra.mxu0 %v2500_v7 }
  0x72   : > { %1514 = vmatprep.subr.bf16.mxu0 %v2508_v34  ;;  %1556 = vmatpush2.bf16.msra.mxu1 %v2503_v39 }
  0x73   : > { %1557 = vmatprep.subr.bf16.mxu1 %v2511_v19 }
  0x75   : > { %1515 = vmatpush2.bf16.msra.mxu0 %v2506_v17 }
  0x76   : > { %1516 = vmatprep.subr.bf16.mxu0 %v2514_v28  ;;  %1558 = vmatpush2.bf16.msra.mxu1 %v2509_v23 }
  0x77   : > { %1559 = vmatprep.subr.bf16.mxu1 %v2517_v40 }
  0x79   : > { %1517 = vmatpush2.bf16.msra.mxu0 %v2512_v21  ;;  %v1868_v21 = vsub.s32 0, %v2741_v43 }
  0x7a   : > { %1518 = vmatprep.subr.bf16.mxu0 %v2520_v22  ;;  %1560 = vmatpush2.bf16.msra.mxu1 %v2515_v26 }
  0x7b   : > { %1561 = vmatprep.subr.bf16.mxu1 %v2523_v27 }
  0x7d   : > { %1519 = vmatpush2.bf16.msra.mxu0 %v2518_v24  ;;  %v1864_v24 = vld [vmem:[%s3406_s2] sm:$0x3] }
  0x7e   : > { %1520 = vmatprep.subr.bf16.mxu0 %v2526_v25  ;;  %1562 = vmatpush2.bf16.msra.mxu1 %v2521_v32  ;;  %v1872_v25 = vsub.s32 1, %v2741_v43 }
  0x7f   : > { %1563 = vmatprep.subr.bf16.mxu1 %v2529_v54 }
  0x81   : > { %1521 = vmatpush2.bf16.msra.mxu0 %v2524_v29  ;;  %v1892_v29 = vld [vmem:[%s3407_s3] sm:$0x3] }
  0x82   : > { %1522 = vmatprep.subr.bf16.mxu0 %v2532_v31  ;;  %1564 = vmatpush2.bf16.msra.mxu1 %v2527_v58  ;;  %v1912_v58 = vld [vmem:[%s3408_s4] sm:$0x3] }
  0x83   : > { %1565 = vmatprep.subr.bf16.mxu1 %v2535_v59 }
  0x85   : > { %1523 = vmatpush2.bf16.msra.mxu0 %v2530_v56 }
  0x86   : > { %1524 = vmatprep.subr.bf16.mxu0 %v2538_v57  ;;  %1566 = vmatpush2.bf16.msra.mxu1 %v2533_v37  ;;  %v3285_v57 = vrot.slane %v1864_v24, %v1868_v21  ;;  %v2577_v37 = vmov 1966171168  }
  0x87   : > { %1567 = vmatprep.subr.bf16.mxu1 %v2541_v38  ;;  %v3294_v38 = vunpack.c.l.s4 %v2577_v37 }
  0x89   : > { %1525 = vmatpush2.bf16.msra.mxu0 %v2536_v35  ;;  %v3290_v35 = vrot.slane %v1864_v24, %v1872_v25 }
  0x8a   : > { %1580 = vmatprep.subr.bf16.mxu0 %v2544_v36  ;;  %1568 = vmatpush2.bf16.msra.mxu1 %v2539_v45  ;;  %v3292_v36 = vrot.slane %v1892_v29, %v1868_v21 }
  0x8c   : > { %1527 = vmatmul.mubr.bf16.vlgmr.msra.gmra.mxu0 %v494_v3  ;;  %v2557_v3 = vld [vmem:[%s3405_s1 + $0x434] ss:$8 sps:$4 sm:$0xff]  }
  0x8d   : > { %1581 = vmatpush1.bf16.msra.mxu0 %v2542_v41  ;;  %1612 = vmatprep.mubr.bf16.mxu0 %v2576_v61  ;;  %v3298_v61 = vrot.slane %v1892_v29, %v1872_v25 }
  0x8e   : > { %1582 = vmatprep.subr.bf16.mxu0 %v2548_v44  ;;  %1570 = vmatmul.mubr.bf16.vlgmr.msra.gmra.mxu1 %v522_v10 }
  0x91   : > { %1583 = vmatpush1.bf16.msra.mxu0 %v2546_v2 }
  0x92   : > { %1584 = vmatprep.subr.bf16.mxu0 %v2551_v8  ;;  %v3300_v8 = vrot.slane %v1912_v58, %v1868_v21 }
  0x95   : > { %1585 = vmatpush1.bf16.msra.mxu0 %v2549_v46  ;;  %v3302_v46 = vrot.slane %v1912_v58, %v1872_v25 }
  0x96   : > { %1586 = vmatprep.subr.bf16.mxu0 %v2554_v30 }
  0x99   : > { %1587 = vmatpush1.bf16.msra.mxu0 %v2552_v51 }
  0x9a   : > { %1588 = vmatprep.subr.bf16.mxu0 %v2557_v3 }
  0x9d   : > { %1589 = vmatpush1.bf16.msra.mxu0 %v2555_v33 }
  0x9e   : > { %1590 = vmatprep.subr.bf16.mxu0 %v2560_v47 }
  0xa1   : > { %1591 = vmatpush1.bf16.msra.mxu0 %v2558_v60  ;;  %v1951_v60 = vunpack.c.0.s8 %v3294_v38 }
  0xa2   : > { %1592 = vmatprep.subr.bf16.mxu0 %v2563_v48  ;;  %v2578_v48 = vmov 1935823168  }
  0xa5   : > { %1593 = vmatpush1.bf16.msra.mxu0 %v2561_v62  ;;  %v3307_v62 = vunpack.c.l.s4 %v2578_v48 }
  0xa6   : > { %1594 = vmatprep.subr.bf16.mxu0 %v2566_v50 }
  0xa9   : > { %1595 = vmatpush1.bf16.msra.mxu0 %v2564_v52 }
  0xac   : > { %1613 = vmatmul.mubr.bf16.vlgmr.msra.gmra.mxu0 %v542_v16 }
 0x10c   : > { %v1442_v9 = vpop.f32.mrf.mxu0 }
 0x10d   : > { %v1485_v63 = vpop.f32.mrf.mxu1 }
 0x10e   : > { %v1444_v10 = vpop.f32.mrf.mxu0  ;;  %v1486_v5 = vadd.f32 %v1485_v63, %v1442_v9 }
 0x10f   : > { %v1487_v53 = vpop.f32.mrf.mxu1 }
 0x110   : > { %v1446_v55 = vpop.f32.mrf.mxu0  ;;  %v1488_v14 = vadd.f32 %v1487_v53, %v1444_v10 }
 0x111   : > { %v1489_v0 = vpop.f32.mrf.mxu1 }
 0x112   : > { %v1448_v1 = vpop.f32.mrf.mxu0  ;;  %v1490_v16 = vadd.f32 %v1489_v0, %v1446_v55 }
 0x113   : > { %v1491_v42 = vpop.f32.mrf.mxu1 }
 0x114   : > { %v1492_v12 = vadd.f32 %v1491_v42, %v1448_v1 }
 0x14c   : > { %v1528_v4 = vpop.f32.mrf.mxu0 }
 0x14d   : > { %v1529_v15 = vadd.f32 %v1528_v4, %v1486_v5 }
 0x14e   : > { %v1530_v7 = vpop.f32.mrf.mxu0  ;;  %v1571_v11 = vpop.f32.mrf.mxu1 }
 0x14f   : > { %v1531_v17 = vadd.f32 %v1530_v7, %v1488_v14  ;;  %v1572_v39 = vadd.f32 %v1571_v11, %v1529_v15 }
 0x150   : > { %v1532_v34 = vpop.f32.mrf.mxu0  ;;  %v1573_v13 = vpop.f32.mrf.mxu1 }
 0x151   : > { %v1574_v19 = vadd.f32 %v1573_v13, %v1531_v17  ;;  %v1533_v22 = vadd.f32 %v1532_v34, %v1490_v16 }
 0x152   : > { %v1534_v28 = vpop.f32.mrf.mxu0  ;;  %v1575_v6 = vpop.f32.mrf.mxu1 }
 0x153   : > { %v1535_v20 = vadd.f32 %v1534_v28, %v1492_v12  ;;  %v1576_v59 = vadd.f32 %v1575_v6, %v1533_v22 }
 0x154   : > { %v1577_v23 = vpop.f32.mrf.mxu1 }
 0x155   : > { %v1578_v32 = vadd.f32 %v1577_v23, %v1535_v20 }
 0x16c   : > { %v1614_v18 = vpop.f32.mrf.mxu0 }
 0x16d   : > { %v1615_v26 = vadd.f32 %v1614_v18, %v1572_v39 }
 0x16e   : > { %v1616_v40 = vpop.f32.mrf.mxu0 }
 0x16f   : > { %v1617_v27 = vadd.f32 %v1616_v40, %v1574_v19 }
 0x170   : > { %v1618_v31 = vpop.f32.mrf.mxu0 }
 0x171   : > { %v1627_v54 = vcombine.low %v1615_v26, %v1617_v27  ;;  %v1628_v56 = vcombine.high %v1615_v26, %v1617_v27  ;;  %v1619_v30 = vadd.f32 %v1618_v31, %v1576_v59 }
 0x172   : > { %v1620_v41 = vpop.f32.mrf.mxu0 }
 0x173   : > { %v1635_v44 = vrot.slane %v1627_v54, %v2764_v49  ;;  %v1642_v45 = vrot.slane %v1628_v56, %v2764_v49  ;;  %v1621_v2 = vadd.f32 %v1620_v41, %v1578_v32 }
 0x175   : > { %v1643_v51 = vcombine.high %v1635_v44, %v1635_v44  ;;  %v1644_v3 = vcombine.high %v1642_v45, %v1642_v45  ;;  %v1669_v33 = vrot.slane %v1635_v44, %v2764_v49  ;;  %v1685_v47 = vrot.slane %v1642_v45, %v2764_v49 }
 0x176   : > { %v1645_v50 = vcombine.low %v1619_v30, %v1621_v2  ;;  %v1646_v52 = vcombine.high %v1619_v30, %v1621_v2 }
 0x177   : > { %v1670_v9 = vcombine.high %v1669_v33, %v1669_v33  ;;  %v1677_v63 = vrot.slane %v1643_v51, %v2764_v49  ;;  %v1686_v10 = vcombine.high %v1685_v47, %v1685_v47  ;;  %v1693_v53 = vrot.slane %v1644_v3, %v2764_v49 }
 0x178   : > { %v1744_v55 = vsel %vm1743_vm14, %v1669_v33, -inf  ;;  %v1772_v0 = vsel %vm1743_vm14, %v1685_v47, -inf  ;;  %v1653_v1 = vrot.slane %v1645_v50, %v2764_v49  ;;  %v3315_v4 = vrot.slane %v1646_v52, %v2764_v49 }
 0x179   : > { %v1678_v42 = vcombine.high %v1677_v63, %v1677_v63  ;;  %v1694_v7 = vcombine.high %v1693_v53, %v1693_v53  ;;  %v1745_v11 = vrot.slane %v1744_v55, 4  ;;  %v1751_v34 = vsel %vm1743_vm14, %v1670_v9, -inf }
 0x17a   : > { %v1752_v13 = vrot.slane %v1751_v34, 4  ;;  %v1758_v5 = vsel %vm1743_vm14, %v1677_v63, -inf  ;;  %v1773_v14 = vrot.slane %v1772_v0, 4  ;;  %v1779_v15 = vsel %vm1743_vm14, %v1686_v10, -inf }
 0x17b   : > { %v1746_v17 = vmax.f32 %v1744_v55, %v1745_v11  ;;  %v1759_v28 = vrot.slane %v1758_v5, 4  ;;  %v1765_v6 = vsel %vm1743_vm14, %v1678_v42, -inf  ;;  %v1780_v12 = vrot.slane %v1779_v15, 4 }
 0x17c   : > { %v1753_v16 = vmax.f32 %v1751_v34, %v1752_v13  ;;  %v1766_v18 = vrot.slane %v1765_v6, 4  ;;  %v1774_v39 = vmax.f32 %v1772_v0, %v1773_v14  ;;  %v1786_v19 = vsel %vm1743_vm14, %v1693_v53, -inf }
 0x17d   : > { %v1747_v20 = vrot.slane %v1746_v17, 2  ;;  %v1760_v21 = vmax.f32 %v1758_v5, %v1759_v28  ;;  %v1781_v22 = vmax.f32 %v1779_v15, %v1780_v12  ;;  %v1787_v23 = vrot.slane %v1786_v19, 4 }
 0x17e   : > { %v1754_v40 = vrot.slane %v1753_v16, 2  ;;  %v1767_v24 = vmax.f32 %v1765_v6, %v1766_v18  ;;  %v1775_v25 = vrot.slane %v1774_v39, 2  ;;  %v1793_v26 = vsel %vm1743_vm14, %v1694_v7, -inf }
 0x17f   : > { %v1748_v27 = vmax.f32 %v1746_v17, %v1747_v20  ;;  %v1761_v29 = vrot.slane %v1760_v21, 2  ;;  %v1782_v31 = vrot.slane %v1781_v22, 2  ;;  %v1788_v32 = vmax.f32 %v1786_v19, %v1787_v23 }
 0x180   : > { %v1755_v54 = vmax.f32 %v1753_v16, %v1754_v40  ;;  %v1768_v56 = vrot.slane %v1767_v24, 2  ;;  %v1776_v58 = vmax.f32 %v1774_v39, %v1775_v25  ;;  %v1794_v59 = vrot.slane %v1793_v26, 4 }
 0x181   : > { %v1749_v37 = vrot.slane %v1748_v27, 1  ;;  %v1762_v41 = vmax.f32 %v1760_v21, %v1761_v29  ;;  %v1783_v44 = vmax.f32 %v1781_v22, %v1782_v31  ;;  %v1789_v45 = vrot.slane %v1788_v32, 2 }
 0x182   : > { %v1756_v2 = vrot.slane %v1755_v54, 1  ;;  %v1769_v30 = vmax.f32 %v1767_v24, %v1768_v56  ;;  %v1777_v51 = vrot.slane %v1776_v58, 1  ;;  %v1795_v3 = vmax.f32 %v1793_v26, %v1794_v59 }
 0x183   : > { %v1750_v33 = vmax.f32 %v1748_v27, %v1749_v37  ;;  %v1763_v47 = vrot.slane %v1762_v41, 1  ;;  %v1784_v48 = vrot.slane %v1783_v44, 1  ;;  %v1790_v50 = vmax.f32 %v1788_v32, %v1789_v45 }
 0x184   : > { %v1757_v52 = vmax.f32 %v1755_v54, %v1756_v2  ;;  %v1770_v9 = vrot.slane %v1769_v30, 1  ;;  %v1778_v63 = vmax.f32 %v1776_v58, %v1777_v51  ;;  %v1796_v10 = vrot.slane %v1795_v3, 2 }
 0x185   : > { %v1764_v53 = vmax.f32 %v1762_v41, %v1763_v47  ;;  %v1785_v55 = vmax.f32 %v1783_v44, %v1784_v48  ;;  %v1791_v0 = vrot.slane %v1790_v50, 1  ;;  %v1661_v42 = vcombine.high %v1653_v1, %v1653_v1 }
 0x186   : > { %v1797_v7 = vmax.f32 %v1795_v3, %v1796_v10  ;;  %v1856_v11 = vmax.f32 %v1750_v33, %v1778_v63  ;;  %v3326_v34 = vsub.s32 %v1951_v60, %v2741_v43  ;;  %v1662_v13 = vcombine.high %v3315_v4, %v3315_v4 }
 0x187   : > { %v1792_v5 = vmax.f32 %v1790_v50, %v1791_v0  ;;  %v1857_v14 = vmax.f32 %v1757_v52, %v1785_v55  ;;  %v1701_v15 = vrot.slane %v1653_v1, %v2764_v49  ;;  %v1709_v17 = vrot.slane %v1661_v42, %v2764_v49 }
 0x188   : > { %v1771_v28 = vmax.f32 %v1769_v30, %v1770_v9  ;;  %v1798_v6 = vrot.slane %v1797_v7, 1  ;;  %v1876_v12 = vadd.f32 %v3285_v57, %v1856_v11  ;;  %v2010_v16 = vunpack.c.0.s8 %v3307_v62 }
 0x189   : > { %v1858_v18 = vmax.f32 %v1764_v53, %v1792_v5  ;;  %v1877_v38 = vadd.f32 %v3290_v35, %v1857_v14  ;;  %v1702_v60 = vcombine.high %v1701_v15, %v1701_v15  ;;  %v1710_v39 = vcombine.high %v1709_v17, %v1709_v17 }
 0x18a   : > { %v1799_v19 = vmax.f32 %v1797_v7, %v1798_v6  ;;  %v1884_v20 = vmax.f32 %v1876_v12, 0.0  ;;  %v1717_v21 = vrot.slane %v3315_v4, %v2764_v49  ;;  %v1725_v1 = vrot.slane %v1662_v13, %v2764_v49 }
 0x18b   : > { %v1878_v22 = vadd.f32 %v3285_v57, %v1858_v18  ;;  %v1885_v23 = vmax.f32 %v1877_v38, 0.0  ;;  %v1800_v40 = vsel %vm1743_vm14, %v1701_v15, -inf  ;;  %v1807_v24 = vsel %vm1743_vm14, %v1702_v60, -inf }
 0x18c   : > { %v1859_v62 = vmax.f32 %v1771_v28, %v1799_v19  ;;  %v1904_v25 = vmul.f32 %v3292_v36, %v1884_v20  ;;  %v1801_v26 = vrot.slane %v1800_v40, 4  ;;  %v1808_v27 = vrot.slane %v1807_v24, 4 }
 0x18d   : > { %v1886_v29 = vmax.f32 %v1878_v22, 0.0  ;;  %v1905_v31 = vmul.f32 %v3298_v61, %v1885_v23  ;;  %v1814_v32 = vsel %vm1743_vm14, %v1709_v17, -inf  ;;  %v1821_v4 = vsel %vm1743_vm14, %v1710_v39, -inf }
 0x18e   : > { %v1879_v49 = vadd.f32 %v3290_v35, %v1859_v62  ;;  %v1718_v54 = vcombine.high %v1717_v21, %v1717_v21  ;;  %v1802_v56 = vmax.f32 %v1800_v40, %v1801_v26  ;;  %v1809_v58 = vmax.f32 %v1807_v24, %v1808_v27 }
 0x18f   : > { %v1924_v59 = vadd.f32 %v3300_v8, %v1904_v25  ;;  %v1925_v37 = vadd.f32 %v3302_v46, %v1905_v31  ;;  %v1815_v41 = vrot.slane %v1814_v32, 4  ;;  %v1822_v44 = vrot.slane %v1821_v4, 4 }
 0x190   : > { %v1887_v45 = vmax.f32 %v1879_v49, 0.0  ;;  %v1906_v2 = vmul.f32 %v3292_v36, %v1886_v29  ;;  %v1803_v30 = vrot.slane %v1802_v56, 2  ;;  %v1828_v51 = vsel %vm1743_vm14, %v1717_v21, -inf }
 0x191   : > { %v2325_v3 = vpack.c.bf16 %v1925_v37, %v1924_v59  ;;  %v1810_v33 = vrot.slane %v1809_v58, 2  ;;  %v1816_v47 = vmax.f32 %v1814_v32, %v1815_v41  ;;  %v1823_v48 = vmax.f32 %v1821_v4, %v1822_v44 }
 0x192   : > { %v1907_v50 = vmul.f32 %v3298_v61, %v1887_v45  ;;  %v3352_v52 = vsub.s32 %v2010_v16, %v2741_v43  ;;  %v1804_v9 = vmax.f32 %v1802_v56, %v1803_v30  ;;  %v1829_v63 = vrot.slane %v1828_v51, 4 }
 0x193   : > { %v1955_v10 = vrot.slane %v2325_v3, %v3326_v34  ;;  %v1817_v53 = vrot.slane %v1816_v47, 2  ;;  %v1824_v55 = vrot.slane %v1823_v48, 2  ;;  %v1835_v0 = vsel %vm1743_vm14, %v1718_v54, -inf }
 0x194   : > { %v1926_v42 = vadd.f32 %v3300_v8, %v1906_v2  ;;  %v1927_v7 = vadd.f32 %v3302_v46, %v1907_v50  ;;  %v1726_v11 = vcombine.high %v1725_v1, %v1725_v1  ;;  %v1830_v13 = vmax.f32 %v1828_v51, %v1829_v63 }
 0x195   : > { %v1962_v5 = vrot.slane %v1955_v10, %v3326_v34  ;;  %v1805_v14 = vrot.slane %v1804_v9, 1  ;;  %v1811_v15 = vmax.f32 %v1809_v58, %v1810_v33  ;;  %v1836_v43 = vrot.slane %v1835_v0, 4 }
 0x196   : > { %v2326_v17 = vpack.c.bf16 %v1927_v7, %v1926_v42  ;;  %v1831_v28 = vrot.slane %v1830_v13, 2  ;;  %v1818_v6 = vmax.f32 %v1816_v47, %v1817_v53  ;;  %v1825_v12 = vmax.f32 %v1823_v48, %v1824_v55 }
 0x197   : > { %v1837_v16 = vmax.f32 %v1835_v0, %v1836_v43  ;;  %v1842_v60 = vsel %vm1743_vm14, %v1725_v1, -inf  ;;  %v1849_v39 = vsel %vm1743_vm14, %v1726_v11, -inf  ;;  %v2014_v19 = vrot.slane %v1962_v5, %v3352_v52 }
 0x198   : > { %v1970_v18 = vrot.slane %v2326_v17, %v3326_v34  ;;  %v1832_v38 = vmax.f32 %v1830_v13, %v1831_v28  ;;  %v1806_v20 = vmax.f32 %v1804_v9, %v1805_v14  ;;  %v1812_v21 = vrot.slane %v1811_v15, 1 }
 0x199   : > { %v1838_v22 = vrot.slane %v1837_v16, 2  ;;  %v1843_v24 = vrot.slane %v1842_v60, 4  ;;  %v1850_v62 = vrot.slane %v1849_v39, 4  ;;  %v1819_v25 = vrot.slane %v1818_v6, 1 }
 0x19a   : > { %v1977_v23 = vrot.slane %v1970_v18, %v3326_v34  ;;  %v1833_v40 = vrot.slane %v1832_v38, 1  ;;  %v1826_v26 = vrot.slane %v1825_v12, 1  ;;  %v2021_v4 = vrot.slane %v2014_v19, %v3352_v52 }
 0x19b   : > { %v1839_v27 = vmax.f32 %v1837_v16, %v1838_v22  ;;  %v1844_v32 = vmax.f32 %v1842_v60, %v1843_v24  ;;  %v1851_v1 = vmax.f32 %v1849_v39, %v1850_v62  ;;  %v1813_v49 = vmax.f32 %v1811_v15, %v1812_v21 }
 0x19c   : > { %v2028_v29 = vrot.slane %v1977_v23, %v3352_v52  ;;  %v1834_v31 = vmax.f32 %v1832_v38, %v1833_v40  ;;  %v1820_v41 = vmax.f32 %v1818_v6, %v1819_v25  ;;  %v1827_v44 = vmax.f32 %v1825_v12, %v1826_v26 }
 0x19d   : > { %v1840_v54 = vrot.slane %v1839_v27, 1  ;;  %v1845_v58 = vrot.slane %v1844_v32, 2  ;;  %v1852_v59 = vrot.slane %v1851_v1, 2  ;;  %v2064_v33 = vunpack.c.l.b16 %v2021_v4 }
 0x19e   : > { %v2035_v56 = vrot.slane %v2028_v29, %v3352_v52  ;;  %v1860_v37 = vmax.f32 %v1806_v20, %v1834_v31  ;;  %v2065_v47 = vunpack.c.h.b16 %v2021_v4 }
 0x19f   : > { %v1841_v45 = vmax.f32 %v1839_v27, %v1840_v54  ;;  %v1846_v51 = vmax.f32 %v1844_v32, %v1845_v58  ;;  %v1853_v3 = vmax.f32 %v1851_v1, %v1852_v59 }
 0x1a0   : > { %v2066_v2 = vunpack.c.l.b16 %v2035_v56  ;;  %v2067_v30 = vunpack.c.h.b16 %v2035_v56  ;;  %v1880_v50 = vadd.f32 %v3285_v57, %v1860_v37 }
 0x1a1   : > { %v1861_v48 = vmax.f32 %v1813_v49, %v1841_v45  ;;  %v1847_v10 = vrot.slane %v1846_v51, 1  ;;  %v1854_v53 = vrot.slane %v1853_v3, 1 }
 0x1a2   : > { %v2072_v9 = vrot.slane %v2066_v2, 7  ;;  %v2075_v63 = vrot.slane %v2067_v30, 7  ;;  %v1888_v0 = vmax.f32 %v1880_v50, 0.0 }
 0x1a3   : > { %v1881_v55 = vadd.f32 %v3290_v35, %v1861_v48  ;;  %v1848_v11 = vmax.f32 %v1846_v51, %v1847_v10  ;;  %v1855_v13 = vmax.f32 %v1853_v3, %v1854_v53 }
 0x1a4   : > { %v2074_v42 = vsel %vm2073_vm15, %v2072_v9, %v2064_v33  ;;  %v2076_v7 = vsel %vm2073_vm15, %v2075_v63, %v2065_v47  ;;  %v1908_v15 = vmul.f32 %v3292_v36, %v1888_v0 }
 0x1a5   : > { %v2081_v5 = vpack.c.b16 %v2076_v7, %v2074_v42  ;;  %v1889_v14 = vmax.f32 %v1881_v55, 0.0  ;;  %v1862_v43 = vmax.f32 %v1820_v41, %v1848_v11  ;;  %v1863_v17 = vmax.f32 %v1827_v44, %v1855_v13 }
 0x1a6   : > { %v1928_v18 = vadd.f32 %v3300_v8, %v1908_v15 }
 0x1a7   : > { %v2089_v28 = vrot.slane %v2081_v5, %v3326_v34  ;;  %v1909_v6 = vmul.f32 %v3298_v61, %v1889_v14  ;;  %v1882_v12 = vadd.f32 %v3285_v57, %v1862_v43  ;;  %v1883_v16 = vadd.f32 %v3290_v35, %v1863_v17 }
 0x1a9   : > { %2329 = vst.sshfl [vmem:[%s3376_s26] sm:$0x5 pattern:$0x73625140] %v2089_v28  ;;  %v1929_v38 = vadd.f32 %v3302_v46, %v1909_v6  ;;  %v1890_v60 = vmax.f32 %v1882_v12, 0.0  ;;  %v1891_v39 = vmax.f32 %v1883_v16, 0.0 }
 0x1ab   : > { %v2327_v19 = vpack.c.bf16 %v1929_v38, %v1928_v18  ;;  %v1910_v20 = vmul.f32 %v3292_v36, %v1890_v60  ;;  %v1911_v21 = vmul.f32 %v3298_v61, %v1891_v39 }
 0x1ad   : > { %v1985_v22 = vrot.slane %v2327_v19, %v3326_v34  ;;  %v1930_v23 = vadd.f32 %v3300_v8, %v1910_v20  ;;  %v1931_v57 = vadd.f32 %v3302_v46, %v1911_v21 }
 0x1af   : > { %v1992_v35 = vrot.slane %v1985_v22, %v3326_v34  ;;  %v2328_v40 = vpack.c.bf16 %v1931_v57, %v1930_v23 }
 0x1b1   : > { %v2000_v24 = vrot.slane %v2328_v40, %v3326_v34  ;;  %v2042_v25 = vrot.slane %v1992_v35, %v3352_v52 }
 0x1b3   : > { %v2007_v62 = vrot.slane %v2000_v24, %v3326_v34  ;;  %v2049_v61 = vrot.slane %v2042_v25, %v3352_v52 }
 0x1b5   : > { %v2056_v36 = vrot.slane %v2007_v62, %v3352_v52  ;;  %v2068_v29 = vunpack.c.l.b16 %v2049_v61  ;;  %v2069_v46 = vunpack.c.h.b16 %v2049_v61 }
 0x1b7   : > { %v2063_v26 = vrot.slane %v2056_v36, %v3352_v52 }
 0x1b9   : > { %v2070_v27 = vunpack.c.l.b16 %v2063_v26  ;;  %v2071_v8 = vunpack.c.h.b16 %v2063_v26 }
 0x1bb   : > { %v2077_v31 = vrot.slane %v2070_v27, 7  ;;  %v2079_v32 = vrot.slane %v2071_v8, 7 }
 0x1bd   : > { %v2078_v1 = vsel %vm2073_vm15, %v2077_v31, %v2068_v29  ;;  %v2080_v4 = vsel %vm2073_vm15, %v2079_v32, %v2069_v46 }
 0x1be   : > { %v2082_v49 = vpack.c.b16 %v2080_v4, %v2078_v1 }
 0x1c0   : > { %v2103_v54 = vrot.slane %v2082_v49, %v3326_v34 }
 0x1c2   : > { %2330 = vst.sshfl [vmem:[%s3376_s26 + $0x2] sm:$0x5 pattern:$0x73625140] %v2103_v54 }
 0x1c3 PF: > { %s15_s18 = sadd.s32 1, %s2573_s18  }
 0x1c4   : > { %p12_p4 = scmp.ge.s32.totalorder %s15_s18, 4  }
 0x1c6   :  { %14 = sbr.rel (!%p12_p4) target bundleno = 1 (0x1), region = 70 }

// kernel: deepfake_detector_forward.11
= control target key start
LH: loop header
LB: loop body
LE: loop exit
PB: predicated region body
PF: predicated region fallthrough
CT: control target
= control target key end

     0   :  { %s1545_s12 = smov 0   ;;  %s1547_s13 = smov 0   ;;  %s1835_s0 = inlined_call_operand.vmem [shape: bf16[16,512], index: 0, kind: input, shape index: {}]   ;;  %s1836_s1 = inlined_call_operand.vmem [shape: bf16[512,512], index: 1, kind: input, shape index: {}]   ;;  %s1837_s2 = inlined_call_operand.vmem [shape: f32[1,512], index: 2, kind: input, shape index: {}]   ;;  %s1838_s3 = inlined_call_operand.vmem [shape: bf16[16,512], index: 3, kind: output, shape index: {}]  }
   0x1   :  { %s1549_s14 = smov 0   ;;  %s1551_s15 = smov 0  }
   0x2   :  { %s1553_s16 = smov 0  }
   0x3 LB: > { %s28_s17 = sadd.s32 1, %s1519_s15  ;;  %s1252_s18 = sadd.s32 4294967295, %s1523_s16   ;;  %s1523_s16 = sphi %s1553_s16, %s13_s16   ;;  %s1519_s15 = sphi %s1551_s15, %s1843_s15   ;;  %s1515_s14 = sphi %s1549_s14, %s1842_s14   ;;  %s1511_s13 = sphi %s1547_s13, %s1841_s13   ;;  %s1507_s12 = sphi %s1545_s12, %s1840_s12  }
   0x4   : > { %p30_p0 = scmp.ge.s32.totalorder %s28_s17, 2  ;;  %p76_p1 = scmp.ne.s32.totalorder %s1511_s13, %s1507_s12 }
   0x5   : > { %p77_p2 = scmp.eq.s32.totalorder %s1523_s16, 0  ;;  %p134_p4 = scmp.eq.s32.totalorder %s1252_s18, 1 }
   0x6   : > { %s1845_s17 = smov (%p30_p0, %s28_s17), 0  ;;  %s69_s20 = sadd.s32 1, %s1511_s13 }
   0x7   : > { %p78_p3 = por %p77_p2, %p76_p1  ;;  %s65_s19 = ssub.s32 %s1519_s15, %s1845_s17 }
   0x8   : > { %p67_p5 = scmp.eq.s32.totalorder %s65_s19, 0  ;;  %p1580_p6 = por %p134_p4, %p76_p1 }
   0x9   : > { %p1256_p7 = scmp.ge.s32.totalorder %s1523_s16, 2 }
   0xa   : > { %s1585_s22 = scalar_select %p67_p5, %s1511_s13, %s69_s20  }
   0xb   : > { %171 = sbr.rel (%p1256_p7) target bundleno = 52 (0x34), region = 20 }
  0x10   : > { %174 = sbr.rel (!%p78_p3) target bundleno = 52 (0x34), region = 24  ;;  %s176_s23 = sand.u32 (%p78_p3), 1, %s1511_s13  }
  0x11   : > { %s1339_s24 = sshll.u32 (%p78_p3), %s1519_s15, 3  ;;  %s1257_s25 = sshll.u32 (%p78_p3), %s176_s23, 9 }
  0x12   : > { %s1593_s28 = scalar_lea.vmem (%p78_p3), %s1836_s1, %s1339_s24  ;;  %s1598_s29 = scalar_lea.vmem (%p78_p3), [#allocation3], %s1257_s25 }
  0x13   : > { %v339_v0 = vld [vmem:[%s1593_s28] sm:$0xff] (%p78_p3)  ;;  %v341_v1 = vld [vmem:[%s1593_s28 + $0x10] sm:$0xff] (%p78_p3) }
  0x14   : > { %v343_v2 = vld [vmem:[%s1593_s28 + $0x20] sm:$0xff] (%p78_p3)  ;;  %340 = vst [vmem:[%s1598_s29] sm:$0xff] (%p78_p3), %v339_v0  ;;  %342 = vst [vmem:[%s1598_s29 + $0x8] sm:$0xff] (%p78_p3), %v341_v1  ;;  %v345_v3 = vld [vmem:[%s1593_s28 + $0x30] sm:$0xff] (%p78_p3) }
  0x15   : > { %344 = vst [vmem:[%s1598_s29 + $0x10] sm:$0xff] %v343_v2  ;;  %v347_v4 = vld [vmem:[%s1593_s28 + $0x40] sm:$0xff]  ;;  %v349_v5 = vld [vmem:[%s1593_s28 + $0x50] sm:$0xff]  ;;  %346 = vst [vmem:[%s1598_s29 + $0x18] sm:$0xff] %v345_v3 }
  0x16   : > { %348 = vst [vmem:[%s1598_s29 + $0x20] sm:$0xff] %v347_v4  ;;  %350 = vst [vmem:[%s1598_s29 + $0x28] sm:$0xff] %v349_v5  ;;  %v351_v6 = vld [vmem:[%s1593_s28 + $0x60] sm:$0xff]  ;;  %v353_v7 = vld [vmem:[%s1593_s28 + $0x70] sm:$0xff] }
  0x17   : > { %v355_v8 = vld [vmem:[%s1593_s28 + $0x80] sm:$0xff]  ;;  %352 = vst [vmem:[%s1598_s29 + $0x30] sm:$0xff] %v351_v6  ;;  %354 = vst [vmem:[%s1598_s29 + $0x38] sm:$0xff] %v353_v7  ;;  %v357_v9 = vld [vmem:[%s1593_s28 + $0x90] sm:$0xff] }
  0x18   : > { %356 = vst [vmem:[%s1598_s29 + $0x40] sm:$0xff] %v355_v8  ;;  %v359_v10 = vld [vmem:[%s1593_s28 + $0xa0] sm:$0xff]  ;;  %v361_v11 = vld [vmem:[%s1593_s28 + $0xb0] sm:$0xff]  ;;  %358 = vst [vmem:[%s1598_s29 + $0x48] sm:$0xff] %v357_v9 }
  0x19   : > { %360 = vst [vmem:[%s1598_s29 + $0x50] sm:$0xff] %v359_v10  ;;  %362 = vst [vmem:[%s1598_s29 + $0x58] sm:$0xff] %v361_v11  ;;  %v363_v12 = vld [vmem:[%s1593_s28 + $0xc0] sm:$0xff]  ;;  %v365_v13 = vld [vmem:[%s1593_s28 + $0xd0] sm:$0xff] }
  0x1a   : > { %v367_v14 = vld [vmem:[%s1593_s28 + $0xe0] sm:$0xff]  ;;  %364 = vst [vmem:[%s1598_s29 + $0x60] sm:$0xff] %v363_v12  ;;  %366 = vst [vmem:[%s1598_s29 + $0x68] sm:$0xff] %v365_v13  ;;  %v369_v15 = vld [vmem:[%s1593_s28 + $0xf0] sm:$0xff] }
  0x1b   : > { %368 = vst [vmem:[%s1598_s29 + $0x70] sm:$0xff] %v367_v14  ;;  %v371_v16 = vld [vmem:[%s1593_s28 + $0x100] sm:$0xff]  ;;  %v373_v17 = vld [vmem:[%s1593_s28 + $0x110] sm:$0xff]  ;;  %370 = vst [vmem:[%s1598_s29 + $0x78] sm:$0xff] %v369_v15 }
  0x1c   : > { %372 = vst [vmem:[%s1598_s29 + $0x80] sm:$0xff] %v371_v16  ;;  %374 = vst [vmem:[%s1598_s29 + $0x88] sm:$0xff] %v373_v17  ;;  %v375_v18 = vld [vmem:[%s1593_s28 + $0x120] sm:$0xff]  ;;  %v377_v19 = vld [vmem:[%s1593_s28 + $0x130] sm:$0xff] }
  0x1d   : > { %v379_v20 = vld [vmem:[%s1593_s28 + $0x140] sm:$0xff]  ;;  %376 = vst [vmem:[%s1598_s29 + $0x90] sm:$0xff] %v375_v18  ;;  %378 = vst [vmem:[%s1598_s29 + $0x98] sm:$0xff] %v377_v19  ;;  %v381_v21 = vld [vmem:[%s1593_s28 + $0x150] sm:$0xff] }
  0x1e   : > { %380 = vst [vmem:[%s1598_s29 + $0xa0] sm:$0xff] %v379_v20  ;;  %v383_v22 = vld [vmem:[%s1593_s28 + $0x160] sm:$0xff]  ;;  %v385_v23 = vld [vmem:[%s1593_s28 + $0x170] sm:$0xff]  ;;  %382 = vst [vmem:[%s1598_s29 + $0xa8] sm:$0xff] %v381_v21 }
  0x1f   : > { %384 = vst [vmem:[%s1598_s29 + $0xb0] sm:$0xff] %v383_v22  ;;  %386 = vst [vmem:[%s1598_s29 + $0xb8] sm:$0xff] %v385_v23  ;;  %v387_v24 = vld [vmem:[%s1593_s28 + $0x180] sm:$0xff]  ;;  %v389_v25 = vld [vmem:[%s1593_s28 + $0x190] sm:$0xff] }
  0x20   : > { %v391_v26 = vld [vmem:[%s1593_s28 + $0x1a0] sm:$0xff]  ;;  %388 = vst [vmem:[%s1598_s29 + $0xc0] sm:$0xff] %v387_v24  ;;  %390 = vst [vmem:[%s1598_s29 + $0xc8] sm:$0xff] %v389_v25  ;;  %v393_v27 = vld [vmem:[%s1593_s28 + $0x1b0] sm:$0xff] }
  0x21   : > { %392 = vst [vmem:[%s1598_s29 + $0xd0] sm:$0xff] %v391_v26  ;;  %v395_v28 = vld [vmem:[%s1593_s28 + $0x1c0] sm:$0xff]  ;;  %v397_v29 = vld [vmem:[%s1593_s28 + $0x1d0] sm:$0xff]  ;;  %394 = vst [vmem:[%s1598_s29 + $0xd8] sm:$0xff] %v393_v27 }
  0x22   : > { %396 = vst [vmem:[%s1598_s29 + $0xe0] sm:$0xff] %v395_v28  ;;  %398 = vst [vmem:[%s1598_s29 + $0xe8] sm:$0xff] %v397_v29  ;;  %v399_v30 = vld [vmem:[%s1593_s28 + $0x1e0] sm:$0xff]  ;;  %v401_v31 = vld [vmem:[%s1593_s28 + $0x1f0] sm:$0xff] }
  0x23   : > { %v403_v32 = vld [vmem:[%s1593_s28 + $0x200] sm:$0xff]  ;;  %400 = vst [vmem:[%s1598_s29 + $0xf0] sm:$0xff] %v399_v30  ;;  %402 = vst [vmem:[%s1598_s29 + $0xf8] sm:$0xff] %v401_v31  ;;  %v405_v33 = vld [vmem:[%s1593_s28 + $0x210] sm:$0xff] }
  0x24   : > { %404 = vst [vmem:[%s1598_s29 + $0x100] sm:$0xff] %v403_v32  ;;  %v407_v34 = vld [vmem:[%s1593_s28 + $0x220] sm:$0xff]  ;;  %v409_v35 = vld [vmem:[%s1593_s28 + $0x230] sm:$0xff]  ;;  %406 = vst [vmem:[%s1598_s29 + $0x108] sm:$0xff] %v405_v33 }
  0x25   : > { %408 = vst [vmem:[%s1598_s29 + $0x110] sm:$0xff] %v407_v34  ;;  %410 = vst [vmem:[%s1598_s29 + $0x118] sm:$0xff] %v409_v35  ;;  %v411_v36 = vld [vmem:[%s1593_s28 + $0x240] sm:$0xff]  ;;  %v413_v37 = vld [vmem:[%s1593_s28 + $0x250] sm:$0xff] }
  0x26   : > { %v415_v38 = vld [vmem:[%s1593_s28 + $0x260] sm:$0xff]  ;;  %412 = vst [vmem:[%s1598_s29 + $0x120] sm:$0xff] %v411_v36  ;;  %414 = vst [vmem:[%s1598_s29 + $0x128] sm:$0xff] %v413_v37  ;;  %v417_v39 = vld [vmem:[%s1593_s28 + $0x270] sm:$0xff] }
  0x27   : > { %416 = vst [vmem:[%s1598_s29 + $0x130] sm:$0xff] %v415_v38  ;;  %v419_v40 = vld [vmem:[%s1593_s28 + $0x280] sm:$0xff]  ;;  %v421_v41 = vld [vmem:[%s1593_s28 + $0x290] sm:$0xff]  ;;  %418 = vst [vmem:[%s1598_s29 + $0x138] sm:$0xff] %v417_v39 }
  0x28   : > { %420 = vst [vmem:[%s1598_s29 + $0x140] sm:$0xff] %v419_v40  ;;  %422 = vst [vmem:[%s1598_s29 + $0x148] sm:$0xff] %v421_v41  ;;  %v423_v42 = vld [vmem:[%s1593_s28 + $0x2a0] sm:$0xff]  ;;  %v425_v43 = vld [vmem:[%s1593_s28 + $0x2b0] sm:$0xff] }
  0x29   : > { %v427_v44 = vld [vmem:[%s1593_s28 + $0x2c0] sm:$0xff]  ;;  %424 = vst [vmem:[%s1598_s29 + $0x150] sm:$0xff] %v423_v42  ;;  %426 = vst [vmem:[%s1598_s29 + $0x158] sm:$0xff] %v425_v43  ;;  %v429_v45 = vld [vmem:[%s1593_s28 + $0x2d0] sm:$0xff] }
  0x2a   : > { %428 = vst [vmem:[%s1598_s29 + $0x160] sm:$0xff] %v427_v44  ;;  %v431_v46 = vld [vmem:[%s1593_s28 + $0x2e0] sm:$0xff]  ;;  %v433_v47 = vld [vmem:[%s1593_s28 + $0x2f0] sm:$0xff]  ;;  %430 = vst [vmem:[%s1598_s29 + $0x168] sm:$0xff] %v429_v45 }
  0x2b   : > { %432 = vst [vmem:[%s1598_s29 + $0x170] sm:$0xff] %v431_v46  ;;  %434 = vst [vmem:[%s1598_s29 + $0x178] sm:$0xff] %v433_v47  ;;  %v435_v48 = vld [vmem:[%s1593_s28 + $0x300] sm:$0xff]  ;;  %v437_v49 = vld [vmem:[%s1593_s28 + $0x310] sm:$0xff] }
  0x2c   : > { %v439_v50 = vld [vmem:[%s1593_s28 + $0x320] sm:$0xff]  ;;  %436 = vst [vmem:[%s1598_s29 + $0x180] sm:$0xff] %v435_v48  ;;  %438 = vst [vmem:[%s1598_s29 + $0x188] sm:$0xff] %v437_v49  ;;  %v441_v51 = vld [vmem:[%s1593_s28 + $0x330] sm:$0xff] }
  0x2d   : > { %440 = vst [vmem:[%s1598_s29 + $0x190] sm:$0xff] %v439_v50  ;;  %v443_v52 = vld [vmem:[%s1593_s28 + $0x340] sm:$0xff]  ;;  %v445_v53 = vld [vmem:[%s1593_s28 + $0x350] sm:$0xff]  ;;  %442 = vst [vmem:[%s1598_s29 + $0x198] sm:$0xff] %v441_v51 }
  0x2e   : > { %444 = vst [vmem:[%s1598_s29 + $0x1a0] sm:$0xff] %v443_v52  ;;  %446 = vst [vmem:[%s1598_s29 + $0x1a8] sm:$0xff] %v445_v53  ;;  %v447_v54 = vld [vmem:[%s1593_s28 + $0x360] sm:$0xff]  ;;  %v449_v55 = vld [vmem:[%s1593_s28 + $0x370] sm:$0xff] }
  0x2f   : > { %v451_v56 = vld [vmem:[%s1593_s28 + $0x380] sm:$0xff]  ;;  %448 = vst [vmem:[%s1598_s29 + $0x1b0] sm:$0xff] %v447_v54  ;;  %450 = vst [vmem:[%s1598_s29 + $0x1b8] sm:$0xff] %v449_v55  ;;  %v453_v57 = vld [vmem:[%s1593_s28 + $0x390] sm:$0xff] }
  0x30   : > { %452 = vst [vmem:[%s1598_s29 + $0x1c0] sm:$0xff] %v451_v56  ;;  %v455_v58 = vld [vmem:[%s1593_s28 + $0x3a0] sm:$0xff]  ;;  %v457_v59 = vld [vmem:[%s1593_s28 + $0x3b0] sm:$0xff]  ;;  %454 = vst [vmem:[%s1598_s29 + $0x1c8] sm:$0xff] %v453_v57 }
  0x31   : > { %456 = vst [vmem:[%s1598_s29 + $0x1d0] sm:$0xff] %v455_v58  ;;  %458 = vst [vmem:[%s1598_s29 + $0x1d8] sm:$0xff] %v457_v59  ;;  %v459_v60 = vld [vmem:[%s1593_s28 + $0x3c0] sm:$0xff]  ;;  %v461_v61 = vld [vmem:[%s1593_s28 + $0x3d0] sm:$0xff] }
  0x32   : > { %v463_v62 = vld [vmem:[%s1593_s28 + $0x3e0] sm:$0xff]  ;;  %460 = vst [vmem:[%s1598_s29 + $0x1e0] sm:$0xff] %v459_v60  ;;  %462 = vst [vmem:[%s1598_s29 + $0x1e8] sm:$0xff] %v461_v61  ;;  %v465_v63 = vld [vmem:[%s1593_s28 + $0x3f0] sm:$0xff] }
  0x33   : > { %464 = vst [vmem:[%s1598_s29 + $0x1f0] sm:$0xff] %v463_v62  ;;  %466 = vst [vmem:[%s1598_s29 + $0x1f8] sm:$0xff] %v465_v63 }
  0x34 PF: > { %p1260_p8 = scmp.ge.s32.totalorder %s1523_s16, 1  ;;  %p479_p9 = scmp.lt.s32.totalorder %s1523_s16, 3 }
  0x36   : > { %p480_p10 = pnand %p1260_p8, %p479_p9 }
  0x37   : > { %s486_s30 = sand.u32 (!%p480_p10), 1, %s1507_s12   ;;  %s1263_s20 = sshll.u32 (!%p480_p10), %s1515_s14, 1 }
  0x38   : > { %483 = sbr.rel (%p480_p10) target bundleno = 344 (0x158), region = 66  ;;  %s1261_s4 = sshll.u32 (!%p480_p10), %s486_s30, 9 }
  0x39   : > { %s1736_s9 = scalar_lea.vmem (!%p480_p10), [#allocation3], %s1261_s4  ;;  %p537_p11 = scmp.lt.s32.totalorder (!%p480_p10), %s1263_s20, 3 }
  0x3a   : > { %s1262_s26 = sshll.u32 (!%p480_p10), %s486_s30, 4 }
  0x3b   : > { %s521_s27 = scalar_lea.vmem (!%p480_p10), [#allocation4], %s1262_s26 }
  0x3d   : > { %v1481_v0 = vld [vmem:[%s1835_s0 + $0x4] ss:$16 sps:$4 sm:$0xff]   ;;  %v1484_v1 = vld [vmem:[%s1835_s0 + $0xc] ss:$16 sps:$4 sm:$0xff]   ;;  %v1387_v4 = vld [vmem:[%s1736_s9 + $0x70] ss:$8 sps:$4 sm:$0xff]  }
  0x3e   : > { %v1383_v2 = vld [vmem:[%s1736_s9 + $0x74] ss:$8 sps:$4 sm:$0xff]   ;;  %995 = vmatprep.mubr.bf16.mxu0 %v1481_v0  ;;  %1038 = vmatprep.mubr.bf16.mxu1 %v1484_v1  ;;  %v1388_v5 = vld [vmem:[%s1736_s9 + $0x170] ss:$8 sps:$4 sm:$0xff]   ;;  %v1389_v6 = vld [vmem:[%s1736_s9 + $0x64] ss:$8 sps:$4 sm:$0xff]  }
  0x3f   : > { %v1385_v3 = vld [vmem:[%s1736_s9 + $0x174] ss:$8 sps:$4 sm:$0xff]   ;;  %963 = vmatprep.subr.bf16.mxu0 %v1383_v2  ;;  %v1391_v7 = vld [vmem:[%s1736_s9 + $0x164] ss:$8 sps:$4 sm:$0xff]   ;;  %v1393_v8 = vld [vmem:[%s1736_s9 + $0x60] ss:$8 sps:$4 sm:$0xff]  }
  0x40   : > { %1006 = vmatprep.subr.bf16.mxu1 %v1385_v3  ;;  %964 = vmatpush1.bf16.msra.mxu0 %v1387_v4  ;;  %v1394_v9 = vld [vmem:[%s1736_s9 + $0x160] ss:$8 sps:$4 sm:$0xff]   ;;  %v1395_v10 = vld [vmem:[%s1736_s9 + $0x54] ss:$8 sps:$4 sm:$0xff]   ;;  %v1399_v12 = vld [vmem:[%s1736_s9 + $0x50] ss:$8 sps:$4 sm:$0xff]   ;;  %v1066_v4 = vlaneseq }
  0x41   : > { %1007 = vmatpush1.bf16.msra.mxu1 %v1388_v5  ;;  %965 = vmatprep.subr.bf16.mxu0 %v1389_v6  ;;  %v1397_v11 = vld [vmem:[%s1736_s9 + $0x154] ss:$8 sps:$4 sm:$0xff]   ;;  %v1400_v13 = vld [vmem:[%s1736_s9 + $0x150] ss:$8 sps:$4 sm:$0xff]   ;;  %v1401_v14 = vld [vmem:[%s1736_s9 + $0x44] ss:$8 sps:$4 sm:$0xff]  }
  0x42   : > { %1008 = vmatprep.subr.bf16.mxu1 %v1391_v7  ;;  %v1403_v15 = vld [vmem:[%s1736_s9 + $0x144] ss:$8 sps:$4 sm:$0xff]   ;;  %v1405_v16 = vld [vmem:[%s1736_s9 + $0x40] ss:$8 sps:$4 sm:$0xff]   ;;  %v1407_v18 = vld [vmem:[%s1736_s9 + $0x34] ss:$8 sps:$4 sm:$0xff]  }
  0x43   : > { %v1406_v17 = vld [vmem:[%s1736_s9 + $0x140] ss:$8 sps:$4 sm:$0xff]   ;;  %v1409_v19 = vld [vmem:[%s1736_s9 + $0x134] ss:$8 sps:$4 sm:$0xff]   ;;  %v1411_v20 = vld [vmem:[%s1736_s9 + $0x30] ss:$8 sps:$4 sm:$0xff]  }
  0x44   : > { %966 = vmatpush1.bf16.msra.mxu0 %v1393_v8  ;;  %v1412_v21 = vld [vmem:[%s1736_s9 + $0x130] ss:$8 sps:$4 sm:$0xff]   ;;  %v1413_v22 = vld [vmem:[%s1736_s9 + $0x24] ss:$8 sps:$4 sm:$0xff]   ;;  %v1417_v24 = vld [vmem:[%s1736_s9 + $0x20] ss:$8 sps:$4 sm:$0xff]  }
  0x45   : > { %1009 = vmatpush1.bf16.msra.mxu1 %v1394_v9  ;;  %967 = vmatprep.subr.bf16.mxu0 %v1395_v10  ;;  %v1415_v23 = vld [vmem:[%s1736_s9 + $0x124] ss:$8 sps:$4 sm:$0xff]   ;;  %v1418_v25 = vld [vmem:[%s1736_s9 + $0x120] ss:$8 sps:$4 sm:$0xff]   ;;  %v1419_v26 = vld [vmem:[%s1736_s9 + $0x14] ss:$8 sps:$4 sm:$0xff]  }
  0x46   : > { %1010 = vmatprep.subr.bf16.mxu1 %v1397_v11  ;;  %v1421_v27 = vld [vmem:[%s1736_s9 + $0x114] ss:$8 sps:$4 sm:$0xff]   ;;  %v1423_v28 = vld [vmem:[%s1736_s9 + $0x10] ss:$8 sps:$4 sm:$0xff]   ;;  %v1425_v30 = vld [vmem:[%s1736_s9 + $0x4] ss:$8 sps:$4 sm:$0xff]  }
  0x47   : > { %v1424_v29 = vld [vmem:[%s1736_s9 + $0x110] ss:$8 sps:$4 sm:$0xff]   ;;  %v1427_v31 = vld [vmem:[%s1736_s9 + $0x104] ss:$8 sps:$4 sm:$0xff]   ;;  %v1429_v32 = vld [vmem:[%s1736_s9] ss:$8 sps:$4 sm:$0xff]  }
  0x48   : > { %968 = vmatpush1.bf16.msra.mxu0 %v1399_v12  ;;  %v1430_v33 = vld [vmem:[%s1736_s9 + $0x100] ss:$8 sps:$4 sm:$0xff]   ;;  %v1431_v34 = vld [vmem:[%s1736_s9 + $0xf4] ss:$8 sps:$4 sm:$0xff]   ;;  %v1435_v36 = vld [vmem:[%s1736_s9 + $0xf0] ss:$8 sps:$4 sm:$0xff]  }
  0x49   : > { %1011 = vmatpush1.bf16.msra.mxu1 %v1400_v13  ;;  %969 = vmatprep.subr.bf16.mxu0 %v1401_v14  ;;  %v1433_v35 = vld [vmem:[%s1736_s9 + $0x1f4] ss:$8 sps:$4 sm:$0xff]   ;;  %v1436_v37 = vld [vmem:[%s1736_s9 + $0x1f0] ss:$8 sps:$4 sm:$0xff]   ;;  %v1437_v38 = vld [vmem:[%s1736_s9 + $0xe4] ss:$8 sps:$4 sm:$0xff]  }
  0x4a   : > { %1012 = vmatprep.subr.bf16.mxu1 %v1403_v15  ;;  %v1439_v39 = vld [vmem:[%s1736_s9 + $0x1e4] ss:$8 sps:$4 sm:$0xff]   ;;  %v1441_v40 = vld [vmem:[%s1736_s9 + $0xe0] ss:$8 sps:$4 sm:$0xff]   ;;  %v1443_v42 = vld [vmem:[%s1736_s9 + $0xd4] ss:$8 sps:$4 sm:$0xff]  }
  0x4b   : > { %v1442_v41 = vld [vmem:[%s1736_s9 + $0x1e0] ss:$8 sps:$4 sm:$0xff]   ;;  %v1445_v43 = vld [vmem:[%s1736_s9 + $0x1d4] ss:$8 sps:$4 sm:$0xff]   ;;  %v1447_v44 = vld [vmem:[%s1736_s9 + $0xd0] ss:$8 sps:$4 sm:$0xff]  }
  0x4c   : > { %970 = vmatpush1.bf16.msra.mxu0 %v1405_v16  ;;  %v1448_v45 = vld [vmem:[%s1736_s9 + $0x1d0] ss:$8 sps:$4 sm:$0xff]   ;;  %v1449_v46 = vld [vmem:[%s1736_s9 + $0xc4] ss:$8 sps:$4 sm:$0xff]   ;;  %v1453_v48 = vld [vmem:[%s1736_s9 + $0xc0] ss:$8 sps:$4 sm:$0xff]  }
  0x4d   : > { %1013 = vmatpush1.bf16.msra.mxu1 %v1406_v17  ;;  %971 = vmatprep.subr.bf16.mxu0 %v1407_v18  ;;  %v1451_v47 = vld [vmem:[%s1736_s9 + $0x1c4] ss:$8 sps:$4 sm:$0xff]   ;;  %v1454_v49 = vld [vmem:[%s1736_s9 + $0x1c0] ss:$8 sps:$4 sm:$0xff]   ;;  %v1455_v50 = vld [vmem:[%s1736_s9 + $0xb4] ss:$8 sps:$4 sm:$0xff]  }
  0x4e   : > { %1014 = vmatprep.subr.bf16.mxu1 %v1409_v19  ;;  %v1457_v51 = vld [vmem:[%s1736_s9 + $0x1b4] ss:$8 sps:$4 sm:$0xff]   ;;  %v1459_v52 = vld [vmem:[%s1736_s9 + $0xb0] ss:$8 sps:$4 sm:$0xff]   ;;  %v1461_v54 = vld [vmem:[%s1736_s9 + $0xa4] ss:$8 sps:$4 sm:$0xff]  }
  0x4f   : > { %v1460_v53 = vld [vmem:[%s1736_s9 + $0x1b0] ss:$8 sps:$4 sm:$0xff]   ;;  %v1463_v55 = vld [vmem:[%s1736_s9 + $0x1a4] ss:$8 sps:$4 sm:$0xff]   ;;  %v1465_v56 = vld [vmem:[%s1736_s9 + $0xa0] ss:$8 sps:$4 sm:$0xff]  }
  0x50   : > { %972 = vmatpush1.bf16.msra.mxu0 %v1411_v20  ;;  %v1466_v57 = vld [vmem:[%s1736_s9 + $0x1a0] ss:$8 sps:$4 sm:$0xff]   ;;  %v1467_v58 = vld [vmem:[%s1736_s9 + $0x94] ss:$8 sps:$4 sm:$0xff]   ;;  %v1471_v60 = vld [vmem:[%s1736_s9 + $0x90] ss:$8 sps:$4 sm:$0xff]  }
  0x51   : > { %1015 = vmatpush1.bf16.msra.mxu1 %v1412_v21  ;;  %973 = vmatprep.subr.bf16.mxu0 %v1413_v22  ;;  %v1469_v59 = vld [vmem:[%s1736_s9 + $0x194] ss:$8 sps:$4 sm:$0xff]   ;;  %v1472_v61 = vld [vmem:[%s1736_s9 + $0x190] ss:$8 sps:$4 sm:$0xff]   ;;  %v1473_v62 = vld [vmem:[%s1736_s9 + $0x84] ss:$8 sps:$4 sm:$0xff]  }
  0x52   : > { %1016 = vmatprep.subr.bf16.mxu1 %v1415_v23  ;;  %v1475_v63 = vld [vmem:[%s1736_s9 + $0x184] ss:$8 sps:$4 sm:$0xff]   ;;  %v1477_v0 = vld [vmem:[%s1736_s9 + $0x80] ss:$8 sps:$4 sm:$0xff]   ;;  %s1847_s20 = smov (!%p537_p11, %s1263_s20), 3  ;;  %v1067_v5 = vshrl.u32 %v1066_v4, 7 }
  0x53   : > { %v1478_v1 = vld [vmem:[%s1736_s9 + $0x180] ss:$8 sps:$4 sm:$0xff]   ;;  %s539_s25 = scalar_lea.vmem %s1837_s2, %s1847_s20  ;;  %s1342_s12 = sshll.u32 (%p1580_p6), %s1515_s14, 3 }
  0x54   : > { %974 = vmatpush1.bf16.msra.mxu0 %v1417_v24  ;;  %v1479_v2 = vld [vmem:[%s1835_s0] ss:$16 sps:$4 sm:$0xff]   ;;  %v1482_v3 = vld [vmem:[%s1835_s0 + $0x8] ss:$16 sps:$4 sm:$0xff]   ;;  %v1068_v6 = vsub.s32 0, %v1067_v5  ;;  %v1072_v8 = vsub.s32 1, %v1067_v5  ;;  %s1110_s30 = scalar_lea.vmem (%p1580_p6), %s1838_s3, %s1342_s12 }
  0x55   : > { %1017 = vmatpush1.bf16.msra.mxu1 %v1418_v25  ;;  %975 = vmatprep.subr.bf16.mxu0 %v1419_v26  ;;  %v1064_v7 = vld [vmem:[%s539_s25] sm:$0x3] }
  0x56   : > { %1018 = vmatprep.subr.bf16.mxu1 %v1421_v27  ;;  %v1069_v9 = vrot.slane %v1064_v7, %v1068_v6  ;;  %v1073_v13 = vrot.slane %v1064_v7, %v1072_v8 }
  0x58   : > { %976 = vmatpush1.bf16.msra.mxu0 %v1423_v28 }
  0x59   : > { %1019 = vmatpush1.bf16.msra.mxu1 %v1424_v29  ;;  %977 = vmatprep.subr.bf16.mxu0 %v1425_v30 }
  0x5a   : > { %1020 = vmatprep.subr.bf16.mxu1 %v1427_v31 }
  0x5c   : > { %978 = vmatpush1.bf16.msra.mxu0 %v1429_v32 }
  0x5d   : > { %1021 = vmatpush1.bf16.msra.mxu1 %v1430_v33  ;;  %979 = vmatprep.subr.bf16.mxu0 %v1431_v34 }
  0x5e   : > { %1022 = vmatprep.subr.bf16.mxu1 %v1433_v35 }
  0x60   : > { %980 = vmatpush2.bf16.msra.mxu0 %v1435_v36 }
  0x61   : > { %1023 = vmatpush2.bf16.msra.mxu1 %v1436_v37  ;;  %981 = vmatprep.subr.bf16.mxu0 %v1437_v38 }
  0x62   : > { %1024 = vmatprep.subr.bf16.mxu1 %v1439_v39 }
  0x64   : > { %982 = vmatpush2.bf16.msra.mxu0 %v1441_v40 }
  0x65   : > { %1025 = vmatpush2.bf16.msra.mxu1 %v1442_v41  ;;  %983 = vmatprep.subr.bf16.mxu0 %v1443_v42 }
  0x66   : > { %1026 = vmatprep.subr.bf16.mxu1 %v1445_v43 }
  0x68   : > { %984 = vmatpush2.bf16.msra.mxu0 %v1447_v44 }
  0x69   : > { %1027 = vmatpush2.bf16.msra.mxu1 %v1448_v45  ;;  %985 = vmatprep.subr.bf16.mxu0 %v1449_v46 }
  0x6a   : > { %1028 = vmatprep.subr.bf16.mxu1 %v1451_v47 }
  0x6c   : > { %986 = vmatpush2.bf16.msra.mxu0 %v1453_v48 }
  0x6d   : > { %1029 = vmatpush2.bf16.msra.mxu1 %v1454_v49  ;;  %987 = vmatprep.subr.bf16.mxu0 %v1455_v50 }
  0x6e   : > { %1030 = vmatprep.subr.bf16.mxu1 %v1457_v51 }
  0x70   : > { %988 = vmatpush2.bf16.msra.mxu0 %v1459_v52 }
  0x71   : > { %1031 = vmatpush2.bf16.msra.mxu1 %v1460_v53  ;;  %989 = vmatprep.subr.bf16.mxu0 %v1461_v54 }
  0x72   : > { %1032 = vmatprep.subr.bf16.mxu1 %v1463_v55 }
  0x74   : > { %990 = vmatpush2.bf16.msra.mxu0 %v1465_v56 }
  0x75   : > { %1033 = vmatpush2.bf16.msra.mxu1 %v1466_v57  ;;  %991 = vmatprep.subr.bf16.mxu0 %v1467_v58 }
  0x76   : > { %1034 = vmatprep.subr.bf16.mxu1 %v1469_v59 }
  0x78   : > { %992 = vmatpush2.bf16.msra.mxu0 %v1471_v60 }
  0x79   : > { %1035 = vmatpush2.bf16.msra.mxu1 %v1472_v61  ;;  %993 = vmatprep.subr.bf16.mxu0 %v1473_v62 }
  0x7a   : > { %1036 = vmatprep.subr.bf16.mxu1 %v1475_v63 }
  0x7c   : > { %994 = vmatpush2.bf16.msra.mxu0 %v1477_v0 }
  0x7d   : > { %1037 = vmatpush2.bf16.msra.mxu1 %v1478_v1 }
  0x7f   : > { %996 = vmatmul.mubr.bf16.vlgmr.msra.gmra.mxu0 %v1479_v2 }
  0x80   : > { %1039 = vmatmul.mubr.bf16.vlgmr.msra.gmra.mxu1 %v1482_v3 }
 0x13f   : > { %v997_v10 = vpop.f32.mrf.mxu0 }
 0x140   : > { %v1040_v11 = vpop.f32.mrf.mxu1 }
 0x141   : > { %v1041_v12 = vadd.f32 %v1040_v11, %v997_v10  ;;  %v999_v14 = vpop.f32.mrf.mxu0 }
 0x142   : > { %v1042_v15 = vpop.f32.mrf.mxu1 }
 0x143   : > { %v1076_v16 = vadd.f32 %v1069_v9, %v1041_v12  ;;  %v1043_v17 = vadd.f32 %v1042_v15, %v999_v14  ;;  %v1001_v18 = vpop.f32.mrf.mxu0 }
 0x144   : > { %v1044_v19 = vpop.f32.mrf.mxu1 }
 0x145   : > { %v1077_v20 = vadd.f32 %v1073_v13, %v1043_v17  ;;  %v1045_v21 = vadd.f32 %v1044_v19, %v1001_v18  ;;  %v1003_v22 = vpop.f32.mrf.mxu0  ;;  %v1080_v24 = vmax.f32 %v1076_v16, 0.0 }
 0x146   : > { %v1046_v23 = vpop.f32.mrf.mxu1 }
 0x147   : > { %v1081_v25 = vmax.f32 %v1077_v20, 0.0  ;;  %v1078_v26 = vadd.f32 %v1069_v9, %v1045_v21  ;;  %v1047_v27 = vadd.f32 %v1046_v23, %v1003_v22 }
 0x149   : > { %v1340_v28 = vpack.c.bf16 %v1081_v25, %v1080_v24  ;;  %v1079_v29 = vadd.f32 %v1073_v13, %v1047_v27  ;;  %v1082_v30 = vmax.f32 %v1078_v26, 0.0 }
 0x14b   : > { %1096 = vst [vmem:[%s521_s27] sm:$0xff] %v1340_v28  ;;  %v1083_v31 = vmax.f32 %v1079_v29, 0.0  ;;  %1104 = sbr.rel (!%p1580_p6) target bundleno = 344 (0x158), region = 82 }
 0x14d   : > { %v1341_v32 = vpack.c.bf16 %v1083_v31, %v1082_v30 }
 0x14f   : > { %1097 = vst [vmem:[%s521_s27 + $0x8] sm:$0xff] %v1341_v32 }
 0x152   : > { %v1141_v33 = vld [vmem:[%s521_s27] sm:$0xff] }
 0x153   : > { %1142 = vst [vmem:[%s1110_s30] sm:$0xff] %v1141_v33 }
 0x156   : > { %v1143_v34 = vld [vmem:[%s521_s27 + $0x8] sm:$0xff] }
 0x157   : > { %1144 = vst [vmem:[%s1110_s30 + $0x10] sm:$0xff] %v1143_v34 }
 0x158 PF: > { %s13_s16 = sadd.s32 1, %s1523_s16   ;;  %s1840_s12 = smov %s1511_s13 }
 0x159   : > { %p10_p12 = scmp.ge.s32.totalorder %s13_s16, 4   ;;  %s1841_s13 = smov %s1585_s22 }
 0x15a   : > { %s1842_s14 = smov %s1519_s15  ;;  %s1843_s15 = smov %s1845_s17 }
 0x15b   :  { %12 = sbr.rel (!%p10_p12) target bundleno = 3 (0x3), region = 157 }

// kernel: deepfake_detector_forward.12
= control target key start
LH: loop header
LB: loop body
LE: loop exit
PB: predicated region body
PF: predicated region fallthrough
CT: control target
= control target key end

     0   :  { %s1345_s12 = smov 0   ;;  %s1347_s13 = smov 0   ;;  %s1604_s0 = inlined_call_operand.vmem [shape: bf16[16,512], index: 0, kind: input, shape index: {}]   ;;  %s1605_s1 = inlined_call_operand.vmem [shape: bf16[512,256], index: 1, kind: input, shape index: {}]   ;;  %s1606_s2 = inlined_call_operand.vmem [shape: f32[1,256], index: 2, kind: input, shape index: {}]   ;;  %s1607_s3 = inlined_call_operand.vmem [shape: bf16[16,256], index: 3, kind: output, shape index: {}]  }
   0x1   :  { %s1349_s14 = smov 0   ;;  %s1351_s15 = smov 0  }
   0x2   :  { %s1353_s16 = smov 0  }
   0x3 LB: > { %s28_s17 = sadd.s32 1, %s1319_s15  ;;  %s1103_s18 = sadd.s32 4294967295, %s1323_s16   ;;  %s1323_s16 = sphi %s1353_s16, %s13_s16   ;;  %s1319_s15 = sphi %s1351_s15, %s1612_s15   ;;  %s1315_s14 = sphi %s1349_s14, %s1611_s14   ;;  %s1311_s13 = sphi %s1347_s13, %s1610_s13   ;;  %s1307_s12 = sphi %s1345_s12, %s1609_s12  }
   0x4   : > { %p30_p0 = scmp.ge.s32.totalorder %s28_s17, 2  ;;  %p76_p1 = scmp.ne.s32.totalorder %s1311_s13, %s1307_s12 }
   0x5   : > { %p77_p2 = scmp.eq.s32.totalorder %s1323_s16, 0  ;;  %p134_p4 = scmp.eq.s32.totalorder %s1103_s18, 1 }
   0x6   : > { %s1614_s17 = smov (%p30_p0, %s28_s17), 0  ;;  %s69_s20 = sadd.s32 1, %s1311_s13 }
   0x7   : > { %p78_p3 = por %p77_p2, %p76_p1  ;;  %s65_s19 = ssub.s32 %s1319_s15, %s1614_s17 }
   0x8   : > { %p67_p5 = scmp.eq.s32.totalorder %s65_s19, 0  ;;  %p1380_p6 = por %p134_p4, %p76_p1 }
   0x9   : > { %p1107_p7 = scmp.ge.s32.totalorder %s1323_s16, 2 }
   0xa   : > { %s1385_s22 = scalar_select %p67_p5, %s1311_s13, %s69_s20  }
   0xb   : > { %171 = sbr.rel (%p1107_p7) target bundleno = 62 (0x3e), region = 20 }
  0x10   : > { %174 = sbr.rel (!%p78_p3) target bundleno = 62 (0x3e), region = 24  ;;  %s176_s23 = sand.u32 (%p78_p3), 1, %s1311_s13  }
  0x11   : > { %s1109_s24 = sshll.u32 (%p78_p3), %s1319_s15, 2  ;;  %s1108_s25 = sshll.u32 (%p78_p3), %s176_s23, 8 }
  0x12   : > { %s1393_s28 = scalar_lea.vmem (%p78_p3), %s1605_s1, %s1109_s24  ;;  %s1397_s29 = scalar_lea.vmem (%p78_p3), [#allocation3], %s1108_s25 }
  0x13   : > { %v200_v0 = vld [vmem:[%s1393_s28] sm:$0xf] (%p78_p3)  ;;  %v202_v1 = vld [vmem:[%s1393_s28 + $0x8] sm:$0xf] (%p78_p3)  ;;  %v204_v2 = vld [vmem:[%s1393_s28 + $0x10] sm:$0xf] (%p78_p3) }
  0x14   : > { %201 = vst [vmem:[%s1397_s29] sm:$0xf] (%p78_p3), %v200_v0  ;;  %203 = vst [vmem:[%s1397_s29 + $0x4] sm:$0xf] (%p78_p3), %v202_v1  ;;  %v206_v3 = vld [vmem:[%s1393_s28 + $0x18] sm:$0xf] (%p78_p3) }
  0x15   : > { %v208_v4 = vld [vmem:[%s1393_s28 + $0x20] sm:$0xf]  ;;  %205 = vst [vmem:[%s1397_s29 + $0x8] sm:$0xf] %v204_v2  ;;  %207 = vst [vmem:[%s1397_s29 + $0xc] sm:$0xf] %v206_v3 }
  0x16   : > { %209 = vst [vmem:[%s1397_s29 + $0x10] sm:$0xf] %v208_v4  ;;  %v210_v5 = vld [vmem:[%s1393_s28 + $0x28] sm:$0xf]  ;;  %v212_v6 = vld [vmem:[%s1393_s28 + $0x30] sm:$0xf] }
  0x17   : > { %v214_v7 = vld [vmem:[%s1393_s28 + $0x38] sm:$0xf]  ;;  %211 = vst [vmem:[%s1397_s29 + $0x14] sm:$0xf] %v210_v5  ;;  %213 = vst [vmem:[%s1397_s29 + $0x18] sm:$0xf] %v212_v6 }
  0x18   : > { %215 = vst [vmem:[%s1397_s29 + $0x1c] sm:$0xf] %v214_v7  ;;  %v216_v8 = vld [vmem:[%s1393_s28 + $0x40] sm:$0xf]  ;;  %v218_v9 = vld [vmem:[%s1393_s28 + $0x48] sm:$0xf] }
  0x19   : > { %v220_v10 = vld [vmem:[%s1393_s28 + $0x50] sm:$0xf]  ;;  %217 = vst [vmem:[%s1397_s29 + $0x20] sm:$0xf] %v216_v8  ;;  %219 = vst [vmem:[%s1397_s29 + $0x24] sm:$0xf] %v218_v9 }
  0x1a   : > { %221 = vst [vmem:[%s1397_s29 + $0x28] sm:$0xf] %v220_v10  ;;  %v222_v11 = vld [vmem:[%s1393_s28 + $0x58] sm:$0xf]  ;;  %v224_v12 = vld [vmem:[%s1393_s28 + $0x60] sm:$0xf] }
  0x1b   : > { %v226_v13 = vld [vmem:[%s1393_s28 + $0x68] sm:$0xf]  ;;  %223 = vst [vmem:[%s1397_s29 + $0x2c] sm:$0xf] %v222_v11  ;;  %225 = vst [vmem:[%s1397_s29 + $0x30] sm:$0xf] %v224_v12 }
  0x1c   : > { %227 = vst [vmem:[%s1397_s29 + $0x34] sm:$0xf] %v226_v13  ;;  %v228_v14 = vld [vmem:[%s1393_s28 + $0x70] sm:$0xf]  ;;  %v230_v15 = vld [vmem:[%s1393_s28 + $0x78] sm:$0xf] }
  0x1d   : > { %v232_v16 = vld [vmem:[%s1393_s28 + $0x80] sm:$0xf]  ;;  %229 = vst [vmem:[%s1397_s29 + $0x38] sm:$0xf] %v228_v14  ;;  %231 = vst [vmem:[%s1397_s29 + $0x3c] sm:$0xf] %v230_v15 }
  0x1e   : > { %233 = vst [vmem:[%s1397_s29 + $0x40] sm:$0xf] %v232_v16  ;;  %v234_v17 = vld [vmem:[%s1393_s28 + $0x88] sm:$0xf]  ;;  %v236_v18 = vld [vmem:[%s1393_s28 + $0x90] sm:$0xf] }
  0x1f   : > { %v238_v19 = vld [vmem:[%s1393_s28 + $0x98] sm:$0xf]  ;;  %235 = vst [vmem:[%s1397_s29 + $0x44] sm:$0xf] %v234_v17  ;;  %237 = vst [vmem:[%s1397_s29 + $0x48] sm:$0xf] %v236_v18 }
  0x20   : > { %239 = vst [vmem:[%s1397_s29 + $0x4c] sm:$0xf] %v238_v19  ;;  %v240_v20 = vld [vmem:[%s1393_s28 + $0xa0] sm:$0xf]  ;;  %v242_v21 = vld [vmem:[%s1393_s28 + $0xa8] sm:$0xf] }
  0x21   : > { %v244_v22 = vld [vmem:[%s1393_s28 + $0xb0] sm:$0xf]  ;;  %241 = vst [vmem:[%s1397_s29 + $0x50] sm:$0xf] %v240_v20  ;;  %243 = vst [vmem:[%s1397_s29 + $0x54] sm:$0xf] %v242_v21 }
  0x22   : > { %245 = vst [vmem:[%s1397_s29 + $0x58] sm:$0xf] %v244_v22  ;;  %v246_v23 = vld [vmem:[%s1393_s28 + $0xb8] sm:$0xf]  ;;  %v248_v24 = vld [vmem:[%s1393_s28 + $0xc0] sm:$0xf] }
  0x23   : > { %v250_v25 = vld [vmem:[%s1393_s28 + $0xc8] sm:$0xf]  ;;  %247 = vst [vmem:[%s1397_s29 + $0x5c] sm:$0xf] %v246_v23  ;;  %249 = vst [vmem:[%s1397_s29 + $0x60] sm:$0xf] %v248_v24 }
  0x24   : > { %251 = vst [vmem:[%s1397_s29 + $0x64] sm:$0xf] %v250_v25  ;;  %v252_v26 = vld [vmem:[%s1393_s28 + $0xd0] sm:$0xf]  ;;  %v254_v27 = vld [vmem:[%s1393_s28 + $0xd8] sm:$0xf] }
  0x25   : > { %v256_v28 = vld [vmem:[%s1393_s28 + $0xe0] sm:$0xf]  ;;  %253 = vst [vmem:[%s1397_s29 + $0x68] sm:$0xf] %v252_v26  ;;  %255 = vst [vmem:[%s1397_s29 + $0x6c] sm:$0xf] %v254_v27 }
  0x26   : > { %257 = vst [vmem:[%s1397_s29 + $0x70] sm:$0xf] %v256_v28  ;;  %v258_v29 = vld [vmem:[%s1393_s28 + $0xe8] sm:$0xf]  ;;  %v260_v30 = vld [vmem:[%s1393_s28 + $0xf0] sm:$0xf] }
  0x27   : > { %v262_v31 = vld [vmem:[%s1393_s28 + $0xf8] sm:$0xf]  ;;  %259 = vst [vmem:[%s1397_s29 + $0x74] sm:$0xf] %v258_v29  ;;  %261 = vst [vmem:[%s1397_s29 + $0x78] sm:$0xf] %v260_v30 }
  0x28   : > { %263 = vst [vmem:[%s1397_s29 + $0x7c] sm:$0xf] %v262_v31  ;;  %v264_v32 = vld [vmem:[%s1393_s28 + $0x100] sm:$0xf]  ;;  %v266_v33 = vld [vmem:[%s1393_s28 + $0x108] sm:$0xf] }
  0x29   : > { %v268_v34 = vld [vmem:[%s1393_s28 + $0x110] sm:$0xf]  ;;  %265 = vst [vmem:[%s1397_s29 + $0x80] sm:$0xf] %v264_v32  ;;  %267 = vst [vmem:[%s1397_s29 + $0x84] sm:$0xf] %v266_v33 }
  0x2a   : > { %269 = vst [vmem:[%s1397_s29 + $0x88] sm:$0xf] %v268_v34  ;;  %v270_v35 = vld [vmem:[%s1393_s28 + $0x118] sm:$0xf]  ;;  %v272_v36 = vld [vmem:[%s1393_s28 + $0x120] sm:$0xf] }
  0x2b   : > { %v274_v37 = vld [vmem:[%s1393_s28 + $0x128] sm:$0xf]  ;;  %271 = vst [vmem:[%s1397_s29 + $0x8c] sm:$0xf] %v270_v35  ;;  %273 = vst [vmem:[%s1397_s29 + $0x90] sm:$0xf] %v272_v36 }
  0x2c   : > { %275 = vst [vmem:[%s1397_s29 + $0x94] sm:$0xf] %v274_v37  ;;  %v276_v38 = vld [vmem:[%s1393_s28 + $0x130] sm:$0xf]  ;;  %v278_v39 = vld [vmem:[%s1393_s28 + $0x138] sm:$0xf] }
  0x2d   : > { %v280_v40 = vld [vmem:[%s1393_s28 + $0x140] sm:$0xf]  ;;  %277 = vst [vmem:[%s1397_s29 + $0x98] sm:$0xf] %v276_v38  ;;  %279 = vst [vmem:[%s1397_s29 + $0x9c] sm:$0xf] %v278_v39 }
  0x2e   : > { %281 = vst [vmem:[%s1397_s29 + $0xa0] sm:$0xf] %v280_v40  ;;  %v282_v41 = vld [vmem:[%s1393_s28 + $0x148] sm:$0xf]  ;;  %v284_v42 = vld [vmem:[%s1393_s28 + $0x150] sm:$0xf] }
  0x2f   : > { %v286_v43 = vld [vmem:[%s1393_s28 + $0x158] sm:$0xf]  ;;  %283 = vst [vmem:[%s1397_s29 + $0xa4] sm:$0xf] %v282_v41  ;;  %285 = vst [vmem:[%s1397_s29 + $0xa8] sm:$0xf] %v284_v42 }
  0x30   : > { %287 = vst [vmem:[%s1397_s29 + $0xac] sm:$0xf] %v286_v43  ;;  %v288_v44 = vld [vmem:[%s1393_s28 + $0x160] sm:$0xf]  ;;  %v290_v45 = vld [vmem:[%s1393_s28 + $0x168] sm:$0xf] }
  0x31   : > { %v292_v46 = vld [vmem:[%s1393_s28 + $0x170] sm:$0xf]  ;;  %289 = vst [vmem:[%s1397_s29 + $0xb0] sm:$0xf] %v288_v44  ;;  %291 = vst [vmem:[%s1397_s29 + $0xb4] sm:$0xf] %v290_v45 }
  0x32   : > { %293 = vst [vmem:[%s1397_s29 + $0xb8] sm:$0xf] %v292_v46  ;;  %v294_v47 = vld [vmem:[%s1393_s28 + $0x178] sm:$0xf]  ;;  %v296_v48 = vld [vmem:[%s1393_s28 + $0x180] sm:$0xf] }
  0x33   : > { %v298_v49 = vld [vmem:[%s1393_s28 + $0x188] sm:$0xf]  ;;  %295 = vst [vmem:[%s1397_s29 + $0xbc] sm:$0xf] %v294_v47  ;;  %297 = vst [vmem:[%s1397_s29 + $0xc0] sm:$0xf] %v296_v48 }
  0x34   : > { %299 = vst [vmem:[%s1397_s29 + $0xc4] sm:$0xf] %v298_v49  ;;  %v300_v50 = vld [vmem:[%s1393_s28 + $0x190] sm:$0xf]  ;;  %v302_v51 = vld [vmem:[%s1393_s28 + $0x198] sm:$0xf] }
  0x35   : > { %v304_v52 = vld [vmem:[%s1393_s28 + $0x1a0] sm:$0xf]  ;;  %301 = vst [vmem:[%s1397_s29 + $0xc8] sm:$0xf] %v300_v50  ;;  %303 = vst [vmem:[%s1397_s29 + $0xcc] sm:$0xf] %v302_v51 }
  0x36   : > { %305 = vst [vmem:[%s1397_s29 + $0xd0] sm:$0xf] %v304_v52  ;;  %v306_v53 = vld [vmem:[%s1393_s28 + $0x1a8] sm:$0xf]  ;;  %v308_v54 = vld [vmem:[%s1393_s28 + $0x1b0] sm:$0xf] }
  0x37   : > { %v310_v55 = vld [vmem:[%s1393_s28 + $0x1b8] sm:$0xf]  ;;  %307 = vst [vmem:[%s1397_s29 + $0xd4] sm:$0xf] %v306_v53  ;;  %309 = vst [vmem:[%s1397_s29 + $0xd8] sm:$0xf] %v308_v54 }
  0x38   : > { %311 = vst [vmem:[%s1397_s29 + $0xdc] sm:$0xf] %v310_v55  ;;  %v312_v56 = vld [vmem:[%s1393_s28 + $0x1c0] sm:$0xf]  ;;  %v314_v57 = vld [vmem:[%s1393_s28 + $0x1c8] sm:$0xf] }
  0x39   : > { %v316_v58 = vld [vmem:[%s1393_s28 + $0x1d0] sm:$0xf]  ;;  %313 = vst [vmem:[%s1397_s29 + $0xe0] sm:$0xf] %v312_v56  ;;  %315 = vst [vmem:[%s1397_s29 + $0xe4] sm:$0xf] %v314_v57 }
  0x3a   : > { %317 = vst [vmem:[%s1397_s29 + $0xe8] sm:$0xf] %v316_v58  ;;  %v318_v59 = vld [vmem:[%s1393_s28 + $0x1d8] sm:$0xf]  ;;  %v320_v60 = vld [vmem:[%s1393_s28 + $0x1e0] sm:$0xf] }
  0x3b   : > { %v322_v61 = vld [vmem:[%s1393_s28 + $0x1e8] sm:$0xf]  ;;  %319 = vst [vmem:[%s1397_s29 + $0xec] sm:$0xf] %v318_v59  ;;  %321 = vst [vmem:[%s1397_s29 + $0xf0] sm:$0xf] %v320_v60 }
  0x3c   : > { %323 = vst [vmem:[%s1397_s29 + $0xf4] sm:$0xf] %v322_v61  ;;  %v324_v62 = vld [vmem:[%s1393_s28 + $0x1f0] sm:$0xf]  ;;  %v326_v63 = vld [vmem:[%s1393_s28 + $0x1f8] sm:$0xf] }
  0x3d   : > { %325 = vst [vmem:[%s1397_s29 + $0xf8] sm:$0xf] %v324_v62  ;;  %327 = vst [vmem:[%s1397_s29 + $0xfc] sm:$0xf] %v326_v63 }
  0x3e PF: > { %p1110_p8 = scmp.ge.s32.totalorder %s1323_s16, 1  ;;  %p484_p9 = scmp.lt.s32.totalorder %s1323_s16, 3 }
  0x40   : > { %p485_p10 = pnand %p1110_p8, %p484_p9 }
  0x41   : > { %s491_s30 = sand.u32 (!%p485_p10), 1, %s1307_s12   ;;  %p539_p11 = scmp.lt.s32.totalorder (!%p485_p10), %s1315_s14, 1 }
  0x42   : > { %488 = sbr.rel (%p485_p10) target bundleno = 325 (0x145), region = 69  ;;  %s1111_s4 = sshll.u32 (!%p485_p10), %s491_s30, 8 }
  0x43   : > { %s1536_s9 = scalar_lea.vmem (!%p485_p10), [#allocation3], %s1111_s4  ;;  %s1112_s26 = sshll.u32 (!%p485_p10), %s491_s30, 3 }
  0x44   : > { %s525_s27 = scalar_lea.vmem (!%p485_p10), [#allocation4], %s1112_s26 }
  0x47   : > { %v1281_v0 = vld [vmem:[%s1604_s0 + $0x4] ss:$16 sps:$4 sm:$0xff]   ;;  %v1284_v1 = vld [vmem:[%s1604_s0 + $0xc] ss:$16 sps:$4 sm:$0xff]   ;;  %v1279_v32 = vld [vmem:[%s1604_s0] ss:$16 sps:$4 sm:$0xff]  }
  0x48   : > { %v1247_v2 = vld [vmem:[%s1536_s9 + $0x78] sm:$0xff]   ;;  %864 = vmatprep.mubr.bf16.mxu0 %v1281_v0  ;;  %905 = vmatprep.mubr.bf16.mxu1 %v1284_v1  ;;  %v1251_v6 = vld [vmem:[%s1536_s9 + $0x70] sm:$0xff]   ;;  %v1255_v10 = vld [vmem:[%s1536_s9 + $0x68] sm:$0xff]   ;;  %s540_s20 = scalar_select %p539_p11, %s1315_s14, 1 }
  0x49   : > { %v1248_v3 = vld [vmem:[%s1536_s9 + $0xf8] sm:$0xff]   ;;  %1163 = vmatprep.subr.bf16.mxu0 %v1247_v2  ;;  %v1252_v7 = vld [vmem:[%s1536_s9 + $0xf0] sm:$0xff]   ;;  %v1256_v11 = vld [vmem:[%s1536_s9 + $0xe8] sm:$0xff]   ;;  %s1153_s28 = sshll.u32 (%p1380_p6), %s1315_s14, 2 }
  0x4a   : > { %v1249_v4 = vld [vmem:[%s1536_s9 + $0x38] sm:$0xff]   ;;  %1185 = vmatprep.subr.bf16.mxu1 %v1248_v3  ;;  %v1253_v8 = vld [vmem:[%s1536_s9 + $0x30] sm:$0xff]   ;;  %v1257_v12 = vld [vmem:[%s1536_s9 + $0x28] sm:$0xff]   ;;  %s541_s25 = scalar_lea.vmem %s1606_s2, %s540_s20  ;;  %s955_s5 = scalar_lea.vmem (%p1380_p6), %s1607_s3, %s1153_s28 }
  0x4b   : > { %v1250_v5 = vld [vmem:[%s1536_s9 + $0xb8] sm:$0xff]   ;;  %1164 = vmatpush3.bf16.msra.mxu0 %v1249_v4  ;;  %v1254_v9 = vld [vmem:[%s1536_s9 + $0xb0] sm:$0xff]   ;;  %v1258_v13 = vld [vmem:[%s1536_s9 + $0xa8] sm:$0xff]  }
  0x4c   : > { %1186 = vmatpush3.bf16.msra.mxu1 %v1250_v5  ;;  %1165 = vmatprep.subr.bf16.mxu0 %v1251_v6  ;;  %v1259_v14 = vld [vmem:[%s1536_s9 + $0x60] sm:$0xff]   ;;  %v1263_v18 = vld [vmem:[%s1536_s9 + $0x58] sm:$0xff]   ;;  %v1267_v22 = vld [vmem:[%s1536_s9 + $0x50] sm:$0xff]  }
  0x4d   : > { %1187 = vmatprep.subr.bf16.mxu1 %v1252_v7  ;;  %v1260_v15 = vld [vmem:[%s1536_s9 + $0xe0] sm:$0xff]   ;;  %v1264_v19 = vld [vmem:[%s1536_s9 + $0xd8] sm:$0xff]   ;;  %v1268_v23 = vld [vmem:[%s1536_s9 + $0xd0] sm:$0xff]  }
  0x4e   : > { %v1261_v16 = vld [vmem:[%s1536_s9 + $0x20] sm:$0xff]   ;;  %v1265_v20 = vld [vmem:[%s1536_s9 + $0x18] sm:$0xff]   ;;  %v1269_v24 = vld [vmem:[%s1536_s9 + $0x10] sm:$0xff]  }
  0x4f   : > { %1166 = vmatpush3.bf16.msra.mxu0 %v1253_v8  ;;  %v1262_v17 = vld [vmem:[%s1536_s9 + $0xa0] sm:$0xff]   ;;  %v1266_v21 = vld [vmem:[%s1536_s9 + $0x98] sm:$0xff]   ;;  %v1270_v25 = vld [vmem:[%s1536_s9 + $0x90] sm:$0xff]  }
  0x50   : > { %1188 = vmatpush3.bf16.msra.mxu1 %v1254_v9  ;;  %1167 = vmatprep.subr.bf16.mxu0 %v1255_v10  ;;  %v1271_v26 = vld [vmem:[%s1536_s9 + $0x48] sm:$0xff]   ;;  %v1275_v30 = vld [vmem:[%s1536_s9 + $0x40] sm:$0xff]  }
  0x51   : > { %1189 = vmatprep.subr.bf16.mxu1 %v1256_v11  ;;  %v1272_v27 = vld [vmem:[%s1536_s9 + $0xc8] sm:$0xff]   ;;  %v1276_v31 = vld [vmem:[%s1536_s9 + $0xc0] sm:$0xff]  }
  0x52   : > { %v1273_v28 = vld [vmem:[%s1536_s9 + $0x8] sm:$0xff]   ;;  %v1277_v33 = vld [vmem:[%s1536_s9] sm:$0xff]  }
  0x53   : > { %1168 = vmatpush3.bf16.msra.mxu0 %v1257_v12  ;;  %v1274_v29 = vld [vmem:[%s1536_s9 + $0x88] sm:$0xff]   ;;  %v1278_v34 = vld [vmem:[%s1536_s9 + $0x80] sm:$0xff]  }
  0x54   : > { %1190 = vmatpush3.bf16.msra.mxu1 %v1258_v13  ;;  %1169 = vmatprep.subr.bf16.mxu0 %v1259_v14  ;;  %v1282_v35 = vld [vmem:[%s1604_s0 + $0x8] ss:$16 sps:$4 sm:$0xff]   ;;  %v1149_v46 = vld [vmem:[%s541_s25] ss:$0 sm:$0xff] }
  0x55   : > { %1191 = vmatprep.subr.bf16.mxu1 %v1260_v15 }
  0x57   : > { %1170 = vmatpush3.bf16.msra.mxu0 %v1261_v16 }
  0x58   : > { %1192 = vmatpush3.bf16.msra.mxu1 %v1262_v17  ;;  %1171 = vmatprep.subr.bf16.mxu0 %v1263_v18 }
  0x59   : > { %1193 = vmatprep.subr.bf16.mxu1 %v1264_v19 }
  0x5b   : > { %1172 = vmatpush3.bf16.msra.mxu0 %v1265_v20 }
  0x5c   : > { %1194 = vmatpush3.bf16.msra.mxu1 %v1266_v21  ;;  %1173 = vmatprep.subr.bf16.mxu0 %v1267_v22 }
  0x5d   : > { %1195 = vmatprep.subr.bf16.mxu1 %v1268_v23 }
  0x5f   : > { %1174 = vmatpush3.bf16.msra.mxu0 %v1269_v24 }
  0x60   : > { %1196 = vmatpush3.bf16.msra.mxu1 %v1270_v25  ;;  %1175 = vmatprep.subr.bf16.mxu0 %v1271_v26 }
  0x61   : > { %1197 = vmatprep.subr.bf16.mxu1 %v1272_v27 }
  0x63   : > { %1176 = vmatpush3.bf16.msra.mxu0 %v1273_v28 }
  0x64   : > { %1198 = vmatpush3.bf16.msra.mxu1 %v1274_v29  ;;  %1177 = vmatprep.subr.bf16.mxu0 %v1275_v30 }
  0x65   : > { %1199 = vmatprep.subr.bf16.mxu1 %v1276_v31 }
  0x67   : > { %1178 = vmatpush3.bf16.msra.mxu0 %v1277_v33 }
  0x68   : > { %1200 = vmatpush3.bf16.msra.mxu1 %v1278_v34 }
  0x6a   : > { %865 = vmatmul.mubr.bf16.vlgmr.msra.gmra.mxu0 %v1279_v32 }
  0x6b   : > { %906 = vmatmul.mubr.bf16.vlgmr.msra.gmra.mxu1 %v1282_v35 }
 0x12a   : > { %v1179_v36 = vpop.f32.mrf.mxu0 }
 0x12b   : > { %v1201_v37 = vpop.f32.mrf.mxu1 }
 0x12c   : > { %v1180_v38 = vpop.f32.mrf.mxu0 }
 0x12d   : > { %v1181_v39 = vadd.f32 %v1180_v38, %v1179_v36  ;;  %v1202_v40 = vpop.f32.mrf.mxu1 }
 0x12e   : > { %v1203_v41 = vadd.f32 %v1202_v40, %v1201_v37  ;;  %v1182_v42 = vpop.f32.mrf.mxu0 }
 0x12f   : > { %v1204_v43 = vpop.f32.mrf.mxu1 }
 0x130   : > { %v908_v44 = vadd.f32 %v1203_v41, %v1181_v39  ;;  %v1183_v45 = vpop.f32.mrf.mxu0 }
 0x131   : > { %v1184_v47 = vadd.f32 %v1183_v45, %v1182_v42  ;;  %v1205_v48 = vpop.f32.mrf.mxu1 }
 0x132   : > { %v1206_v49 = vadd.f32 %v1205_v48, %v1204_v43  ;;  %v930_v50 = vadd.f32 %v1149_v46, %v908_v44 }
 0x134   : > { %v911_v51 = vadd.f32 %v1206_v49, %v1184_v47  ;;  %v932_v53 = vmax.f32 %v930_v50, 0.0 }
 0x136   : > { %v931_v52 = vadd.f32 %v1149_v46, %v911_v51 }
 0x138   : > { %v933_v54 = vmax.f32 %v931_v52, 0.0  ;;  %950 = sbr.rel (!%p1380_p6) target bundleno = 325 (0x145), region = 85 }
 0x13a   : > { %v1161_v55 = vpack.c.bf16 %v933_v54, %v932_v53 }
 0x13c   : > { %1162 = vst [vmem:[%s525_s27] sm:$0xff] %v1161_v55  }
 0x143   : > { %v972_v56 = vld [vmem:[%s525_s27] sm:$0xf]  ;;  %v974_v57 = vld [vmem:[%s525_s27 + $0x4] sm:$0xf] }
 0x144   : > { %973 = vst [vmem:[%s955_s5] sm:$0xf] %v972_v56  ;;  %975 = vst [vmem:[%s955_s5 + $0x8] sm:$0xf] %v974_v57 }
 0x145 PF: > { %s13_s16 = sadd.s32 1, %s1323_s16   ;;  %s1609_s12 = smov %s1311_s13 }
 0x146   : > { %p10_p12 = scmp.ge.s32.totalorder %s13_s16, 4   ;;  %s1610_s13 = smov %s1385_s22 }
 0x147   : > { %s1611_s14 = smov %s1319_s15  ;;  %s1612_s15 = smov %s1614_s17 }
 0x148   :  { %12 = sbr.rel (!%p10_p12) target bundleno = 3 (0x3), region = 163 }

// kernel: deepfake_detector_forward.13
= control target key start
LH: loop header
LB: loop body
LE: loop exit
PB: predicated region body
PF: predicated region fallthrough
CT: control target
= control target key end

     0   :  { %s371_s1 = inlined_call_operand.vmem [shape: bf16[256,128], index: 1, kind: input, shape index: {}]   ;;  %s372_s0 = inlined_call_operand.vmem [shape: bf16[16,256], index: 0, kind: input, shape index: {}]   ;;  %s373_s2 = inlined_call_operand.vmem [shape: f32[1,128], index: 2, kind: input, shape index: {}]   ;;  %s374_s3 = inlined_call_operand.vmem [shape: f32[16,128], index: 3, kind: output, shape index: {}]  }
   0x1   :  { %v269_v0 = vld [vmem:[%s371_s1 + $0x78] sm:$0xff]   ;;  %v271_v2 = vld [vmem:[%s371_s1 + $0x70] sm:$0xff]   ;;  %v273_v4 = vld [vmem:[%s371_s1 + $0x68] sm:$0xff]  }
   0x2   :  { %v270_v1 = vld [vmem:[%s371_s1 + $0x38] sm:$0xff]   ;;  %247 = vmatprep.subr.bf16.mxu0 %v269_v0  ;;  %v272_v3 = vld [vmem:[%s371_s1 + $0x30] sm:$0xff]   ;;  %v274_v5 = vld [vmem:[%s371_s1 + $0x28] sm:$0xff]  }
   0x3   :  { %248 = vmatpush3.bf16.msra.mxu0 %v270_v1  ;;  %v275_v6 = vld [vmem:[%s371_s1 + $0x60] sm:$0xff]   ;;  %v277_v8 = vld [vmem:[%s371_s1 + $0x58] sm:$0xff]   ;;  %v279_v10 = vld [vmem:[%s371_s1 + $0x50] sm:$0xff]  }
   0x4   :  { %249 = vmatprep.subr.bf16.mxu0 %v271_v2  ;;  %v276_v7 = vld [vmem:[%s371_s1 + $0x20] sm:$0xff]   ;;  %v278_v9 = vld [vmem:[%s371_s1 + $0x18] sm:$0xff]   ;;  %v280_v12 = vld [vmem:[%s371_s1 + $0x10] sm:$0xff]  }
   0x5   :  { %v287_v11 = vld [vmem:[%s372_s0 + $0x4] ss:$8 sps:$4 sm:$0xff]   ;;  %v285_v17 = vld [vmem:[%s372_s0] ss:$8 sps:$4 sm:$0xff]  }
   0x6   :  { %195 = vmatprep.mubr.bf16.mxu0 %v287_v11  ;;  %v281_v13 = vld [vmem:[%s371_s1 + $0x48] sm:$0xff]   ;;  %v283_v15 = vld [vmem:[%s371_s1 + $0x40] sm:$0xff]  }
   0x7   :  { %250 = vmatpush3.bf16.msra.mxu0 %v272_v3  ;;  %v282_v14 = vld [vmem:[%s371_s1 + $0x8] sm:$0xff]   ;;  %v284_v16 = vld [vmem:[%s371_s1] sm:$0xff]  }
   0x8   :  { %251 = vmatprep.subr.bf16.mxu0 %v273_v4  ;;  %v246_v20 = vld [vmem:[%s373_s2] ss:$0 sm:$0xff] }
   0xb   :  { %252 = vmatpush3.bf16.msra.mxu0 %v274_v5 }
   0xc   :  { %253 = vmatprep.subr.bf16.mxu0 %v275_v6 }
   0xf   :  { %254 = vmatpush3.bf16.msra.mxu0 %v276_v7 }
  0x10   :  { %255 = vmatprep.subr.bf16.mxu0 %v277_v8 }
  0x13   :  { %256 = vmatpush3.bf16.msra.mxu0 %v278_v9 }
  0x14   :  { %257 = vmatprep.subr.bf16.mxu0 %v279_v10 }
  0x17   :  { %258 = vmatpush3.bf16.msra.mxu0 %v280_v12 }
  0x18   :  { %259 = vmatprep.subr.bf16.mxu0 %v281_v13 }
  0x1b   :  { %260 = vmatpush3.bf16.msra.mxu0 %v282_v14 }
  0x1c   :  { %261 = vmatprep.subr.bf16.mxu0 %v283_v15 }
  0x1f   :  { %262 = vmatpush3.bf16.msra.mxu0 %v284_v16 }
  0x22   :  { %196 = vmatmul.mubr.bf16.vlgmr.msra.gmra.mxu0 %v285_v17 }
  0xe2   :  { %v263_v18 = vpop.f32.mrf.mxu0 }
  0xe4   :  { %v264_v19 = vpop.f32.mrf.mxu0 }
  0xe5   :  { %v265_v21 = vadd.f32 %v264_v19, %v263_v18 }
  0xe6   :  { %v266_v22 = vpop.f32.mrf.mxu0 }
  0xe7   :  { %v220_v23 = vadd.f32 %v265_v21, %v246_v20 }
  0xe8   :  { %v267_v24 = vpop.f32.mrf.mxu0 }
  0xe9   :  { %222 = vst [vmem:[%s374_s3] sm:$0xff] %v220_v23  ;;  %v268_v25 = vadd.f32 %v267_v24, %v266_v22 }
  0xeb   :  { %v221_v26 = vadd.f32 %v268_v25, %v246_v20 }
  0xed   :  { %223 = vst [vmem:[%s374_s3 + $0x8] sm:$0xff] %v221_v26 }

// kernel: deepfake_detector_forward.10
= control target key start
LH: loop header
LB: loop body
LE: loop exit
PB: predicated region body
PF: predicated region fallthrough
CT: control target
= control target key end

     0   :  { %s6560_s18 = smov 0   ;;  %s8614_s0 = inlined_call_operand.vmem [shape: bf16[2,4,4,256], index: 0, kind: input, shape index: {}]   ;;  %s8615_s1 = inlined_call_operand.vmem [shape: bf16[2304,512], index: 1, kind: input, shape index: {}]   ;;  %s8616_s2 = inlined_call_operand.vmem [shape: f32[1,512], index: 2, kind: input, shape index: {}]   ;;  %s8617_s3 = inlined_call_operand.vmem [shape: f32[1,512], index: 3, kind: input, shape index: {}]   ;;  %s8618_s4 = inlined_call_operand.vmem [shape: f32[1,512], index: 4, kind: input, shape index: {}]   ;;  %s8619_s5 = inlined_call_operand.vmem [shape: bf16[2,1,1,512], index: 5, kind: output, shape index: {}]  }
   0x1 LB: > { %s5043_s19 = sadd.s32 4294967295, %s6526_s18   ;;  %p5047_p0 = scmp.ge.s32.totalorder %s6526_s18, 1  ;;  %s6526_s18 = sphi %s6560_s18, %s15_s18  }
   0x2   : > { %p187_p1 = scmp.lt.s32.totalorder %s6526_s18, 3 }
   0x4   : > { %p188_p2 = pnand %p5047_p0, %p187_p1 }
   0x5   : > { %p214_p3 = scmp.lt.s32.totalorder (!%p188_p2), %s5043_s19, 1 }
   0x6   : > { %191 = sbr.rel (%p188_p2) target bundleno = 834 (0x342), region = 40 }
   0xb   : > { %v5655_v0 = vld [vmem:[%s8615_s1 + $0xe4] ss:$16 sps:$4 sm:$0xff]   ;;  %v5659_v2 = vld [vmem:[%s8615_s1 + $0xe0] ss:$16 sps:$4 sm:$0xff]   ;;  %v318_v36 = vlaneseq  ;;  %s8627_s19 = smov (!%p214_p3, %s5043_s19), 1  ;;  %vm4797_vm15 = vcmask 1041408  }
   0xc   : > { %v5657_v1 = vld [vmem:[%s8615_s1 + $0x2e4] ss:$16 sps:$4 sm:$0xff]   ;;  %3995 = vmatprep.subr.bf16.mxu0 %v5655_v0  ;;  %v5660_v3 = vld [vmem:[%s8615_s1 + $0x2e0] ss:$16 sps:$4 sm:$0xff]   ;;  %v6528_v40 = vmov 1966171168  }
   0xd   : > { %4036 = vmatprep.subr.bf16.mxu1 %v5657_v1  ;;  %v5661_v4 = vld [vmem:[%s8615_s1 + $0xc4] ss:$16 sps:$4 sm:$0xff]   ;;  %3996 = vmatpush1.bf16.msra.mxu0 %v5659_v2  ;;  %v5665_v6 = vld [vmem:[%s8615_s1 + $0xc0] ss:$16 sps:$4 sm:$0xff]   ;;  %v316_v41 = vunpack.c.l.s4 %v6528_v40  ;;  %v6691_v42 = vshrl.u32 %v318_v36, 7  ;;  %s5644_s8 = sshll.u32 %s8627_s19, 4 }
   0xe   : > { %4037 = vmatpush1.bf16.msra.mxu1 %v5660_v3  ;;  %v5663_v5 = vld [vmem:[%s8615_s1 + $0x2c4] ss:$16 sps:$4 sm:$0xff]   ;;  %3997 = vmatprep.subr.bf16.mxu0 %v5661_v4  ;;  %v5666_v7 = vld [vmem:[%s8615_s1 + $0x2c0] ss:$16 sps:$4 sm:$0xff]   ;;  %vm245_vm0 = vsmask.f32 256  ;;  %s6715_s21 = scalar_lea.vmem %s8614_s0, %s5644_s8 }
   0xf   : > { %4038 = vmatprep.subr.bf16.mxu1 %v5663_v5  ;;  %v5667_v8 = vld [vmem:[%s8615_s1 + $0xa4] ss:$16 sps:$4 sm:$0xff]   ;;  %v5671_v10 = vld [vmem:[%s8615_s1 + $0xa0] ss:$16 sps:$4 sm:$0xff]   ;;  %vm246_vm1 = vsmask.f32 1284  ;;  %v317_v48 = vunpack.c.0.s8 %v316_v41 }
  0x10   : > { %v5669_v9 = vld [vmem:[%s8615_s1 + $0x2a4] ss:$16 sps:$4 sm:$0xff]   ;;  %v5672_v11 = vld [vmem:[%s8615_s1 + $0x2a0] ss:$16 sps:$4 sm:$0xff]   ;;  %vm248_vm2 = vsmask.f32 2312  ;;  %vm247_vm7 = vmor %vm245_vm0, %vm246_vm1 }
  0x11   : > { %3998 = vmatpush1.bf16.msra.mxu0 %v5665_v6  ;;  %v5673_v12 = vld [vmem:[%s8615_s1 + $0x84] ss:$16 sps:$4 sm:$0xff]   ;;  %v5677_v14 = vld [vmem:[%s8615_s1 + $0x80] ss:$16 sps:$4 sm:$0xff]   ;;  %vm250_vm3 = vsmask.f32 3340  ;;  %v6731_v55 = vsub.s32 %v317_v48, %v6691_v42  ;;  %vm249_vm8 = vmor %vm247_vm7, %vm248_vm2 }
  0x12   : > { %4039 = vmatpush1.bf16.msra.mxu1 %v5666_v7  ;;  %3999 = vmatprep.subr.bf16.mxu0 %v5667_v8  ;;  %v5675_v13 = vld [vmem:[%s8615_s1 + $0x284] ss:$16 sps:$4 sm:$0xff]   ;;  %v5678_v15 = vld [vmem:[%s8615_s1 + $0x280] ss:$16 sps:$4 sm:$0xff]   ;;  %vm252_vm4 = vsmask.f32 4368  ;;  %vm251_vm9 = vmor %vm249_vm8, %vm250_vm3 }
  0x13   : > { %4040 = vmatprep.subr.bf16.mxu1 %v5669_v9  ;;  %v5679_v16 = vld [vmem:[%s8615_s1 + $0x64] ss:$16 sps:$4 sm:$0xff]   ;;  %v5683_v18 = vld [vmem:[%s8615_s1 + $0x60] ss:$16 sps:$4 sm:$0xff]   ;;  %vm254_vm5 = vsmask.f32 5396  ;;  %vm253_vm11 = vmor %vm251_vm9, %vm252_vm4 }
  0x14   : > { %v5681_v17 = vld [vmem:[%s8615_s1 + $0x264] ss:$16 sps:$4 sm:$0xff]   ;;  %v5684_v19 = vld [vmem:[%s8615_s1 + $0x260] ss:$16 sps:$4 sm:$0xff]   ;;  %vm256_vm6 = vsmask.f32 6424  ;;  %vm255_vm12 = vmor %vm253_vm11, %vm254_vm5 }
  0x15   : > { %4000 = vmatpush1.bf16.msra.mxu0 %v5671_v10  ;;  %v5685_v20 = vld [vmem:[%s8615_s1 + $0x44] ss:$16 sps:$4 sm:$0xff]   ;;  %v5689_v22 = vld [vmem:[%s8615_s1 + $0x40] ss:$16 sps:$4 sm:$0xff]   ;;  %vm258_vm10 = vsmask.f32 7452  ;;  %vm257_vm13 = vmor %vm255_vm12, %vm256_vm6 }
  0x16   : > { %4041 = vmatpush1.bf16.msra.mxu1 %v5672_v11  ;;  %4001 = vmatprep.subr.bf16.mxu0 %v5673_v12  ;;  %v5687_v21 = vld [vmem:[%s8615_s1 + $0x244] ss:$16 sps:$4 sm:$0xff]   ;;  %v5690_v23 = vld [vmem:[%s8615_s1 + $0x240] ss:$16 sps:$4 sm:$0xff]   ;;  %vm6764_vm14 = vmor %vm257_vm13, %vm258_vm10  ;;  %vm4973_vm1 = vcmask 1040384   ;;  %vm4975_vm2 = vcmask 1041409  }
  0x17   : > { %4042 = vmatprep.subr.bf16.mxu1 %v5675_v13  ;;  %v5691_v24 = vld [vmem:[%s8615_s1 + $0x24] ss:$16 sps:$4 sm:$0xff]   ;;  %v5695_v26 = vld [vmem:[%s8615_s1 + $0x20] ss:$16 sps:$4 sm:$0xff]   ;;  %vm4976_vm3 = vsmask.f32 1280  ;;  %vm8590_vm4 = vmand %vm4973_vm1, %vm245_vm0 }
  0x18   : > { %v5693_v25 = vld [vmem:[%s8615_s1 + $0x224] ss:$16 sps:$4 sm:$0xff]   ;;  %v5696_v27 = vld [vmem:[%s8615_s1 + $0x220] ss:$16 sps:$4 sm:$0xff]   ;;  %vm8595_vm5 = vmand %vm4975_vm2, %vm4976_vm3  ;;  %vm4979_vm6 = vcmask 1042434   ;;  %s5050_s27 = sshll.u32 %s8627_s19, 2 }
  0x19   : > { %4002 = vmatpush1.bf16.msra.mxu0 %v5677_v14  ;;  %v5697_v28 = vld [vmem:[%s8615_s1 + $0x4] ss:$16 sps:$4 sm:$0xff]   ;;  %v5701_v30 = vld [vmem:[%s8615_s1] ss:$16 sps:$4 sm:$0xff]   ;;  %vm4980_vm7 = vsmask.f32 2304  ;;  %vm4978_vm0 = vmor %vm8595_vm5, %vm8590_vm4  ;;  %s222_s30 = scalar_lea.vmem %s8619_s5, %s5050_s27 }
  0x1a   : > { %4043 = vmatpush1.bf16.msra.mxu1 %v5678_v15  ;;  %4003 = vmatprep.subr.bf16.mxu0 %v5679_v16  ;;  %v5699_v29 = vld [vmem:[%s8615_s1 + $0x204] ss:$16 sps:$4 sm:$0xff]   ;;  %v5702_v31 = vld [vmem:[%s8615_s1 + $0x200] ss:$16 sps:$4 sm:$0xff]   ;;  %vm4981_vm8 = vmand %vm4979_vm6, %vm4980_vm7  ;;  %vm4983_vm9 = vcmask 1043459  }
  0x1b   : > { %4044 = vmatprep.subr.bf16.mxu1 %v5681_v17  ;;  %v5703_v32 = vld [vmem:[%s8615_s1 + $0x1e4] ss:$16 sps:$4 sm:$0xff]   ;;  %v5707_v34 = vld [vmem:[%s8615_s1 + $0x1e0] ss:$16 sps:$4 sm:$0xff]   ;;  %vm4984_vm10 = vsmask.f32 3328  ;;  %vm4982_vm11 = vmor %vm4981_vm8, %vm4978_vm0 }
  0x1c   : > { %v5705_v33 = vld [vmem:[%s8615_s1 + $0x3e4] ss:$16 sps:$4 sm:$0xff]   ;;  %v5708_v35 = vld [vmem:[%s8615_s1 + $0x3e0] ss:$16 sps:$4 sm:$0xff]   ;;  %vm4985_vm12 = vmand %vm4983_vm9, %vm4984_vm10 }
  0x1d   : > { %4004 = vmatpush1.bf16.msra.mxu0 %v5683_v18  ;;  %v5709_v37 = vld [vmem:[%s8615_s1 + $0x1c4] ss:$16 sps:$4 sm:$0xff]   ;;  %v5713_v39 = vld [vmem:[%s8615_s1 + $0x1c0] ss:$16 sps:$4 sm:$0xff]   ;;  %vm4986_vm13 = vmor %vm4985_vm12, %vm4982_vm11 }
  0x1e   : > { %4045 = vmatpush1.bf16.msra.mxu1 %v5684_v19  ;;  %4005 = vmatprep.subr.bf16.mxu0 %v5685_v20  ;;  %v5711_v38 = vld [vmem:[%s8615_s1 + $0x3c4] ss:$16 sps:$4 sm:$0xff]   ;;  %v5714_v43 = vld [vmem:[%s8615_s1 + $0x3c0] ss:$16 sps:$4 sm:$0xff]  }
  0x1f   : > { %4046 = vmatprep.subr.bf16.mxu1 %v5687_v21  ;;  %v5715_v44 = vld [vmem:[%s8615_s1 + $0x1a4] ss:$16 sps:$4 sm:$0xff]   ;;  %v5719_v46 = vld [vmem:[%s8615_s1 + $0x1a0] ss:$16 sps:$4 sm:$0xff]  }
  0x20   : > { %v5717_v45 = vld [vmem:[%s8615_s1 + $0x3a4] ss:$16 sps:$4 sm:$0xff]   ;;  %v5720_v47 = vld [vmem:[%s8615_s1 + $0x3a0] ss:$16 sps:$4 sm:$0xff]  }
  0x21   : > { %4006 = vmatpush1.bf16.msra.mxu0 %v5689_v22  ;;  %v5721_v49 = vld [vmem:[%s8615_s1 + $0x184] ss:$16 sps:$4 sm:$0xff]   ;;  %v5725_v51 = vld [vmem:[%s8615_s1 + $0x180] ss:$16 sps:$4 sm:$0xff]  }
  0x22   : > { %4047 = vmatpush1.bf16.msra.mxu1 %v5690_v23  ;;  %4007 = vmatprep.subr.bf16.mxu0 %v5691_v24  ;;  %v5723_v50 = vld [vmem:[%s8615_s1 + $0x384] ss:$16 sps:$4 sm:$0xff]   ;;  %v5726_v52 = vld [vmem:[%s8615_s1 + $0x380] ss:$16 sps:$4 sm:$0xff]  }
  0x23   : > { %4048 = vmatprep.subr.bf16.mxu1 %v5693_v25  ;;  %v5727_v53 = vld [vmem:[%s8615_s1 + $0x164] ss:$16 sps:$4 sm:$0xff]   ;;  %v5051_v54 = vld.sshfl [vmem:[%s6715_s21] sm:$0x33 pattern:$0x75316420] }
  0x24   : > { %v6736_v56 = vld.sshfl [vmem:[%s6715_s21 + $0x4] sm:$0x33 pattern:$0x75316420]  ;;  %v243_v57 = vcombine.high %v5051_v54, %v5051_v54  ;;  %v5731_v61 = vld [vmem:[%s8615_s1 + $0x160] ss:$16 sps:$4 sm:$0xff]  }
  0x25   : > { %4008 = vmatpush1.bf16.msra.mxu0 %v5695_v26  ;;  %v5729_v58 = vld [vmem:[%s8615_s1 + $0x364] ss:$16 sps:$4 sm:$0xff]   ;;  %v314_v59 = vcombine.low %v5051_v54, %v6736_v56  ;;  %v244_v60 = vcombine.high %v6736_v56, %v6736_v56  ;;  %v261_v62 = vshrl.u32 %v5051_v54, 16  ;;  %v270_v0 = vshrl.u32 %v6736_v56, 16  ;;  %v5732_v1 = vld [vmem:[%s8615_s1 + $0x360] ss:$16 sps:$4 sm:$0xff]  }
  0x26   : > { %4049 = vmatpush1.bf16.msra.mxu1 %v5696_v27  ;;  %4009 = vmatprep.subr.bf16.mxu0 %v5697_v28  ;;  %v266_v63 = vshll.u32 %v243_v57, 16  ;;  %v5733_v4 = vld [vmem:[%s8615_s1 + $0x144] ss:$16 sps:$4 sm:$0xff]   ;;  %v5737_v13 = vld [vmem:[%s8615_s1 + $0x140] ss:$16 sps:$4 sm:$0xff]   ;;  %v5059_v18 = vcombine.high %v5051_v54, %v6736_v56 }
  0x27   : > { %4050 = vmatprep.subr.bf16.mxu1 %v5699_v29  ;;  %v321_v2 = vrot.slane %v314_v59, %v6731_v55  ;;  %v275_v3 = vshll.u32 %v244_v60, 16  ;;  %v5735_v5 = vld [vmem:[%s8615_s1 + $0x344] ss:$16 sps:$4 sm:$0xff]   ;;  %v5738_v14 = vld [vmem:[%s8615_s1 + $0x340] ss:$16 sps:$4 sm:$0xff]  }
  0x28   : > { %v268_v8 = vsel %vm6764_vm14, %v261_v62, %v266_v63  ;;  %v6775_v10 = vld.sshfl [vmem:[%s6715_s21 + $0x8] sm:$0x33 pattern:$0x75316420]  ;;  %v5739_v15 = vld [vmem:[%s8615_s1 + $0x124] ss:$16 sps:$4 sm:$0xff]   ;;  %v6814_v26 = vrot.slane %v5059_v18, %v6731_v55 }
  0x29   : > { %4010 = vmatpush1.bf16.msra.mxu0 %v5701_v30  ;;  %v322_v6 = vcombine.high %v321_v2, %v321_v2  ;;  %v6772_v9 = vsel %vm6764_vm14, %v270_v0, %v275_v3  ;;  %v5741_v16 = vld [vmem:[%s8615_s1 + $0x324] ss:$16 sps:$4 sm:$0xff]   ;;  %v389_v19 = vcombine.low %v6736_v56, %v6775_v10  ;;  %v5743_v21 = vld [vmem:[%s8615_s1 + $0x120] ss:$16 sps:$4 sm:$0xff]  }
  0x2a   : > { %4051 = vmatpush1.bf16.msra.mxu1 %v5702_v31  ;;  %4011 = vmatprep.subr.bf16.mxu0 %v5703_v32  ;;  %v339_v12 = vcombine.low %v268_v8, %v6772_v9  ;;  %v5744_v22 = vld [vmem:[%s8615_s1 + $0x320] ss:$16 sps:$4 sm:$0xff]   ;;  %v5745_v23 = vld [vmem:[%s8615_s1 + $0x104] ss:$16 sps:$4 sm:$0xff]   ;;  %v372_v32 = vcombine.high %v6814_v26, %v6814_v26 }
  0x2b   : > { %4052 = vmatprep.subr.bf16.mxu1 %v5705_v33  ;;  %v6778_v11 = vrot.slane %v322_v6, %v6731_v55  ;;  %v5747_v24 = vld [vmem:[%s8615_s1 + $0x304] ss:$16 sps:$4 sm:$0xff]   ;;  %v6817_v27 = vrot.slane %v389_v19, %v6731_v55  ;;  %v5749_v28 = vld [vmem:[%s8615_s1 + $0x100] ss:$16 sps:$4 sm:$0xff]  }
  0x2c   : > { %v346_v17 = vrot.slane %v339_v12, %v6731_v55  ;;  %v5750_v29 = vld [vmem:[%s8615_s1 + $0x300] ss:$16 sps:$4 sm:$0xff]   ;;  %v5753_v30 = vld [vmem:[%s8615_s1 + $0x4e4] ss:$16 sps:$4 sm:$0xff]   ;;  %v6855_v40 = vrot.slane %v372_v32, %v6731_v55 }
  0x2d   : > { %4012 = vmatpush2.bf16.msra.mxu0 %v5707_v34  ;;  %4027 = vmatprep.mubr.bf16.mxu0 %v6778_v11  ;;  %v5756_v31 = vld [vmem:[%s8615_s1 + $0x6e4] ss:$16 sps:$4 sm:$0xff]   ;;  %v397_v33 = vcombine.high %v6817_v27, %v6817_v27  ;;  %v6837_v34 = vrot.slane %v321_v2, %v6731_v55  ;;  %v5751_v36 = vld [vmem:[%s8615_s1 + $0x4e0] ss:$16 sps:$4 sm:$0xff]  }
  0x2e   : > { %4053 = vmatpush2.bf16.msra.mxu1 %v5708_v35  ;;  %4013 = vmatprep.subr.bf16.mxu0 %v5709_v37  ;;  %v347_v20 = vcombine.high %v346_v17, %v346_v17  ;;  %v6840_v35 = vrot.slane %v346_v17, %v6731_v55  ;;  %v5754_v37 = vld [vmem:[%s8615_s1 + $0x6e0] ss:$16 sps:$4 sm:$0xff]   ;;  %v5780_v54 = vld [vmem:[%s8615_s1 + $0x664] ss:$16 sps:$4 sm:$0xff]  }
  0x2f   : > { %4054 = vmatprep.subr.bf16.mxu1 %v5711_v38  ;;  %v5759_v38 = vld [vmem:[%s8615_s1 + $0x4c4] ss:$16 sps:$4 sm:$0xff]   ;;  %v6858_v41 = vrot.slane %v397_v33, %v6731_v55  ;;  %v5766_v48 = vld [vmem:[%s8615_s1 + $0x6a0] ss:$16 sps:$4 sm:$0xff]   ;;  %v288_v33 = vshrl.u32 %v6775_v10, 16 }
  0x30   : > { %v6811_v25 = vrot.slane %v347_v20, %v6731_v55  ;;  %v5775_v57 = vld [vmem:[%s8615_s1 + $0x460] ss:$16 sps:$4 sm:$0xff]   ;;  %v5783_v59 = vld [vmem:[%s8615_s1 + $0x444] ss:$16 sps:$4 sm:$0xff]  }
  0x31   : > { %4014 = vmatpush2.bf16.msra.mxu0 %v5713_v39  ;;  %v5762_v39 = vld [vmem:[%s8615_s1 + $0x6c4] ss:$16 sps:$4 sm:$0xff]   ;;  %v5784_v62 = vld [vmem:[%s8615_s1 + $0x640] ss:$16 sps:$4 sm:$0xff]  }
  0x32   : > { %4055 = vmatpush2.bf16.msra.mxu1 %v5714_v43  ;;  %4015 = vmatprep.subr.bf16.mxu0 %v5715_v44  ;;  %v5757_v43 = vld [vmem:[%s8615_s1 + $0x4c0] ss:$16 sps:$4 sm:$0xff]   ;;  %v5786_v60 = vld [vmem:[%s8615_s1 + $0x644] ss:$16 sps:$4 sm:$0xff]  }
  0x33   : > { %4056 = vmatprep.subr.bf16.mxu1 %v5717_v45  ;;  %4068 = vmatprep.mubr.bf16.mxu1 %v6811_v25  ;;  %v5760_v44 = vld [vmem:[%s8615_s1 + $0x6c0] ss:$16 sps:$4 sm:$0xff]   ;;  %v5765_v45 = vld [vmem:[%s8615_s1 + $0x4a4] ss:$16 sps:$4 sm:$0xff]  }
  0x34   : > { %v5789_v63 = vld [vmem:[%s8615_s1 + $0x424] ss:$16 sps:$4 sm:$0xff]   ;;  %v5790_v2 = vld [vmem:[%s8615_s1 + $0x620] ss:$16 sps:$4 sm:$0xff]  }
  0x35   : > { %4016 = vmatpush2.bf16.msra.mxu0 %v5719_v46  ;;  %v5768_v46 = vld [vmem:[%s8615_s1 + $0x6a4] ss:$16 sps:$4 sm:$0xff]   ;;  %v5796_v6 = vld [vmem:[%s8615_s1 + $0x600] ss:$16 sps:$4 sm:$0xff]  }
  0x36   : > { %4057 = vmatpush2.bf16.msra.mxu1 %v5720_v47  ;;  %4017 = vmatprep.subr.bf16.mxu0 %v5721_v49  ;;  %v5763_v47 = vld [vmem:[%s8615_s1 + $0x4a0] ss:$16 sps:$4 sm:$0xff]   ;;  %v5771_v49 = vld [vmem:[%s8615_s1 + $0x484] ss:$16 sps:$4 sm:$0xff]  }
  0x37   : > { %4058 = vmatprep.subr.bf16.mxu1 %v5723_v50  ;;  %v5774_v50 = vld [vmem:[%s8615_s1 + $0x684] ss:$16 sps:$4 sm:$0xff]   ;;  %v5805_v17 = vld [vmem:[%s8615_s1 + $0x5c0] ss:$16 sps:$4 sm:$0xff]  }
  0x38   : > { %v5792_v0 = vld [vmem:[%s8615_s1 + $0x624] ss:$16 sps:$4 sm:$0xff]   ;;  %v5808_v18 = vld [vmem:[%s8615_s1 + $0x7c0] ss:$16 sps:$4 sm:$0xff]  }
  0x39   : > { %4018 = vmatpush2.bf16.msra.mxu0 %v5725_v51  ;;  %v5769_v51 = vld [vmem:[%s8615_s1 + $0x480] ss:$16 sps:$4 sm:$0xff]   ;;  %v5795_v3 = vld [vmem:[%s8615_s1 + $0x404] ss:$16 sps:$4 sm:$0xff]  }
  0x3a   : > { %4059 = vmatpush2.bf16.msra.mxu1 %v5726_v52  ;;  %4019 = vmatprep.subr.bf16.mxu0 %v5727_v53  ;;  %v5772_v52 = vld [vmem:[%s8615_s1 + $0x680] ss:$16 sps:$4 sm:$0xff]   ;;  %v5777_v53 = vld [vmem:[%s8615_s1 + $0x464] ss:$16 sps:$4 sm:$0xff]  }
  0x3b   : > { %4060 = vmatprep.subr.bf16.mxu1 %v5729_v58  ;;  %v5778_v58 = vld [vmem:[%s8615_s1 + $0x660] ss:$16 sps:$4 sm:$0xff]   ;;  %v5801_v8 = vld [vmem:[%s8615_s1 + $0x5e4] ss:$16 sps:$4 sm:$0xff]  }
  0x3c   : > { %v5804_v12 = vld [vmem:[%s8615_s1 + $0x7e4] ss:$16 sps:$4 sm:$0xff]  }
  0x3d   : > { %4020 = vmatpush2.bf16.msra.mxu0 %v5731_v61  ;;  %v5781_v61 = vld [vmem:[%s8615_s1 + $0x440] ss:$16 sps:$4 sm:$0xff]   ;;  %v5813_v19 = vld [vmem:[%s8615_s1 + $0x5a4] ss:$16 sps:$4 sm:$0xff]  }
  0x3e   : > { %4061 = vmatpush2.bf16.msra.mxu1 %v5732_v1  ;;  %4021 = vmatprep.subr.bf16.mxu0 %v5733_v4  ;;  %v5787_v1 = vld [vmem:[%s8615_s1 + $0x420] ss:$16 sps:$4 sm:$0xff]   ;;  %v5798_v4 = vld [vmem:[%s8615_s1 + $0x604] ss:$16 sps:$4 sm:$0xff]  }
  0x3f   : > { %4062 = vmatprep.subr.bf16.mxu1 %v5735_v5  ;;  %v5793_v5 = vld [vmem:[%s8615_s1 + $0x400] ss:$16 sps:$4 sm:$0xff]   ;;  %v5816_v20 = vld [vmem:[%s8615_s1 + $0x7a4] ss:$16 sps:$4 sm:$0xff]  }
  0x40   : > { %v5828_v32 = vld [vmem:[%s8615_s1 + $0x764] ss:$16 sps:$4 sm:$0xff]  }
  0x41   : > { %4022 = vmatpush2.bf16.msra.mxu0 %v5737_v13  ;;  %v5799_v13 = vld [vmem:[%s8615_s1 + $0x5e0] ss:$16 sps:$4 sm:$0xff]   ;;  %v5942_v7 = vld [vmem:[%s8615_s1 + $0xb04] ss:$16 sps:$4 sm:$0xff]  }
  0x42   : > { %4063 = vmatpush2.bf16.msra.mxu1 %v5738_v14  ;;  %4023 = vmatprep.subr.bf16.mxu0 %v5739_v15  ;;  %v5802_v14 = vld [vmem:[%s8615_s1 + $0x7e0] ss:$16 sps:$4 sm:$0xff]   ;;  %v5807_v15 = vld [vmem:[%s8615_s1 + $0x5c4] ss:$16 sps:$4 sm:$0xff]  }
  0x43   : > { %4064 = vmatprep.subr.bf16.mxu1 %v5741_v16  ;;  %v5810_v16 = vld [vmem:[%s8615_s1 + $0x7c4] ss:$16 sps:$4 sm:$0xff]  }
  0x45   : > { %4024 = vmatpush2.bf16.msra.mxu0 %v5743_v21  ;;  %v5811_v21 = vld [vmem:[%s8615_s1 + $0x5a0] ss:$16 sps:$4 sm:$0xff]  }
  0x46   : > { %4065 = vmatpush2.bf16.msra.mxu1 %v5744_v22  ;;  %4025 = vmatprep.subr.bf16.mxu0 %v5745_v23  ;;  %v5814_v22 = vld [vmem:[%s8615_s1 + $0x7a0] ss:$16 sps:$4 sm:$0xff]   ;;  %v5819_v23 = vld [vmem:[%s8615_s1 + $0x584] ss:$16 sps:$4 sm:$0xff]  }
  0x47   : > { %4066 = vmatprep.subr.bf16.mxu1 %v5747_v24  ;;  %v5822_v24 = vld [vmem:[%s8615_s1 + $0x784] ss:$16 sps:$4 sm:$0xff]  }
  0x49   : > { %4026 = vmatpush2.bf16.msra.mxu0 %v5749_v28  ;;  %v286_v28 = vcombine.high %v6775_v10, %v6775_v10 }
  0x4a   : > { %4067 = vmatpush2.bf16.msra.mxu1 %v5750_v29  ;;  %4077 = vmatprep.subr.bf16.mxu0 %v5753_v30  ;;  %v5817_v29 = vld [vmem:[%s8615_s1 + $0x580] ss:$16 sps:$4 sm:$0xff]  }
  0x4b   : > { %4118 = vmatprep.subr.bf16.mxu1 %v5756_v31  ;;  %v5820_v30 = vld [vmem:[%s8615_s1 + $0x780] ss:$16 sps:$4 sm:$0xff]   ;;  %v5825_v31 = vld [vmem:[%s8615_s1 + $0x564] ss:$16 sps:$4 sm:$0xff]  }
  0x4c   : > { %4028 = vmatmul.mubr.bf16.vlgmr.msra.gmra.mxu0 %v6837_v34 }
  0x4d   : > { %4069 = vmatmul.mubr.bf16.vlgmr.msra.gmra.mxu1 %v6840_v35  ;;  %4078 = vmatpush1.bf16.msra.mxu0 %v5751_v36  ;;  %v293_v36 = vshll.u32 %v286_v28, 16  ;;  %v5877_v28 = vld [vmem:[%s8615_s1 + $0x840] ss:$16 sps:$4 sm:$0xff]  }
  0x4e   : > { %4119 = vmatpush1.bf16.msra.mxu1 %v5754_v37  ;;  %4079 = vmatprep.subr.bf16.mxu0 %v5759_v38  ;;  %v5823_v37 = vld [vmem:[%s8615_s1 + $0x560] ss:$16 sps:$4 sm:$0xff]  }
  0x4f   : > { %4120 = vmatprep.subr.bf16.mxu1 %v5762_v39  ;;  %4109 = vmatprep.mubr.bf16.mxu0 %v6855_v40  ;;  %v5826_v38 = vld [vmem:[%s8615_s1 + $0x760] ss:$16 sps:$4 sm:$0xff]   ;;  %v5831_v39 = vld [vmem:[%s8615_s1 + $0x544] ss:$16 sps:$4 sm:$0xff]  }
  0x50   : > { %4150 = vmatprep.mubr.bf16.mxu1 %v6858_v41 }
  0x51   : > { %4080 = vmatpush1.bf16.msra.mxu0 %v5757_v43  ;;  %v5834_v43 = vld [vmem:[%s8615_s1 + $0x744] ss:$16 sps:$4 sm:$0xff]  }
  0x52   : > { %4121 = vmatpush1.bf16.msra.mxu1 %v5760_v44  ;;  %4081 = vmatprep.subr.bf16.mxu0 %v5765_v45  ;;  %v7013_v44 = vsel %vm6764_vm14, %v288_v33, %v293_v36  ;;  %v5829_v45 = vld [vmem:[%s8615_s1 + $0x540] ss:$16 sps:$4 sm:$0xff]   ;;  %v5891_v36 = vld [vmem:[%s8615_s1 + $0x804] ss:$16 sps:$4 sm:$0xff]  }
  0x53   : > { %4122 = vmatprep.subr.bf16.mxu1 %v5768_v46  ;;  %v5832_v46 = vld [vmem:[%s8615_s1 + $0x740] ss:$16 sps:$4 sm:$0xff]  }
  0x54   : > { %v5886_v33 = vld [vmem:[%s8615_s1 + $0xa20] ss:$16 sps:$4 sm:$0xff]  }
  0x55   : > { %4082 = vmatpush1.bf16.msra.mxu0 %v5763_v47  ;;  %v5837_v47 = vld [vmem:[%s8615_s1 + $0x524] ss:$16 sps:$4 sm:$0xff]  }
  0x56   : > { %4123 = vmatpush1.bf16.msra.mxu1 %v5766_v48  ;;  %4083 = vmatprep.subr.bf16.mxu0 %v5771_v49  ;;  %v5840_v48 = vld [vmem:[%s8615_s1 + $0x724] ss:$16 sps:$4 sm:$0xff]   ;;  %v414_v49 = vcombine.low %v6772_v9, %v7013_v44 }
  0x57   : > { %4124 = vmatprep.subr.bf16.mxu1 %v5774_v50  ;;  %v5060_v50 = vcombine.high %v6736_v56, %v6775_v10  ;;  %v5846_v56 = vld [vmem:[%s8615_s1 + $0x704] ss:$16 sps:$4 sm:$0xff]  }
  0x58   : > { %v7044_v9 = vrot.slane %v414_v49, %v6731_v55  ;;  %v5906_v49 = vld [vmem:[%s8615_s1 + $0xbc4] ss:$16 sps:$4 sm:$0xff]  }
  0x59   : > { %4084 = vmatpush1.bf16.msra.mxu0 %v5769_v51  ;;  %v5835_v51 = vld [vmem:[%s8615_s1 + $0x520] ss:$16 sps:$4 sm:$0xff]  }
  0x5a   : > { %4125 = vmatpush1.bf16.msra.mxu1 %v5772_v52  ;;  %4085 = vmatprep.subr.bf16.mxu0 %v5777_v53  ;;  %v5838_v52 = vld [vmem:[%s8615_s1 + $0x720] ss:$16 sps:$4 sm:$0xff]   ;;  %v5843_v53 = vld [vmem:[%s8615_s1 + $0x504] ss:$16 sps:$4 sm:$0xff]  }
  0x5b   : > { %4126 = vmatprep.subr.bf16.mxu1 %v5780_v54  ;;  %v7047_v54 = vrot.slane %v5060_v50, %v6731_v55  ;;  %v5901_v50 = vld [vmem:[%s8615_s1 + $0x9c0] ss:$16 sps:$4 sm:$0xff]  }
  0x5d   : > { %4086 = vmatpush1.bf16.msra.mxu0 %v5775_v57  ;;  %v5841_v57 = vld [vmem:[%s8615_s1 + $0x500] ss:$16 sps:$4 sm:$0xff]  }
  0x5e   : > { %4127 = vmatpush1.bf16.msra.mxu1 %v5778_v58  ;;  %4087 = vmatprep.subr.bf16.mxu0 %v5783_v59  ;;  %v5844_v58 = vld [vmem:[%s8615_s1 + $0x700] ss:$16 sps:$4 sm:$0xff]   ;;  %v5849_v59 = vld [vmem:[%s8615_s1 + $0x8e4] ss:$16 sps:$4 sm:$0xff]  }
  0x5f   : > { %4128 = vmatprep.subr.bf16.mxu1 %v5786_v60  ;;  %v5852_v60 = vld [vmem:[%s8615_s1 + $0xae4] ss:$16 sps:$4 sm:$0xff]  }
  0x61   : > { %4088 = vmatpush1.bf16.msra.mxu0 %v5781_v61  ;;  %v422_v61 = vcombine.high %v7044_v9, %v7044_v9 }
  0x62   : > { %4129 = vmatpush1.bf16.msra.mxu1 %v5784_v62  ;;  %4089 = vmatprep.subr.bf16.mxu0 %v5789_v63  ;;  %v447_v62 = vcombine.high %v7047_v54, %v7047_v54  ;;  %v7067_v63 = vrot.slane %v6814_v26, %v6731_v55  ;;  %v5855_v26 = vld [vmem:[%s8615_s1 + $0x8c4] ss:$16 sps:$4 sm:$0xff]  }
  0x63   : > { %4130 = vmatprep.subr.bf16.mxu1 %v5792_v0  ;;  %v7071_v0 = vrot.slane %v6817_v27, %v6731_v55  ;;  %v5858_v27 = vld [vmem:[%s8615_s1 + $0xac4] ss:$16 sps:$4 sm:$0xff]  }
  0x65   : > { %4090 = vmatpush1.bf16.msra.mxu0 %v5787_v1  ;;  %v5847_v1 = vld [vmem:[%s8615_s1 + $0x8e0] ss:$16 sps:$4 sm:$0xff]  }
  0x66   : > { %4131 = vmatpush1.bf16.msra.mxu1 %v5790_v2  ;;  %4091 = vmatprep.subr.bf16.mxu0 %v5795_v3  ;;  %v5850_v2 = vld [vmem:[%s8615_s1 + $0xae0] ss:$16 sps:$4 sm:$0xff]   ;;  %v7086_v3 = vrot.slane %v422_v61, %v6731_v55 }
  0x67   : > { %4132 = vmatprep.subr.bf16.mxu1 %v5798_v4  ;;  %v7089_v4 = vrot.slane %v447_v62, %v6731_v55  ;;  %v5916_v61 = vld [vmem:[%s8615_s1 + $0xb80] ss:$16 sps:$4 sm:$0xff]   ;;  %v5921_v62 = vld [vmem:[%s8615_s1 + $0x964] ss:$16 sps:$4 sm:$0xff]  }
  0x69   : > { %4092 = vmatpush1.bf16.msra.mxu0 %v5793_v5  ;;  %v5853_v5 = vld [vmem:[%s8615_s1 + $0x8c0] ss:$16 sps:$4 sm:$0xff]  }
  0x6a   : > { %4133 = vmatpush1.bf16.msra.mxu1 %v5796_v6  ;;  %4093 = vmatprep.subr.bf16.mxu0 %v5801_v8  ;;  %v5856_v6 = vld [vmem:[%s8615_s1 + $0xac0] ss:$16 sps:$4 sm:$0xff]   ;;  %v5861_v8 = vld [vmem:[%s8615_s1 + $0x8a4] ss:$16 sps:$4 sm:$0xff]  }
  0x6b   : > { %4134 = vmatprep.subr.bf16.mxu1 %v5804_v12  ;;  %v5864_v12 = vld [vmem:[%s8615_s1 + $0xaa4] ss:$16 sps:$4 sm:$0xff]  }
  0x6d   : > { %4094 = vmatpush2.bf16.msra.mxu0 %v5799_v13  ;;  %v5859_v13 = vld [vmem:[%s8615_s1 + $0x8a0] ss:$16 sps:$4 sm:$0xff]  }
  0x6e   : > { %4135 = vmatpush2.bf16.msra.mxu1 %v5802_v14  ;;  %4095 = vmatprep.subr.bf16.mxu0 %v5807_v15  ;;  %v5862_v14 = vld [vmem:[%s8615_s1 + $0xaa0] ss:$16 sps:$4 sm:$0xff]   ;;  %v5867_v15 = vld [vmem:[%s8615_s1 + $0x884] ss:$16 sps:$4 sm:$0xff]  }
  0x6f   : > { %4136 = vmatprep.subr.bf16.mxu1 %v5810_v16  ;;  %v5870_v16 = vld [vmem:[%s8615_s1 + $0xa84] ss:$16 sps:$4 sm:$0xff]  }
  0x71   : > { %4096 = vmatpush2.bf16.msra.mxu0 %v5805_v17  ;;  %v5865_v17 = vld [vmem:[%s8615_s1 + $0x880] ss:$16 sps:$4 sm:$0xff]  }
  0x72   : > { %4137 = vmatpush2.bf16.msra.mxu1 %v5808_v18  ;;  %4097 = vmatprep.subr.bf16.mxu0 %v5813_v19  ;;  %v5868_v18 = vld [vmem:[%s8615_s1 + $0xa80] ss:$16 sps:$4 sm:$0xff]   ;;  %v5873_v19 = vld [vmem:[%s8615_s1 + $0x864] ss:$16 sps:$4 sm:$0xff]  }
  0x73   : > { %4138 = vmatprep.subr.bf16.mxu1 %v5816_v20  ;;  %v5876_v20 = vld [vmem:[%s8615_s1 + $0xa64] ss:$16 sps:$4 sm:$0xff]  }
  0x75   : > { %4098 = vmatpush2.bf16.msra.mxu0 %v5811_v21  ;;  %v5871_v21 = vld [vmem:[%s8615_s1 + $0x860] ss:$16 sps:$4 sm:$0xff]  }
  0x76   : > { %4139 = vmatpush2.bf16.msra.mxu1 %v5814_v22  ;;  %4099 = vmatprep.subr.bf16.mxu0 %v5819_v23  ;;  %v5874_v22 = vld [vmem:[%s8615_s1 + $0xa60] ss:$16 sps:$4 sm:$0xff]   ;;  %v5879_v23 = vld [vmem:[%s8615_s1 + $0x844] ss:$16 sps:$4 sm:$0xff]  }
  0x77   : > { %4140 = vmatprep.subr.bf16.mxu1 %v5822_v24  ;;  %v5882_v24 = vld [vmem:[%s8615_s1 + $0xa44] ss:$16 sps:$4 sm:$0xff]  }
  0x79   : > { %4100 = vmatpush2.bf16.msra.mxu0 %v5817_v29  ;;  %v5880_v29 = vld [vmem:[%s8615_s1 + $0xa40] ss:$16 sps:$4 sm:$0xff]  }
  0x7a   : > { %4141 = vmatpush2.bf16.msra.mxu1 %v5820_v30  ;;  %4101 = vmatprep.subr.bf16.mxu0 %v5825_v31  ;;  %v5885_v30 = vld [vmem:[%s8615_s1 + $0x824] ss:$16 sps:$4 sm:$0xff]  }
  0x7b   : > { %4142 = vmatprep.subr.bf16.mxu1 %v5828_v32  ;;  %v5888_v31 = vld [vmem:[%s8615_s1 + $0xa24] ss:$16 sps:$4 sm:$0xff]   ;;  %v5883_v32 = vld [vmem:[%s8615_s1 + $0x820] ss:$16 sps:$4 sm:$0xff]  }
  0x7d   : > { %4102 = vmatpush2.bf16.msra.mxu0 %v5823_v37  ;;  %v5894_v37 = vld [vmem:[%s8615_s1 + $0xa04] ss:$16 sps:$4 sm:$0xff]  }
  0x7e   : > { %4143 = vmatpush2.bf16.msra.mxu1 %v5826_v38  ;;  %4103 = vmatprep.subr.bf16.mxu0 %v5831_v39  ;;  %v5889_v38 = vld [vmem:[%s8615_s1 + $0x800] ss:$16 sps:$4 sm:$0xff]  }
  0x7f   : > { %4144 = vmatprep.subr.bf16.mxu1 %v5834_v43  ;;  %v5892_v39 = vld [vmem:[%s8615_s1 + $0xa00] ss:$16 sps:$4 sm:$0xff]   ;;  %v5897_v43 = vld [vmem:[%s8615_s1 + $0x9e4] ss:$16 sps:$4 sm:$0xff]  }
  0x81   : > { %4104 = vmatpush2.bf16.msra.mxu0 %v5829_v45  ;;  %v5900_v45 = vld [vmem:[%s8615_s1 + $0xbe4] ss:$16 sps:$4 sm:$0xff]  }
  0x82   : > { %4145 = vmatpush2.bf16.msra.mxu1 %v5832_v46  ;;  %4105 = vmatprep.subr.bf16.mxu0 %v5837_v47  ;;  %v5895_v46 = vld [vmem:[%s8615_s1 + $0x9e0] ss:$16 sps:$4 sm:$0xff]  }
  0x83   : > { %4146 = vmatprep.subr.bf16.mxu1 %v5840_v48  ;;  %v5898_v47 = vld [vmem:[%s8615_s1 + $0xbe0] ss:$16 sps:$4 sm:$0xff]   ;;  %v5903_v48 = vld [vmem:[%s8615_s1 + $0x9c4] ss:$16 sps:$4 sm:$0xff]  }
  0x85   : > { %4106 = vmatpush2.bf16.msra.mxu0 %v5835_v51  ;;  %v5904_v51 = vld [vmem:[%s8615_s1 + $0xbc0] ss:$16 sps:$4 sm:$0xff]  }
  0x86   : > { %4147 = vmatpush2.bf16.msra.mxu1 %v5838_v52  ;;  %4107 = vmatprep.subr.bf16.mxu0 %v5843_v53  ;;  %v5909_v52 = vld [vmem:[%s8615_s1 + $0x9a4] ss:$16 sps:$4 sm:$0xff]  }
  0x87   : > { %4148 = vmatprep.subr.bf16.mxu1 %v5846_v56  ;;  %v5912_v53 = vld [vmem:[%s8615_s1 + $0xba4] ss:$16 sps:$4 sm:$0xff]   ;;  %v5907_v56 = vld [vmem:[%s8615_s1 + $0x9a0] ss:$16 sps:$4 sm:$0xff]  }
  0x89   : > { %4108 = vmatpush2.bf16.msra.mxu0 %v5841_v57  ;;  %v5910_v57 = vld [vmem:[%s8615_s1 + $0xba0] ss:$16 sps:$4 sm:$0xff]  }
  0x8a   : > { %4149 = vmatpush2.bf16.msra.mxu1 %v5844_v58  ;;  %4159 = vmatprep.subr.bf16.mxu0 %v5849_v59  ;;  %v5915_v58 = vld [vmem:[%s8615_s1 + $0x984] ss:$16 sps:$4 sm:$0xff]  }
  0x8b   : > { %4200 = vmatprep.subr.bf16.mxu1 %v5852_v60  ;;  %v5918_v59 = vld [vmem:[%s8615_s1 + $0xb84] ss:$16 sps:$4 sm:$0xff]   ;;  %v5913_v60 = vld [vmem:[%s8615_s1 + $0x980] ss:$16 sps:$4 sm:$0xff]  }
  0x8c   : > { %4110 = vmatmul.mubr.bf16.vlgmr.msra.gmra.mxu0 %v7067_v63 }
  0x8d   : > { %4151 = vmatmul.mubr.bf16.vlgmr.msra.gmra.mxu1 %v7071_v0  ;;  %4160 = vmatpush1.bf16.msra.mxu0 %v5847_v1  ;;  %v5924_v1 = vld [vmem:[%s8615_s1 + $0xb64] ss:$16 sps:$4 sm:$0xff]  }
  0x8e   : > { %4201 = vmatpush1.bf16.msra.mxu1 %v5850_v2  ;;  %4161 = vmatprep.subr.bf16.mxu0 %v5855_v26  ;;  %v5919_v2 = vld [vmem:[%s8615_s1 + $0x960] ss:$16 sps:$4 sm:$0xff]  }
  0x8f   : > { %4202 = vmatprep.subr.bf16.mxu1 %v5858_v27  ;;  %4191 = vmatprep.mubr.bf16.mxu0 %v7086_v3  ;;  %v5922_v26 = vld [vmem:[%s8615_s1 + $0xb60] ss:$16 sps:$4 sm:$0xff]   ;;  %v5927_v27 = vld [vmem:[%s8615_s1 + $0x944] ss:$16 sps:$4 sm:$0xff]  }
  0x90   : > { %4232 = vmatprep.mubr.bf16.mxu1 %v7089_v4 }
  0x91   : > { %4162 = vmatpush1.bf16.msra.mxu0 %v5853_v5  ;;  %v5930_v5 = vld [vmem:[%s8615_s1 + $0xb44] ss:$16 sps:$4 sm:$0xff]  }
  0x92   : > { %4203 = vmatpush1.bf16.msra.mxu1 %v5856_v6  ;;  %4163 = vmatprep.subr.bf16.mxu0 %v5861_v8  ;;  %v7240_v6 = vld.sshfl [vmem:[%s6715_s21 + $0xc] sm:$0x33 pattern:$0x75316420] }
  0x93   : > { %4204 = vmatprep.subr.bf16.mxu1 %v5864_v12  ;;  %v304_v8 = vcombine.high %v7240_v6, %v7240_v6  ;;  %v306_v12 = vshrl.u32 %v7240_v6, 16 }
  0x95   : > { %4164 = vmatpush1.bf16.msra.mxu0 %v5859_v13  ;;  %v5925_v13 = vld [vmem:[%s8615_s1 + $0x940] ss:$16 sps:$4 sm:$0xff]  }
  0x96   : > { %4205 = vmatpush1.bf16.msra.mxu1 %v5862_v14  ;;  %4165 = vmatprep.subr.bf16.mxu0 %v5867_v15  ;;  %v5928_v14 = vld [vmem:[%s8615_s1 + $0xb40] ss:$16 sps:$4 sm:$0xff]   ;;  %v5933_v15 = vld [vmem:[%s8615_s1 + $0x924] ss:$16 sps:$4 sm:$0xff]  }
  0x97   : > { %4206 = vmatprep.subr.bf16.mxu1 %v5870_v16  ;;  %v311_v16 = vshll.u32 %v304_v8, 16  ;;  %v5982_v8 = vld [vmem:[%s8615_s1 + $0xe20] ss:$16 sps:$4 sm:$0xff]  }
  0x99   : > { %4166 = vmatpush1.bf16.msra.mxu0 %v5865_v17  ;;  %v5936_v17 = vld [vmem:[%s8615_s1 + $0xb24] ss:$16 sps:$4 sm:$0xff]  }
  0x9a   : > { %4207 = vmatpush1.bf16.msra.mxu1 %v5868_v18  ;;  %4167 = vmatprep.subr.bf16.mxu0 %v5873_v19  ;;  %v464_v18 = vcombine.low %v6775_v10, %v7240_v6  ;;  %v313_v19 = vsel %vm6764_vm14, %v306_v12, %v311_v16  ;;  %v5987_v12 = vld [vmem:[%s8615_s1 + $0xc04] ss:$16 sps:$4 sm:$0xff]  }
  0x9b   : > { %4208 = vmatprep.subr.bf16.mxu1 %v5876_v20  ;;  %v5931_v20 = vld [vmem:[%s8615_s1 + $0x920] ss:$16 sps:$4 sm:$0xff]   ;;  %v5993_v16 = vld [vmem:[%s8615_s1 + $0xde4] ss:$16 sps:$4 sm:$0xff]  }
  0x9c   : > { %v7275_v10 = vrot.slane %v464_v18, %v6731_v55  ;;  %v5991_v18 = vld [vmem:[%s8615_s1 + $0xde0] ss:$16 sps:$4 sm:$0xff]  }
  0x9d   : > { %4168 = vmatpush1.bf16.msra.mxu0 %v5871_v21  ;;  %v489_v21 = vcombine.low %v7013_v44, %v313_v19  ;;  %v5994_v19 = vld [vmem:[%s8615_s1 + $0xfe0] ss:$16 sps:$4 sm:$0xff]  }
  0x9e   : > { %4209 = vmatpush1.bf16.msra.mxu1 %v5874_v22  ;;  %4169 = vmatprep.subr.bf16.mxu0 %v5879_v23  ;;  %v5934_v22 = vld [vmem:[%s8615_s1 + $0xb20] ss:$16 sps:$4 sm:$0xff]   ;;  %v5939_v23 = vld [vmem:[%s8615_s1 + $0x904] ss:$16 sps:$4 sm:$0xff]  }
  0x9f   : > { %4210 = vmatprep.subr.bf16.mxu1 %v5882_v24  ;;  %v7278_v44 = vrot.slane %v489_v21, %v6731_v55  ;;  %v5937_v24 = vld [vmem:[%s8615_s1 + $0x900] ss:$16 sps:$4 sm:$0xff]   ;;  %v6002_v21 = vld [vmem:[%s8615_s1 + $0xfc4] ss:$16 sps:$4 sm:$0xff]  }
  0xa1   : > { %4170 = vmatpush1.bf16.msra.mxu0 %v5877_v28  ;;  %v5940_v28 = vld [vmem:[%s8615_s1 + $0xb00] ss:$16 sps:$4 sm:$0xff]  }
  0xa2   : > { %4211 = vmatpush1.bf16.msra.mxu1 %v5880_v29  ;;  %4171 = vmatprep.subr.bf16.mxu0 %v5885_v30  ;;  %v5945_v29 = vld [vmem:[%s8615_s1 + $0xce4] ss:$16 sps:$4 sm:$0xff]  }
  0xa3   : > { %4212 = vmatprep.subr.bf16.mxu1 %v5888_v31  ;;  %v5948_v30 = vld [vmem:[%s8615_s1 + $0xee4] ss:$16 sps:$4 sm:$0xff]   ;;  %v472_v31 = vcombine.high %v7275_v10, %v7275_v10 }
  0xa5   : > { %4172 = vmatpush1.bf16.msra.mxu0 %v5883_v32  ;;  %v497_v32 = vcombine.high %v7278_v44, %v7278_v44 }
  0xa6   : > { %4213 = vmatpush1.bf16.msra.mxu1 %v5886_v33  ;;  %4173 = vmatprep.subr.bf16.mxu0 %v5891_v36  ;;  %v7298_v33 = vrot.slane %v7044_v9, %v6731_v55  ;;  %v7302_v36 = vrot.slane %v7047_v54, %v6731_v55  ;;  %v5954_v9 = vld [vmem:[%s8615_s1 + $0xec4] ss:$16 sps:$4 sm:$0xff]   ;;  %v7317_v54 = vrot.slane %v472_v31, %v6731_v55 }
  0xa7   : > { %4214 = vmatprep.subr.bf16.mxu1 %v5894_v37  ;;  %v5943_v37 = vld [vmem:[%s8615_s1 + $0xce0] ss:$16 sps:$4 sm:$0xff]   ;;  %v6014_v31 = vld [vmem:[%s8615_s1 + $0xf84] ss:$16 sps:$4 sm:$0xff]  }
  0xa9   : > { %4174 = vmatpush1.bf16.msra.mxu0 %v5889_v38  ;;  %v5946_v38 = vld [vmem:[%s8615_s1 + $0xee0] ss:$16 sps:$4 sm:$0xff]  }
  0xaa   : > { %4215 = vmatpush1.bf16.msra.mxu1 %v5892_v39  ;;  %4175 = vmatprep.subr.bf16.mxu0 %v5897_v43  ;;  %v5951_v39 = vld [vmem:[%s8615_s1 + $0xcc4] ss:$16 sps:$4 sm:$0xff]   ;;  %v7320_v43 = vrot.slane %v497_v32, %v6731_v55  ;;  %v6009_v32 = vld [vmem:[%s8615_s1 + $0xd80] ss:$16 sps:$4 sm:$0xff]  }
  0xab   : > { %4216 = vmatprep.subr.bf16.mxu1 %v5900_v45  ;;  %v5949_v45 = vld [vmem:[%s8615_s1 + $0xcc0] ss:$16 sps:$4 sm:$0xff]  }
  0xad   : > { %4176 = vmatpush2.bf16.msra.mxu0 %v5895_v46  ;;  %v5952_v46 = vld [vmem:[%s8615_s1 + $0xec0] ss:$16 sps:$4 sm:$0xff]  }
  0xae   : > { %4217 = vmatpush2.bf16.msra.mxu1 %v5898_v47  ;;  %4177 = vmatprep.subr.bf16.mxu0 %v5903_v48  ;;  %v5957_v47 = vld [vmem:[%s8615_s1 + $0xca4] ss:$16 sps:$4 sm:$0xff]  }
  0xaf   : > { %4218 = vmatprep.subr.bf16.mxu1 %v5906_v49  ;;  %v5960_v48 = vld [vmem:[%s8615_s1 + $0xea4] ss:$16 sps:$4 sm:$0xff]   ;;  %v5955_v49 = vld [vmem:[%s8615_s1 + $0xca0] ss:$16 sps:$4 sm:$0xff]  }
  0xb1   : > { %4178 = vmatpush2.bf16.msra.mxu0 %v5901_v50  ;;  %v5958_v50 = vld [vmem:[%s8615_s1 + $0xea0] ss:$16 sps:$4 sm:$0xff]  }
  0xb2   : > { %4219 = vmatpush2.bf16.msra.mxu1 %v5904_v51  ;;  %4179 = vmatprep.subr.bf16.mxu0 %v5909_v52  ;;  %v5963_v51 = vld [vmem:[%s8615_s1 + $0xc84] ss:$16 sps:$4 sm:$0xff]  }
  0xb3   : > { %4220 = vmatprep.subr.bf16.mxu1 %v5912_v53  ;;  %v5966_v52 = vld [vmem:[%s8615_s1 + $0xe84] ss:$16 sps:$4 sm:$0xff]   ;;  %v5961_v53 = vld [vmem:[%s8615_s1 + $0xc80] ss:$16 sps:$4 sm:$0xff]  }
  0xb5   : > { %4180 = vmatpush2.bf16.msra.mxu0 %v5907_v56  ;;  %v5964_v56 = vld [vmem:[%s8615_s1 + $0xe80] ss:$16 sps:$4 sm:$0xff]  }
  0xb6   : > { %4221 = vmatpush2.bf16.msra.mxu1 %v5910_v57  ;;  %4181 = vmatprep.subr.bf16.mxu0 %v5915_v58  ;;  %v5969_v57 = vld [vmem:[%s8615_s1 + $0xc64] ss:$16 sps:$4 sm:$0xff]  }
  0xb7   : > { %4222 = vmatprep.subr.bf16.mxu1 %v5918_v59  ;;  %v5972_v58 = vld [vmem:[%s8615_s1 + $0xe64] ss:$16 sps:$4 sm:$0xff]   ;;  %v5967_v59 = vld [vmem:[%s8615_s1 + $0xc60] ss:$16 sps:$4 sm:$0xff]  }
  0xb9   : > { %4182 = vmatpush2.bf16.msra.mxu0 %v5913_v60  ;;  %v5970_v60 = vld [vmem:[%s8615_s1 + $0xe60] ss:$16 sps:$4 sm:$0xff]  }
  0xba   : > { %4223 = vmatpush2.bf16.msra.mxu1 %v5916_v61  ;;  %4183 = vmatprep.subr.bf16.mxu0 %v5921_v62  ;;  %v5975_v61 = vld [vmem:[%s8615_s1 + $0xc44] ss:$16 sps:$4 sm:$0xff]  }
  0xbb   : > { %4224 = vmatprep.subr.bf16.mxu1 %v5924_v1  ;;  %v5978_v62 = vld [vmem:[%s8615_s1 + $0xe44] ss:$16 sps:$4 sm:$0xff]   ;;  %v5973_v1 = vld [vmem:[%s8615_s1 + $0xc40] ss:$16 sps:$4 sm:$0xff]  }
  0xbd   : > { %4184 = vmatpush2.bf16.msra.mxu0 %v5919_v2  ;;  %v5976_v2 = vld [vmem:[%s8615_s1 + $0xe40] ss:$16 sps:$4 sm:$0xff]  }
  0xbe   : > { %4225 = vmatpush2.bf16.msra.mxu1 %v5922_v26  ;;  %4185 = vmatprep.subr.bf16.mxu0 %v5927_v27  ;;  %v5981_v26 = vld [vmem:[%s8615_s1 + $0xc24] ss:$16 sps:$4 sm:$0xff]  }
  0xbf   : > { %4226 = vmatprep.subr.bf16.mxu1 %v5930_v5  ;;  %v5984_v27 = vld [vmem:[%s8615_s1 + $0xe24] ss:$16 sps:$4 sm:$0xff]   ;;  %v5979_v5 = vld [vmem:[%s8615_s1 + $0xc20] ss:$16 sps:$4 sm:$0xff]  }
  0xc1   : > { %4186 = vmatpush2.bf16.msra.mxu0 %v5925_v13  ;;  %v5990_v13 = vld [vmem:[%s8615_s1 + $0xe04] ss:$16 sps:$4 sm:$0xff]  }
  0xc2   : > { %4227 = vmatpush2.bf16.msra.mxu1 %v5928_v14  ;;  %4187 = vmatprep.subr.bf16.mxu0 %v5933_v15  ;;  %v5985_v14 = vld [vmem:[%s8615_s1 + $0xc00] ss:$16 sps:$4 sm:$0xff]  }
  0xc3   : > { %4228 = vmatprep.subr.bf16.mxu1 %v5936_v17  ;;  %v5988_v15 = vld [vmem:[%s8615_s1 + $0xe00] ss:$16 sps:$4 sm:$0xff]   ;;  %v5996_v17 = vld [vmem:[%s8615_s1 + $0xfe4] ss:$16 sps:$4 sm:$0xff]  }
  0xc5   : > { %4188 = vmatpush2.bf16.msra.mxu0 %v5931_v20  ;;  %v5999_v20 = vld [vmem:[%s8615_s1 + $0xdc4] ss:$16 sps:$4 sm:$0xff]  }
  0xc6   : > { %4229 = vmatpush2.bf16.msra.mxu1 %v5934_v22  ;;  %4189 = vmatprep.subr.bf16.mxu0 %v5939_v23  ;;  %v5997_v22 = vld [vmem:[%s8615_s1 + $0xdc0] ss:$16 sps:$4 sm:$0xff]  }
  0xc7   : > { %4230 = vmatprep.subr.bf16.mxu1 %v5942_v7  ;;  %v6000_v23 = vld [vmem:[%s8615_s1 + $0xfc0] ss:$16 sps:$4 sm:$0xff]   ;;  %v6005_v7 = vld [vmem:[%s8615_s1 + $0xda4] ss:$16 sps:$4 sm:$0xff]  }
  0xc9   : > { %4190 = vmatpush2.bf16.msra.mxu0 %v5937_v24  ;;  %v6008_v24 = vld [vmem:[%s8615_s1 + $0xfa4] ss:$16 sps:$4 sm:$0xff]  }
  0xca   : > { %4231 = vmatpush2.bf16.msra.mxu1 %v5940_v28  ;;  %4241 = vmatprep.subr.bf16.mxu0 %v5945_v29  ;;  %v6003_v28 = vld [vmem:[%s8615_s1 + $0xda0] ss:$16 sps:$4 sm:$0xff]  }
  0xcb   : > { %4282 = vmatprep.subr.bf16.mxu1 %v5948_v30  ;;  %v6006_v29 = vld [vmem:[%s8615_s1 + $0xfa0] ss:$16 sps:$4 sm:$0xff]   ;;  %v6011_v30 = vld [vmem:[%s8615_s1 + $0xd84] ss:$16 sps:$4 sm:$0xff]  }
  0xcc   : > { %4192 = vmatmul.mubr.bf16.vlgmr.msra.gmra.mxu0 %v7298_v33 }
  0xcd   : > { %4233 = vmatmul.mubr.bf16.vlgmr.msra.gmra.mxu1 %v7302_v36  ;;  %4242 = vmatpush1.bf16.msra.mxu0 %v5943_v37  ;;  %v6012_v37 = vld [vmem:[%s8615_s1 + $0xf80] ss:$16 sps:$4 sm:$0xff]  }
  0xce   : > { %4283 = vmatpush1.bf16.msra.mxu1 %v5946_v38  ;;  %4243 = vmatprep.subr.bf16.mxu0 %v5951_v39  ;;  %v6017_v38 = vld [vmem:[%s8615_s1 + $0xd64] ss:$16 sps:$4 sm:$0xff]  }
  0xcf   : > { %4284 = vmatprep.subr.bf16.mxu1 %v5954_v9  ;;  %4273 = vmatprep.mubr.bf16.mxu0 %v7317_v54  ;;  %v6020_v39 = vld [vmem:[%s8615_s1 + $0xf64] ss:$16 sps:$4 sm:$0xff]   ;;  %v6015_v9 = vld [vmem:[%s8615_s1 + $0xd60] ss:$16 sps:$4 sm:$0xff]  }
  0xd0   : > { %4314 = vmatprep.mubr.bf16.mxu1 %v7320_v43 }
  0xd1   : > { %4244 = vmatpush1.bf16.msra.mxu0 %v5949_v45  ;;  %v6018_v45 = vld [vmem:[%s8615_s1 + $0xf60] ss:$16 sps:$4 sm:$0xff]  }
  0xd2   : > { %4285 = vmatpush1.bf16.msra.mxu1 %v5952_v46  ;;  %4245 = vmatprep.subr.bf16.mxu0 %v5957_v47  ;;  %v6023_v46 = vld [vmem:[%s8615_s1 + $0xd44] ss:$16 sps:$4 sm:$0xff]  }
  0xd3   : > { %4286 = vmatprep.subr.bf16.mxu1 %v5960_v48  ;;  %v6026_v47 = vld [vmem:[%s8615_s1 + $0xf44] ss:$16 sps:$4 sm:$0xff]   ;;  %v6021_v48 = vld [vmem:[%s8615_s1 + $0xd40] ss:$16 sps:$4 sm:$0xff]  }
  0xd5   : > { %4246 = vmatpush1.bf16.msra.mxu0 %v5955_v49  ;;  %v6024_v49 = vld [vmem:[%s8615_s1 + $0xf40] ss:$16 sps:$4 sm:$0xff]  }
  0xd6   : > { %4287 = vmatpush1.bf16.msra.mxu1 %v5958_v50  ;;  %4247 = vmatprep.subr.bf16.mxu0 %v5963_v51  ;;  %v6029_v50 = vld [vmem:[%s8615_s1 + $0xd24] ss:$16 sps:$4 sm:$0xff]  }
  0xd7   : > { %4288 = vmatprep.subr.bf16.mxu1 %v5966_v52  ;;  %v6032_v51 = vld [vmem:[%s8615_s1 + $0xf24] ss:$16 sps:$4 sm:$0xff]   ;;  %v6519_v52 = vld.sshfl [vmem:[%s6715_s21 + $0x8] sm:$0x33 pattern:$0x75316420] }
  0xd9   : > { %4248 = vmatpush1.bf16.msra.mxu0 %v5961_v53  ;;  %v5061_v53 = vcombine.high %v6519_v52, %v7240_v6  ;;  %v6038_v6 = vld [vmem:[%s8615_s1 + $0xf04] ss:$16 sps:$4 sm:$0xff]   ;;  %v6075_v52 = vld [vmem:[%s8615_s1 + $0x1020] ss:$16 sps:$4 sm:$0xff]  }
  0xda   : > { %4289 = vmatpush1.bf16.msra.mxu1 %v5964_v56  ;;  %4249 = vmatprep.subr.bf16.mxu0 %v5969_v57  ;;  %v6027_v56 = vld [vmem:[%s8615_s1 + $0xd20] ss:$16 sps:$4 sm:$0xff]  }
  0xdb   : > { %4290 = vmatprep.subr.bf16.mxu1 %v5972_v58  ;;  %v6030_v57 = vld [vmem:[%s8615_s1 + $0xf20] ss:$16 sps:$4 sm:$0xff]   ;;  %v6035_v58 = vld [vmem:[%s8615_s1 + $0xd04] ss:$16 sps:$4 sm:$0xff]  }
  0xdd   : > { %4250 = vmatpush1.bf16.msra.mxu0 %v5967_v59  ;;  %v7497_v59 = vrot.slane %v5061_v53, %v6731_v55  ;;  %v6078_v53 = vld [vmem:[%s8615_s1 + $0x28] ss:$16 sps:$4 sm:$0xff]  }
  0xde   : > { %4291 = vmatpush1.bf16.msra.mxu1 %v5970_v60  ;;  %4251 = vmatprep.subr.bf16.mxu0 %v5975_v61  ;;  %v6033_v60 = vld [vmem:[%s8615_s1 + $0xd00] ss:$16 sps:$4 sm:$0xff]  }
  0xdf   : > { %4292 = vmatprep.subr.bf16.mxu1 %v5978_v62  ;;  %v6036_v61 = vld [vmem:[%s8615_s1 + $0xf00] ss:$16 sps:$4 sm:$0xff]   ;;  %v6041_v62 = vld [vmem:[%s8615_s1 + $0x10e4] ss:$16 sps:$4 sm:$0xff]  }
  0xe1   : > { %4252 = vmatpush1.bf16.msra.mxu0 %v5973_v1  ;;  %v6044_v1 = vld [vmem:[%s8615_s1 + $0xec] ss:$16 sps:$4 sm:$0xff]  }
  0xe2   : > { %4293 = vmatpush1.bf16.msra.mxu1 %v5976_v2  ;;  %4253 = vmatprep.subr.bf16.mxu0 %v5981_v26  ;;  %v522_v2 = vcombine.high %v7497_v59, %v7497_v59  ;;  %v7515_v26 = vrot.slane %v7275_v10, %v6731_v55  ;;  %v6050_v10 = vld [vmem:[%s8615_s1 + $0xcc] ss:$16 sps:$4 sm:$0xff]  }
  0xe3   : > { %4294 = vmatprep.subr.bf16.mxu1 %v5984_v27  ;;  %v7519_v27 = vrot.slane %v7278_v44, %v6731_v55 }
  0xe4   : > { %v7534_v44 = vrot.slane %v522_v2, %v6731_v55  ;;  %v6095_v2 = vld [vmem:[%s8615_s1 + $0x11c4] ss:$16 sps:$4 sm:$0xff]  }
  0xe5   : > { %4254 = vmatpush1.bf16.msra.mxu0 %v5979_v5  ;;  %v6039_v5 = vld [vmem:[%s8615_s1 + $0x10e0] ss:$16 sps:$4 sm:$0xff]  }
  0xe6   : > { %4295 = vmatpush1.bf16.msra.mxu1 %v5982_v8  ;;  %4255 = vmatprep.subr.bf16.mxu0 %v5987_v12  ;;  %v6042_v8 = vld [vmem:[%s8615_s1 + $0xe8] ss:$16 sps:$4 sm:$0xff]   ;;  %v6047_v12 = vld [vmem:[%s8615_s1 + $0x10c4] ss:$16 sps:$4 sm:$0xff]  }
  0xe7   : > { %4296 = vmatprep.subr.bf16.mxu1 %v5990_v13 }
  0xe9   : > { %4256 = vmatpush1.bf16.msra.mxu0 %v5985_v14 }
  0xea   : > { %4297 = vmatpush1.bf16.msra.mxu1 %v5988_v15  ;;  %4257 = vmatprep.subr.bf16.mxu0 %v5993_v16  ;;  %v6045_v15 = vld [vmem:[%s8615_s1 + $0x10c0] ss:$16 sps:$4 sm:$0xff]  }
  0xeb   : > { %4298 = vmatprep.subr.bf16.mxu1 %v5996_v17  ;;  %v6048_v17 = vld [vmem:[%s8615_s1 + $0xc8] ss:$16 sps:$4 sm:$0xff]  }
  0xed   : > { %4258 = vmatpush2.bf16.msra.mxu0 %v5991_v18  ;;  %v6053_v18 = vld [vmem:[%s8615_s1 + $0x10a4] ss:$16 sps:$4 sm:$0xff]  }
  0xee   : > { %4299 = vmatpush2.bf16.msra.mxu1 %v5994_v19  ;;  %4259 = vmatprep.subr.bf16.mxu0 %v5999_v20 }
  0xef   : > { %4300 = vmatprep.subr.bf16.mxu1 %v6002_v21  ;;  %v6056_v21 = vld [vmem:[%s8615_s1 + $0xac] ss:$16 sps:$4 sm:$0xff]  }
  0xf1   : > { %4260 = vmatpush2.bf16.msra.mxu0 %v5997_v22 }
  0xf2   : > { %4301 = vmatpush2.bf16.msra.mxu1 %v6000_v23  ;;  %4261 = vmatprep.subr.bf16.mxu0 %v6005_v7 }
  0xf3   : > { %4302 = vmatprep.subr.bf16.mxu1 %v6008_v24  ;;  %v6051_v24 = vld [vmem:[%s8615_s1 + $0x10a0] ss:$16 sps:$4 sm:$0xff]  }
  0xf5   : > { %4262 = vmatpush2.bf16.msra.mxu0 %v6003_v28  ;;  %v6054_v28 = vld [vmem:[%s8615_s1 + $0xa8] ss:$16 sps:$4 sm:$0xff]  }
  0xf6   : > { %4303 = vmatpush2.bf16.msra.mxu1 %v6006_v29  ;;  %4263 = vmatprep.subr.bf16.mxu0 %v6011_v30  ;;  %v6059_v29 = vld [vmem:[%s8615_s1 + $0x1084] ss:$16 sps:$4 sm:$0xff]  }
  0xf7   : > { %4304 = vmatprep.subr.bf16.mxu1 %v6014_v31 }
  0xf9   : > { %4264 = vmatpush2.bf16.msra.mxu0 %v6009_v32  ;;  %v6057_v32 = vld [vmem:[%s8615_s1 + $0x1080] ss:$16 sps:$4 sm:$0xff]  }
  0xfa   : > { %4305 = vmatpush2.bf16.msra.mxu1 %v6012_v37  ;;  %4265 = vmatprep.subr.bf16.mxu0 %v6017_v38  ;;  %v6060_v37 = vld [vmem:[%s8615_s1 + $0x88] ss:$16 sps:$4 sm:$0xff]   ;;  %v6065_v38 = vld [vmem:[%s8615_s1 + $0x1064] ss:$16 sps:$4 sm:$0xff]  }
  0xfb   : > { %4306 = vmatprep.subr.bf16.mxu1 %v6020_v39  ;;  %v6068_v39 = vld [vmem:[%s8615_s1 + $0x6c] ss:$16 sps:$4 sm:$0xff]  }
  0xfd   : > { %4266 = vmatpush2.bf16.msra.mxu0 %v6015_v9  ;;  %v6063_v9 = vld [vmem:[%s8615_s1 + $0x1060] ss:$16 sps:$4 sm:$0xff]  }
  0xfe   : > { %4307 = vmatpush2.bf16.msra.mxu1 %v6018_v45  ;;  %4267 = vmatprep.subr.bf16.mxu0 %v6023_v46  ;;  %v6066_v45 = vld [vmem:[%s8615_s1 + $0x68] ss:$16 sps:$4 sm:$0xff]   ;;  %v6071_v46 = vld [vmem:[%s8615_s1 + $0x1044] ss:$16 sps:$4 sm:$0xff]  }
  0xff   : > { %4308 = vmatprep.subr.bf16.mxu1 %v6026_v47  ;;  %v6074_v47 = vld [vmem:[%s8615_s1 + $0x4c] ss:$16 sps:$4 sm:$0xff]  }
 0x101   : > { %4268 = vmatpush2.bf16.msra.mxu0 %v6021_v48  ;;  %v6069_v48 = vld [vmem:[%s8615_s1 + $0x1040] ss:$16 sps:$4 sm:$0xff]  }
 0x102   : > { %4309 = vmatpush2.bf16.msra.mxu1 %v6024_v49  ;;  %4269 = vmatprep.subr.bf16.mxu0 %v6029_v50  ;;  %v6072_v49 = vld [vmem:[%s8615_s1 + $0x48] ss:$16 sps:$4 sm:$0xff]   ;;  %v6077_v50 = vld [vmem:[%s8615_s1 + $0x1024] ss:$16 sps:$4 sm:$0xff]  }
 0x103   : > { %4310 = vmatprep.subr.bf16.mxu1 %v6032_v51  ;;  %v6080_v51 = vld [vmem:[%s8615_s1 + $0x2c] ss:$16 sps:$4 sm:$0xff]  }
 0x105   : > { %4270 = vmatpush2.bf16.msra.mxu0 %v6027_v56  ;;  %v6083_v56 = vld [vmem:[%s8615_s1 + $0x1004] ss:$16 sps:$4 sm:$0xff]  }
 0x106   : > { %4311 = vmatpush2.bf16.msra.mxu1 %v6030_v57  ;;  %4271 = vmatprep.subr.bf16.mxu0 %v6035_v58  ;;  %v6086_v57 = vld [vmem:[%s8615_s1 + $0xc] ss:$16 sps:$4 sm:$0xff]   ;;  %v6081_v58 = vld [vmem:[%s8615_s1 + $0x1000] ss:$16 sps:$4 sm:$0xff]  }
 0x107   : > { %4312 = vmatprep.subr.bf16.mxu1 %v6038_v6  ;;  %v6084_v6 = vld [vmem:[%s8615_s1 + $0x8] ss:$16 sps:$4 sm:$0xff]  }
 0x109   : > { %4272 = vmatpush2.bf16.msra.mxu0 %v6033_v60  ;;  %v6089_v60 = vld [vmem:[%s8615_s1 + $0x11e4] ss:$16 sps:$4 sm:$0xff]  }
 0x10a   : > { %4313 = vmatpush2.bf16.msra.mxu1 %v6036_v61  ;;  %4323 = vmatprep.subr.bf16.mxu0 %v6041_v62  ;;  %v6092_v61 = vld [vmem:[%s8615_s1 + $0x1ec] ss:$16 sps:$4 sm:$0xff]   ;;  %v6087_v62 = vld [vmem:[%s8615_s1 + $0x11e0] ss:$16 sps:$4 sm:$0xff]  }
 0x10b   : > { %4364 = vmatprep.subr.bf16.mxu1 %v6044_v1  ;;  %v6090_v1 = vld [vmem:[%s8615_s1 + $0x1e8] ss:$16 sps:$4 sm:$0xff]  }
 0x10c   : > { %v4029_v13 = vpop.f32.mrf.mxu0  ;;  %4274 = vmatmul.mubr.bf16.vlgmr.msra.gmra.mxu0 %v7515_v26 }
 0x10d   : > { %v4070_v14 = vpop.f32.mrf.mxu1  ;;  %4315 = vmatmul.mubr.bf16.vlgmr.msra.gmra.mxu1 %v7519_v27  ;;  %4324 = vmatpush1.bf16.msra.mxu0 %v6039_v5  ;;  %v6098_v5 = vld [vmem:[%s8615_s1 + $0x1cc] ss:$16 sps:$4 sm:$0xff]  }
 0x10e   : > { %v7541_v16 = vadd.f32 %v4070_v14, %v4029_v13  ;;  %4365 = vmatpush1.bf16.msra.mxu1 %v6042_v8  ;;  %v4031_v19 = vpop.f32.mrf.mxu0  ;;  %4325 = vmatprep.subr.bf16.mxu0 %v6047_v12  ;;  %v6093_v8 = vld [vmem:[%s8615_s1 + $0x11c0] ss:$16 sps:$4 sm:$0xff]   ;;  %v6096_v12 = vld [vmem:[%s8615_s1 + $0x1c8] ss:$16 sps:$4 sm:$0xff]   ;;  %v6104_v13 = vld [vmem:[%s8615_s1 + $0x1ac] ss:$16 sps:$4 sm:$0xff]  }
 0x10f   : > { %v4072_v20 = vpop.f32.mrf.mxu1  ;;  %4366 = vmatprep.subr.bf16.mxu1 %v6050_v10  ;;  %4355 = vmatprep.mubr.bf16.mxu0 %v7534_v44  ;;  %v6101_v10 = vld [vmem:[%s8615_s1 + $0x11a4] ss:$16 sps:$4 sm:$0xff]   ;;  %v6099_v14 = vld [vmem:[%s8615_s1 + $0x11a0] ss:$16 sps:$4 sm:$0xff]  }
 0x110   : > { %v7552_v22 = vadd.f32 %v4072_v20, %v4031_v19  ;;  %4396 = vmatprep.mubr.bf16.mxu1 %v6778_v11  ;;  %v4033_v23 = vpop.f32.mrf.mxu0  ;;  %v6062_v11 = vld [vmem:[%s8615_s1 + $0x8c] ss:$16 sps:$4 sm:$0xff]   ;;  %v6105_v19 = vld [vmem:[%s8615_s1 + $0x1180] ss:$16 sps:$4 sm:$0xff]   ;;  %v6108_v20 = vld [vmem:[%s8615_s1 + $0x188] ss:$16 sps:$4 sm:$0xff]  }
 0x111   : > { %v4074_v7 = vpop.f32.mrf.mxu1  ;;  %4326 = vmatpush1.bf16.msra.mxu0 %v6045_v15  ;;  %v6102_v15 = vld [vmem:[%s8615_s1 + $0x1a8] ss:$16 sps:$4 sm:$0xff]   ;;  %v6116_v23 = vld [vmem:[%s8615_s1 + $0x16c] ss:$16 sps:$4 sm:$0xff]  }
 0x112   : > { %4367 = vmatpush1.bf16.msra.mxu1 %v6048_v17  ;;  %v4034_v30 = vpop.f32.mrf.mxu0  ;;  %4327 = vmatprep.subr.bf16.mxu0 %v6053_v18  ;;  %v6107_v17 = vld [vmem:[%s8615_s1 + $0x1184] ss:$16 sps:$4 sm:$0xff]   ;;  %v6110_v18 = vld [vmem:[%s8615_s1 + $0x18c] ss:$16 sps:$4 sm:$0xff]   ;;  %v6111_v7 = vld [vmem:[%s8615_s1 + $0x1160] ss:$16 sps:$4 sm:$0xff]  }
 0x113   : > { %v4075_v31 = vpop.f32.mrf.mxu1  ;;  %4368 = vmatprep.subr.bf16.mxu1 %v6056_v21  ;;  %v6113_v21 = vld [vmem:[%s8615_s1 + $0x1164] ss:$16 sps:$4 sm:$0xff]   ;;  %v6117_v30 = vld [vmem:[%s8615_s1 + $0x1140] ss:$16 sps:$4 sm:$0xff]  }
 0x114   : > { %v6120_v31 = vld [vmem:[%s8615_s1 + $0x148] ss:$16 sps:$4 sm:$0xff]  }
 0x115   : > { %4328 = vmatpush1.bf16.msra.mxu0 %v6051_v24  ;;  %v6114_v24 = vld [vmem:[%s8615_s1 + $0x168] ss:$16 sps:$4 sm:$0xff]  }
 0x116   : > { %4369 = vmatpush1.bf16.msra.mxu1 %v6054_v28  ;;  %4329 = vmatprep.subr.bf16.mxu0 %v6059_v29  ;;  %v6119_v28 = vld [vmem:[%s8615_s1 + $0x1144] ss:$16 sps:$4 sm:$0xff]   ;;  %v6122_v29 = vld [vmem:[%s8615_s1 + $0x14c] ss:$16 sps:$4 sm:$0xff]  }
 0x117   : > { %4370 = vmatprep.subr.bf16.mxu1 %v6062_v11  ;;  %v6125_v11 = vld [vmem:[%s8615_s1 + $0x1124] ss:$16 sps:$4 sm:$0xff]  }
 0x119   : > { %4330 = vmatpush1.bf16.msra.mxu0 %v6057_v32  ;;  %v6128_v32 = vld [vmem:[%s8615_s1 + $0x12c] ss:$16 sps:$4 sm:$0xff]  }
 0x11a   : > { %4371 = vmatpush1.bf16.msra.mxu1 %v6060_v37  ;;  %4331 = vmatprep.subr.bf16.mxu0 %v6065_v38  ;;  %v6123_v37 = vld [vmem:[%s8615_s1 + $0x1120] ss:$16 sps:$4 sm:$0xff]   ;;  %v6126_v38 = vld [vmem:[%s8615_s1 + $0x128] ss:$16 sps:$4 sm:$0xff]  }
 0x11b   : > { %4372 = vmatprep.subr.bf16.mxu1 %v6068_v39  ;;  %v6131_v39 = vld [vmem:[%s8615_s1 + $0x1104] ss:$16 sps:$4 sm:$0xff]  }
 0x11d   : > { %4332 = vmatpush1.bf16.msra.mxu0 %v6063_v9  ;;  %v6134_v9 = vld [vmem:[%s8615_s1 + $0x10c] ss:$16 sps:$4 sm:$0xff]  }
 0x11e   : > { %4373 = vmatpush1.bf16.msra.mxu1 %v6066_v45  ;;  %4333 = vmatprep.subr.bf16.mxu0 %v6071_v46  ;;  %v6129_v45 = vld [vmem:[%s8615_s1 + $0x1100] ss:$16 sps:$4 sm:$0xff]   ;;  %v6132_v46 = vld [vmem:[%s8615_s1 + $0x108] ss:$16 sps:$4 sm:$0xff]  }
 0x11f   : > { %4374 = vmatprep.subr.bf16.mxu1 %v6074_v47  ;;  %v6137_v47 = vld [vmem:[%s8615_s1 + $0x2ec] ss:$16 sps:$4 sm:$0xff]  }
 0x121   : > { %4334 = vmatpush1.bf16.msra.mxu0 %v6069_v48  ;;  %v6140_v48 = vld [vmem:[%s8615_s1 + $0x4ec] ss:$16 sps:$4 sm:$0xff]  }
 0x122   : > { %4375 = vmatpush1.bf16.msra.mxu1 %v6072_v49  ;;  %4335 = vmatprep.subr.bf16.mxu0 %v6077_v50  ;;  %v6135_v49 = vld [vmem:[%s8615_s1 + $0x2e8] ss:$16 sps:$4 sm:$0xff]  }
 0x123   : > { %4376 = vmatprep.subr.bf16.mxu1 %v6080_v51  ;;  %v6138_v50 = vld [vmem:[%s8615_s1 + $0x4e8] ss:$16 sps:$4 sm:$0xff]   ;;  %v7732_v51 = vrot.slane %v7497_v59, %v6731_v55 }
 0x124   : > { %v6144_v59 = vld [vmem:[%s8615_s1 + $0x4c8] ss:$16 sps:$4 sm:$0xff]  }
 0x125   : > { %4336 = vmatpush1.bf16.msra.mxu0 %v6075_v52  ;;  %v6143_v52 = vld [vmem:[%s8615_s1 + $0x2cc] ss:$16 sps:$4 sm:$0xff]  }
 0x126   : > { %4377 = vmatpush1.bf16.msra.mxu1 %v6078_v53  ;;  %4337 = vmatprep.subr.bf16.mxu0 %v6083_v56  ;;  %v6146_v53 = vld [vmem:[%s8615_s1 + $0x4cc] ss:$16 sps:$4 sm:$0xff]   ;;  %v6141_v56 = vld [vmem:[%s8615_s1 + $0x2c8] ss:$16 sps:$4 sm:$0xff]  }
 0x127   : > { %4378 = vmatprep.subr.bf16.mxu1 %v6086_v57 }
 0x129   : > { %4338 = vmatpush1.bf16.msra.mxu0 %v6081_v58 }
 0x12a   : > { %4379 = vmatpush1.bf16.msra.mxu1 %v6084_v6  ;;  %4339 = vmatprep.subr.bf16.mxu0 %v6089_v60 }
 0x12b   : > { %4380 = vmatprep.subr.bf16.mxu1 %v6092_v61 }
 0x12d   : > { %4340 = vmatpush2.bf16.msra.mxu0 %v6087_v62  ;;  %v6149_v62 = vld [vmem:[%s8615_s1 + $0x2ac] ss:$16 sps:$4 sm:$0xff]  }
 0x12e   : > { %4381 = vmatpush2.bf16.msra.mxu1 %v6090_v1  ;;  %4341 = vmatprep.subr.bf16.mxu0 %v6095_v2  ;;  %v6152_v1 = vld [vmem:[%s8615_s1 + $0x4ac] ss:$16 sps:$4 sm:$0xff]  }
 0x12f   : > { %4382 = vmatprep.subr.bf16.mxu1 %v6098_v5  ;;  %v6150_v5 = vld [vmem:[%s8615_s1 + $0x4a8] ss:$16 sps:$4 sm:$0xff]  }
 0x131   : > { %4342 = vmatpush2.bf16.msra.mxu0 %v6093_v8 }
 0x132   : > { %4383 = vmatpush2.bf16.msra.mxu1 %v6096_v12  ;;  %4343 = vmatprep.subr.bf16.mxu0 %v6101_v10 }
 0x133   : > { %4384 = vmatprep.subr.bf16.mxu1 %v6104_v13 }
 0x135   : > { %4344 = vmatpush2.bf16.msra.mxu0 %v6099_v14  ;;  %v6155_v14 = vld [vmem:[%s8615_s1 + $0x28c] ss:$16 sps:$4 sm:$0xff]  }
 0x136   : > { %4385 = vmatpush2.bf16.msra.mxu1 %v6102_v15  ;;  %4345 = vmatprep.subr.bf16.mxu0 %v6107_v17  ;;  %v6156_v15 = vld [vmem:[%s8615_s1 + $0x488] ss:$16 sps:$4 sm:$0xff]   ;;  %v6161_v17 = vld [vmem:[%s8615_s1 + $0x26c] ss:$16 sps:$4 sm:$0xff]  }
 0x137   : > { %4386 = vmatprep.subr.bf16.mxu1 %v6110_v18  ;;  %v6164_v18 = vld [vmem:[%s8615_s1 + $0x46c] ss:$16 sps:$4 sm:$0xff]  }
 0x139   : > { %4346 = vmatpush2.bf16.msra.mxu0 %v6105_v19  ;;  %v6159_v19 = vld [vmem:[%s8615_s1 + $0x268] ss:$16 sps:$4 sm:$0xff]  }
 0x13a   : > { %4387 = vmatpush2.bf16.msra.mxu1 %v6108_v20  ;;  %4347 = vmatprep.subr.bf16.mxu0 %v6113_v21  ;;  %v6162_v20 = vld [vmem:[%s8615_s1 + $0x468] ss:$16 sps:$4 sm:$0xff]   ;;  %v6167_v21 = vld [vmem:[%s8615_s1 + $0x24c] ss:$16 sps:$4 sm:$0xff]  }
 0x13b   : > { %4388 = vmatprep.subr.bf16.mxu1 %v6116_v23  ;;  %v6170_v23 = vld [vmem:[%s8615_s1 + $0x44c] ss:$16 sps:$4 sm:$0xff]  }
 0x13d   : > { %4348 = vmatpush2.bf16.msra.mxu0 %v6111_v7  ;;  %v6165_v7 = vld [vmem:[%s8615_s1 + $0x248] ss:$16 sps:$4 sm:$0xff]  }
 0x13e   : > { %4389 = vmatpush2.bf16.msra.mxu1 %v6114_v24  ;;  %4349 = vmatprep.subr.bf16.mxu0 %v6119_v28  ;;  %v6168_v24 = vld [vmem:[%s8615_s1 + $0x448] ss:$16 sps:$4 sm:$0xff]   ;;  %v6173_v28 = vld [vmem:[%s8615_s1 + $0x22c] ss:$16 sps:$4 sm:$0xff]  }
 0x13f   : > { %4390 = vmatprep.subr.bf16.mxu1 %v6122_v29  ;;  %v6176_v29 = vld [vmem:[%s8615_s1 + $0x42c] ss:$16 sps:$4 sm:$0xff]  }
 0x141   : > { %4350 = vmatpush2.bf16.msra.mxu0 %v6117_v30  ;;  %v6171_v30 = vld [vmem:[%s8615_s1 + $0x228] ss:$16 sps:$4 sm:$0xff]  }
 0x142   : > { %4391 = vmatpush2.bf16.msra.mxu1 %v6120_v31  ;;  %4351 = vmatprep.subr.bf16.mxu0 %v6125_v11  ;;  %v6174_v31 = vld [vmem:[%s8615_s1 + $0x428] ss:$16 sps:$4 sm:$0xff]   ;;  %v6179_v11 = vld [vmem:[%s8615_s1 + $0x20c] ss:$16 sps:$4 sm:$0xff]  }
 0x143   : > { %4392 = vmatprep.subr.bf16.mxu1 %v6128_v32  ;;  %v6182_v32 = vld [vmem:[%s8615_s1 + $0x40c] ss:$16 sps:$4 sm:$0xff]  }
 0x145   : > { %4352 = vmatpush2.bf16.msra.mxu0 %v6123_v37  ;;  %v6177_v37 = vld [vmem:[%s8615_s1 + $0x208] ss:$16 sps:$4 sm:$0xff]  }
 0x146   : > { %4393 = vmatpush2.bf16.msra.mxu1 %v6126_v38  ;;  %4353 = vmatprep.subr.bf16.mxu0 %v6131_v39  ;;  %v6180_v38 = vld [vmem:[%s8615_s1 + $0x408] ss:$16 sps:$4 sm:$0xff]   ;;  %v6185_v39 = vld [vmem:[%s8615_s1 + $0x3ec] ss:$16 sps:$4 sm:$0xff]  }
 0x147   : > { %4394 = vmatprep.subr.bf16.mxu1 %v6134_v9  ;;  %v6188_v9 = vld [vmem:[%s8615_s1 + $0x5ec] ss:$16 sps:$4 sm:$0xff]  }
 0x149   : > { %4354 = vmatpush2.bf16.msra.mxu0 %v6129_v45  ;;  %v6183_v45 = vld [vmem:[%s8615_s1 + $0x3e8] ss:$16 sps:$4 sm:$0xff]  }
 0x14a   : > { %4395 = vmatpush2.bf16.msra.mxu1 %v6132_v46  ;;  %4405 = vmatprep.subr.bf16.mxu0 %v6137_v47  ;;  %v6186_v46 = vld [vmem:[%s8615_s1 + $0x5e8] ss:$16 sps:$4 sm:$0xff]   ;;  %v6191_v47 = vld [vmem:[%s8615_s1 + $0x3cc] ss:$16 sps:$4 sm:$0xff]  }
 0x14b   : > { %4446 = vmatprep.subr.bf16.mxu1 %v6140_v48  ;;  %v6194_v48 = vld [vmem:[%s8615_s1 + $0x5cc] ss:$16 sps:$4 sm:$0xff]  }
 0x14c   : > { %v4111_v57 = vpop.f32.mrf.mxu0  ;;  %4356 = vmatmul.mubr.bf16.vlgmr.msra.gmra.mxu0 %v7732_v51 }
 0x14d   : > { %v4152_v58 = vpop.f32.mrf.mxu1  ;;  %4397 = vmatmul.mubr.bf16.vlgmr.msra.gmra.mxu1 %v6837_v34  ;;  %v4112_v6 = vadd.f32 %v4111_v57, %v7541_v16  ;;  %4406 = vmatpush1.bf16.msra.mxu0 %v6135_v49  ;;  %v6147_v16 = vld [vmem:[%s8615_s1 + $0x2a8] ss:$16 sps:$4 sm:$0xff]   ;;  %v6203_v57 = vld [vmem:[%s8615_s1 + $0x38c] ss:$16 sps:$4 sm:$0xff]  }
 0x14e   : > { %4447 = vmatpush1.bf16.msra.mxu1 %v6138_v50  ;;  %v4113_v60 = vpop.f32.mrf.mxu0  ;;  %4407 = vmatprep.subr.bf16.mxu0 %v6143_v52  ;;  %v6189_v49 = vld [vmem:[%s8615_s1 + $0x3c8] ss:$16 sps:$4 sm:$0xff]   ;;  %v6197_v52 = vld [vmem:[%s8615_s1 + $0x3ac] ss:$16 sps:$4 sm:$0xff]  }
 0x14f   : > { %v4154_v61 = vpop.f32.mrf.mxu1  ;;  %4448 = vmatprep.subr.bf16.mxu1 %v6146_v53  ;;  %v7755_v2 = vadd.f32 %v4152_v58, %v4112_v6  ;;  %v4114_v34 = vadd.f32 %v4113_v60, %v7552_v22  ;;  %4437 = vmatprep.mubr.bf16.mxu0 %v6811_v25  ;;  %v6158_v25 = vld [vmem:[%s8615_s1 + $0x48c] ss:$16 sps:$4 sm:$0xff]   ;;  %v6192_v50 = vld [vmem:[%s8615_s1 + $0x5c8] ss:$16 sps:$4 sm:$0xff]  }
 0x150   : > { %4478 = vmatprep.mubr.bf16.mxu1 %v6855_v40  ;;  %v4115_v8 = vpop.f32.mrf.mxu0  ;;  %v6153_v40 = vld [vmem:[%s8615_s1 + $0x288] ss:$16 sps:$4 sm:$0xff]   ;;  %v6200_v53 = vld [vmem:[%s8615_s1 + $0x5ac] ss:$16 sps:$4 sm:$0xff]  }
 0x151   : > { %v4156_v12 = vpop.f32.mrf.mxu1  ;;  %v7766_v10 = vadd.f32 %v4154_v61, %v4114_v34  ;;  %4408 = vmatpush1.bf16.msra.mxu0 %v6141_v56  ;;  %v6195_v56 = vld [vmem:[%s8615_s1 + $0x3a8] ss:$16 sps:$4 sm:$0xff]   ;;  %v6206_v58 = vld [vmem:[%s8615_s1 + $0x58c] ss:$16 sps:$4 sm:$0xff]  }
 0x152   : > { %4449 = vmatpush1.bf16.msra.mxu1 %v6144_v59  ;;  %v4116_v13 = vpop.f32.mrf.mxu0  ;;  %4409 = vmatprep.subr.bf16.mxu0 %v6149_v62  ;;  %v6198_v59 = vld [vmem:[%s8615_s1 + $0x5a8] ss:$16 sps:$4 sm:$0xff]   ;;  %v6209_v61 = vld [vmem:[%s8615_s1 + $0x36c] ss:$16 sps:$4 sm:$0xff]  }
 0x153   : > { %v4157_v22 = vpop.f32.mrf.mxu1  ;;  %4450 = vmatprep.subr.bf16.mxu1 %v6152_v1  ;;  %v6201_v6 = vld [vmem:[%s8615_s1 + $0x388] ss:$16 sps:$4 sm:$0xff]   ;;  %v6212_v62 = vld [vmem:[%s8615_s1 + $0x56c] ss:$16 sps:$4 sm:$0xff]  }
 0x154   : > { %v6204_v60 = vld [vmem:[%s8615_s1 + $0x588] ss:$16 sps:$4 sm:$0xff]   ;;  %v6221_v13 = vld [vmem:[%s8615_s1 + $0x32c] ss:$16 sps:$4 sm:$0xff]  }
 0x155   : > { %4410 = vmatpush1.bf16.msra.mxu0 %v6147_v16  ;;  %v6207_v1 = vld [vmem:[%s8615_s1 + $0x368] ss:$16 sps:$4 sm:$0xff]   ;;  %v6215_v16 = vld [vmem:[%s8615_s1 + $0x34c] ss:$16 sps:$4 sm:$0xff]  }
 0x156   : > { %4451 = vmatpush1.bf16.msra.mxu1 %v6150_v5  ;;  %4411 = vmatprep.subr.bf16.mxu0 %v6155_v14  ;;  %v6210_v34 = vld [vmem:[%s8615_s1 + $0x568] ss:$16 sps:$4 sm:$0xff]   ;;  %v6218_v5 = vld [vmem:[%s8615_s1 + $0x54c] ss:$16 sps:$4 sm:$0xff]  }
 0x157   : > { %4452 = vmatprep.subr.bf16.mxu1 %v6158_v25  ;;  %v6213_v8 = vld [vmem:[%s8615_s1 + $0x348] ss:$16 sps:$4 sm:$0xff]   ;;  %v6224_v22 = vld [vmem:[%s8615_s1 + $0x52c] ss:$16 sps:$4 sm:$0xff]  }
 0x158   : > { %v6216_v12 = vld [vmem:[%s8615_s1 + $0x548] ss:$16 sps:$4 sm:$0xff]  }
 0x159   : > { %4412 = vmatpush1.bf16.msra.mxu0 %v6153_v40  ;;  %v6219_v14 = vld [vmem:[%s8615_s1 + $0x328] ss:$16 sps:$4 sm:$0xff]   ;;  %v6227_v40 = vld [vmem:[%s8615_s1 + $0x30c] ss:$16 sps:$4 sm:$0xff]  }
 0x15a   : > { %4453 = vmatpush1.bf16.msra.mxu1 %v6156_v15  ;;  %4413 = vmatprep.subr.bf16.mxu0 %v6161_v17  ;;  %v6222_v25 = vld [vmem:[%s8615_s1 + $0x528] ss:$16 sps:$4 sm:$0xff]   ;;  %v6230_v15 = vld [vmem:[%s8615_s1 + $0x50c] ss:$16 sps:$4 sm:$0xff]  }
 0x15b   : > { %4454 = vmatprep.subr.bf16.mxu1 %v6164_v18  ;;  %v6225_v17 = vld [vmem:[%s8615_s1 + $0x308] ss:$16 sps:$4 sm:$0xff]  }
 0x15c   : > { %v6228_v18 = vld [vmem:[%s8615_s1 + $0x508] ss:$16 sps:$4 sm:$0xff]  }
 0x15d   : > { %4414 = vmatpush1.bf16.msra.mxu0 %v6159_v19  ;;  %v6233_v19 = vld [vmem:[%s8615_s1 + $0x6ec] ss:$16 sps:$4 sm:$0xff]  }
 0x15e   : > { %4455 = vmatpush1.bf16.msra.mxu1 %v6162_v20  ;;  %4415 = vmatprep.subr.bf16.mxu0 %v6167_v21  ;;  %v6236_v20 = vld [vmem:[%s8615_s1 + $0x8ec] ss:$16 sps:$4 sm:$0xff]   ;;  %v6231_v21 = vld [vmem:[%s8615_s1 + $0x6e8] ss:$16 sps:$4 sm:$0xff]  }
 0x15f   : > { %4456 = vmatprep.subr.bf16.mxu1 %v6170_v23  ;;  %v6234_v23 = vld [vmem:[%s8615_s1 + $0x8e8] ss:$16 sps:$4 sm:$0xff]  }
 0x161   : > { %4416 = vmatpush1.bf16.msra.mxu0 %v6165_v7  ;;  %v6239_v7 = vld [vmem:[%s8615_s1 + $0x6cc] ss:$16 sps:$4 sm:$0xff]  }
 0x162   : > { %4457 = vmatpush1.bf16.msra.mxu1 %v6168_v24  ;;  %4417 = vmatprep.subr.bf16.mxu0 %v6173_v28  ;;  %v6242_v24 = vld [vmem:[%s8615_s1 + $0x8cc] ss:$16 sps:$4 sm:$0xff]  }
 0x163   : > { %4458 = vmatprep.subr.bf16.mxu1 %v6176_v29 }
 0x165   : > { %4418 = vmatpush1.bf16.msra.mxu0 %v6171_v30 }
 0x166   : > { %4459 = vmatpush1.bf16.msra.mxu1 %v6174_v31  ;;  %4419 = vmatprep.subr.bf16.mxu0 %v6179_v11  ;;  %v6237_v31 = vld [vmem:[%s8615_s1 + $0x6c8] ss:$16 sps:$4 sm:$0xff]  }
 0x167   : > { %4460 = vmatprep.subr.bf16.mxu1 %v6182_v32  ;;  %v6240_v11 = vld [vmem:[%s8615_s1 + $0x8c8] ss:$16 sps:$4 sm:$0xff]  }
 0x169   : > { %4420 = vmatpush1.bf16.msra.mxu0 %v6177_v37 }
 0x16a   : > { %4461 = vmatpush1.bf16.msra.mxu1 %v6180_v38  ;;  %4421 = vmatprep.subr.bf16.mxu0 %v6185_v39 }
 0x16b   : > { %4462 = vmatprep.subr.bf16.mxu1 %v6188_v9 }
 0x16d   : > { %4422 = vmatpush2.bf16.msra.mxu0 %v6183_v45 }
 0x16e   : > { %4463 = vmatpush2.bf16.msra.mxu1 %v6186_v46  ;;  %4423 = vmatprep.subr.bf16.mxu0 %v6191_v47  ;;  %v6243_v46 = vld [vmem:[%s8615_s1 + $0x6a8] ss:$16 sps:$4 sm:$0xff]  }
 0x16f   : > { %4464 = vmatprep.subr.bf16.mxu1 %v6194_v48  ;;  %v6246_v47 = vld [vmem:[%s8615_s1 + $0x8a8] ss:$16 sps:$4 sm:$0xff]  }
 0x171   : > { %4424 = vmatpush2.bf16.msra.mxu0 %v6189_v49  ;;  %v6249_v49 = vld [vmem:[%s8615_s1 + $0x688] ss:$16 sps:$4 sm:$0xff]  }
 0x172   : > { %4465 = vmatpush2.bf16.msra.mxu1 %v6192_v50  ;;  %4425 = vmatprep.subr.bf16.mxu0 %v6197_v52  ;;  %v6252_v50 = vld [vmem:[%s8615_s1 + $0x888] ss:$16 sps:$4 sm:$0xff]   ;;  %v6257_v52 = vld [vmem:[%s8615_s1 + $0x66c] ss:$16 sps:$4 sm:$0xff]  }
 0x173   : > { %4466 = vmatprep.subr.bf16.mxu1 %v6200_v53  ;;  %v6260_v53 = vld [vmem:[%s8615_s1 + $0x86c] ss:$16 sps:$4 sm:$0xff]  }
 0x175   : > { %4426 = vmatpush2.bf16.msra.mxu0 %v6195_v56  ;;  %v6255_v56 = vld [vmem:[%s8615_s1 + $0x668] ss:$16 sps:$4 sm:$0xff]  }
 0x176   : > { %4467 = vmatpush2.bf16.msra.mxu1 %v6198_v59  ;;  %4427 = vmatprep.subr.bf16.mxu0 %v6203_v57  ;;  %v6258_v59 = vld [vmem:[%s8615_s1 + $0x868] ss:$16 sps:$4 sm:$0xff]   ;;  %v6263_v57 = vld [vmem:[%s8615_s1 + $0x64c] ss:$16 sps:$4 sm:$0xff]  }
 0x177   : > { %4468 = vmatprep.subr.bf16.mxu1 %v6206_v58  ;;  %v6266_v58 = vld [vmem:[%s8615_s1 + $0x84c] ss:$16 sps:$4 sm:$0xff]  }
 0x179   : > { %4428 = vmatpush2.bf16.msra.mxu0 %v6201_v6  ;;  %v6261_v6 = vld [vmem:[%s8615_s1 + $0x648] ss:$16 sps:$4 sm:$0xff]  }
 0x17a   : > { %4469 = vmatpush2.bf16.msra.mxu1 %v6204_v60  ;;  %4429 = vmatprep.subr.bf16.mxu0 %v6209_v61  ;;  %v6264_v60 = vld [vmem:[%s8615_s1 + $0x848] ss:$16 sps:$4 sm:$0xff]   ;;  %v6269_v61 = vld [vmem:[%s8615_s1 + $0x62c] ss:$16 sps:$4 sm:$0xff]  }
 0x17b   : > { %4470 = vmatprep.subr.bf16.mxu1 %v6212_v62  ;;  %v6272_v62 = vld [vmem:[%s8615_s1 + $0x82c] ss:$16 sps:$4 sm:$0xff]  }
 0x17d   : > { %4430 = vmatpush2.bf16.msra.mxu0 %v6207_v1  ;;  %v6267_v1 = vld [vmem:[%s8615_s1 + $0x628] ss:$16 sps:$4 sm:$0xff]  }
 0x17e   : > { %4471 = vmatpush2.bf16.msra.mxu1 %v6210_v34  ;;  %4431 = vmatprep.subr.bf16.mxu0 %v6215_v16  ;;  %v6270_v34 = vld [vmem:[%s8615_s1 + $0x828] ss:$16 sps:$4 sm:$0xff]   ;;  %v6275_v16 = vld [vmem:[%s8615_s1 + $0x60c] ss:$16 sps:$4 sm:$0xff]  }
 0x17f   : > { %4472 = vmatprep.subr.bf16.mxu1 %v6218_v5  ;;  %v6278_v5 = vld [vmem:[%s8615_s1 + $0x80c] ss:$16 sps:$4 sm:$0xff]  }
 0x181   : > { %4432 = vmatpush2.bf16.msra.mxu0 %v6213_v8  ;;  %v6273_v8 = vld [vmem:[%s8615_s1 + $0x608] ss:$16 sps:$4 sm:$0xff]  }
 0x182   : > { %4473 = vmatpush2.bf16.msra.mxu1 %v6216_v12  ;;  %4433 = vmatprep.subr.bf16.mxu0 %v6221_v13  ;;  %v6276_v12 = vld [vmem:[%s8615_s1 + $0x808] ss:$16 sps:$4 sm:$0xff]   ;;  %v6281_v13 = vld [vmem:[%s8615_s1 + $0x7ec] ss:$16 sps:$4 sm:$0xff]  }
 0x183   : > { %4474 = vmatprep.subr.bf16.mxu1 %v6224_v22  ;;  %v6284_v22 = vld [vmem:[%s8615_s1 + $0x9ec] ss:$16 sps:$4 sm:$0xff]  }
 0x185   : > { %4434 = vmatpush2.bf16.msra.mxu0 %v6219_v14  ;;  %v6279_v14 = vld [vmem:[%s8615_s1 + $0x7e8] ss:$16 sps:$4 sm:$0xff]  }
 0x186   : > { %4475 = vmatpush2.bf16.msra.mxu1 %v6222_v25  ;;  %4435 = vmatprep.subr.bf16.mxu0 %v6227_v40  ;;  %v6282_v25 = vld [vmem:[%s8615_s1 + $0x9e8] ss:$16 sps:$4 sm:$0xff]   ;;  %v6287_v40 = vld [vmem:[%s8615_s1 + $0x7cc] ss:$16 sps:$4 sm:$0xff]  }
 0x187   : > { %4476 = vmatprep.subr.bf16.mxu1 %v6230_v15  ;;  %v6290_v15 = vld [vmem:[%s8615_s1 + $0x9cc] ss:$16 sps:$4 sm:$0xff]  }
 0x189   : > { %4436 = vmatpush2.bf16.msra.mxu0 %v6225_v17  ;;  %v6285_v17 = vld [vmem:[%s8615_s1 + $0x7c8] ss:$16 sps:$4 sm:$0xff]  }
 0x18a   : > { %4477 = vmatpush2.bf16.msra.mxu1 %v6228_v18  ;;  %4487 = vmatprep.subr.bf16.mxu0 %v6233_v19  ;;  %v6288_v18 = vld [vmem:[%s8615_s1 + $0x9c8] ss:$16 sps:$4 sm:$0xff]   ;;  %v6293_v19 = vld [vmem:[%s8615_s1 + $0x7ac] ss:$16 sps:$4 sm:$0xff]  }
 0x18b   : > { %4528 = vmatprep.subr.bf16.mxu1 %v6236_v20  ;;  %v6296_v20 = vld [vmem:[%s8615_s1 + $0x9ac] ss:$16 sps:$4 sm:$0xff]  }
 0x18c   : > { %v4193_v28 = vpop.f32.mrf.mxu0  ;;  %4438 = vmatmul.mubr.bf16.vlgmr.msra.gmra.mxu0 %v6840_v35  ;;  %v6245_v35 = vld [vmem:[%s8615_s1 + $0x6ac] ss:$16 sps:$4 sm:$0xff]  }
 0x18d   : > { %v4234_v29 = vpop.f32.mrf.mxu1  ;;  %4479 = vmatmul.mubr.bf16.vlgmr.msra.gmra.mxu1 %v7067_v63  ;;  %v4194_v30 = vadd.f32 %v4193_v28, %v7755_v2  ;;  %4488 = vmatpush1.bf16.msra.mxu0 %v6231_v21  ;;  %v6248_v63 = vld [vmem:[%s8615_s1 + $0x8ac] ss:$16 sps:$4 sm:$0xff]   ;;  %v6291_v21 = vld [vmem:[%s8615_s1 + $0x7a8] ss:$16 sps:$4 sm:$0xff]  }
 0x18e   : > { %4529 = vmatpush1.bf16.msra.mxu1 %v6234_v23  ;;  %v4195_v32 = vpop.f32.mrf.mxu0  ;;  %4489 = vmatprep.subr.bf16.mxu0 %v6239_v7  ;;  %v6294_v23 = vld [vmem:[%s8615_s1 + $0x9a8] ss:$16 sps:$4 sm:$0xff]   ;;  %v6299_v7 = vld [vmem:[%s8615_s1 + $0x78c] ss:$16 sps:$4 sm:$0xff]  }
 0x18f   : > { %v4236_v37 = vpop.f32.mrf.mxu1  ;;  %4530 = vmatprep.subr.bf16.mxu1 %v6242_v24  ;;  %v7957_v2 = vadd.f32 %v4234_v29, %v4194_v30  ;;  %v4196_v38 = vadd.f32 %v4195_v32, %v7766_v10  ;;  %4519 = vmatprep.mubr.bf16.mxu0 %v6858_v41  ;;  %v6251_v41 = vld [vmem:[%s8615_s1 + $0x68c] ss:$16 sps:$4 sm:$0xff]   ;;  %v6297_v28 = vld [vmem:[%s8615_s1 + $0x788] ss:$16 sps:$4 sm:$0xff]  }
 0x190   : > { %4560 = vmatprep.mubr.bf16.mxu1 %v7086_v3  ;;  %v4197_v39 = vpop.f32.mrf.mxu0  ;;  %v6254_v3 = vld [vmem:[%s8615_s1 + $0x88c] ss:$16 sps:$4 sm:$0xff]   ;;  %v6300_v29 = vld [vmem:[%s8615_s1 + $0x988] ss:$16 sps:$4 sm:$0xff]  }
 0x191   : > { %v4238_v9 = vpop.f32.mrf.mxu1  ;;  %v7962_v45 = vadd.f32 %v4236_v37, %v4196_v38  ;;  %4490 = vmatpush1.bf16.msra.mxu0 %v6237_v31  ;;  %v6302_v24 = vld [vmem:[%s8615_s1 + $0x98c] ss:$16 sps:$4 sm:$0xff]   ;;  %v6306_v32 = vld [vmem:[%s8615_s1 + $0x968] ss:$16 sps:$4 sm:$0xff]  }
 0x192   : > { %4531 = vmatpush1.bf16.msra.mxu1 %v6240_v11  ;;  %v4198_v48 = vpop.f32.mrf.mxu0  ;;  %4491 = vmatprep.subr.bf16.mxu0 %v6245_v35  ;;  %v6305_v30 = vld [vmem:[%s8615_s1 + $0x76c] ss:$16 sps:$4 sm:$0xff]   ;;  %v6303_v11 = vld [vmem:[%s8615_s1 + $0x768] ss:$16 sps:$4 sm:$0xff]  }
 0x193   : > { %v4239_v10 = vpop.f32.mrf.mxu1  ;;  %4532 = vmatprep.subr.bf16.mxu1 %v6248_v63  ;;  %v6308_v31 = vld [vmem:[%s8615_s1 + $0x96c] ss:$16 sps:$4 sm:$0xff]   ;;  %v6309_v63 = vld [vmem:[%s8615_s1 + $0x748] ss:$16 sps:$4 sm:$0xff]  }
 0x194   : > { %v6311_v37 = vld [vmem:[%s8615_s1 + $0x74c] ss:$16 sps:$4 sm:$0xff]   ;;  %v6312_v38 = vld [vmem:[%s8615_s1 + $0x948] ss:$16 sps:$4 sm:$0xff]  }
 0x195   : > { %4492 = vmatpush1.bf16.msra.mxu0 %v6243_v46  ;;  %v6314_v35 = vld [vmem:[%s8615_s1 + $0x94c] ss:$16 sps:$4 sm:$0xff]   ;;  %v6315_v46 = vld [vmem:[%s8615_s1 + $0x728] ss:$16 sps:$4 sm:$0xff]  }
 0x196   : > { %4533 = vmatpush1.bf16.msra.mxu1 %v6246_v47  ;;  %4493 = vmatprep.subr.bf16.mxu0 %v6251_v41  ;;  %v6317_v39 = vld [vmem:[%s8615_s1 + $0x72c] ss:$16 sps:$4 sm:$0xff]   ;;  %v6318_v47 = vld [vmem:[%s8615_s1 + $0x928] ss:$16 sps:$4 sm:$0xff]  }
 0x197   : > { %4534 = vmatprep.subr.bf16.mxu1 %v6254_v3  ;;  %v6320_v9 = vld [vmem:[%s8615_s1 + $0x92c] ss:$16 sps:$4 sm:$0xff]   ;;  %v6321_v41 = vld [vmem:[%s8615_s1 + $0x708] ss:$16 sps:$4 sm:$0xff]  }
 0x198   : > { %v6323_v48 = vld [vmem:[%s8615_s1 + $0x70c] ss:$16 sps:$4 sm:$0xff]   ;;  %v6324_v3 = vld [vmem:[%s8615_s1 + $0x908] ss:$16 sps:$4 sm:$0xff]  }
 0x199   : > { %4494 = vmatpush1.bf16.msra.mxu0 %v6249_v49  ;;  %v6326_v10 = vld [vmem:[%s8615_s1 + $0x90c] ss:$16 sps:$4 sm:$0xff]  }
 0x19a   : > { %4535 = vmatpush1.bf16.msra.mxu1 %v6252_v50  ;;  %4495 = vmatprep.subr.bf16.mxu0 %v6257_v52  ;;  %v6329_v49 = vld [vmem:[%s8615_s1 + $0xaec] ss:$16 sps:$4 sm:$0xff]   ;;  %v6327_v52 = vld [vmem:[%s8615_s1 + $0xae8] ss:$16 sps:$4 sm:$0xff]  }
 0x19b   : > { %4536 = vmatprep.subr.bf16.mxu1 %v6260_v53  ;;  %v6332_v50 = vld [vmem:[%s8615_s1 + $0xcec] ss:$16 sps:$4 sm:$0xff]   ;;  %v6330_v53 = vld [vmem:[%s8615_s1 + $0xce8] ss:$16 sps:$4 sm:$0xff]  }
 0x19d   : > { %4496 = vmatpush1.bf16.msra.mxu0 %v6255_v56  ;;  %v6335_v56 = vld [vmem:[%s8615_s1 + $0xacc] ss:$16 sps:$4 sm:$0xff]  }
 0x19e   : > { %4537 = vmatpush1.bf16.msra.mxu1 %v6258_v59  ;;  %4497 = vmatprep.subr.bf16.mxu0 %v6263_v57  ;;  %v6338_v59 = vld [vmem:[%s8615_s1 + $0xccc] ss:$16 sps:$4 sm:$0xff]  }
 0x19f   : > { %4538 = vmatprep.subr.bf16.mxu1 %v6266_v58 }
 0x1a1   : > { %4498 = vmatpush1.bf16.msra.mxu0 %v6261_v6 }
 0x1a2   : > { %4539 = vmatpush1.bf16.msra.mxu1 %v6264_v60  ;;  %4499 = vmatprep.subr.bf16.mxu0 %v6269_v61  ;;  %v6333_v60 = vld [vmem:[%s8615_s1 + $0xac8] ss:$16 sps:$4 sm:$0xff]  }
 0x1a3   : > { %4540 = vmatprep.subr.bf16.mxu1 %v6272_v62  ;;  %v6336_v61 = vld [vmem:[%s8615_s1 + $0xcc8] ss:$16 sps:$4 sm:$0xff]  }
 0x1a5   : > { %4500 = vmatpush1.bf16.msra.mxu0 %v6267_v1 }
 0x1a6   : > { %4541 = vmatpush1.bf16.msra.mxu1 %v6270_v34  ;;  %4501 = vmatprep.subr.bf16.mxu0 %v6275_v16 }
 0x1a7   : > { %4542 = vmatprep.subr.bf16.mxu1 %v6278_v5 }
 0x1a9   : > { %4502 = vmatpush1.bf16.msra.mxu0 %v6273_v8 }
 0x1aa   : > { %4543 = vmatpush1.bf16.msra.mxu1 %v6276_v12  ;;  %4503 = vmatprep.subr.bf16.mxu0 %v6281_v13  ;;  %v6339_v12 = vld [vmem:[%s8615_s1 + $0xaa8] ss:$16 sps:$4 sm:$0xff]  }
 0x1ab   : > { %4544 = vmatprep.subr.bf16.mxu1 %v6284_v22  ;;  %v6342_v13 = vld [vmem:[%s8615_s1 + $0xca8] ss:$16 sps:$4 sm:$0xff]  }
 0x1ad   : > { %4504 = vmatpush2.bf16.msra.mxu0 %v6279_v14  ;;  %v6345_v14 = vld [vmem:[%s8615_s1 + $0xa88] ss:$16 sps:$4 sm:$0xff]  }
 0x1ae   : > { %4545 = vmatpush2.bf16.msra.mxu1 %v6282_v25  ;;  %4505 = vmatprep.subr.bf16.mxu0 %v6287_v40  ;;  %v6348_v25 = vld [vmem:[%s8615_s1 + $0xc88] ss:$16 sps:$4 sm:$0xff]   ;;  %v6353_v40 = vld [vmem:[%s8615_s1 + $0xa6c] ss:$16 sps:$4 sm:$0xff]  }
 0x1af   : > { %4546 = vmatprep.subr.bf16.mxu1 %v6290_v15  ;;  %v6356_v15 = vld [vmem:[%s8615_s1 + $0xc6c] ss:$16 sps:$4 sm:$0xff]  }
 0x1b1   : > { %4506 = vmatpush2.bf16.msra.mxu0 %v6285_v17  ;;  %v6351_v17 = vld [vmem:[%s8615_s1 + $0xa68] ss:$16 sps:$4 sm:$0xff]  }
 0x1b2   : > { %4547 = vmatpush2.bf16.msra.mxu1 %v6288_v18  ;;  %4507 = vmatprep.subr.bf16.mxu0 %v6293_v19  ;;  %v6354_v18 = vld [vmem:[%s8615_s1 + $0xc68] ss:$16 sps:$4 sm:$0xff]   ;;  %v6359_v19 = vld [vmem:[%s8615_s1 + $0xa4c] ss:$16 sps:$4 sm:$0xff]  }
 0x1b3   : > { %4548 = vmatprep.subr.bf16.mxu1 %v6296_v20  ;;  %v6362_v20 = vld [vmem:[%s8615_s1 + $0xc4c] ss:$16 sps:$4 sm:$0xff]  }
 0x1b5   : > { %4508 = vmatpush2.bf16.msra.mxu0 %v6291_v21  ;;  %v6357_v21 = vld [vmem:[%s8615_s1 + $0xa48] ss:$16 sps:$4 sm:$0xff]  }
 0x1b6   : > { %4549 = vmatpush2.bf16.msra.mxu1 %v6294_v23  ;;  %4509 = vmatprep.subr.bf16.mxu0 %v6299_v7  ;;  %v6360_v23 = vld [vmem:[%s8615_s1 + $0xc48] ss:$16 sps:$4 sm:$0xff]   ;;  %v6365_v7 = vld [vmem:[%s8615_s1 + $0xa2c] ss:$16 sps:$4 sm:$0xff]  }
 0x1b7   : > { %4550 = vmatprep.subr.bf16.mxu1 %v6302_v24  ;;  %v6368_v24 = vld [vmem:[%s8615_s1 + $0xc2c] ss:$16 sps:$4 sm:$0xff]  }
 0x1b9   : > { %4510 = vmatpush2.bf16.msra.mxu0 %v6297_v28  ;;  %v6363_v28 = vld [vmem:[%s8615_s1 + $0xa28] ss:$16 sps:$4 sm:$0xff]  }
 0x1ba   : > { %4551 = vmatpush2.bf16.msra.mxu1 %v6300_v29  ;;  %4511 = vmatprep.subr.bf16.mxu0 %v6305_v30  ;;  %v6366_v29 = vld [vmem:[%s8615_s1 + $0xc28] ss:$16 sps:$4 sm:$0xff]   ;;  %v6371_v30 = vld [vmem:[%s8615_s1 + $0xa0c] ss:$16 sps:$4 sm:$0xff]  }
 0x1bb   : > { %4552 = vmatprep.subr.bf16.mxu1 %v6308_v31  ;;  %v6374_v31 = vld [vmem:[%s8615_s1 + $0xc0c] ss:$16 sps:$4 sm:$0xff]  }
 0x1bd   : > { %4512 = vmatpush2.bf16.msra.mxu0 %v6303_v11  ;;  %v6369_v11 = vld [vmem:[%s8615_s1 + $0xa08] ss:$16 sps:$4 sm:$0xff]  }
 0x1be   : > { %4553 = vmatpush2.bf16.msra.mxu1 %v6306_v32  ;;  %4513 = vmatprep.subr.bf16.mxu0 %v6311_v37  ;;  %v6372_v32 = vld [vmem:[%s8615_s1 + $0xc08] ss:$16 sps:$4 sm:$0xff]   ;;  %v6377_v37 = vld [vmem:[%s8615_s1 + $0xbec] ss:$16 sps:$4 sm:$0xff]  }
 0x1bf   : > { %4554 = vmatprep.subr.bf16.mxu1 %v6314_v35  ;;  %v6380_v35 = vld [vmem:[%s8615_s1 + $0xdec] ss:$16 sps:$4 sm:$0xff]  }
 0x1c1   : > { %4514 = vmatpush2.bf16.msra.mxu0 %v6309_v63  ;;  %v6375_v63 = vld [vmem:[%s8615_s1 + $0xbe8] ss:$16 sps:$4 sm:$0xff]  }
 0x1c2   : > { %4555 = vmatpush2.bf16.msra.mxu1 %v6312_v38  ;;  %4515 = vmatprep.subr.bf16.mxu0 %v6317_v39  ;;  %v6378_v38 = vld [vmem:[%s8615_s1 + $0xde8] ss:$16 sps:$4 sm:$0xff]   ;;  %v6383_v39 = vld [vmem:[%s8615_s1 + $0xbcc] ss:$16 sps:$4 sm:$0xff]  }
 0x1c3   : > { %4556 = vmatprep.subr.bf16.mxu1 %v6320_v9  ;;  %v6386_v9 = vld [vmem:[%s8615_s1 + $0xdcc] ss:$16 sps:$4 sm:$0xff]  }
 0x1c5   : > { %4516 = vmatpush2.bf16.msra.mxu0 %v6315_v46  ;;  %v6381_v46 = vld [vmem:[%s8615_s1 + $0xbc8] ss:$16 sps:$4 sm:$0xff]  }
 0x1c6   : > { %4557 = vmatpush2.bf16.msra.mxu1 %v6318_v47  ;;  %4517 = vmatprep.subr.bf16.mxu0 %v6323_v48  ;;  %v6384_v47 = vld [vmem:[%s8615_s1 + $0xdc8] ss:$16 sps:$4 sm:$0xff]   ;;  %v6389_v48 = vld [vmem:[%s8615_s1 + $0xbac] ss:$16 sps:$4 sm:$0xff]  }
 0x1c7   : > { %4558 = vmatprep.subr.bf16.mxu1 %v6326_v10  ;;  %v6392_v10 = vld [vmem:[%s8615_s1 + $0xdac] ss:$16 sps:$4 sm:$0xff]  }
 0x1c9   : > { %4518 = vmatpush2.bf16.msra.mxu0 %v6321_v41  ;;  %v6387_v41 = vld [vmem:[%s8615_s1 + $0xba8] ss:$16 sps:$4 sm:$0xff]  }
 0x1ca   : > { %4559 = vmatpush2.bf16.msra.mxu1 %v6324_v3  ;;  %4569 = vmatprep.subr.bf16.mxu0 %v6329_v49  ;;  %v6390_v3 = vld [vmem:[%s8615_s1 + $0xda8] ss:$16 sps:$4 sm:$0xff]   ;;  %v6395_v49 = vld [vmem:[%s8615_s1 + $0xb8c] ss:$16 sps:$4 sm:$0xff]  }
 0x1cb   : > { %4610 = vmatprep.subr.bf16.mxu1 %v6332_v50  ;;  %v6398_v50 = vld [vmem:[%s8615_s1 + $0xd8c] ss:$16 sps:$4 sm:$0xff]  }
 0x1cc   : > { %v4275_v57 = vpop.f32.mrf.mxu0  ;;  %4520 = vmatmul.mubr.bf16.vlgmr.msra.gmra.mxu0 %v7071_v0  ;;  %v6341_v0 = vld [vmem:[%s8615_s1 + $0xaac] ss:$16 sps:$4 sm:$0xff]  }
 0x1cd   : > { %v4316_v58 = vpop.f32.mrf.mxu1  ;;  %4561 = vmatmul.mubr.bf16.vlgmr.msra.gmra.mxu1 %v7298_v33  ;;  %v4276_v6 = vadd.f32 %v4275_v57, %v7957_v2  ;;  %4570 = vmatpush1.bf16.msra.mxu0 %v6327_v52  ;;  %v6344_v33 = vld [vmem:[%s8615_s1 + $0xcac] ss:$16 sps:$4 sm:$0xff]   ;;  %v6393_v52 = vld [vmem:[%s8615_s1 + $0xb88] ss:$16 sps:$4 sm:$0xff]  }
 0x1ce   : > { %4611 = vmatpush1.bf16.msra.mxu1 %v6330_v53  ;;  %v4277_v62 = vpop.f32.mrf.mxu0  ;;  %4571 = vmatprep.subr.bf16.mxu0 %v6335_v56  ;;  %v6396_v53 = vld [vmem:[%s8615_s1 + $0xd88] ss:$16 sps:$4 sm:$0xff]   ;;  %v6401_v56 = vld [vmem:[%s8615_s1 + $0xb6c] ss:$16 sps:$4 sm:$0xff]  }
 0x1cf   : > { %v4318_v1 = vpop.f32.mrf.mxu1  ;;  %4612 = vmatprep.subr.bf16.mxu1 %v6338_v59  ;;  %v8159_v2 = vadd.f32 %v4316_v58, %v4276_v6  ;;  %v4278_v34 = vadd.f32 %v4277_v62, %v7962_v45  ;;  %4601 = vmatprep.mubr.bf16.mxu0 %v7089_v4  ;;  %v6347_v4 = vld [vmem:[%s8615_s1 + $0xa8c] ss:$16 sps:$4 sm:$0xff]   ;;  %v6399_v57 = vld [vmem:[%s8615_s1 + $0xb68] ss:$16 sps:$4 sm:$0xff]  }
 0x1d0   : > { %4642 = vmatprep.mubr.bf16.mxu1 %v7317_v54  ;;  %v4279_v16 = vpop.f32.mrf.mxu0  ;;  %v6350_v54 = vld [vmem:[%s8615_s1 + $0xc8c] ss:$16 sps:$4 sm:$0xff]   ;;  %v6402_v58 = vld [vmem:[%s8615_s1 + $0xd68] ss:$16 sps:$4 sm:$0xff]  }
 0x1d1   : > { %v4320_v5 = vpop.f32.mrf.mxu1  ;;  %v8164_v8 = vadd.f32 %v4318_v1, %v4278_v34  ;;  %4572 = vmatpush1.bf16.msra.mxu0 %v6333_v60  ;;  %v6404_v59 = vld [vmem:[%s8615_s1 + $0xd6c] ss:$16 sps:$4 sm:$0xff]   ;;  %v6408_v62 = vld [vmem:[%s8615_s1 + $0xd48] ss:$16 sps:$4 sm:$0xff]  }
 0x1d2   : > { %4613 = vmatpush1.bf16.msra.mxu1 %v6336_v61  ;;  %v4280_v22 = vpop.f32.mrf.mxu0  ;;  %4573 = vmatprep.subr.bf16.mxu0 %v6341_v0  ;;  %v6407_v6 = vld [vmem:[%s8615_s1 + $0xb4c] ss:$16 sps:$4 sm:$0xff]   ;;  %v6405_v61 = vld [vmem:[%s8615_s1 + $0xb48] ss:$16 sps:$4 sm:$0xff]  }
 0x1d3   : > { %v4321_v45 = vpop.f32.mrf.mxu1  ;;  %4614 = vmatprep.subr.bf16.mxu1 %v6344_v33  ;;  %v6410_v60 = vld [vmem:[%s8615_s1 + $0xd4c] ss:$16 sps:$4 sm:$0xff]   ;;  %v6411_v33 = vld [vmem:[%s8615_s1 + $0xb28] ss:$16 sps:$4 sm:$0xff]  }
 0x1d4   : > { %v6413_v1 = vld [vmem:[%s8615_s1 + $0xb2c] ss:$16 sps:$4 sm:$0xff]   ;;  %v6414_v34 = vld [vmem:[%s8615_s1 + $0xd28] ss:$16 sps:$4 sm:$0xff]  }
 0x1d5   : > { %4574 = vmatpush1.bf16.msra.mxu0 %v6339_v12  ;;  %v6416_v0 = vld [vmem:[%s8615_s1 + $0xd2c] ss:$16 sps:$4 sm:$0xff]   ;;  %v6417_v12 = vld [vmem:[%s8615_s1 + $0xb08] ss:$16 sps:$4 sm:$0xff]  }
 0x1d6   : > { %4615 = vmatpush1.bf16.msra.mxu1 %v6342_v13  ;;  %4575 = vmatprep.subr.bf16.mxu0 %v6347_v4  ;;  %v6419_v16 = vld [vmem:[%s8615_s1 + $0xb0c] ss:$16 sps:$4 sm:$0xff]   ;;  %v6420_v13 = vld [vmem:[%s8615_s1 + $0xd08] ss:$16 sps:$4 sm:$0xff]  }
 0x1d7   : > { %4616 = vmatprep.subr.bf16.mxu1 %v6350_v54  ;;  %v6422_v5 = vld [vmem:[%s8615_s1 + $0xd0c] ss:$16 sps:$4 sm:$0xff]   ;;  %v6423_v4 = vld [vmem:[%s8615_s1 + $0xee8] ss:$16 sps:$4 sm:$0xff]  }
 0x1d8   : > { %v6425_v22 = vld [vmem:[%s8615_s1 + $0xeec] ss:$16 sps:$4 sm:$0xff]   ;;  %v6426_v54 = vld [vmem:[%s8615_s1 + $0x10e8] ss:$16 sps:$4 sm:$0xff]  }
 0x1d9   : > { %4576 = vmatpush1.bf16.msra.mxu0 %v6345_v14  ;;  %v6428_v45 = vld [vmem:[%s8615_s1 + $0x10ec] ss:$16 sps:$4 sm:$0xff]  }
 0x1da   : > { %4617 = vmatpush1.bf16.msra.mxu1 %v6348_v25  ;;  %4577 = vmatprep.subr.bf16.mxu0 %v6353_v40  ;;  %v6431_v14 = vld [vmem:[%s8615_s1 + $0xecc] ss:$16 sps:$4 sm:$0xff]  }
 0x1db   : > { %4618 = vmatprep.subr.bf16.mxu1 %v6356_v15  ;;  %v6434_v25 = vld [vmem:[%s8615_s1 + $0x10cc] ss:$16 sps:$4 sm:$0xff]  }
 0x1dd   : > { %4578 = vmatpush1.bf16.msra.mxu0 %v6351_v17 }
 0x1de   : > { %4619 = vmatpush1.bf16.msra.mxu1 %v6354_v18  ;;  %4579 = vmatprep.subr.bf16.mxu0 %v6359_v19  ;;  %v6429_v18 = vld [vmem:[%s8615_s1 + $0xec8] ss:$16 sps:$4 sm:$0xff]  }
 0x1df   : > { %4620 = vmatprep.subr.bf16.mxu1 %v6362_v20  ;;  %v6432_v19 = vld [vmem:[%s8615_s1 + $0x10c8] ss:$16 sps:$4 sm:$0xff]  }
 0x1e1   : > { %4580 = vmatpush1.bf16.msra.mxu0 %v6357_v21 }
 0x1e2   : > { %4621 = vmatpush1.bf16.msra.mxu1 %v6360_v23  ;;  %4581 = vmatprep.subr.bf16.mxu0 %v6365_v7 }
 0x1e3   : > { %4622 = vmatprep.subr.bf16.mxu1 %v6368_v24 }
 0x1e5   : > { %4582 = vmatpush1.bf16.msra.mxu0 %v6363_v28  ;;  %v6435_v28 = vld [vmem:[%s8615_s1 + $0xea8] ss:$16 sps:$4 sm:$0xff]  }
 0x1e6   : > { %4623 = vmatpush1.bf16.msra.mxu1 %v6366_v29  ;;  %4583 = vmatprep.subr.bf16.mxu0 %v6371_v30 }
 0x1e7   : > { %4624 = vmatprep.subr.bf16.mxu1 %v6374_v31  ;;  %v6441_v31 = vld [vmem:[%s8615_s1 + $0xe88] ss:$16 sps:$4 sm:$0xff]  }
 0x1e9   : > { %4584 = vmatpush1.bf16.msra.mxu0 %v6369_v11  ;;  %v6444_v11 = vld [vmem:[%s8615_s1 + $0x1088] ss:$16 sps:$4 sm:$0xff]  }
 0x1ea   : > { %4625 = vmatpush1.bf16.msra.mxu1 %v6372_v32  ;;  %4585 = vmatprep.subr.bf16.mxu0 %v6377_v37  ;;  %v6449_v32 = vld [vmem:[%s8615_s1 + $0xe6c] ss:$16 sps:$4 sm:$0xff]  }
 0x1eb   : > { %4626 = vmatprep.subr.bf16.mxu1 %v6380_v35  ;;  %v6452_v37 = vld [vmem:[%s8615_s1 + $0x106c] ss:$16 sps:$4 sm:$0xff]   ;;  %v6447_v35 = vld [vmem:[%s8615_s1 + $0xe68] ss:$16 sps:$4 sm:$0xff]  }
 0x1ed   : > { %4586 = vmatpush2.bf16.msra.mxu0 %v6375_v63  ;;  %v6450_v63 = vld [vmem:[%s8615_s1 + $0x1068] ss:$16 sps:$4 sm:$0xff]  }
 0x1ee   : > { %4627 = vmatpush2.bf16.msra.mxu1 %v6378_v38  ;;  %4587 = vmatprep.subr.bf16.mxu0 %v6383_v39  ;;  %v6455_v38 = vld [vmem:[%s8615_s1 + $0xe4c] ss:$16 sps:$4 sm:$0xff]  }
 0x1ef   : > { %4628 = vmatprep.subr.bf16.mxu1 %v6386_v9  ;;  %v6458_v39 = vld [vmem:[%s8615_s1 + $0x104c] ss:$16 sps:$4 sm:$0xff]   ;;  %v6453_v9 = vld [vmem:[%s8615_s1 + $0xe48] ss:$16 sps:$4 sm:$0xff]  }
 0x1f1   : > { %4588 = vmatpush2.bf16.msra.mxu0 %v6381_v46  ;;  %v6456_v46 = vld [vmem:[%s8615_s1 + $0x1048] ss:$16 sps:$4 sm:$0xff]  }
 0x1f2   : > { %4629 = vmatpush2.bf16.msra.mxu1 %v6384_v47  ;;  %4589 = vmatprep.subr.bf16.mxu0 %v6389_v48  ;;  %v6461_v47 = vld [vmem:[%s8615_s1 + $0xe2c] ss:$16 sps:$4 sm:$0xff]  }
 0x1f3   : > { %4630 = vmatprep.subr.bf16.mxu1 %v6392_v10  ;;  %v6464_v48 = vld [vmem:[%s8615_s1 + $0x102c] ss:$16 sps:$4 sm:$0xff]   ;;  %v6459_v10 = vld [vmem:[%s8615_s1 + $0xe28] ss:$16 sps:$4 sm:$0xff]  }
 0x1f5   : > { %4590 = vmatpush2.bf16.msra.mxu0 %v6387_v41  ;;  %v6462_v41 = vld [vmem:[%s8615_s1 + $0x1028] ss:$16 sps:$4 sm:$0xff]  }
 0x1f6   : > { %4631 = vmatpush2.bf16.msra.mxu1 %v6390_v3  ;;  %4591 = vmatprep.subr.bf16.mxu0 %v6395_v49  ;;  %v6467_v3 = vld [vmem:[%s8615_s1 + $0xe0c] ss:$16 sps:$4 sm:$0xff]  }
 0x1f7   : > { %4632 = vmatprep.subr.bf16.mxu1 %v6398_v50  ;;  %v6470_v49 = vld [vmem:[%s8615_s1 + $0x100c] ss:$16 sps:$4 sm:$0xff]   ;;  %v6465_v50 = vld [vmem:[%s8615_s1 + $0xe08] ss:$16 sps:$4 sm:$0xff]  }
 0x1f9   : > { %4592 = vmatpush2.bf16.msra.mxu0 %v6393_v52  ;;  %v6468_v52 = vld [vmem:[%s8615_s1 + $0x1008] ss:$16 sps:$4 sm:$0xff]  }
 0x1fa   : > { %4633 = vmatpush2.bf16.msra.mxu1 %v6396_v53  ;;  %4593 = vmatprep.subr.bf16.mxu0 %v6401_v56  ;;  %v6473_v53 = vld [vmem:[%s8615_s1 + $0xfec] ss:$16 sps:$4 sm:$0xff]  }
 0x1fb   : > { %4634 = vmatprep.subr.bf16.mxu1 %v6404_v59  ;;  %v6476_v56 = vld [vmem:[%s8615_s1 + $0x11ec] ss:$16 sps:$4 sm:$0xff]   ;;  %v6471_v59 = vld [vmem:[%s8615_s1 + $0xfe8] ss:$16 sps:$4 sm:$0xff]  }
 0x1fd   : > { %4594 = vmatpush2.bf16.msra.mxu0 %v6399_v57  ;;  %v6474_v57 = vld [vmem:[%s8615_s1 + $0x11e8] ss:$16 sps:$4 sm:$0xff]  }
 0x1fe   : > { %4635 = vmatpush2.bf16.msra.mxu1 %v6402_v58  ;;  %4595 = vmatprep.subr.bf16.mxu0 %v6407_v6  ;;  %v6479_v58 = vld [vmem:[%s8615_s1 + $0xfcc] ss:$16 sps:$4 sm:$0xff]  }
 0x1ff   : > { %4636 = vmatprep.subr.bf16.mxu1 %v6410_v60  ;;  %v6482_v6 = vld [vmem:[%s8615_s1 + $0x11cc] ss:$16 sps:$4 sm:$0xff]   ;;  %v6477_v60 = vld [vmem:[%s8615_s1 + $0xfc8] ss:$16 sps:$4 sm:$0xff]  }
 0x201   : > { %4596 = vmatpush2.bf16.msra.mxu0 %v6405_v61  ;;  %v6480_v61 = vld [vmem:[%s8615_s1 + $0x11c8] ss:$16 sps:$4 sm:$0xff]  }
 0x202   : > { %4637 = vmatpush2.bf16.msra.mxu1 %v6408_v62  ;;  %4597 = vmatprep.subr.bf16.mxu0 %v6413_v1  ;;  %v6485_v62 = vld [vmem:[%s8615_s1 + $0xfac] ss:$16 sps:$4 sm:$0xff]  }
 0x203   : > { %4638 = vmatprep.subr.bf16.mxu1 %v6416_v0  ;;  %v6488_v1 = vld [vmem:[%s8615_s1 + $0x11ac] ss:$16 sps:$4 sm:$0xff]   ;;  %v6483_v0 = vld [vmem:[%s8615_s1 + $0xfa8] ss:$16 sps:$4 sm:$0xff]  }
 0x205   : > { %4598 = vmatpush2.bf16.msra.mxu0 %v6411_v33  ;;  %v6486_v33 = vld [vmem:[%s8615_s1 + $0x11a8] ss:$16 sps:$4 sm:$0xff]  }
 0x206   : > { %4639 = vmatpush2.bf16.msra.mxu1 %v6414_v34  ;;  %4599 = vmatprep.subr.bf16.mxu0 %v6419_v16  ;;  %v6491_v34 = vld [vmem:[%s8615_s1 + $0xf8c] ss:$16 sps:$4 sm:$0xff]  }
 0x207   : > { %4640 = vmatprep.subr.bf16.mxu1 %v6422_v5  ;;  %v6494_v16 = vld [vmem:[%s8615_s1 + $0x118c] ss:$16 sps:$4 sm:$0xff]   ;;  %v6489_v5 = vld [vmem:[%s8615_s1 + $0xf88] ss:$16 sps:$4 sm:$0xff]  }
 0x209   : > { %4600 = vmatpush2.bf16.msra.mxu0 %v6417_v12  ;;  %v6492_v12 = vld [vmem:[%s8615_s1 + $0x1188] ss:$16 sps:$4 sm:$0xff]  }
 0x20a   : > { %4641 = vmatpush2.bf16.msra.mxu1 %v6420_v13  ;;  %4651 = vmatprep.subr.bf16.mxu0 %v6425_v22  ;;  %v6497_v13 = vld [vmem:[%s8615_s1 + $0xf6c] ss:$16 sps:$4 sm:$0xff]  }
 0x20b   : > { %4692 = vmatprep.subr.bf16.mxu1 %v6428_v45  ;;  %v6500_v22 = vld [vmem:[%s8615_s1 + $0x116c] ss:$16 sps:$4 sm:$0xff]   ;;  %v6495_v45 = vld [vmem:[%s8615_s1 + $0xf68] ss:$16 sps:$4 sm:$0xff]  }
 0x20c   : > { %v4357_v40 = vpop.f32.mrf.mxu0  ;;  %4602 = vmatmul.mubr.bf16.vlgmr.msra.gmra.mxu0 %v7302_v36  ;;  %v6437_v36 = vld [vmem:[%s8615_s1 + $0xeac] ss:$16 sps:$4 sm:$0xff]  }
 0x20d   : > { %v8346_v15 = vpop.f32.mrf.mxu1  ;;  %4643 = vmatmul.mubr.bf16.vlgmr.msra.gmra.mxu1 %v7515_v26  ;;  %v8351_v17 = vadd.f32 %v4357_v40, %v8159_v2  ;;  %4652 = vmatpush1.bf16.msra.mxu0 %v6423_v4  ;;  %v6440_v26 = vld [vmem:[%s8615_s1 + $0x10ac] ss:$16 sps:$4 sm:$0xff]   ;;  %v6498_v4 = vld [vmem:[%s8615_s1 + $0x1168] ss:$16 sps:$4 sm:$0xff]  }
 0x20e   : > { %4693 = vmatpush1.bf16.msra.mxu1 %v6426_v54  ;;  %v4359_v20 = vpop.f32.mrf.mxu0  ;;  %4653 = vmatprep.subr.bf16.mxu0 %v6431_v14  ;;  %v6503_v54 = vld [vmem:[%s8615_s1 + $0xf4c] ss:$16 sps:$4 sm:$0xff]   ;;  %v6504_v40 = vld [vmem:[%s8615_s1 + $0x1148] ss:$16 sps:$4 sm:$0xff]  }
 0x20f   : > { %v8359_v21 = vpop.f32.mrf.mxu1  ;;  %4694 = vmatprep.subr.bf16.mxu1 %v6434_v25  ;;  %v8368_v2 = vadd.f32 %v4359_v20, %v8164_v8  ;;  %4683 = vmatprep.mubr.bf16.mxu0 %v7320_v43  ;;  %v6438_v8 = vld [vmem:[%s8615_s1 + $0x10a8] ss:$16 sps:$4 sm:$0xff]   ;;  %v6443_v43 = vld [vmem:[%s8615_s1 + $0xe8c] ss:$16 sps:$4 sm:$0xff]  }
 0x210   : > { %4724 = vmatprep.mubr.bf16.mxu1 %v7534_v44  ;;  %v4361_v23 = vpop.f32.mrf.mxu0  ;;  %v6446_v44 = vld [vmem:[%s8615_s1 + $0x108c] ss:$16 sps:$4 sm:$0xff]   ;;  %v6501_v25 = vld [vmem:[%s8615_s1 + $0xf48] ss:$16 sps:$4 sm:$0xff]  }
 0x211   : > { %v4402_v7 = vpop.f32.mrf.mxu1  ;;  %v4737_v24 = vcombine.low %v8351_v17, %v8368_v2  ;;  %4654 = vmatpush1.bf16.msra.mxu0 %v6429_v18  ;;  %v6506_v14 = vld [vmem:[%s8615_s1 + $0x114c] ss:$16 sps:$4 sm:$0xff]   ;;  %v6507_v20 = vld [vmem:[%s8615_s1 + $0xf28] ss:$16 sps:$4 sm:$0xff]   ;;  %v8555_v2 = vsub.s32 1, %v6691_v42 }
 0x212   : > { %4695 = vmatpush1.bf16.msra.mxu1 %v6432_v19  ;;  %v4362_v29 = vpop.f32.mrf.mxu0  ;;  %4655 = vmatprep.subr.bf16.mxu0 %v6437_v36  ;;  %v6509_v18 = vld [vmem:[%s8615_s1 + $0xf2c] ss:$16 sps:$4 sm:$0xff]   ;;  %v6510_v36 = vld [vmem:[%s8615_s1 + $0x1128] ss:$16 sps:$4 sm:$0xff]  }
 0x213   : > { %v4403_v30 = vpop.f32.mrf.mxu1  ;;  %4696 = vmatprep.subr.bf16.mxu1 %v6440_v26  ;;  %v6512_v19 = vld [vmem:[%s8615_s1 + $0x112c] ss:$16 sps:$4 sm:$0xff]   ;;  %v6513_v7 = vld [vmem:[%s8615_s1 + $0xf08] ss:$16 sps:$4 sm:$0xff]  }
 0x214   : > { %v6515_v26 = vld [vmem:[%s8615_s1 + $0xf0c] ss:$16 sps:$4 sm:$0xff]  }
 0x215   : > { %4656 = vmatpush1.bf16.msra.mxu0 %v6435_v28  ;;  %v6518_v23 = vld [vmem:[%s8615_s1 + $0x110c] ss:$16 sps:$4 sm:$0xff]   ;;  %v6516_v28 = vld [vmem:[%s8615_s1 + $0x1108] ss:$16 sps:$4 sm:$0xff]  }
 0x216   : > { %4697 = vmatpush1.bf16.msra.mxu1 %v6438_v8  ;;  %4657 = vmatprep.subr.bf16.mxu0 %v6443_v43 }
 0x217   : > { %4698 = vmatprep.subr.bf16.mxu1 %v6446_v44 }
 0x219   : > { %4658 = vmatpush1.bf16.msra.mxu0 %v6441_v31 }
 0x21a   : > { %4699 = vmatpush1.bf16.msra.mxu1 %v6444_v11  ;;  %4659 = vmatprep.subr.bf16.mxu0 %v6449_v32 }
 0x21b   : > { %4700 = vmatprep.subr.bf16.mxu1 %v6452_v37 }
 0x21d   : > { %4660 = vmatpush1.bf16.msra.mxu0 %v6447_v35 }
 0x21e   : > { %4701 = vmatpush1.bf16.msra.mxu1 %v6450_v63  ;;  %4661 = vmatprep.subr.bf16.mxu0 %v6455_v38 }
 0x21f   : > { %4702 = vmatprep.subr.bf16.mxu1 %v6458_v39 }
 0x221   : > { %4662 = vmatpush1.bf16.msra.mxu0 %v6453_v9 }
 0x222   : > { %4703 = vmatpush1.bf16.msra.mxu1 %v6456_v46  ;;  %4663 = vmatprep.subr.bf16.mxu0 %v6461_v47 }
 0x223   : > { %4704 = vmatprep.subr.bf16.mxu1 %v6464_v48 }
 0x225   : > { %4664 = vmatpush1.bf16.msra.mxu0 %v6459_v10 }
 0x226   : > { %4705 = vmatpush1.bf16.msra.mxu1 %v6462_v41  ;;  %4665 = vmatprep.subr.bf16.mxu0 %v6467_v3 }
 0x227   : > { %4706 = vmatprep.subr.bf16.mxu1 %v6470_v49 }
 0x229   : > { %4666 = vmatpush1.bf16.msra.mxu0 %v6465_v50 }
 0x22a   : > { %4707 = vmatpush1.bf16.msra.mxu1 %v6468_v52  ;;  %4667 = vmatprep.subr.bf16.mxu0 %v6473_v53 }
 0x22b   : > { %4708 = vmatprep.subr.bf16.mxu1 %v6476_v56 }
 0x22d   : > { %4668 = vmatpush2.bf16.msra.mxu0 %v6471_v59 }
 0x22e   : > { %4709 = vmatpush2.bf16.msra.mxu1 %v6474_v57  ;;  %4669 = vmatprep.subr.bf16.mxu0 %v6479_v58 }
 0x22f   : > { %4710 = vmatprep.subr.bf16.mxu1 %v6482_v6 }
 0x231   : > { %4670 = vmatpush2.bf16.msra.mxu0 %v6477_v60 }
 0x232   : > { %4711 = vmatpush2.bf16.msra.mxu1 %v6480_v61  ;;  %4671 = vmatprep.subr.bf16.mxu0 %v6485_v62 }
 0x233   : > { %4712 = vmatprep.subr.bf16.mxu1 %v6488_v1  ;;  %v6529_v1 = vmov 1983009808  }
 0x235   : > { %4672 = vmatpush2.bf16.msra.mxu0 %v6483_v0  ;;  %v4740_v0 = vunpack.c.l.s4 %v6529_v1 }
 0x236   : > { %4713 = vmatpush2.bf16.msra.mxu1 %v6486_v33  ;;  %4673 = vmatprep.subr.bf16.mxu0 %v6491_v34 }
 0x237   : > { %4714 = vmatprep.subr.bf16.mxu1 %v6494_v16  ;;  %v4741_v16 = vunpack.c.0.s8 %v4740_v0 }
 0x239   : > { %4674 = vmatpush2.bf16.msra.mxu0 %v6489_v5 }
 0x23a   : > { %4715 = vmatpush2.bf16.msra.mxu1 %v6492_v12  ;;  %4675 = vmatprep.subr.bf16.mxu0 %v6497_v13 }
 0x23b   : > { %4716 = vmatprep.subr.bf16.mxu1 %v6500_v22 }
 0x23d   : > { %4676 = vmatpush2.bf16.msra.mxu0 %v6495_v45 }
 0x23e   : > { %4717 = vmatpush2.bf16.msra.mxu1 %v6498_v4  ;;  %4677 = vmatprep.subr.bf16.mxu0 %v6503_v54  ;;  %v4744_v54 = vsub.s32 %v4741_v16, %v6691_v42 }
 0x23f   : > { %4718 = vmatprep.subr.bf16.mxu1 %v6506_v14 }
 0x241   : > { %4678 = vmatpush2.bf16.msra.mxu0 %v6501_v25 }
 0x242   : > { %4719 = vmatpush2.bf16.msra.mxu1 %v6504_v40  ;;  %4679 = vmatprep.subr.bf16.mxu0 %v6509_v18 }
 0x243   : > { %4720 = vmatprep.subr.bf16.mxu1 %v6512_v19 }
 0x245   : > { %4680 = vmatpush2.bf16.msra.mxu0 %v6507_v20  ;;  %v4745_v20 = vrot.slane %v4737_v24, %v4744_v54  ;;  %v8558_v24 = vsub.s32 2, %v6691_v42 }
 0x246   : > { %4721 = vmatpush2.bf16.msra.mxu1 %v6510_v36  ;;  %4681 = vmatprep.subr.bf16.mxu0 %v6515_v26  ;;  %v8545_v26 = vsub.s32 0, %v6691_v42 }
 0x247   : > { %4722 = vmatprep.subr.bf16.mxu1 %v6518_v23 }
 0x249   : > { %4682 = vmatpush2.bf16.msra.mxu0 %v6513_v7 }
 0x24a   : > { %4723 = vmatpush2.bf16.msra.mxu1 %v6516_v28 }
 0x24c   : > { %v4439_v8 = vpop.f32.mrf.mxu0  ;;  %4684 = vmatmul.mubr.bf16.vlgmr.msra.gmra.mxu0 %v7519_v27 }
 0x24d   : > { %v4480_v29 = vpop.f32.mrf.mxu1  ;;  %4725 = vmatmul.mubr.bf16.vlgmr.msra.gmra.mxu1 %v7732_v51  ;;  %v4440_v30 = vadd.f32 %v4439_v8, %v8346_v15 }
 0x24e   : > { %v4441_v43 = vpop.f32.mrf.mxu0 }
 0x24f   : > { %v4482_v44 = vpop.f32.mrf.mxu1  ;;  %v4481_v31 = vadd.f32 %v4480_v29, %v4440_v30  ;;  %v4442_v11 = vadd.f32 %v4441_v43, %v8359_v21  ;;  %v8550_v29 = vld [vmem:[%s8616_s2] sm:$0xf] }
 0x250   : > { %v4443_v32 = vpop.f32.mrf.mxu0  ;;  %v4863_v17 = vrot.slane %v8550_v29, %v8545_v26 }
 0x251   : > { %v4484_v37 = vpop.f32.mrf.mxu1  ;;  %v4483_v35 = vadd.f32 %v4482_v44, %v4442_v11 }
 0x252   : > { %v4444_v63 = vpop.f32.mrf.mxu0 }
 0x253   : > { %v4485_v38 = vpop.f32.mrf.mxu1 }
 0x28c   : > { %v4521_v39 = vpop.f32.mrf.mxu0 }
 0x28d   : > { %v4562_v9 = vpop.f32.mrf.mxu1  ;;  %v4522_v46 = vadd.f32 %v4521_v39, %v4481_v31 }
 0x28e   : > { %v4523_v47 = vpop.f32.mrf.mxu0 }
 0x28f   : > { %v4564_v48 = vpop.f32.mrf.mxu1  ;;  %v4563_v27 = vadd.f32 %v4562_v9, %v4522_v46  ;;  %v4524_v10 = vadd.f32 %v4523_v47, %v4483_v35 }
 0x290   : > { %v4525_v51 = vpop.f32.mrf.mxu0 }
 0x291   : > { %v4566_v41 = vpop.f32.mrf.mxu1  ;;  %v4565_v15 = vadd.f32 %v4564_v48, %v4524_v10 }
 0x292   : > { %v4526_v3 = vpop.f32.mrf.mxu0 }
 0x293   : > { %v4567_v49 = vpop.f32.mrf.mxu1 }
 0x2cc   : > { %v4603_v50 = vpop.f32.mrf.mxu0 }
 0x2cd   : > { %v4644_v52 = vpop.f32.mrf.mxu1  ;;  %v4604_v21 = vadd.f32 %v4603_v50, %v4563_v27 }
 0x2ce   : > { %v4605_v53 = vpop.f32.mrf.mxu0 }
 0x2cf   : > { %v4646_v56 = vpop.f32.mrf.mxu1  ;;  %v4645_v59 = vadd.f32 %v4644_v52, %v4604_v21  ;;  %v4606_v57 = vadd.f32 %v4605_v53, %v4565_v15 }
 0x2d0   : > { %v4607_v58 = vpop.f32.mrf.mxu0 }
 0x2d1   : > { %v4648_v6 = vpop.f32.mrf.mxu1  ;;  %v4647_v60 = vadd.f32 %v4646_v56, %v4606_v57 }
 0x2d2   : > { %v4608_v61 = vpop.f32.mrf.mxu0 }
 0x2d3   : > { %v4649_v62 = vpop.f32.mrf.mxu1 }
 0x30c   : > { %v4685_v33 = vpop.f32.mrf.mxu0 }
 0x30d   : > { %v4726_v34 = vpop.f32.mrf.mxu1  ;;  %v4686_v5 = vadd.f32 %v4685_v33, %v4645_v59 }
 0x30e   : > { %v4687_v12 = vpop.f32.mrf.mxu0 }
 0x30f   : > { %v4728_v13 = vpop.f32.mrf.mxu1  ;;  %v4688_v22 = vadd.f32 %v4687_v12, %v4647_v60  ;;  %v4727_v14 = vadd.f32 %v4726_v34, %v4686_v5 }
 0x310   : > { %v4689_v45 = vpop.f32.mrf.mxu0 }
 0x311   : > { %v4730_v4 = vpop.f32.mrf.mxu1  ;;  %v4729_v25 = vadd.f32 %v4728_v13, %v4688_v22 }
 0x312   : > { %v4690_v40 = vpop.f32.mrf.mxu0 }
 0x313   : > { %v4731_v18 = vpop.f32.mrf.mxu1  ;;  %v4738_v19 = vcombine.low %v4727_v14, %v4729_v25 }
 0x315   : > { %v4752_v36 = vrot.slane %v4738_v19, %v4744_v54 }
 0x317   : > { %v4753_v23 = vcombine.low %v4745_v20, %v4752_v36  ;;  %v4754_v7 = vcombine.high %v4745_v20, %v4752_v36  ;;  %v5638_v28 = vcombine.low %v4752_v36, %v4752_v36  ;;  %v5639_v8 = vcombine.high %v4752_v36, %v4752_v36 }
 0x319   : > { %v4762_v30 = vrot.slane %v4753_v23, %v4744_v54  ;;  %v4769_v43 = vrot.slane %v5638_v28, %v4744_v54  ;;  %v4779_v44 = vrot.slane %v4754_v7, %v4744_v54  ;;  %v4786_v31 = vrot.slane %v5639_v8, %v4744_v54 }
 0x31b   : > { %v4770_v11 = vcombine.high %v4762_v30, %v4762_v30  ;;  %v4771_v32 = vcombine.high %v4769_v43, %v4769_v43  ;;  %v4787_v37 = vcombine.high %v4779_v44, %v4779_v44  ;;  %v4788_v35 = vcombine.high %v4786_v31, %v4786_v31 }
 0x31c   : > { %v4798_v63 = vsel %vm4797_vm15, %v4762_v30, -inf  ;;  %v4812_v38 = vsel %vm4797_vm15, %v4769_v43, -inf  ;;  %v4826_v39 = vsel %vm4797_vm15, %v4779_v44, -inf  ;;  %v4840_v9 = vsel %vm4797_vm15, %v4786_v31, -inf }
 0x31d   : > { %v4799_v46 = vrot.slane %v4798_v63, 4  ;;  %v4805_v47 = vsel %vm4797_vm15, %v4770_v11, -inf  ;;  %v4813_v48 = vrot.slane %v4812_v38, 4  ;;  %v4819_v27 = vsel %vm4797_vm15, %v4771_v32, -inf }
 0x31e   : > { %v4806_v10 = vrot.slane %v4805_v47, 4  ;;  %v4820_v51 = vrot.slane %v4819_v27, 4  ;;  %v4827_v41 = vrot.slane %v4826_v39, 4  ;;  %v4833_v15 = vsel %vm4797_vm15, %v4787_v37, -inf }
 0x31f   : > { %v4800_v3 = vmax.f32 %v4798_v63, %v4799_v46  ;;  %v4814_v49 = vmax.f32 %v4812_v38, %v4813_v48  ;;  %v4834_v50 = vrot.slane %v4833_v15, 4  ;;  %v4841_v52 = vrot.slane %v4840_v9, 4 }
 0x320   : > { %v4807_v21 = vmax.f32 %v4805_v47, %v4806_v10  ;;  %v4821_v53 = vmax.f32 %v4819_v27, %v4820_v51  ;;  %v4828_v56 = vmax.f32 %v4826_v39, %v4827_v41  ;;  %v4847_v59 = vsel %vm4797_vm15, %v4788_v35, -inf  ;;  %v4888_v35 = vld [vmem:[%s8617_s3] sm:$0xf] }
 0x321   : > { %v4801_v57 = vrot.slane %v4800_v3, 2  ;;  %v4815_v58 = vrot.slane %v4814_v49, 2  ;;  %v4835_v6 = vmax.f32 %v4833_v15, %v4834_v50  ;;  %v4842_v60 = vmax.f32 %v4840_v9, %v4841_v52  ;;  %v4914_v10 = vld [vmem:[%s8618_s4] sm:$0xf] }
 0x322   : > { %v4808_v61 = vrot.slane %v4807_v21, 2  ;;  %v4822_v62 = vrot.slane %v4821_v53, 2  ;;  %v4829_v1 = vrot.slane %v4828_v56, 2  ;;  %v4848_v0 = vrot.slane %v4847_v59, 4 }
 0x323   : > { %v4802_v33 = vmax.f32 %v4800_v3, %v4801_v57  ;;  %v4816_v34 = vmax.f32 %v4814_v49, %v4815_v58  ;;  %v4836_v16 = vrot.slane %v4835_v6, 2  ;;  %v4843_v5 = vrot.slane %v4842_v60, 2 }
 0x324   : > { %v4809_v12 = vmax.f32 %v4807_v21, %v4808_v61  ;;  %v4823_v13 = vmax.f32 %v4821_v53, %v4822_v62  ;;  %v4830_v22 = vmax.f32 %v4828_v56, %v4829_v1  ;;  %v4849_v45 = vmax.f32 %v4847_v59, %v4848_v0 }
 0x325   : > { %v4803_v4 = vrot.slane %v4802_v33, 1  ;;  %v4817_v54 = vrot.slane %v4816_v34, 1  ;;  %v4837_v14 = vmax.f32 %v4835_v6, %v4836_v16  ;;  %v4844_v25 = vmax.f32 %v4842_v60, %v4843_v5 }
 0x326   : > { %v4810_v40 = vrot.slane %v4809_v12, 1  ;;  %v4824_v18 = vrot.slane %v4823_v13, 1  ;;  %v4831_v19 = vrot.slane %v4830_v22, 1  ;;  %v4850_v20 = vrot.slane %v4849_v45, 2 }
 0x327   : > { %v4804_v36 = vmax.f32 %v4802_v33, %v4803_v4  ;;  %v4818_v23 = vmax.f32 %v4816_v34, %v4817_v54  ;;  %v4838_v7 = vrot.slane %v4837_v14, 1  ;;  %v4845_v28 = vrot.slane %v4844_v25, 1 }
 0x328   : > { %v4811_v8 = vmax.f32 %v4809_v12, %v4810_v40  ;;  %v4832_v30 = vmax.f32 %v4830_v22, %v4831_v19  ;;  %v4851_v43 = vmax.f32 %v4849_v45, %v4850_v20  ;;  %v4874_v44 = vsub.s32 3, %v6691_v42  ;;  %v4987_v22 = vld [vmem:[%s222_s30] sm:$0xf] }
 0x329   : > { %v4839_v31 = vmax.f32 %v4837_v14, %v4838_v7  ;;  %v4846_v11 = vmax.f32 %v4844_v25, %v4845_v28  ;;  %v4867_v32 = vrot.slane %v8550_v29, %v8555_v2  ;;  %v4871_v37 = vrot.slane %v8550_v29, %v8558_v24 }
 0x32a   : > { %v4825_v63 = vmax.f32 %v4823_v13, %v4824_v18  ;;  %v4852_v38 = vrot.slane %v4851_v43, 1  ;;  %v4854_v39 = vmax.f32 %v4804_v36, %v4832_v30  ;;  %v4875_v42 = vrot.slane %v8550_v29, %v4874_v44 }
 0x32b   : > { %v4855_v9 = vmax.f32 %v4811_v8, %v4839_v31  ;;  %v4856_v46 = vmax.f32 %v4818_v23, %v4846_v11  ;;  %v4893_v27 = vrot.slane %v4888_v35, %v8545_v26  ;;  %v4897_v15 = vrot.slane %v4888_v35, %v8555_v2 }
 0x32c   : > { %v4853_v47 = vmax.f32 %v4851_v43, %v4852_v38  ;;  %v4880_v48 = vadd.f32 %v4863_v17, %v4854_v39  ;;  %v4901_v50 = vrot.slane %v4888_v35, %v8558_v24  ;;  %v4919_v29 = vrot.slane %v4914_v10, %v8545_v26 }
 0x32d   : > { %v4881_v51 = vadd.f32 %v4867_v32, %v4855_v9  ;;  %v4882_v41 = vadd.f32 %v4871_v37, %v4856_v46  ;;  %v4923_v17 = vrot.slane %v4914_v10, %v8555_v2  ;;  %v4905_v56 = vrot.slane %v4888_v35, %v4874_v44 }
 0x32e   : > { %v4857_v3 = vmax.f32 %v4825_v63, %v4853_v47  ;;  %v4884_v49 = vmax.f32 %v4880_v48, 0.0  ;;  %v4927_v2 = vrot.slane %v4914_v10, %v8558_v24  ;;  %v4931_v61 = vrot.slane %v4914_v10, %v4874_v44 }
 0x32f   : > { %v4885_v52 = vmax.f32 %v4881_v51, 0.0  ;;  %v4886_v21 = vmax.f32 %v4882_v41, 0.0 }
 0x330   : > { %v4883_v53 = vadd.f32 %v4875_v42, %v4857_v3  ;;  %v4910_v59 = vmul.f32 %v4893_v27, %v4884_v49 }
 0x331   : > { %v4911_v58 = vmul.f32 %v4897_v15, %v4885_v52  ;;  %v4912_v26 = vmul.f32 %v4901_v50, %v4886_v21 }
 0x332   : > { %v4887_v60 = vmax.f32 %v4883_v53, 0.0  ;;  %v4936_v62 = vadd.f32 %v4919_v29, %v4910_v59 }
 0x333   : > { %v4937_v1 = vadd.f32 %v4923_v17, %v4911_v58  ;;  %v4938_v34 = vadd.f32 %v4927_v2, %v4912_v26 }
 0x334   : > { %v4913_v0 = vmul.f32 %v4905_v56, %v4887_v60 }
 0x335   : > { %v5640_v33 = vpack.c.bf16 %v4937_v1, %v4936_v62 }
 0x336   : > { %v4939_v16 = vadd.f32 %v4931_v61, %v4913_v0 }
 0x337   : > { %v4956_v24 = vrot.slane %v5640_v33, %v6731_v55 }
 0x338   : > { %v5641_v5 = vpack.c.bf16 %v4939_v16, %v4938_v34 }
 0x33a   : > { %v4963_v12 = vrot.slane %v5641_v5, %v6731_v55 }
 0x33c   : > { %v4964_v13 = vcombine.low %v4956_v24, %v4963_v12 }
 0x33e   : > { %v4971_v45 = vrot.slane %v4964_v13, %v6731_v55 }
 0x340   : > { %v4988_v4 = vsel %vm4986_vm13, %v4971_v45, %v4987_v22 }
 0x341   : > { %4989 = vst [vmem:[%s222_s30] sm:$0xf] %v4988_v4 }
 0x342 PF: > { %s15_s18 = sadd.s32 1, %s6526_s18  }
 0x343   : > { %p12_p4 = scmp.ge.s32.totalorder %s15_s18, 4  }
 0x345   :  { %14 = sbr.rel (!%p12_p4) target bundleno = 1 (0x1), region = 70 }

</bundles_post_ra>
